<compile_context>
chip_gen: v7x
topology: tpu7x:2x2x1
jax: 0.10.0
libtpu: 0.0.40
codegen_flags: <defaults>
</compile_context>

<pallas_src>
import functools
import math

import jax
import jax.numpy as jnp
from jax import lax
from jax.experimental import pallas as pl
from jax.experimental.pallas import tpu as pltpu

LANE = 128
OUT_HW = 37            # spatial size of every branch after pooling / cropping
EPS = 1e-5             # BatchNorm2d default eps
IN_HW = 298
FC_IN = 8 * OUT_HW * OUT_HW   # 10952
FC_OUT = 4

# (kernel_size, stride, padding, conv_out_h, conv_out_w) for conv1..conv8
CONV_CFG = [
    (150, 4, 0, 38, 38),   # conv1 (-> 2x2 stride-1 maxpool -> 37x37)
    (125, 4, 0, 44, 44),   # conv2 (-> 8x8 stride-1 maxpool -> 37x37)
    (75, 6, 0, 38, 38),    # conv3 (-> 2x2 stride-1 maxpool -> 37x37)
    (50, 7, 4, 37, 37),    # conv4
    (25, 8, 8, 37, 37),    # conv5
    (10, 8, 0, 37, 37),    # conv6
    # TODO(synk): for a 298x298 input (the size implied by FC1 in=10952), conv7
    # and conv8 natively produce 59x59 / 98x98 maps, so the original torch.cat
    # cannot run as written; we compute only the top-left 37x37 window of these
    # two branches -- the only size consistent with the rest of the module.
    (8, 5, 0, 37, 37),     # conv7 (cropped to 37x37)
    (5, 3, 0, 37, 37),     # conv8 (cropped to 37x37)
]


# ---------------------------------------------------------------------------
# Pallas kernel 1: one conv branch (stride folded into channels), reduction
# grid over the Q = ceil(K/stride) kernel-row groups.  The output block stays
# resident in VMEM across the whole grid (accumulator pattern).
#   x_ref: (1, C, OH, 128) bf16   -- row-window q of the space-to-depth input
#   w_ref: (1, C, 128)     f32    -- kernel-row q of the rearranged weights
#   o_ref: (OH, OW)        f32    -- conv output (bias added later, in head)
# ---------------------------------------------------------------------------
def _conv_accum_kernel(x_ref, w_ref, o_ref, *, C, Q, OH, OW):
    @pl.when(pl.program_id(0) == 0)
    def _():
        o_ref[...] = jnp.zeros_like(o_ref)

    def body(ci, acc):
        slab = x_ref[0, ci].astype(jnp.float32)      # (OH, 128), bf16 -> f32
        wrow = w_ref[0, pl.ds(ci, 1), :]             # (1, 128)
        for qx in range(Q):                          # static lane shifts
            acc = acc + slab[:, qx:qx + OW] * wrow[0, qx]
        return acc

    acc = lax.fori_loop(0, C, body, jnp.zeros((OH, OW), jnp.float32))
    o_ref[...] += acc


# ---------------------------------------------------------------------------
# Plain-JAX glue (small arrays only): space-to-depth + row-window staging.
# ---------------------------------------------------------------------------
def _prep_branch_input(x_chw, s, p, OH, OW, Q):
    """x_chw: (3, 298, 298) -> (Q, 3*s*s, OH, 128) bf16 row-window stack."""
    My = OH + Q - 1
    Mx = OW + Q - 1
    Hn, Wn = s * My, s * Mx
    xpad = jnp.pad(x_chw, ((0, 0), (p, p), (p, p)))
    xpad = xpad[:, :Hn, :Wn]                                   # crop (conv7/8)
    xpad = jnp.pad(xpad, ((0, 0),
                          (0, Hn - xpad.shape[1]),
                          (0, Wn - xpad.shape[2])))            # pad to s*My
    xr = xpad.reshape(3, My, s, Mx, s)
    xr = jnp.transpose(xr, (2, 4, 0, 1, 3)).reshape(3 * s * s, My, Mx)
    xr = jnp.pad(xr, ((0, 0), (0, 0), (0, LANE - Mx)))         # lane pad
    xw = jnp.stack([xr[:, q:q + OH, :] for q in range(Q)], axis=0)
    return xw.astype(jnp.bfloat16)                             # bf16 staging


def _prep_branch_weight(w, K, s, Q):
    """w: (1,3,K,K) -> (Q, 3*s*s, 128) f32 (zero-padded to s*Q taps)."""
    Kp = s * Q
    wk = w.reshape(3, K, K).astype(jnp.float32)
    wk = jnp.pad(wk, ((0, 0), (0, Kp - K), (0, Kp - K)))
    wr = wk.reshape(3, Q, s, Q, s)
    wr = jnp.transpose(wr, (2, 4, 0, 1, 3)).reshape(3 * s * s, Q, Q)
    wr = jnp.pad(wr, ((0, 0), (0, 0), (0, LANE - Q)))          # (C, Q, 128)
    return jnp.transpose(wr, (1, 0, 2))                        # (Q, C, 128)


def conv_branch(x_chw, w, K, s, p, OH, OW):
    Q = -(-K // s)
    C = 3 * s * s
    xw = _prep_branch_input(x_chw, s, p, OH, OW, Q)   # (Q, C, OH, 128) bf16
    wr = _prep_branch_weight(w, K, s, Q)              # (Q, C, 128)     f32
    kern = functools.partial(_conv_accum_kernel, C=C, Q=Q, OH=OH, OW=OW)
    return pl.pallas_call(
        kern,
        out_shape=jax.ShapeDtypeStruct((OH, OW), jnp.float32),
        grid=(Q,),
        in_specs=[
            pl.BlockSpec((1, C, OH, LANE), lambda q: (q, 0, 0, 0)),
            pl.BlockSpec((1, C, LANE), lambda q: (q, 0, 0)),
        ],
        out_specs=pl.BlockSpec((OH, OW), lambda q: (0, 0)),
        compiler_params=pltpu.CompilerParams(
            dimension_semantics=("arbitrary",)),
    )(xw, wr)


# ---------------------------------------------------------------------------
# Pallas kernel 2: fused head.  conv-bias add + stride-1 max-pools (separable)
# + ReLU + BatchNorm2d(train, gamma=1, beta=0, biased var) + ReLU + FC1 + ReLU.
# Outputs an (8, 128) block; rows 0..3 hold the 4 broadcast logits.
# ---------------------------------------------------------------------------
def _head_fc_kernel(x1_ref, x2_ref, x3_ref, x4_ref, x5_ref, x6_ref, x7_ref,
                    x8_ref, cb_ref, fcw_ref, fcb_ref, o_ref):
    def pool_s1(v, k):
        cm = v[:, 0:OUT_HW]                       # separable: cols, then rows
        for dx in range(1, k):
            cm = jnp.maximum(cm, v[:, dx:dx + OUT_HW])
        out = cm[0:OUT_HW, :]
        for dy in range(1, k):
            out = jnp.maximum(out, cm[dy:dy + OUT_HW, :])
        return out

    feats = [
        pool_s1(x1_ref[...], 2),                  # conv1 -> maxpool3 (2x2, s1)
        pool_s1(x2_ref[...], 8),                  # conv2 -> maxpool2 (8x8, s1)
        pool_s1(x3_ref[...], 2),                  # conv3 -> maxpool3 (2x2, s1)
        x4_ref[...], x5_ref[...], x6_ref[...], x7_ref[...], x8_ref[...],
    ]

    normed = []
    for c in range(8):
        f = feats[c] + cb_ref[0, c]               # conv bias (commutes w/ pool)
        f = jnp.maximum(f, 0.0)                   # ReLU (post-concat)
        m = jnp.mean(f)                           # per-channel batch stats
        v = jnp.mean((f - m) * (f - m))           # biased var (train mode)
        fn = (f - m) * lax.rsqrt(v + EPS)         # gamma=1, beta=0
        normed.append(jnp.maximum(fn, 0.0))       # ReLU (post-BN)

    for j in range(FC_OUT):                       # tiny FC, no padded matvec
        s = fcb_ref[0, j]
        for c in range(8):
            s = s + jnp.sum(normed[c] * fcw_ref[j, c, :, :])
        s = jnp.maximum(s, 0.0)                   # ReLU after FC1
        o_ref[j:j + 1, :] = jnp.full((1, LANE), s, dtype=jnp.float32)
    for j in range(FC_OUT, 8):
        o_ref[j:j + 1, :] = jnp.zeros((1, LANE), jnp.float32)


# ---------------------------------------------------------------------------
# Parameter init (mirrors the PyTorch module's init) + forward pass.
# ---------------------------------------------------------------------------
def init_params(key):
    params = {}
    keys = jax.random.split(key, 2 * len(CONV_CFG) + 2)
    for i, (K, _, _, _, _) in enumerate(CONV_CFG):
        fan_in = 3 * K * K
        w = jax.random.normal(keys[2 * i], (1, 3, K, K), jnp.float32)
        params[f"conv{i + 1}_w"] = w * math.sqrt(2.0 / fan_in)
        bound = 1.0 / math.sqrt(fan_in)
        params[f"conv{i + 1}_b"] = jax.random.uniform(
            keys[2 * i + 1], (), jnp.float32, -bound, bound)
    bound = 1.0 / math.sqrt(FC_IN)
    params["fc_w"] = jax.random.uniform(keys[-2], (FC_OUT, FC_IN), jnp.float32,
                                        -bound, bound)
    params["fc_b"] = jax.random.uniform(keys[-1], (FC_OUT,), jnp.float32,
                                        -bound, bound)
    return params


def net_forward(params, x):
    """x: (1, 3, 298, 298) NCHW float32  ->  (1, 1, 4) float32."""
    x0 = x[0]
    branches = []
    for i, (K, s, p, oh, ow) in enumerate(CONV_CFG):
        branches.append(
            conv_branch(x0, params[f"conv{i + 1}_w"], K, s, p, oh, ow))

    cb = jnp.stack([params[f"conv{i + 1}_b"] for i in range(8)]
                   ).reshape(1, 8).astype(jnp.float32)
    fcw = params["fc_w"].reshape(FC_OUT, 8, OUT_HW, OUT_HW).astype(jnp.float32)
    fcb = params["fc_b"].reshape(1, FC_OUT).astype(jnp.float32)

    head = pl.pallas_call(
        _head_fc_kernel,
        out_shape=jax.ShapeDtypeStruct((8, LANE), jnp.float32),
    )(*branches, cb, fcw, fcb)

    return head[:FC_OUT, 0].reshape(1, 1, FC_OUT)


if __name__ == "__main__":
    key = jax.random.PRNGKey(0)
    kx, kp = jax.random.split(key)
    x = jax.random.normal(kx, (1, 3, IN_HW, IN_HW), jnp.float32)
    params = init_params(kp)

    fwd = jax.jit(net_forward)
    out = jax.block_until_ready(fwd(params, x))
    assert out.shape == (1, 1, FC_OUT)
    assert bool(jnp.all(jnp.isfinite(out)))
    print("KERNEL_OK")
</pallas_src>

<mosaic_0001>
module attributes {stable_mosaic.version = 11 : i64} {
  func.func @_conv_accum_kernel(%arg0: i32, %arg1: memref<1x48x44x128xbf16, #tpu.memory_space<vmem>>, %arg2: memref<1x48x128xf32, #tpu.memory_space<vmem>>, %arg3: memref<44x44xf32, #tpu.memory_space<vmem>>) attributes {dimension_semantics = [#tpu.dimension_semantics<arbitrary>], iteration_bounds = array<i64: 32>, scalar_prefetch = 0 : i64, scratch_operands = 0 : i64, tpu.core_type = #tpu.core_type<tc>, window_params = [{transform_indices = @transform_0, window_bounds = array<i64: 1, 48, 44, 128>}, {transform_indices = @transform_1, window_bounds = array<i64: 1, 48, 128>}, {pipeline_mode = #tpu.pipeline_mode<synchronous>, transform_indices = @transform_2, window_bounds = array<i64: 44, 44>}]} {
    %c0_i32 = arith.constant 0 : i32
    %0 = arith.cmpi eq, %arg0, %c0_i32 : i32
    %1 = arith.extui %0 : i1 to i32
    %c0_i32_0 = arith.constant 0 : i32
    %2 = arith.cmpi ne, %1, %c0_i32_0 : i32
    scf.if %2 {
      %cst_6 = arith.constant 0.000000e+00 : f32
      %9 = vector.broadcast %cst_6 : f32 to vector<44x44xf32>
      %c0_7 = arith.constant 0 : index
      %c0_8 = arith.constant 0 : index
      %10 = vector.load %arg3[%c0_7, %c0_8] : memref<44x44xf32, #tpu.memory_space<vmem>>, vector<44x44xf32>
      tpu.vector_store %arg3[%c0_7, %c0_8], %9 {strides = array<i32>} : memref<44x44xf32, #tpu.memory_space<vmem>>, vector<44x44xf32>,
    } else {
    }
    %cst = arith.constant 0.000000e+00 : f32
    %3 = vector.broadcast %cst : f32 to vector<44x44xf32>
    %c0_i32_1 = arith.constant 0 : i32
    %c48_i32 = arith.constant 48 : i32
    %4 = arith.addi %c0_i32_1, %c48_i32 : i32
    %c1_i32 = arith.constant 1 : i32
    %5 = scf.for %arg4 = %c0_i32_1 to %4 step %c1_i32 iter_args(%arg5 = %3) -> (vector<44x44xf32>)  : i32 {
      %c0_6 = arith.constant 0 : index
      %9 = arith.index_cast %arg4 : i32 to index
      %c0_7 = arith.constant 0 : index
      %c0_8 = arith.constant 0 : index
      %10 = vector.load %arg1[%c0_6, %9, %c0_7, %c0_8] : memref<1x48x44x128xbf16, #tpu.memory_space<vmem>>, vector<1x1x44x128xbf16>
      %11 = vector.shape_cast %10 : vector<1x1x44x128xbf16> to vector<44x128xbf16>
      %12 = arith.extf %11 : vector<44x128xbf16> to vector<44x128xf32>
      %c0_9 = arith.constant 0 : index
      %13 = arith.index_cast %arg4 : i32 to index
      %c0_10 = arith.constant 0 : index
      %14 = vector.load %arg2[%c0_9, %13, %c0_10] : memref<1x48x128xf32, #tpu.memory_space<vmem>>, vector<1x1x128xf32>
      %15 = vector.shape_cast %14 : vector<1x1x128xf32> to vector<1x128xf32>
      %16 = vector.extract_strided_slice %12 {offsets = [0, 0], sizes = [44, 44], strides = [1, 1]} : vector<44x128xf32> to vector<44x44xf32>
      %17 = vector.extract_strided_slice %15 {offsets = [0, 0], sizes = [1, 1], strides = [1, 1]} : vector<1x128xf32> to vector<1x1xf32>
      %18 = vector.extract %17[0, 0] : f32 from vector<1x1xf32>
      %19 = vector.broadcast %18 : f32 to vector<44x44xf32>
      %20 = arith.mulf %16, %19 : vector<44x44xf32>
      %21 = arith.addf %arg5, %20 : vector<44x44xf32>
      %22 = vector.extract_strided_slice %12 {offsets = [0, 1], sizes = [44, 44], strides = [1, 1]} : vector<44x128xf32> to vector<44x44xf32>
      %23 = vector.extract_strided_slice %15 {offsets = [0, 1], sizes = [1, 1], strides = [1, 1]} : vector<1x128xf32> to vector<1x1xf32>
      %24 = vector.extract %23[0, 0] : f32 from vector<1x1xf32>
      %25 = vector.broadcast %24 : f32 to vector<44x44xf32>
      %26 = arith.mulf %22, %25 : vector<44x44xf32>
      %27 = arith.addf %21, %26 : vector<44x44xf32>
      %28 = vector.extract_strided_slice %12 {offsets = [0, 2], sizes = [44, 44], strides = [1, 1]} : vector<44x128xf32> to vector<44x44xf32>
      %29 = vector.extract_strided_slice %15 {offsets = [0, 2], sizes = [1, 1], strides = [1, 1]} : vector<1x128xf32> to vector<1x1xf32>
      %30 = vector.extract %29[0, 0] : f32 from vector<1x1xf32>
      %31 = vector.broadcast %30 : f32 to vector<44x44xf32>
      %32 = arith.mulf %28, %31 : vector<44x44xf32>
      %33 = arith.addf %27, %32 : vector<44x44xf32>
      %34 = vector.extract_strided_slice %12 {offsets = [0, 3], sizes = [44, 44], strides = [1, 1]} : vector<44x128xf32> to vector<44x44xf32>
      %35 = vector.extract_strided_slice %15 {offsets = [0, 3], sizes = [1, 1], strides = [1, 1]} : vector<1x128xf32> to vector<1x1xf32>
      %36 = vector.extract %35[0, 0] : f32 from vector<1x1xf32>
      %37 = vector.broadcast %36 : f32 to vector<44x44xf32>
      %38 = arith.mulf %34, %37 : vector<44x44xf32>
      %39 = arith.addf %33, %38 : vector<44x44xf32>
      %40 = vector.extract_strided_slice %12 {offsets = [0, 4], sizes = [44, 44], strides = [1, 1]} : vector<44x128xf32> to vector<44x44xf32>
      %41 = vector.extract_strided_slice %15 {offsets = [0, 4], sizes = [1, 1], strides = [1, 1]} : vector<1x128xf32> to vector<1x1xf32>
      %42 = vector.extract %41[0, 0] : f32 from vector<1x1xf32>
      %43 = vector.broadcast %42 : f32 to vector<44x44xf32>
      %44 = arith.mulf %40, %43 : vector<44x44xf32>
      %45 = arith.addf %39, %44 : vector<44x44xf32>
      %46 = vector.extract_strided_slice %12 {offsets = [0, 5], sizes = [44, 44], strides = [1, 1]} : vector<44x128xf32> to vector<44x44xf32>
      %47 = vector.extract_strided_slice %15 {offsets = [0, 5], sizes = [1, 1], strides = [1, 1]} : vector<1x128xf32> to vector<1x1xf32>
      %48 = vector.extract %47[0, 0] : f32 from vector<1x1xf32>
      %49 = vector.broadcast %48 : f32 to vector<44x44xf32>
      %50 = arith.mulf %46, %49 : vector<44x44xf32>
      %51 = arith.addf %45, %50 : vector<44x44xf32>
      %52 = vector.extract_strided_slice %12 {offsets = [0, 6], sizes = [44, 44], strides = [1, 1]} : vector<44x128xf32> to vector<44x44xf32>
      %53 = vector.extract_strided_slice %15 {offsets = [0, 6], sizes = [1, 1], strides = [1, 1]} : vector<1x128xf32> to vector<1x1xf32>
      %54 = vector.extract %53[0, 0] : f32 from vector<1x1xf32>
      %55 = vector.broadcast %54 : f32 to vector<44x44xf32>
      %56 = arith.mulf %52, %55 : vector<44x44xf32>
      %57 = arith.addf %51, %56 : vector<44x44xf32>
      %58 = vector.extract_strided_slice %12 {offsets = [0, 7], sizes = [44, 44], strides = [1, 1]} : vector<44x128xf32> to vector<44x44xf32>
      %59 = vector.extract_strided_slice %15 {offsets = [0, 7], sizes = [1, 1], strides = [1, 1]} : vector<1x128xf32> to vector<1x1xf32>
      %60 = vector.extract %59[0, 0] : f32 from vector<1x1xf32>
      %61 = vector.broadcast %60 : f32 to vector<44x44xf32>
      %62 = arith.mulf %58, %61 : vector<44x44xf32>
      %63 = arith.addf %57, %62 : vector<44x44xf32>
      %64 = vector.extract_strided_slice %12 {offsets = [0, 8], sizes = [44, 44], strides = [1, 1]} : vector<44x128xf32> to vector<44x44xf32>
      %65 = vector.extract_strided_slice %15 {offsets = [0, 8], sizes = [1, 1], strides = [1, 1]} : vector<1x128xf32> to vector<1x1xf32>
      %66 = vector.extract %65[0, 0] : f32 from vector<1x1xf32>
      %67 = vector.broadcast %66 : f32 to vector<44x44xf32>
      %68 = arith.mulf %64, %67 : vector<44x44xf32>
      %69 = arith.addf %63, %68 : vector<44x44xf32>
      %70 = vector.extract_strided_slice %12 {offsets = [0, 9], sizes = [44, 44], strides = [1, 1]} : vector<44x128xf32> to vector<44x44xf32>
      %71 = vector.extract_strided_slice %15 {offsets = [0, 9], sizes = [1, 1], strides = [1, 1]} : vector<1x128xf32> to vector<1x1xf32>
      %72 = vector.extract %71[0, 0] : f32 from vector<1x1xf32>
      %73 = vector.broadcast %72 : f32 to vector<44x44xf32>
      %74 = arith.mulf %70, %73 : vector<44x44xf32>
      %75 = arith.addf %69, %74 : vector<44x44xf32>
      %76 = vector.extract_strided_slice %12 {offsets = [0, 10], sizes = [44, 44], strides = [1, 1]} : vector<44x128xf32> to vector<44x44xf32>
      %77 = vector.extract_strided_slice %15 {offsets = [0, 10], sizes = [1, 1], strides = [1, 1]} : vector<1x128xf32> to vector<1x1xf32>
      %78 = vector.extract %77[0, 0] : f32 from vector<1x1xf32>
      %79 = vector.broadcast %78 : f32 to vector<44x44xf32>
      %80 = arith.mulf %76, %79 : vector<44x44xf32>
      %81 = arith.addf %75, %80 : vector<44x44xf32>
      %82 = vector.extract_strided_slice %12 {offsets = [0, 11], sizes = [44, 44], strides = [1, 1]} : vector<44x128xf32> to vector<44x44xf32>
      %83 = vector.extract_strided_slice %15 {offsets = [0, 11], sizes = [1, 1], strides = [1, 1]} : vector<1x128xf32> to vector<1x1xf32>
      %84 = vector.extract %83[0, 0] : f32 from vector<1x1xf32>
      %85 = vector.broadcast %84 : f32 to vector<44x44xf32>
      %86 = arith.mulf %82, %85 : vector<44x44xf32>
      %87 = arith.addf %81, %86 : vector<44x44xf32>
      %88 = vector.extract_strided_slice %12 {offsets = [0, 12], sizes = [44, 44], strides = [1, 1]} : vector<44x128xf32> to vector<44x44xf32>
      %89 = vector.extract_strided_slice %15 {offsets = [0, 12], sizes = [1, 1], strides = [1, 1]} : vector<1x128xf32> to vector<1x1xf32>
      %90 = vector.extract %89[0, 0] : f32 from vector<1x1xf32>
      %91 = vector.broadcast %90 : f32 to vector<44x44xf32>
      %92 = arith.mulf %88, %91 : vector<44x44xf32>
      %93 = arith.addf %87, %92 : vector<44x44xf32>
      %94 = vector.extract_strided_slice %12 {offsets = [0, 13], sizes = [44, 44], strides = [1, 1]} : vector<44x128xf32> to vector<44x44xf32>
      %95 = vector.extract_strided_slice %15 {offsets = [0, 13], sizes = [1, 1], strides = [1, 1]} : vector<1x128xf32> to vector<1x1xf32>
      %96 = vector.extract %95[0, 0] : f32 from vector<1x1xf32>
      %97 = vector.broadcast %96 : f32 to vector<44x44xf32>
      %98 = arith.mulf %94, %97 : vector<44x44xf32>
      %99 = arith.addf %93, %98 : vector<44x44xf32>
      %100 = vector.extract_strided_slice %12 {offsets = [0, 14], sizes = [44, 44], strides = [1, 1]} : vector<44x128xf32> to vector<44x44xf32>
      %101 = vector.extract_strided_slice %15 {offsets = [0, 14], sizes = [1, 1], strides = [1, 1]} : vector<1x128xf32> to vector<1x1xf32>
      %102 = vector.extract %101[0, 0] : f32 from vector<1x1xf32>
      %103 = vector.broadcast %102 : f32 to vector<44x44xf32>
      %104 = arith.mulf %100, %103 : vector<44x44xf32>
      %105 = arith.addf %99, %104 : vector<44x44xf32>
      %106 = vector.extract_strided_slice %12 {offsets = [0, 15], sizes = [44, 44], strides = [1, 1]} : vector<44x128xf32> to vector<44x44xf32>
      %107 = vector.extract_strided_slice %15 {offsets = [0, 15], sizes = [1, 1], strides = [1, 1]} : vector<1x128xf32> to vector<1x1xf32>
      %108 = vector.extract %107[0, 0] : f32 from vector<1x1xf32>
      %109 = vector.broadcast %108 : f32 to vector<44x44xf32>
      %110 = arith.mulf %106, %109 : vector<44x44xf32>
      %111 = arith.addf %105, %110 : vector<44x44xf32>
      %112 = vector.extract_strided_slice %12 {offsets = [0, 16], sizes = [44, 44], strides = [1, 1]} : vector<44x128xf32> to vector<44x44xf32>
      %113 = vector.extract_strided_slice %15 {offsets = [0, 16], sizes = [1, 1], strides = [1, 1]} : vector<1x128xf32> to vector<1x1xf32>
      %114 = vector.extract %113[0, 0] : f32 from vector<1x1xf32>
      %115 = vector.broadcast %114 : f32 to vector<44x44xf32>
      %116 = arith.mulf %112, %115 : vector<44x44xf32>
      %117 = arith.addf %111, %116 : vector<44x44xf32>
      %118 = vector.extract_strided_slice %12 {offsets = [0, 17], sizes = [44, 44], strides = [1, 1]} : vector<44x128xf32> to vector<44x44xf32>
      %119 = vector.extract_strided_slice %15 {offsets = [0, 17], sizes = [1, 1], strides = [1, 1]} : vector<1x128xf32> to vector<1x1xf32>
      %120 = vector.extract %119[0, 0] : f32 from vector<1x1xf32>
      %121 = vector.broadcast %120 : f32 to vector<44x44xf32>
      %122 = arith.mulf %118, %121 : vector<44x44xf32>
      %123 = arith.addf %117, %122 : vector<44x44xf32>
      %124 = vector.extract_strided_slice %12 {offsets = [0, 18], sizes = [44, 44], strides = [1, 1]} : vector<44x128xf32> to vector<44x44xf32>
      %125 = vector.extract_strided_slice %15 {offsets = [0, 18], sizes = [1, 1], strides = [1, 1]} : vector<1x128xf32> to vector<1x1xf32>
      %126 = vector.extract %125[0, 0] : f32 from vector<1x1xf32>
      %127 = vector.broadcast %126 : f32 to vector<44x44xf32>
      %128 = arith.mulf %124, %127 : vector<44x44xf32>
      %129 = arith.addf %123, %128 : vector<44x44xf32>
      %130 = vector.extract_strided_slice %12 {offsets = [0, 19], sizes = [44, 44], strides = [1, 1]} : vector<44x128xf32> to vector<44x44xf32>
      %131 = vector.extract_strided_slice %15 {offsets = [0, 19], sizes = [1, 1], strides = [1, 1]} : vector<1x128xf32> to vector<1x1xf32>
      %132 = vector.extract %131[0, 0] : f32 from vector<1x1xf32>
      %133 = vector.broadcast %132 : f32 to vector<44x44xf32>
      %134 = arith.mulf %130, %133 : vector<44x44xf32>
      %135 = arith.addf %129, %134 : vector<44x44xf32>
      %136 = vector.extract_strided_slice %12 {offsets = [0, 20], sizes = [44, 44], strides = [1, 1]} : vector<44x128xf32> to vector<44x44xf32>
      %137 = vector.extract_strided_slice %15 {offsets = [0, 20], sizes = [1, 1], strides = [1, 1]} : vector<1x128xf32> to vector<1x1xf32>
      %138 = vector.extract %137[0, 0] : f32 from vector<1x1xf32>
      %139 = vector.broadcast %138 : f32 to vector<44x44xf32>
      %140 = arith.mulf %136, %139 : vector<44x44xf32>
      %141 = arith.addf %135, %140 : vector<44x44xf32>
      %142 = vector.extract_strided_slice %12 {offsets = [0, 21], sizes = [44, 44], strides = [1, 1]} : vector<44x128xf32> to vector<44x44xf32>
      %143 = vector.extract_strided_slice %15 {offsets = [0, 21], sizes = [1, 1], strides = [1, 1]} : vector<1x128xf32> to vector<1x1xf32>
      %144 = vector.extract %143[0, 0] : f32 from vector<1x1xf32>
      %145 = vector.broadcast %144 : f32 to vector<44x44xf32>
      %146 = arith.mulf %142, %145 : vector<44x44xf32>
      %147 = arith.addf %141, %146 : vector<44x44xf32>
      %148 = vector.extract_strided_slice %12 {offsets = [0, 22], sizes = [44, 44], strides = [1, 1]} : vector<44x128xf32> to vector<44x44xf32>
      %149 = vector.extract_strided_slice %15 {offsets = [0, 22], sizes = [1, 1], strides = [1, 1]} : vector<1x128xf32> to vector<1x1xf32>
      %150 = vector.extract %149[0, 0] : f32 from vector<1x1xf32>
      %151 = vector.broadcast %150 : f32 to vector<44x44xf32>
      %152 = arith.mulf %148, %151 : vector<44x44xf32>
      %153 = arith.addf %147, %152 : vector<44x44xf32>
      %154 = vector.extract_strided_slice %12 {offsets = [0, 23], sizes = [44, 44], strides = [1, 1]} : vector<44x128xf32> to vector<44x44xf32>
      %155 = vector.extract_strided_slice %15 {offsets = [0, 23], sizes = [1, 1], strides = [1, 1]} : vector<1x128xf32> to vector<1x1xf32>
      %156 = vector.extract %155[0, 0] : f32 from vector<1x1xf32>
      %157 = vector.broadcast %156 : f32 to vector<44x44xf32>
      %158 = arith.mulf %154, %157 : vector<44x44xf32>
      %159 = arith.addf %153, %158 : vector<44x44xf32>
      %160 = vector.extract_strided_slice %12 {offsets = [0, 24], sizes = [44, 44], strides = [1, 1]} : vector<44x128xf32> to vector<44x44xf32>
      %161 = vector.extract_strided_slice %15 {offsets = [0, 24], sizes = [1, 1], strides = [1, 1]} : vector<1x128xf32> to vector<1x1xf32>
      %162 = vector.extract %161[0, 0] : f32 from vector<1x1xf32>
      %163 = vector.broadcast %162 : f32 to vector<44x44xf32>
      %164 = arith.mulf %160, %163 : vector<44x44xf32>
      %165 = arith.addf %159, %164 : vector<44x44xf32>
      %166 = vector.extract_strided_slice %12 {offsets = [0, 25], sizes = [44, 44], strides = [1, 1]} : vector<44x128xf32> to vector<44x44xf32>
      %167 = vector.extract_strided_slice %15 {offsets = [0, 25], sizes = [1, 1], strides = [1, 1]} : vector<1x128xf32> to vector<1x1xf32>
      %168 = vector.extract %167[0, 0] : f32 from vector<1x1xf32>
      %169 = vector.broadcast %168 : f32 to vector<44x44xf32>
      %170 = arith.mulf %166, %169 : vector<44x44xf32>
      %171 = arith.addf %165, %170 : vector<44x44xf32>
      %172 = vector.extract_strided_slice %12 {offsets = [0, 26], sizes = [44, 44], strides = [1, 1]} : vector<44x128xf32> to vector<44x44xf32>
      %173 = vector.extract_strided_slice %15 {offsets = [0, 26], sizes = [1, 1], strides = [1, 1]} : vector<1x128xf32> to vector<1x1xf32>
      %174 = vector.extract %173[0, 0] : f32 from vector<1x1xf32>
      %175 = vector.broadcast %174 : f32 to vector<44x44xf32>
      %176 = arith.mulf %172, %175 : vector<44x44xf32>
      %177 = arith.addf %171, %176 : vector<44x44xf32>
      %178 = vector.extract_strided_slice %12 {offsets = [0, 27], sizes = [44, 44], strides = [1, 1]} : vector<44x128xf32> to vector<44x44xf32>
      %179 = vector.extract_strided_slice %15 {offsets = [0, 27], sizes = [1, 1], strides = [1, 1]} : vector<1x128xf32> to vector<1x1xf32>
      %180 = vector.extract %179[0, 0] : f32 from vector<1x1xf32>
      %181 = vector.broadcast %180 : f32 to vector<44x44xf32>
      %182 = arith.mulf %178, %181 : vector<44x44xf32>
      %183 = arith.addf %177, %182 : vector<44x44xf32>
      %184 = vector.extract_strided_slice %12 {offsets = [0, 28], sizes = [44, 44], strides = [1, 1]} : vector<44x128xf32> to vector<44x44xf32>
      %185 = vector.extract_strided_slice %15 {offsets = [0, 28], sizes = [1, 1], strides = [1, 1]} : vector<1x128xf32> to vector<1x1xf32>
      %186 = vector.extract %185[0, 0] : f32 from vector<1x1xf32>
      %187 = vector.broadcast %186 : f32 to vector<44x44xf32>
      %188 = arith.mulf %184, %187 : vector<44x44xf32>
      %189 = arith.addf %183, %188 : vector<44x44xf32>
      %190 = vector.extract_strided_slice %12 {offsets = [0, 29], sizes = [44, 44], strides = [1, 1]} : vector<44x128xf32> to vector<44x44xf32>
      %191 = vector.extract_strided_slice %15 {offsets = [0, 29], sizes = [1, 1], strides = [1, 1]} : vector<1x128xf32> to vector<1x1xf32>
      %192 = vector.extract %191[0, 0] : f32 from vector<1x1xf32>
      %193 = vector.broadcast %192 : f32 to vector<44x44xf32>
      %194 = arith.mulf %190, %193 : vector<44x44xf32>
      %195 = arith.addf %189, %194 : vector<44x44xf32>
      %196 = vector.extract_strided_slice %12 {offsets = [0, 30], sizes = [44, 44], strides = [1, 1]} : vector<44x128xf32> to vector<44x44xf32>
      %197 = vector.extract_strided_slice %15 {offsets = [0, 30], sizes = [1, 1], strides = [1, 1]} : vector<1x128xf32> to vector<1x1xf32>
      %198 = vector.extract %197[0, 0] : f32 from vector<1x1xf32>
      %199 = vector.broadcast %198 : f32 to vector<44x44xf32>
      %200 = arith.mulf %196, %199 : vector<44x44xf32>
      %201 = arith.addf %195, %200 : vector<44x44xf32>
      %202 = vector.extract_strided_slice %12 {offsets = [0, 31], sizes = [44, 44], strides = [1, 1]} : vector<44x128xf32> to vector<44x44xf32>
      %203 = vector.extract_strided_slice %15 {offsets = [0, 31], sizes = [1, 1], strides = [1, 1]} : vector<1x128xf32> to vector<1x1xf32>
      %204 = vector.extract %203[0, 0] : f32 from vector<1x1xf32>
      %205 = vector.broadcast %204 : f32 to vector<44x44xf32>
      %206 = arith.mulf %202, %205 : vector<44x44xf32>
      %207 = arith.addf %201, %206 : vector<44x44xf32>
      scf.yield %207 : vector<44x44xf32>
    }
    %c48_i32_2 = arith.constant 48 : i32
    %c0 = arith.constant 0 : index
    %c0_3 = arith.constant 0 : index
    %6 = vector.load %arg3[%c0, %c0_3] : memref<44x44xf32, #tpu.memory_space<vmem>>, vector<44x44xf32>
    %7 = arith.addf %6, %5 : vector<44x44xf32>
    %c0_4 = arith.constant 0 : index
    %c0_5 = arith.constant 0 : index
    %8 = vector.load %arg3[%c0_4, %c0_5] : memref<44x44xf32, #tpu.memory_space<vmem>>, vector<44x44xf32>
    tpu.vector_store %arg3[%c0_4, %c0_5], %7 {strides = array<i32>} : memref<44x44xf32, #tpu.memory_space<vmem>>, vector<44x44xf32>,
    return
  }
  func.func @transform_0(%arg0: i32) -> (i32, i32, i32, i32) {
    %c0_i32 = arith.constant 0 : i32
    %c0_i32_0 = arith.constant 0 : i32
    %c0_i32_1 = arith.constant 0 : i32
    %c0_i32_2 = arith.constant 0 : i32
    return %arg0, %c0_i32, %c0_i32_0, %c0_i32_1 : i32, i32, i32, i32
  }
  func.func @transform_1(%arg0: i32) -> (i32, i32, i32) {
    %c0_i32 = arith.constant 0 : i32
    %c0_i32_0 = arith.constant 0 : i32
    %c0_i32_1 = arith.constant 0 : i32
    return %arg0, %c0_i32, %c0_i32_0 : i32, i32, i32
  }
  func.func @transform_2(%arg0: i32) -> (i32, i32) {
    %c0_i32 = arith.constant 0 : i32
    %c0_i32_0 = arith.constant 0 : i32
    %c0_i32_1 = arith.constant 0 : i32
    return %c0_i32, %c0_i32_0 : i32, i32
  }
}

module attributes {stable_mosaic.version = 11 : i64} {
  func.func @_conv_accum_kernel(%arg0: i32, %arg1: memref<1x48x38x128xbf16, #tpu.memory_space<vmem>>, %arg2: memref<1x48x128xf32, #tpu.memory_space<vmem>>, %arg3: memref<38x38xf32, #tpu.memory_space<vmem>>) attributes {dimension_semantics = [#tpu.dimension_semantics<arbitrary>], iteration_bounds = array<i64: 38>, scalar_prefetch = 0 : i64, scratch_operands = 0 : i64, tpu.core_type = #tpu.core_type<tc>, window_params = [{transform_indices = @transform_0, window_bounds = array<i64: 1, 48, 38, 128>}, {transform_indices = @transform_1, window_bounds = array<i64: 1, 48, 128>}, {pipeline_mode = #tpu.pipeline_mode<synchronous>, transform_indices = @transform_2, window_bounds = array<i64: 38, 38>}]} {
    %c0_i32 = arith.constant 0 : i32
    %0 = arith.cmpi eq, %arg0, %c0_i32 : i32
    %1 = arith.extui %0 : i1 to i32
    %c0_i32_0 = arith.constant 0 : i32
    %2 = arith.cmpi ne, %1, %c0_i32_0 : i32
    scf.if %2 {
      %cst_6 = arith.constant 0.000000e+00 : f32
      %9 = vector.broadcast %cst_6 : f32 to vector<38x38xf32>
      %c0_7 = arith.constant 0 : index
      %c0_8 = arith.constant 0 : index
      %10 = vector.load %arg3[%c0_7, %c0_8] : memref<38x38xf32, #tpu.memory_space<vmem>>, vector<38x38xf32>
      tpu.vector_store %arg3[%c0_7, %c0_8], %9 {strides = array<i32>} : memref<38x38xf32, #tpu.memory_space<vmem>>, vector<38x38xf32>,
    } else {
    }
    %cst = arith.constant 0.000000e+00 : f32
    %3 = vector.broadcast %cst : f32 to vector<38x38xf32>
    %c0_i32_1 = arith.constant 0 : i32
    %c48_i32 = arith.constant 48 : i32
    %4 = arith.addi %c0_i32_1, %c48_i32 : i32
    %c1_i32 = arith.constant 1 : i32
    %5 = scf.for %arg4 = %c0_i32_1 to %4 step %c1_i32 iter_args(%arg5 = %3) -> (vector<38x38xf32>)  : i32 {
      %c0_6 = arith.constant 0 : index
      %9 = arith.index_cast %arg4 : i32 to index
      %c0_7 = arith.constant 0 : index
      %c0_8 = arith.constant 0 : index
      %10 = vector.load %arg1[%c0_6, %9, %c0_7, %c0_8] : memref<1x48x38x128xbf16, #tpu.memory_space<vmem>>, vector<1x1x38x128xbf16>
      %11 = vector.shape_cast %10 : vector<1x1x38x128xbf16> to vector<38x128xbf16>
      %12 = arith.extf %11 : vector<38x128xbf16> to vector<38x128xf32>
      %c0_9 = arith.constant 0 : index
      %13 = arith.index_cast %arg4 : i32 to index
      %c0_10 = arith.constant 0 : index
      %14 = vector.load %arg2[%c0_9, %13, %c0_10] : memref<1x48x128xf32, #tpu.memory_space<vmem>>, vector<1x1x128xf32>
      %15 = vector.shape_cast %14 : vector<1x1x128xf32> to vector<1x128xf32>
      %16 = vector.extract_strided_slice %12 {offsets = [0, 0], sizes = [38, 38], strides = [1, 1]} : vector<38x128xf32> to vector<38x38xf32>
      %17 = vector.extract_strided_slice %15 {offsets = [0, 0], sizes = [1, 1], strides = [1, 1]} : vector<1x128xf32> to vector<1x1xf32>
      %18 = vector.extract %17[0, 0] : f32 from vector<1x1xf32>
      %19 = vector.broadcast %18 : f32 to vector<38x38xf32>
      %20 = arith.mulf %16, %19 : vector<38x38xf32>
      %21 = arith.addf %arg5, %20 : vector<38x38xf32>
      %22 = vector.extract_strided_slice %12 {offsets = [0, 1], sizes = [38, 38], strides = [1, 1]} : vector<38x128xf32> to vector<38x38xf32>
      %23 = vector.extract_strided_slice %15 {offsets = [0, 1], sizes = [1, 1], strides = [1, 1]} : vector<1x128xf32> to vector<1x1xf32>
      %24 = vector.extract %23[0, 0] : f32 from vector<1x1xf32>
      %25 = vector.broadcast %24 : f32 to vector<38x38xf32>
      %26 = arith.mulf %22, %25 : vector<38x38xf32>
      %27 = arith.addf %21, %26 : vector<38x38xf32>
      %28 = vector.extract_strided_slice %12 {offsets = [0, 2], sizes = [38, 38], strides = [1, 1]} : vector<38x128xf32> to vector<38x38xf32>
      %29 = vector.extract_strided_slice %15 {offsets = [0, 2], sizes = [1, 1], strides = [1, 1]} : vector<1x128xf32> to vector<1x1xf32>
      %30 = vector.extract %29[0, 0] : f32 from vector<1x1xf32>
      %31 = vector.broadcast %30 : f32 to vector<38x38xf32>
      %32 = arith.mulf %28, %31 : vector<38x38xf32>
      %33 = arith.addf %27, %32 : vector<38x38xf32>
      %34 = vector.extract_strided_slice %12 {offsets = [0, 3], sizes = [38, 38], strides = [1, 1]} : vector<38x128xf32> to vector<38x38xf32>
      %35 = vector.extract_strided_slice %15 {offsets = [0, 3], sizes = [1, 1], strides = [1, 1]} : vector<1x128xf32> to vector<1x1xf32>
      %36 = vector.extract %35[0, 0] : f32 from vector<1x1xf32>
      %37 = vector.broadcast %36 : f32 to vector<38x38xf32>
      %38 = arith.mulf %34, %37 : vector<38x38xf32>
      %39 = arith.addf %33, %38 : vector<38x38xf32>
      %40 = vector.extract_strided_slice %12 {offsets = [0, 4], sizes = [38, 38], strides = [1, 1]} : vector<38x128xf32> to vector<38x38xf32>
      %41 = vector.extract_strided_slice %15 {offsets = [0, 4], sizes = [1, 1], strides = [1, 1]} : vector<1x128xf32> to vector<1x1xf32>
      %42 = vector.extract %41[0, 0] : f32 from vector<1x1xf32>
      %43 = vector.broadcast %42 : f32 to vector<38x38xf32>
      %44 = arith.mulf %40, %43 : vector<38x38xf32>
      %45 = arith.addf %39, %44 : vector<38x38xf32>
      %46 = vector.extract_strided_slice %12 {offsets = [0, 5], sizes = [38, 38], strides = [1, 1]} : vector<38x128xf32> to vector<38x38xf32>
      %47 = vector.extract_strided_slice %15 {offsets = [0, 5], sizes = [1, 1], strides = [1, 1]} : vector<1x128xf32> to vector<1x1xf32>
      %48 = vector.extract %47[0, 0] : f32 from vector<1x1xf32>
      %49 = vector.broadcast %48 : f32 to vector<38x38xf32>
      %50 = arith.mulf %46, %49 : vector<38x38xf32>
      %51 = arith.addf %45, %50 : vector<38x38xf32>
      %52 = vector.extract_strided_slice %12 {offsets = [0, 6], sizes = [38, 38], strides = [1, 1]} : vector<38x128xf32> to vector<38x38xf32>
      %53 = vector.extract_strided_slice %15 {offsets = [0, 6], sizes = [1, 1], strides = [1, 1]} : vector<1x128xf32> to vector<1x1xf32>
      %54 = vector.extract %53[0, 0] : f32 from vector<1x1xf32>
      %55 = vector.broadcast %54 : f32 to vector<38x38xf32>
      %56 = arith.mulf %52, %55 : vector<38x38xf32>
      %57 = arith.addf %51, %56 : vector<38x38xf32>
      %58 = vector.extract_strided_slice %12 {offsets = [0, 7], sizes = [38, 38], strides = [1, 1]} : vector<38x128xf32> to vector<38x38xf32>
      %59 = vector.extract_strided_slice %15 {offsets = [0, 7], sizes = [1, 1], strides = [1, 1]} : vector<1x128xf32> to vector<1x1xf32>
      %60 = vector.extract %59[0, 0] : f32 from vector<1x1xf32>
      %61 = vector.broadcast %60 : f32 to vector<38x38xf32>
      %62 = arith.mulf %58, %61 : vector<38x38xf32>
      %63 = arith.addf %57, %62 : vector<38x38xf32>
      %64 = vector.extract_strided_slice %12 {offsets = [0, 8], sizes = [38, 38], strides = [1, 1]} : vector<38x128xf32> to vector<38x38xf32>
      %65 = vector.extract_strided_slice %15 {offsets = [0, 8], sizes = [1, 1], strides = [1, 1]} : vector<1x128xf32> to vector<1x1xf32>
      %66 = vector.extract %65[0, 0] : f32 from vector<1x1xf32>
      %67 = vector.broadcast %66 : f32 to vector<38x38xf32>
      %68 = arith.mulf %64, %67 : vector<38x38xf32>
      %69 = arith.addf %63, %68 : vector<38x38xf32>
      %70 = vector.extract_strided_slice %12 {offsets = [0, 9], sizes = [38, 38], strides = [1, 1]} : vector<38x128xf32> to vector<38x38xf32>
      %71 = vector.extract_strided_slice %15 {offsets = [0, 9], sizes = [1, 1], strides = [1, 1]} : vector<1x128xf32> to vector<1x1xf32>
      %72 = vector.extract %71[0, 0] : f32 from vector<1x1xf32>
      %73 = vector.broadcast %72 : f32 to vector<38x38xf32>
      %74 = arith.mulf %70, %73 : vector<38x38xf32>
      %75 = arith.addf %69, %74 : vector<38x38xf32>
      %76 = vector.extract_strided_slice %12 {offsets = [0, 10], sizes = [38, 38], strides = [1, 1]} : vector<38x128xf32> to vector<38x38xf32>
      %77 = vector.extract_strided_slice %15 {offsets = [0, 10], sizes = [1, 1], strides = [1, 1]} : vector<1x128xf32> to vector<1x1xf32>
      %78 = vector.extract %77[0, 0] : f32 from vector<1x1xf32>
      %79 = vector.broadcast %78 : f32 to vector<38x38xf32>
      %80 = arith.mulf %76, %79 : vector<38x38xf32>
      %81 = arith.addf %75, %80 : vector<38x38xf32>
      %82 = vector.extract_strided_slice %12 {offsets = [0, 11], sizes = [38, 38], strides = [1, 1]} : vector<38x128xf32> to vector<38x38xf32>
      %83 = vector.extract_strided_slice %15 {offsets = [0, 11], sizes = [1, 1], strides = [1, 1]} : vector<1x128xf32> to vector<1x1xf32>
      %84 = vector.extract %83[0, 0] : f32 from vector<1x1xf32>
      %85 = vector.broadcast %84 : f32 to vector<38x38xf32>
      %86 = arith.mulf %82, %85 : vector<38x38xf32>
      %87 = arith.addf %81, %86 : vector<38x38xf32>
      %88 = vector.extract_strided_slice %12 {offsets = [0, 12], sizes = [38, 38], strides = [1, 1]} : vector<38x128xf32> to vector<38x38xf32>
      %89 = vector.extract_strided_slice %15 {offsets = [0, 12], sizes = [1, 1], strides = [1, 1]} : vector<1x128xf32> to vector<1x1xf32>
      %90 = vector.extract %89[0, 0] : f32 from vector<1x1xf32>
      %91 = vector.broadcast %90 : f32 to vector<38x38xf32>
      %92 = arith.mulf %88, %91 : vector<38x38xf32>
      %93 = arith.addf %87, %92 : vector<38x38xf32>
      %94 = vector.extract_strided_slice %12 {offsets = [0, 13], sizes = [38, 38], strides = [1, 1]} : vector<38x128xf32> to vector<38x38xf32>
      %95 = vector.extract_strided_slice %15 {offsets = [0, 13], sizes = [1, 1], strides = [1, 1]} : vector<1x128xf32> to vector<1x1xf32>
      %96 = vector.extract %95[0, 0] : f32 from vector<1x1xf32>
      %97 = vector.broadcast %96 : f32 to vector<38x38xf32>
      %98 = arith.mulf %94, %97 : vector<38x38xf32>
      %99 = arith.addf %93, %98 : vector<38x38xf32>
      %100 = vector.extract_strided_slice %12 {offsets = [0, 14], sizes = [38, 38], strides = [1, 1]} : vector<38x128xf32> to vector<38x38xf32>
      %101 = vector.extract_strided_slice %15 {offsets = [0, 14], sizes = [1, 1], strides = [1, 1]} : vector<1x128xf32> to vector<1x1xf32>
      %102 = vector.extract %101[0, 0] : f32 from vector<1x1xf32>
      %103 = vector.broadcast %102 : f32 to vector<38x38xf32>
      %104 = arith.mulf %100, %103 : vector<38x38xf32>
      %105 = arith.addf %99, %104 : vector<38x38xf32>
      %106 = vector.extract_strided_slice %12 {offsets = [0, 15], sizes = [38, 38], strides = [1, 1]} : vector<38x128xf32> to vector<38x38xf32>
      %107 = vector.extract_strided_slice %15 {offsets = [0, 15], sizes = [1, 1], strides = [1, 1]} : vector<1x128xf32> to vector<1x1xf32>
      %108 = vector.extract %107[0, 0] : f32 from vector<1x1xf32>
      %109 = vector.broadcast %108 : f32 to vector<38x38xf32>
      %110 = arith.mulf %106, %109 : vector<38x38xf32>
      %111 = arith.addf %105, %110 : vector<38x38xf32>
      %112 = vector.extract_strided_slice %12 {offsets = [0, 16], sizes = [38, 38], strides = [1, 1]} : vector<38x128xf32> to vector<38x38xf32>
      %113 = vector.extract_strided_slice %15 {offsets = [0, 16], sizes = [1, 1], strides = [1, 1]} : vector<1x128xf32> to vector<1x1xf32>
      %114 = vector.extract %113[0, 0] : f32 from vector<1x1xf32>
      %115 = vector.broadcast %114 : f32 to vector<38x38xf32>
      %116 = arith.mulf %112, %115 : vector<38x38xf32>
      %117 = arith.addf %111, %116 : vector<38x38xf32>
      %118 = vector.extract_strided_slice %12 {offsets = [0, 17], sizes = [38, 38], strides = [1, 1]} : vector<38x128xf32> to vector<38x38xf32>
      %119 = vector.extract_strided_slice %15 {offsets = [0, 17], sizes = [1, 1], strides = [1, 1]} : vector<1x128xf32> to vector<1x1xf32>
      %120 = vector.extract %119[0, 0] : f32 from vector<1x1xf32>
      %121 = vector.broadcast %120 : f32 to vector<38x38xf32>
      %122 = arith.mulf %118, %121 : vector<38x38xf32>
      %123 = arith.addf %117, %122 : vector<38x38xf32>
      %124 = vector.extract_strided_slice %12 {offsets = [0, 18], sizes = [38, 38], strides = [1, 1]} : vector<38x128xf32> to vector<38x38xf32>
      %125 = vector.extract_strided_slice %15 {offsets = [0, 18], sizes = [1, 1], strides = [1, 1]} : vector<1x128xf32> to vector<1x1xf32>
      %126 = vector.extract %125[0, 0] : f32 from vector<1x1xf32>
      %127 = vector.broadcast %126 : f32 to vector<38x38xf32>
      %128 = arith.mulf %124, %127 : vector<38x38xf32>
      %129 = arith.addf %123, %128 : vector<38x38xf32>
      %130 = vector.extract_strided_slice %12 {offsets = [0, 19], sizes = [38, 38], strides = [1, 1]} : vector<38x128xf32> to vector<38x38xf32>
      %131 = vector.extract_strided_slice %15 {offsets = [0, 19], sizes = [1, 1], strides = [1, 1]} : vector<1x128xf32> to vector<1x1xf32>
      %132 = vector.extract %131[0, 0] : f32 from vector<1x1xf32>
      %133 = vector.broadcast %132 : f32 to vector<38x38xf32>
      %134 = arith.mulf %130, %133 : vector<38x38xf32>
      %135 = arith.addf %129, %134 : vector<38x38xf32>
      %136 = vector.extract_strided_slice %12 {offsets = [0, 20], sizes = [38, 38], strides = [1, 1]} : vector<38x128xf32> to vector<38x38xf32>
      %137 = vector.extract_strided_slice %15 {offsets = [0, 20], sizes = [1, 1], strides = [1, 1]} : vector<1x128xf32> to vector<1x1xf32>
      %138 = vector.extract %137[0, 0] : f32 from vector<1x1xf32>
      %139 = vector.broadcast %138 : f32 to vector<38x38xf32>
      %140 = arith.mulf %136, %139 : vector<38x38xf32>
      %141 = arith.addf %135, %140 : vector<38x38xf32>
      %142 = vector.extract_strided_slice %12 {offsets = [0, 21], sizes = [38, 38], strides = [1, 1]} : vector<38x128xf32> to vector<38x38xf32>
      %143 = vector.extract_strided_slice %15 {offsets = [0, 21], sizes = [1, 1], strides = [1, 1]} : vector<1x128xf32> to vector<1x1xf32>
      %144 = vector.extract %143[0, 0] : f32 from vector<1x1xf32>
      %145 = vector.broadcast %144 : f32 to vector<38x38xf32>
      %146 = arith.mulf %142, %145 : vector<38x38xf32>
      %147 = arith.addf %141, %146 : vector<38x38xf32>
      %148 = vector.extract_strided_slice %12 {offsets = [0, 22], sizes = [38, 38], strides = [1, 1]} : vector<38x128xf32> to vector<38x38xf32>
      %149 = vector.extract_strided_slice %15 {offsets = [0, 22], sizes = [1, 1], strides = [1, 1]} : vector<1x128xf32> to vector<1x1xf32>
      %150 = vector.extract %149[0, 0] : f32 from vector<1x1xf32>
      %151 = vector.broadcast %150 : f32 to vector<38x38xf32>
      %152 = arith.mulf %148, %151 : vector<38x38xf32>
      %153 = arith.addf %147, %152 : vector<38x38xf32>
      %154 = vector.extract_strided_slice %12 {offsets = [0, 23], sizes = [38, 38], strides = [1, 1]} : vector<38x128xf32> to vector<38x38xf32>
      %155 = vector.extract_strided_slice %15 {offsets = [0, 23], sizes = [1, 1], strides = [1, 1]} : vector<1x128xf32> to vector<1x1xf32>
      %156 = vector.extract %155[0, 0] : f32 from vector<1x1xf32>
      %157 = vector.broadcast %156 : f32 to vector<38x38xf32>
      %158 = arith.mulf %154, %157 : vector<38x38xf32>
      %159 = arith.addf %153, %158 : vector<38x38xf32>
      %160 = vector.extract_strided_slice %12 {offsets = [0, 24], sizes = [38, 38], strides = [1, 1]} : vector<38x128xf32> to vector<38x38xf32>
      %161 = vector.extract_strided_slice %15 {offsets = [0, 24], sizes = [1, 1], strides = [1, 1]} : vector<1x128xf32> to vector<1x1xf32>
      %162 = vector.extract %161[0, 0] : f32 from vector<1x1xf32>
      %163 = vector.broadcast %162 : f32 to vector<38x38xf32>
      %164 = arith.mulf %160, %163 : vector<38x38xf32>
      %165 = arith.addf %159, %164 : vector<38x38xf32>
      %166 = vector.extract_strided_slice %12 {offsets = [0, 25], sizes = [38, 38], strides = [1, 1]} : vector<38x128xf32> to vector<38x38xf32>
      %167 = vector.extract_strided_slice %15 {offsets = [0, 25], sizes = [1, 1], strides = [1, 1]} : vector<1x128xf32> to vector<1x1xf32>
      %168 = vector.extract %167[0, 0] : f32 from vector<1x1xf32>
      %169 = vector.broadcast %168 : f32 to vector<38x38xf32>
      %170 = arith.mulf %166, %169 : vector<38x38xf32>
      %171 = arith.addf %165, %170 : vector<38x38xf32>
      %172 = vector.extract_strided_slice %12 {offsets = [0, 26], sizes = [38, 38], strides = [1, 1]} : vector<38x128xf32> to vector<38x38xf32>
      %173 = vector.extract_strided_slice %15 {offsets = [0, 26], sizes = [1, 1], strides = [1, 1]} : vector<1x128xf32> to vector<1x1xf32>
      %174 = vector.extract %173[0, 0] : f32 from vector<1x1xf32>
      %175 = vector.broadcast %174 : f32 to vector<38x38xf32>
      %176 = arith.mulf %172, %175 : vector<38x38xf32>
      %177 = arith.addf %171, %176 : vector<38x38xf32>
      %178 = vector.extract_strided_slice %12 {offsets = [0, 27], sizes = [38, 38], strides = [1, 1]} : vector<38x128xf32> to vector<38x38xf32>
      %179 = vector.extract_strided_slice %15 {offsets = [0, 27], sizes = [1, 1], strides = [1, 1]} : vector<1x128xf32> to vector<1x1xf32>
      %180 = vector.extract %179[0, 0] : f32 from vector<1x1xf32>
      %181 = vector.broadcast %180 : f32 to vector<38x38xf32>
      %182 = arith.mulf %178, %181 : vector<38x38xf32>
      %183 = arith.addf %177, %182 : vector<38x38xf32>
      %184 = vector.extract_strided_slice %12 {offsets = [0, 28], sizes = [38, 38], strides = [1, 1]} : vector<38x128xf32> to vector<38x38xf32>
      %185 = vector.extract_strided_slice %15 {offsets = [0, 28], sizes = [1, 1], strides = [1, 1]} : vector<1x128xf32> to vector<1x1xf32>
      %186 = vector.extract %185[0, 0] : f32 from vector<1x1xf32>
      %187 = vector.broadcast %186 : f32 to vector<38x38xf32>
      %188 = arith.mulf %184, %187 : vector<38x38xf32>
      %189 = arith.addf %183, %188 : vector<38x38xf32>
      %190 = vector.extract_strided_slice %12 {offsets = [0, 29], sizes = [38, 38], strides = [1, 1]} : vector<38x128xf32> to vector<38x38xf32>
      %191 = vector.extract_strided_slice %15 {offsets = [0, 29], sizes = [1, 1], strides = [1, 1]} : vector<1x128xf32> to vector<1x1xf32>
      %192 = vector.extract %191[0, 0] : f32 from vector<1x1xf32>
      %193 = vector.broadcast %192 : f32 to vector<38x38xf32>
      %194 = arith.mulf %190, %193 : vector<38x38xf32>
      %195 = arith.addf %189, %194 : vector<38x38xf32>
      %196 = vector.extract_strided_slice %12 {offsets = [0, 30], sizes = [38, 38], strides = [1, 1]} : vector<38x128xf32> to vector<38x38xf32>
      %197 = vector.extract_strided_slice %15 {offsets = [0, 30], sizes = [1, 1], strides = [1, 1]} : vector<1x128xf32> to vector<1x1xf32>
      %198 = vector.extract %197[0, 0] : f32 from vector<1x1xf32>
      %199 = vector.broadcast %198 : f32 to vector<38x38xf32>
      %200 = arith.mulf %196, %199 : vector<38x38xf32>
      %201 = arith.addf %195, %200 : vector<38x38xf32>
      %202 = vector.extract_strided_slice %12 {offsets = [0, 31], sizes = [38, 38], strides = [1, 1]} : vector<38x128xf32> to vector<38x38xf32>
      %203 = vector.extract_strided_slice %15 {offsets = [0, 31], sizes = [1, 1], strides = [1, 1]} : vector<1x128xf32> to vector<1x1xf32>
      %204 = vector.extract %203[0, 0] : f32 from vector<1x1xf32>
      %205 = vector.broadcast %204 : f32 to vector<38x38xf32>
      %206 = arith.mulf %202, %205 : vector<38x38xf32>
      %207 = arith.addf %201, %206 : vector<38x38xf32>
      %208 = vector.extract_strided_slice %12 {offsets = [0, 32], sizes = [38, 38], strides = [1, 1]} : vector<38x128xf32> to vector<38x38xf32>
      %209 = vector.extract_strided_slice %15 {offsets = [0, 32], sizes = [1, 1], strides = [1, 1]} : vector<1x128xf32> to vector<1x1xf32>
      %210 = vector.extract %209[0, 0] : f32 from vector<1x1xf32>
      %211 = vector.broadcast %210 : f32 to vector<38x38xf32>
      %212 = arith.mulf %208, %211 : vector<38x38xf32>
      %213 = arith.addf %207, %212 : vector<38x38xf32>
      %214 = vector.extract_strided_slice %12 {offsets = [0, 33], sizes = [38, 38], strides = [1, 1]} : vector<38x128xf32> to vector<38x38xf32>
      %215 = vector.extract_strided_slice %15 {offsets = [0, 33], sizes = [1, 1], strides = [1, 1]} : vector<1x128xf32> to vector<1x1xf32>
      %216 = vector.extract %215[0, 0] : f32 from vector<1x1xf32>
      %217 = vector.broadcast %216 : f32 to vector<38x38xf32>
      %218 = arith.mulf %214, %217 : vector<38x38xf32>
      %219 = arith.addf %213, %218 : vector<38x38xf32>
      %220 = vector.extract_strided_slice %12 {offsets = [0, 34], sizes = [38, 38], strides = [1, 1]} : vector<38x128xf32> to vector<38x38xf32>
      %221 = vector.extract_strided_slice %15 {offsets = [0, 34], sizes = [1, 1], strides = [1, 1]} : vector<1x128xf32> to vector<1x1xf32>
      %222 = vector.extract %221[0, 0] : f32 from vector<1x1xf32>
      %223 = vector.broadcast %222 : f32 to vector<38x38xf32>
      %224 = arith.mulf %220, %223 : vector<38x38xf32>
      %225 = arith.addf %219, %224 : vector<38x38xf32>
      %226 = vector.extract_strided_slice %12 {offsets = [0, 35], sizes = [38, 38], strides = [1, 1]} : vector<38x128xf32> to vector<38x38xf32>
      %227 = vector.extract_strided_slice %15 {offsets = [0, 35], sizes = [1, 1], strides = [1, 1]} : vector<1x128xf32> to vector<1x1xf32>
      %228 = vector.extract %227[0, 0] : f32 from vector<1x1xf32>
      %229 = vector.broadcast %228 : f32 to vector<38x38xf32>
      %230 = arith.mulf %226, %229 : vector<38x38xf32>
      %231 = arith.addf %225, %230 : vector<38x38xf32>
      %232 = vector.extract_strided_slice %12 {offsets = [0, 36], sizes = [38, 38], strides = [1, 1]} : vector<38x128xf32> to vector<38x38xf32>
      %233 = vector.extract_strided_slice %15 {offsets = [0, 36], sizes = [1, 1], strides = [1, 1]} : vector<1x128xf32> to vector<1x1xf32>
      %234 = vector.extract %233[0, 0] : f32 from vector<1x1xf32>
      %235 = vector.broadcast %234 : f32 to vector<38x38xf32>
      %236 = arith.mulf %232, %235 : vector<38x38xf32>
      %237 = arith.addf %231, %236 : vector<38x38xf32>
      %238 = vector.extract_strided_slice %12 {offsets = [0, 37], sizes = [38, 38], strides = [1, 1]} : vector<38x128xf32> to vector<38x38xf32>
      %239 = vector.extract_strided_slice %15 {offsets = [0, 37], sizes = [1, 1], strides = [1, 1]} : vector<1x128xf32> to vector<1x1xf32>
      %240 = vector.extract %239[0, 0] : f32 from vector<1x1xf32>
      %241 = vector.broadcast %240 : f32 to vector<38x38xf32>
      %242 = arith.mulf %238, %241 : vector<38x38xf32>
      %243 = arith.addf %237, %242 : vector<38x38xf32>
      scf.yield %243 : vector<38x38xf32>
    }
    %c48_i32_2 = arith.constant 48 : i32
    %c0 = arith.constant 0 : index
    %c0_3 = arith.constant 0 : index
    %6 = vector.load %arg3[%c0, %c0_3] : memref<38x38xf32, #tpu.memory_space<vmem>>, vector<38x38xf32>
    %7 = arith.addf %6, %5 : vector<38x38xf32>
    %c0_4 = arith.constant 0 : index
    %c0_5 = arith.constant 0 : index
    %8 = vector.load %arg3[%c0_4, %c0_5] : memref<38x38xf32, #tpu.memory_space<vmem>>, vector<38x38xf32>
    tpu.vector_store %arg3[%c0_4, %c0_5], %7 {strides = array<i32>} : memref<38x38xf32, #tpu.memory_space<vmem>>, vector<38x38xf32>,
    return
  }
  func.func @transform_0(%arg0: i32) -> (i32, i32, i32, i32) {
    %c0_i32 = arith.constant 0 : i32
    %c0_i32_0 = arith.constant 0 : i32
    %c0_i32_1 = arith.constant 0 : i32
    %c0_i32_2 = arith.constant 0 : i32
    return %arg0, %c0_i32, %c0_i32_0, %c0_i32_1 : i32, i32, i32, i32
  }
  func.func @transform_1(%arg0: i32) -> (i32, i32, i32) {
    %c0_i32 = arith.constant 0 : i32
    %c0_i32_0 = arith.constant 0 : i32
    %c0_i32_1 = arith.constant 0 : i32
    return %arg0, %c0_i32, %c0_i32_0 : i32, i32, i32
  }
  func.func @transform_2(%arg0: i32) -> (i32, i32) {
    %c0_i32 = arith.constant 0 : i32
    %c0_i32_0 = arith.constant 0 : i32
    %c0_i32_1 = arith.constant 0 : i32
    return %c0_i32, %c0_i32_0 : i32, i32
  }
}

module attributes {stable_mosaic.version = 11 : i64} {
  func.func @_conv_accum_kernel(%arg0: i32, %arg1: memref<1x108x38x128xbf16, #tpu.memory_space<vmem>>, %arg2: memref<1x108x128xf32, #tpu.memory_space<vmem>>, %arg3: memref<38x38xf32, #tpu.memory_space<vmem>>) attributes {dimension_semantics = [#tpu.dimension_semantics<arbitrary>], iteration_bounds = array<i64: 13>, scalar_prefetch = 0 : i64, scratch_operands = 0 : i64, tpu.core_type = #tpu.core_type<tc>, window_params = [{transform_indices = @transform_0, window_bounds = array<i64: 1, 108, 38, 128>}, {transform_indices = @transform_1, window_bounds = array<i64: 1, 108, 128>}, {pipeline_mode = #tpu.pipeline_mode<synchronous>, transform_indices = @transform_2, window_bounds = array<i64: 38, 38>}]} {
    %c0_i32 = arith.constant 0 : i32
    %0 = arith.cmpi eq, %arg0, %c0_i32 : i32
    %1 = arith.extui %0 : i1 to i32
    %c0_i32_0 = arith.constant 0 : i32
    %2 = arith.cmpi ne, %1, %c0_i32_0 : i32
    scf.if %2 {
      %cst_6 = arith.constant 0.000000e+00 : f32
      %9 = vector.broadcast %cst_6 : f32 to vector<38x38xf32>
      %c0_7 = arith.constant 0 : index
      %c0_8 = arith.constant 0 : index
      %10 = vector.load %arg3[%c0_7, %c0_8] : memref<38x38xf32, #tpu.memory_space<vmem>>, vector<38x38xf32>
      tpu.vector_store %arg3[%c0_7, %c0_8], %9 {strides = array<i32>} : memref<38x38xf32, #tpu.memory_space<vmem>>, vector<38x38xf32>,
    } else {
    }
    %cst = arith.constant 0.000000e+00 : f32
    %3 = vector.broadcast %cst : f32 to vector<38x38xf32>
    %c0_i32_1 = arith.constant 0 : i32
    %c108_i32 = arith.constant 108 : i32
    %4 = arith.addi %c0_i32_1, %c108_i32 : i32
    %c1_i32 = arith.constant 1 : i32
    %5 = scf.for %arg4 = %c0_i32_1 to %4 step %c1_i32 iter_args(%arg5 = %3) -> (vector<38x38xf32>)  : i32 {
      %c0_6 = arith.constant 0 : index
      %9 = arith.index_cast %arg4 : i32 to index
      %c0_7 = arith.constant 0 : index
      %c0_8 = arith.constant 0 : index
      %10 = vector.load %arg1[%c0_6, %9, %c0_7, %c0_8] : memref<1x108x38x128xbf16, #tpu.memory_space<vmem>>, vector<1x1x38x128xbf16>
      %11 = vector.shape_cast %10 : vector<1x1x38x128xbf16> to vector<38x128xbf16>
      %12 = arith.extf %11 : vector<38x128xbf16> to vector<38x128xf32>
      %c0_9 = arith.constant 0 : index
      %13 = arith.index_cast %arg4 : i32 to index
      %c0_10 = arith.constant 0 : index
      %14 = vector.load %arg2[%c0_9, %13, %c0_10] : memref<1x108x128xf32, #tpu.memory_space<vmem>>, vector<1x1x128xf32>
      %15 = vector.shape_cast %14 : vector<1x1x128xf32> to vector<1x128xf32>
      %16 = vector.extract_strided_slice %12 {offsets = [0, 0], sizes = [38, 38], strides = [1, 1]} : vector<38x128xf32> to vector<38x38xf32>
      %17 = vector.extract_strided_slice %15 {offsets = [0, 0], sizes = [1, 1], strides = [1, 1]} : vector<1x128xf32> to vector<1x1xf32>
      %18 = vector.extract %17[0, 0] : f32 from vector<1x1xf32>
      %19 = vector.broadcast %18 : f32 to vector<38x38xf32>
      %20 = arith.mulf %16, %19 : vector<38x38xf32>
      %21 = arith.addf %arg5, %20 : vector<38x38xf32>
      %22 = vector.extract_strided_slice %12 {offsets = [0, 1], sizes = [38, 38], strides = [1, 1]} : vector<38x128xf32> to vector<38x38xf32>
      %23 = vector.extract_strided_slice %15 {offsets = [0, 1], sizes = [1, 1], strides = [1, 1]} : vector<1x128xf32> to vector<1x1xf32>
      %24 = vector.extract %23[0, 0] : f32 from vector<1x1xf32>
      %25 = vector.broadcast %24 : f32 to vector<38x38xf32>
      %26 = arith.mulf %22, %25 : vector<38x38xf32>
      %27 = arith.addf %21, %26 : vector<38x38xf32>
      %28 = vector.extract_strided_slice %12 {offsets = [0, 2], sizes = [38, 38], strides = [1, 1]} : vector<38x128xf32> to vector<38x38xf32>
      %29 = vector.extract_strided_slice %15 {offsets = [0, 2], sizes = [1, 1], strides = [1, 1]} : vector<1x128xf32> to vector<1x1xf32>
      %30 = vector.extract %29[0, 0] : f32 from vector<1x1xf32>
      %31 = vector.broadcast %30 : f32 to vector<38x38xf32>
      %32 = arith.mulf %28, %31 : vector<38x38xf32>
      %33 = arith.addf %27, %32 : vector<38x38xf32>
      %34 = vector.extract_strided_slice %12 {offsets = [0, 3], sizes = [38, 38], strides = [1, 1]} : vector<38x128xf32> to vector<38x38xf32>
      %35 = vector.extract_strided_slice %15 {offsets = [0, 3], sizes = [1, 1], strides = [1, 1]} : vector<1x128xf32> to vector<1x1xf32>
      %36 = vector.extract %35[0, 0] : f32 from vector<1x1xf32>
      %37 = vector.broadcast %36 : f32 to vector<38x38xf32>
      %38 = arith.mulf %34, %37 : vector<38x38xf32>
      %39 = arith.addf %33, %38 : vector<38x38xf32>
      %40 = vector.extract_strided_slice %12 {offsets = [0, 4], sizes = [38, 38], strides = [1, 1]} : vector<38x128xf32> to vector<38x38xf32>
      %41 = vector.extract_strided_slice %15 {offsets = [0, 4], sizes = [1, 1], strides = [1, 1]} : vector<1x128xf32> to vector<1x1xf32>
      %42 = vector.extract %41[0, 0] : f32 from vector<1x1xf32>
      %43 = vector.broadcast %42 : f32 to vector<38x38xf32>
      %44 = arith.mulf %40, %43 : vector<38x38xf32>
      %45 = arith.addf %39, %44 : vector<38x38xf32>
      %46 = vector.extract_strided_slice %12 {offsets = [0, 5], sizes = [38, 38], strides = [1, 1]} : vector<38x128xf32> to vector<38x38xf32>
      %47 = vector.extract_strided_slice %15 {offsets = [0, 5], sizes = [1, 1], strides = [1, 1]} : vector<1x128xf32> to vector<1x1xf32>
      %48 = vector.extract %47[0, 0] : f32 from vector<1x1xf32>
      %49 = vector.broadcast %48 : f32 to vector<38x38xf32>
      %50 = arith.mulf %46, %49 : vector<38x38xf32>
      %51 = arith.addf %45, %50 : vector<38x38xf32>
      %52 = vector.extract_strided_slice %12 {offsets = [0, 6], sizes = [38, 38], strides = [1, 1]} : vector<38x128xf32> to vector<38x38xf32>
      %53 = vector.extract_strided_slice %15 {offsets = [0, 6], sizes = [1, 1], strides = [1, 1]} : vector<1x128xf32> to vector<1x1xf32>
      %54 = vector.extract %53[0, 0] : f32 from vector<1x1xf32>
      %55 = vector.broadcast %54 : f32 to vector<38x38xf32>
      %56 = arith.mulf %52, %55 : vector<38x38xf32>
      %57 = arith.addf %51, %56 : vector<38x38xf32>
      %58 = vector.extract_strided_slice %12 {offsets = [0, 7], sizes = [38, 38], strides = [1, 1]} : vector<38x128xf32> to vector<38x38xf32>
      %59 = vector.extract_strided_slice %15 {offsets = [0, 7], sizes = [1, 1], strides = [1, 1]} : vector<1x128xf32> to vector<1x1xf32>
      %60 = vector.extract %59[0, 0] : f32 from vector<1x1xf32>
      %61 = vector.broadcast %60 : f32 to vector<38x38xf32>
      %62 = arith.mulf %58, %61 : vector<38x38xf32>
      %63 = arith.addf %57, %62 : vector<38x38xf32>
      %64 = vector.extract_strided_slice %12 {offsets = [0, 8], sizes = [38, 38], strides = [1, 1]} : vector<38x128xf32> to vector<38x38xf32>
      %65 = vector.extract_strided_slice %15 {offsets = [0, 8], sizes = [1, 1], strides = [1, 1]} : vector<1x128xf32> to vector<1x1xf32>
      %66 = vector.extract %65[0, 0] : f32 from vector<1x1xf32>
      %67 = vector.broadcast %66 : f32 to vector<38x38xf32>
      %68 = arith.mulf %64, %67 : vector<38x38xf32>
      %69 = arith.addf %63, %68 : vector<38x38xf32>
      %70 = vector.extract_strided_slice %12 {offsets = [0, 9], sizes = [38, 38], strides = [1, 1]} : vector<38x128xf32> to vector<38x38xf32>
      %71 = vector.extract_strided_slice %15 {offsets = [0, 9], sizes = [1, 1], strides = [1, 1]} : vector<1x128xf32> to vector<1x1xf32>
      %72 = vector.extract %71[0, 0] : f32 from vector<1x1xf32>
      %73 = vector.broadcast %72 : f32 to vector<38x38xf32>
      %74 = arith.mulf %70, %73 : vector<38x38xf32>
      %75 = arith.addf %69, %74 : vector<38x38xf32>
      %76 = vector.extract_strided_slice %12 {offsets = [0, 10], sizes = [38, 38], strides = [1, 1]} : vector<38x128xf32> to vector<38x38xf32>
      %77 = vector.extract_strided_slice %15 {offsets = [0, 10], sizes = [1, 1], strides = [1, 1]} : vector<1x128xf32> to vector<1x1xf32>
      %78 = vector.extract %77[0, 0] : f32 from vector<1x1xf32>
      %79 = vector.broadcast %78 : f32 to vector<38x38xf32>
      %80 = arith.mulf %76, %79 : vector<38x38xf32>
      %81 = arith.addf %75, %80 : vector<38x38xf32>
      %82 = vector.extract_strided_slice %12 {offsets = [0, 11], sizes = [38, 38], strides = [1, 1]} : vector<38x128xf32> to vector<38x38xf32>
      %83 = vector.extract_strided_slice %15 {offsets = [0, 11], sizes = [1, 1], strides = [1, 1]} : vector<1x128xf32> to vector<1x1xf32>
      %84 = vector.extract %83[0, 0] : f32 from vector<1x1xf32>
      %85 = vector.broadcast %84 : f32 to vector<38x38xf32>
      %86 = arith.mulf %82, %85 : vector<38x38xf32>
      %87 = arith.addf %81, %86 : vector<38x38xf32>
      %88 = vector.extract_strided_slice %12 {offsets = [0, 12], sizes = [38, 38], strides = [1, 1]} : vector<38x128xf32> to vector<38x38xf32>
      %89 = vector.extract_strided_slice %15 {offsets = [0, 12], sizes = [1, 1], strides = [1, 1]} : vector<1x128xf32> to vector<1x1xf32>
      %90 = vector.extract %89[0, 0] : f32 from vector<1x1xf32>
      %91 = vector.broadcast %90 : f32 to vector<38x38xf32>
      %92 = arith.mulf %88, %91 : vector<38x38xf32>
      %93 = arith.addf %87, %92 : vector<38x38xf32>
      scf.yield %93 : vector<38x38xf32>
    }
    %c108_i32_2 = arith.constant 108 : i32
    %c0 = arith.constant 0 : index
    %c0_3 = arith.constant 0 : index
    %6 = vector.load %arg3[%c0, %c0_3] : memref<38x38xf32, #tpu.memory_space<vmem>>, vector<38x38xf32>
    %7 = arith.addf %6, %5 : vector<38x38xf32>
    %c0_4 = arith.constant 0 : index
    %c0_5 = arith.constant 0 : index
    %8 = vector.load %arg3[%c0_4, %c0_5] : memref<38x38xf32, #tpu.memory_space<vmem>>, vector<38x38xf32>
    tpu.vector_store %arg3[%c0_4, %c0_5], %7 {strides = array<i32>} : memref<38x38xf32, #tpu.memory_space<vmem>>, vector<38x38xf32>,
    return
  }
  func.func @transform_0(%arg0: i32) -> (i32, i32, i32, i32) {
    %c0_i32 = arith.constant 0 : i32
    %c0_i32_0 = arith.constant 0 : i32
    %c0_i32_1 = arith.constant 0 : i32
    %c0_i32_2 = arith.constant 0 : i32
    return %arg0, %c0_i32, %c0_i32_0, %c0_i32_1 : i32, i32, i32, i32
  }
  func.func @transform_1(%arg0: i32) -> (i32, i32, i32) {
    %c0_i32 = arith.constant 0 : i32
    %c0_i32_0 = arith.constant 0 : i32
    %c0_i32_1 = arith.constant 0 : i32
    return %arg0, %c0_i32, %c0_i32_0 : i32, i32, i32
  }
  func.func @transform_2(%arg0: i32) -> (i32, i32) {
    %c0_i32 = arith.constant 0 : i32
    %c0_i32_0 = arith.constant 0 : i32
    %c0_i32_1 = arith.constant 0 : i32
    return %c0_i32, %c0_i32_0 : i32, i32
  }
}

module attributes {stable_mosaic.version = 11 : i64} {
  func.func @_conv_accum_kernel(%arg0: i32, %arg1: memref<1x147x37x128xbf16, #tpu.memory_space<vmem>>, %arg2: memref<1x147x128xf32, #tpu.memory_space<vmem>>, %arg3: memref<37x37xf32, #tpu.memory_space<vmem>>) attributes {dimension_semantics = [#tpu.dimension_semantics<arbitrary>], iteration_bounds = array<i64: 8>, scalar_prefetch = 0 : i64, scratch_operands = 0 : i64, tpu.core_type = #tpu.core_type<tc>, window_params = [{transform_indices = @transform_0, window_bounds = array<i64: 1, 147, 37, 128>}, {transform_indices = @transform_1, window_bounds = array<i64: 1, 147, 128>}, {pipeline_mode = #tpu.pipeline_mode<synchronous>, transform_indices = @transform_2, window_bounds = array<i64: 37, 37>}]} {
    %c0_i32 = arith.constant 0 : i32
    %0 = arith.cmpi eq, %arg0, %c0_i32 : i32
    %1 = arith.extui %0 : i1 to i32
    %c0_i32_0 = arith.constant 0 : i32
    %2 = arith.cmpi ne, %1, %c0_i32_0 : i32
    scf.if %2 {
      %cst_6 = arith.constant 0.000000e+00 : f32
      %9 = vector.broadcast %cst_6 : f32 to vector<37x37xf32>
      %c0_7 = arith.constant 0 : index
      %c0_8 = arith.constant 0 : index
      %10 = vector.load %arg3[%c0_7, %c0_8] : memref<37x37xf32, #tpu.memory_space<vmem>>, vector<37x37xf32>
      tpu.vector_store %arg3[%c0_7, %c0_8], %9 {strides = array<i32>} : memref<37x37xf32, #tpu.memory_space<vmem>>, vector<37x37xf32>,
    } else {
    }
    %cst = arith.constant 0.000000e+00 : f32
    %3 = vector.broadcast %cst : f32 to vector<37x37xf32>
    %c0_i32_1 = arith.constant 0 : i32
    %c147_i32 = arith.constant 147 : i32
    %4 = arith.addi %c0_i32_1, %c147_i32 : i32
    %c1_i32 = arith.constant 1 : i32
    %5 = scf.for %arg4 = %c0_i32_1 to %4 step %c1_i32 iter_args(%arg5 = %3) -> (vector<37x37xf32>)  : i32 {
      %c0_6 = arith.constant 0 : index
      %9 = arith.index_cast %arg4 : i32 to index
      %c0_7 = arith.constant 0 : index
      %c0_8 = arith.constant 0 : index
      %10 = vector.load %arg1[%c0_6, %9, %c0_7, %c0_8] : memref<1x147x37x128xbf16, #tpu.memory_space<vmem>>, vector<1x1x37x128xbf16>
      %11 = vector.shape_cast %10 : vector<1x1x37x128xbf16> to vector<37x128xbf16>
      %12 = arith.extf %11 : vector<37x128xbf16> to vector<37x128xf32>
      %c0_9 = arith.constant 0 : index
      %13 = arith.index_cast %arg4 : i32 to index
      %c0_10 = arith.constant 0 : index
      %14 = vector.load %arg2[%c0_9, %13, %c0_10] : memref<1x147x128xf32, #tpu.memory_space<vmem>>, vector<1x1x128xf32>
      %15 = vector.shape_cast %14 : vector<1x1x128xf32> to vector<1x128xf32>
      %16 = vector.extract_strided_slice %12 {offsets = [0, 0], sizes = [37, 37], strides = [1, 1]} : vector<37x128xf32> to vector<37x37xf32>
      %17 = vector.extract_strided_slice %15 {offsets = [0, 0], sizes = [1, 1], strides = [1, 1]} : vector<1x128xf32> to vector<1x1xf32>
      %18 = vector.extract %17[0, 0] : f32 from vector<1x1xf32>
      %19 = vector.broadcast %18 : f32 to vector<37x37xf32>
      %20 = arith.mulf %16, %19 : vector<37x37xf32>
      %21 = arith.addf %arg5, %20 : vector<37x37xf32>
      %22 = vector.extract_strided_slice %12 {offsets = [0, 1], sizes = [37, 37], strides = [1, 1]} : vector<37x128xf32> to vector<37x37xf32>
      %23 = vector.extract_strided_slice %15 {offsets = [0, 1], sizes = [1, 1], strides = [1, 1]} : vector<1x128xf32> to vector<1x1xf32>
      %24 = vector.extract %23[0, 0] : f32 from vector<1x1xf32>
      %25 = vector.broadcast %24 : f32 to vector<37x37xf32>
      %26 = arith.mulf %22, %25 : vector<37x37xf32>
      %27 = arith.addf %21, %26 : vector<37x37xf32>
      %28 = vector.extract_strided_slice %12 {offsets = [0, 2], sizes = [37, 37], strides = [1, 1]} : vector<37x128xf32> to vector<37x37xf32>
      %29 = vector.extract_strided_slice %15 {offsets = [0, 2], sizes = [1, 1], strides = [1, 1]} : vector<1x128xf32> to vector<1x1xf32>
      %30 = vector.extract %29[0, 0] : f32 from vector<1x1xf32>
      %31 = vector.broadcast %30 : f32 to vector<37x37xf32>
      %32 = arith.mulf %28, %31 : vector<37x37xf32>
      %33 = arith.addf %27, %32 : vector<37x37xf32>
      %34 = vector.extract_strided_slice %12 {offsets = [0, 3], sizes = [37, 37], strides = [1, 1]} : vector<37x128xf32> to vector<37x37xf32>
      %35 = vector.extract_strided_slice %15 {offsets = [0, 3], sizes = [1, 1], strides = [1, 1]} : vector<1x128xf32> to vector<1x1xf32>
      %36 = vector.extract %35[0, 0] : f32 from vector<1x1xf32>
      %37 = vector.broadcast %36 : f32 to vector<37x37xf32>
      %38 = arith.mulf %34, %37 : vector<37x37xf32>
      %39 = arith.addf %33, %38 : vector<37x37xf32>
      %40 = vector.extract_strided_slice %12 {offsets = [0, 4], sizes = [37, 37], strides = [1, 1]} : vector<37x128xf32> to vector<37x37xf32>
      %41 = vector.extract_strided_slice %15 {offsets = [0, 4], sizes = [1, 1], strides = [1, 1]} : vector<1x128xf32> to vector<1x1xf32>
      %42 = vector.extract %41[0, 0] : f32 from vector<1x1xf32>
      %43 = vector.broadcast %42 : f32 to vector<37x37xf32>
      %44 = arith.mulf %40, %43 : vector<37x37xf32>
      %45 = arith.addf %39, %44 : vector<37x37xf32>
      %46 = vector.extract_strided_slice %12 {offsets = [0, 5], sizes = [37, 37], strides = [1, 1]} : vector<37x128xf32> to vector<37x37xf32>
      %47 = vector.extract_strided_slice %15 {offsets = [0, 5], sizes = [1, 1], strides = [1, 1]} : vector<1x128xf32> to vector<1x1xf32>
      %48 = vector.extract %47[0, 0] : f32 from vector<1x1xf32>
      %49 = vector.broadcast %48 : f32 to vector<37x37xf32>
      %50 = arith.mulf %46, %49 : vector<37x37xf32>
      %51 = arith.addf %45, %50 : vector<37x37xf32>
      %52 = vector.extract_strided_slice %12 {offsets = [0, 6], sizes = [37, 37], strides = [1, 1]} : vector<37x128xf32> to vector<37x37xf32>
      %53 = vector.extract_strided_slice %15 {offsets = [0, 6], sizes = [1, 1], strides = [1, 1]} : vector<1x128xf32> to vector<1x1xf32>
      %54 = vector.extract %53[0, 0] : f32 from vector<1x1xf32>
      %55 = vector.broadcast %54 : f32 to vector<37x37xf32>
      %56 = arith.mulf %52, %55 : vector<37x37xf32>
      %57 = arith.addf %51, %56 : vector<37x37xf32>
      %58 = vector.extract_strided_slice %12 {offsets = [0, 7], sizes = [37, 37], strides = [1, 1]} : vector<37x128xf32> to vector<37x37xf32>
      %59 = vector.extract_strided_slice %15 {offsets = [0, 7], sizes = [1, 1], strides = [1, 1]} : vector<1x128xf32> to vector<1x1xf32>
      %60 = vector.extract %59[0, 0] : f32 from vector<1x1xf32>
      %61 = vector.broadcast %60 : f32 to vector<37x37xf32>
      %62 = arith.mulf %58, %61 : vector<37x37xf32>
      %63 = arith.addf %57, %62 : vector<37x37xf32>
      scf.yield %63 : vector<37x37xf32>
    }
    %c147_i32_2 = arith.constant 147 : i32
    %c0 = arith.constant 0 : index
    %c0_3 = arith.constant 0 : index
    %6 = vector.load %arg3[%c0, %c0_3] : memref<37x37xf32, #tpu.memory_space<vmem>>, vector<37x37xf32>
    %7 = arith.addf %6, %5 : vector<37x37xf32>
    %c0_4 = arith.constant 0 : index
    %c0_5 = arith.constant 0 : index
    %8 = vector.load %arg3[%c0_4, %c0_5] : memref<37x37xf32, #tpu.memory_space<vmem>>, vector<37x37xf32>
    tpu.vector_store %arg3[%c0_4, %c0_5], %7 {strides = array<i32>} : memref<37x37xf32, #tpu.memory_space<vmem>>, vector<37x37xf32>,
    return
  }
  func.func @transform_0(%arg0: i32) -> (i32, i32, i32, i32) {
    %c0_i32 = arith.constant 0 : i32
    %c0_i32_0 = arith.constant 0 : i32
    %c0_i32_1 = arith.constant 0 : i32
    %c0_i32_2 = arith.constant 0 : i32
    return %arg0, %c0_i32, %c0_i32_0, %c0_i32_1 : i32, i32, i32, i32
  }
  func.func @transform_1(%arg0: i32) -> (i32, i32, i32) {
    %c0_i32 = arith.constant 0 : i32
    %c0_i32_0 = arith.constant 0 : i32
    %c0_i32_1 = arith.constant 0 : i32
    return %arg0, %c0_i32, %c0_i32_0 : i32, i32, i32
  }
  func.func @transform_2(%arg0: i32) -> (i32, i32) {
    %c0_i32 = arith.constant 0 : i32
    %c0_i32_0 = arith.constant 0 : i32
    %c0_i32_1 = arith.constant 0 : i32
    return %c0_i32, %c0_i32_0 : i32, i32
  }
}

module attributes {stable_mosaic.version = 11 : i64} {
  func.func @_conv_accum_kernel(%arg0: i32, %arg1: memref<1x192x37x128xbf16, #tpu.memory_space<vmem>>, %arg2: memref<1x192x128xf32, #tpu.memory_space<vmem>>, %arg3: memref<37x37xf32, #tpu.memory_space<vmem>>) attributes {dimension_semantics = [#tpu.dimension_semantics<arbitrary>], iteration_bounds = array<i64: 4>, scalar_prefetch = 0 : i64, scratch_operands = 0 : i64, tpu.core_type = #tpu.core_type<tc>, window_params = [{transform_indices = @transform_0, window_bounds = array<i64: 1, 192, 37, 128>}, {transform_indices = @transform_1, window_bounds = array<i64: 1, 192, 128>}, {pipeline_mode = #tpu.pipeline_mode<synchronous>, transform_indices = @transform_2, window_bounds = array<i64: 37, 37>}]} {
    %c0_i32 = arith.constant 0 : i32
    %0 = arith.cmpi eq, %arg0, %c0_i32 : i32
    %1 = arith.extui %0 : i1 to i32
    %c0_i32_0 = arith.constant 0 : i32
    %2 = arith.cmpi ne, %1, %c0_i32_0 : i32
    scf.if %2 {
      %cst_6 = arith.constant 0.000000e+00 : f32
      %9 = vector.broadcast %cst_6 : f32 to vector<37x37xf32>
      %c0_7 = arith.constant 0 : index
      %c0_8 = arith.constant 0 : index
      %10 = vector.load %arg3[%c0_7, %c0_8] : memref<37x37xf32, #tpu.memory_space<vmem>>, vector<37x37xf32>
      tpu.vector_store %arg3[%c0_7, %c0_8], %9 {strides = array<i32>} : memref<37x37xf32, #tpu.memory_space<vmem>>, vector<37x37xf32>,
    } else {
    }
    %cst = arith.constant 0.000000e+00 : f32
    %3 = vector.broadcast %cst : f32 to vector<37x37xf32>
    %c0_i32_1 = arith.constant 0 : i32
    %c192_i32 = arith.constant 192 : i32
    %4 = arith.addi %c0_i32_1, %c192_i32 : i32
    %c1_i32 = arith.constant 1 : i32
    %5 = scf.for %arg4 = %c0_i32_1 to %4 step %c1_i32 iter_args(%arg5 = %3) -> (vector<37x37xf32>)  : i32 {
      %c0_6 = arith.constant 0 : index
      %9 = arith.index_cast %arg4 : i32 to index
      %c0_7 = arith.constant 0 : index
      %c0_8 = arith.constant 0 : index
      %10 = vector.load %arg1[%c0_6, %9, %c0_7, %c0_8] : memref<1x192x37x128xbf16, #tpu.memory_space<vmem>>, vector<1x1x37x128xbf16>
      %11 = vector.shape_cast %10 : vector<1x1x37x128xbf16> to vector<37x128xbf16>
      %12 = arith.extf %11 : vector<37x128xbf16> to vector<37x128xf32>
      %c0_9 = arith.constant 0 : index
      %13 = arith.index_cast %arg4 : i32 to index
      %c0_10 = arith.constant 0 : index
      %14 = vector.load %arg2[%c0_9, %13, %c0_10] : memref<1x192x128xf32, #tpu.memory_space<vmem>>, vector<1x1x128xf32>
      %15 = vector.shape_cast %14 : vector<1x1x128xf32> to vector<1x128xf32>
      %16 = vector.extract_strided_slice %12 {offsets = [0, 0], sizes = [37, 37], strides = [1, 1]} : vector<37x128xf32> to vector<37x37xf32>
      %17 = vector.extract_strided_slice %15 {offsets = [0, 0], sizes = [1, 1], strides = [1, 1]} : vector<1x128xf32> to vector<1x1xf32>
      %18 = vector.extract %17[0, 0] : f32 from vector<1x1xf32>
      %19 = vector.broadcast %18 : f32 to vector<37x37xf32>
      %20 = arith.mulf %16, %19 : vector<37x37xf32>
      %21 = arith.addf %arg5, %20 : vector<37x37xf32>
      %22 = vector.extract_strided_slice %12 {offsets = [0, 1], sizes = [37, 37], strides = [1, 1]} : vector<37x128xf32> to vector<37x37xf32>
      %23 = vector.extract_strided_slice %15 {offsets = [0, 1], sizes = [1, 1], strides = [1, 1]} : vector<1x128xf32> to vector<1x1xf32>
      %24 = vector.extract %23[0, 0] : f32 from vector<1x1xf32>
      %25 = vector.broadcast %24 : f32 to vector<37x37xf32>
      %26 = arith.mulf %22, %25 : vector<37x37xf32>
      %27 = arith.addf %21, %26 : vector<37x37xf32>
      %28 = vector.extract_strided_slice %12 {offsets = [0, 2], sizes = [37, 37], strides = [1, 1]} : vector<37x128xf32> to vector<37x37xf32>
      %29 = vector.extract_strided_slice %15 {offsets = [0, 2], sizes = [1, 1], strides = [1, 1]} : vector<1x128xf32> to vector<1x1xf32>
      %30 = vector.extract %29[0, 0] : f32 from vector<1x1xf32>
      %31 = vector.broadcast %30 : f32 to vector<37x37xf32>
      %32 = arith.mulf %28, %31 : vector<37x37xf32>
      %33 = arith.addf %27, %32 : vector<37x37xf32>
      %34 = vector.extract_strided_slice %12 {offsets = [0, 3], sizes = [37, 37], strides = [1, 1]} : vector<37x128xf32> to vector<37x37xf32>
      %35 = vector.extract_strided_slice %15 {offsets = [0, 3], sizes = [1, 1], strides = [1, 1]} : vector<1x128xf32> to vector<1x1xf32>
      %36 = vector.extract %35[0, 0] : f32 from vector<1x1xf32>
      %37 = vector.broadcast %36 : f32 to vector<37x37xf32>
      %38 = arith.mulf %34, %37 : vector<37x37xf32>
      %39 = arith.addf %33, %38 : vector<37x37xf32>
      scf.yield %39 : vector<37x37xf32>
    }
    %c192_i32_2 = arith.constant 192 : i32
    %c0 = arith.constant 0 : index
    %c0_3 = arith.constant 0 : index
    %6 = vector.load %arg3[%c0, %c0_3] : memref<37x37xf32, #tpu.memory_space<vmem>>, vector<37x37xf32>
    %7 = arith.addf %6, %5 : vector<37x37xf32>
    %c0_4 = arith.constant 0 : index
    %c0_5 = arith.constant 0 : index
    %8 = vector.load %arg3[%c0_4, %c0_5] : memref<37x37xf32, #tpu.memory_space<vmem>>, vector<37x37xf32>
    tpu.vector_store %arg3[%c0_4, %c0_5], %7 {strides = array<i32>} : memref<37x37xf32, #tpu.memory_space<vmem>>, vector<37x37xf32>,
    return
  }
  func.func @transform_0(%arg0: i32) -> (i32, i32, i32, i32) {
    %c0_i32 = arith.constant 0 : i32
    %c0_i32_0 = arith.constant 0 : i32
    %c0_i32_1 = arith.constant 0 : i32
    %c0_i32_2 = arith.constant 0 : i32
    return %arg0, %c0_i32, %c0_i32_0, %c0_i32_1 : i32, i32, i32, i32
  }
  func.func @transform_1(%arg0: i32) -> (i32, i32, i32) {
    %c0_i32 = arith.constant 0 : i32
    %c0_i32_0 = arith.constant 0 : i32
    %c0_i32_1 = arith.constant 0 : i32
    return %arg0, %c0_i32, %c0_i32_0 : i32, i32, i32
  }
  func.func @transform_2(%arg0: i32) -> (i32, i32) {
    %c0_i32 = arith.constant 0 : i32
    %c0_i32_0 = arith.constant 0 : i32
    %c0_i32_1 = arith.constant 0 : i32
    return %c0_i32, %c0_i32_0 : i32, i32
  }
}

module attributes {stable_mosaic.version = 11 : i64} {
  func.func @_conv_accum_kernel(%arg0: i32, %arg1: memref<1x192x37x128xbf16, #tpu.memory_space<vmem>>, %arg2: memref<1x192x128xf32, #tpu.memory_space<vmem>>, %arg3: memref<37x37xf32, #tpu.memory_space<vmem>>) attributes {dimension_semantics = [#tpu.dimension_semantics<arbitrary>], iteration_bounds = array<i64: 2>, scalar_prefetch = 0 : i64, scratch_operands = 0 : i64, tpu.core_type = #tpu.core_type<tc>, window_params = [{transform_indices = @transform_0, window_bounds = array<i64: 1, 192, 37, 128>}, {transform_indices = @transform_1, window_bounds = array<i64: 1, 192, 128>}, {pipeline_mode = #tpu.pipeline_mode<synchronous>, transform_indices = @transform_2, window_bounds = array<i64: 37, 37>}]} {
    %c0_i32 = arith.constant 0 : i32
    %0 = arith.cmpi eq, %arg0, %c0_i32 : i32
    %1 = arith.extui %0 : i1 to i32
    %c0_i32_0 = arith.constant 0 : i32
    %2 = arith.cmpi ne, %1, %c0_i32_0 : i32
    scf.if %2 {
      %cst_6 = arith.constant 0.000000e+00 : f32
      %9 = vector.broadcast %cst_6 : f32 to vector<37x37xf32>
      %c0_7 = arith.constant 0 : index
      %c0_8 = arith.constant 0 : index
      %10 = vector.load %arg3[%c0_7, %c0_8] : memref<37x37xf32, #tpu.memory_space<vmem>>, vector<37x37xf32>
      tpu.vector_store %arg3[%c0_7, %c0_8], %9 {strides = array<i32>} : memref<37x37xf32, #tpu.memory_space<vmem>>, vector<37x37xf32>,
    } else {
    }
    %cst = arith.constant 0.000000e+00 : f32
    %3 = vector.broadcast %cst : f32 to vector<37x37xf32>
    %c0_i32_1 = arith.constant 0 : i32
    %c192_i32 = arith.constant 192 : i32
    %4 = arith.addi %c0_i32_1, %c192_i32 : i32
    %c1_i32 = arith.constant 1 : i32
    %5 = scf.for %arg4 = %c0_i32_1 to %4 step %c1_i32 iter_args(%arg5 = %3) -> (vector<37x37xf32>)  : i32 {
      %c0_6 = arith.constant 0 : index
      %9 = arith.index_cast %arg4 : i32 to index
      %c0_7 = arith.constant 0 : index
      %c0_8 = arith.constant 0 : index
      %10 = vector.load %arg1[%c0_6, %9, %c0_7, %c0_8] : memref<1x192x37x128xbf16, #tpu.memory_space<vmem>>, vector<1x1x37x128xbf16>
      %11 = vector.shape_cast %10 : vector<1x1x37x128xbf16> to vector<37x128xbf16>
      %12 = arith.extf %11 : vector<37x128xbf16> to vector<37x128xf32>
      %c0_9 = arith.constant 0 : index
      %13 = arith.index_cast %arg4 : i32 to index
      %c0_10 = arith.constant 0 : index
      %14 = vector.load %arg2[%c0_9, %13, %c0_10] : memref<1x192x128xf32, #tpu.memory_space<vmem>>, vector<1x1x128xf32>
      %15 = vector.shape_cast %14 : vector<1x1x128xf32> to vector<1x128xf32>
      %16 = vector.extract_strided_slice %12 {offsets = [0, 0], sizes = [37, 37], strides = [1, 1]} : vector<37x128xf32> to vector<37x37xf32>
      %17 = vector.extract_strided_slice %15 {offsets = [0, 0], sizes = [1, 1], strides = [1, 1]} : vector<1x128xf32> to vector<1x1xf32>
      %18 = vector.extract %17[0, 0] : f32 from vector<1x1xf32>
      %19 = vector.broadcast %18 : f32 to vector<37x37xf32>
      %20 = arith.mulf %16, %19 : vector<37x37xf32>
      %21 = arith.addf %arg5, %20 : vector<37x37xf32>
      %22 = vector.extract_strided_slice %12 {offsets = [0, 1], sizes = [37, 37], strides = [1, 1]} : vector<37x128xf32> to vector<37x37xf32>
      %23 = vector.extract_strided_slice %15 {offsets = [0, 1], sizes = [1, 1], strides = [1, 1]} : vector<1x128xf32> to vector<1x1xf32>
      %24 = vector.extract %23[0, 0] : f32 from vector<1x1xf32>
      %25 = vector.broadcast %24 : f32 to vector<37x37xf32>
      %26 = arith.mulf %22, %25 : vector<37x37xf32>
      %27 = arith.addf %21, %26 : vector<37x37xf32>
      scf.yield %27 : vector<37x37xf32>
    }
    %c192_i32_2 = arith.constant 192 : i32
    %c0 = arith.constant 0 : index
    %c0_3 = arith.constant 0 : index
    %6 = vector.load %arg3[%c0, %c0_3] : memref<37x37xf32, #tpu.memory_space<vmem>>, vector<37x37xf32>
    %7 = arith.addf %6, %5 : vector<37x37xf32>
    %c0_4 = arith.constant 0 : index
    %c0_5 = arith.constant 0 : index
    %8 = vector.load %arg3[%c0_4, %c0_5] : memref<37x37xf32, #tpu.memory_space<vmem>>, vector<37x37xf32>
    tpu.vector_store %arg3[%c0_4, %c0_5], %7 {strides = array<i32>} : memref<37x37xf32, #tpu.memory_space<vmem>>, vector<37x37xf32>,
    return
  }
  func.func @transform_0(%arg0: i32) -> (i32, i32, i32, i32) {
    %c0_i32 = arith.constant 0 : i32
    %c0_i32_0 = arith.constant 0 : i32
    %c0_i32_1 = arith.constant 0 : i32
    %c0_i32_2 = arith.constant 0 : i32
    return %arg0, %c0_i32, %c0_i32_0, %c0_i32_1 : i32, i32, i32, i32
  }
  func.func @transform_1(%arg0: i32) -> (i32, i32, i32) {
    %c0_i32 = arith.constant 0 : i32
    %c0_i32_0 = arith.constant 0 : i32
    %c0_i32_1 = arith.constant 0 : i32
    return %arg0, %c0_i32, %c0_i32_0 : i32, i32, i32
  }
  func.func @transform_2(%arg0: i32) -> (i32, i32) {
    %c0_i32 = arith.constant 0 : i32
    %c0_i32_0 = arith.constant 0 : i32
    %c0_i32_1 = arith.constant 0 : i32
    return %c0_i32, %c0_i32_0 : i32, i32
  }
}

module attributes {stable_mosaic.version = 11 : i64} {
  func.func @_conv_accum_kernel(%arg0: i32, %arg1: memref<1x75x37x128xbf16, #tpu.memory_space<vmem>>, %arg2: memref<1x75x128xf32, #tpu.memory_space<vmem>>, %arg3: memref<37x37xf32, #tpu.memory_space<vmem>>) attributes {dimension_semantics = [#tpu.dimension_semantics<arbitrary>], iteration_bounds = array<i64: 2>, scalar_prefetch = 0 : i64, scratch_operands = 0 : i64, tpu.core_type = #tpu.core_type<tc>, window_params = [{transform_indices = @transform_0, window_bounds = array<i64: 1, 75, 37, 128>}, {transform_indices = @transform_1, window_bounds = array<i64: 1, 75, 128>}, {pipeline_mode = #tpu.pipeline_mode<synchronous>, transform_indices = @transform_2, window_bounds = array<i64: 37, 37>}]} {
    %c0_i32 = arith.constant 0 : i32
    %0 = arith.cmpi eq, %arg0, %c0_i32 : i32
    %1 = arith.extui %0 : i1 to i32
    %c0_i32_0 = arith.constant 0 : i32
    %2 = arith.cmpi ne, %1, %c0_i32_0 : i32
    scf.if %2 {
      %cst_6 = arith.constant 0.000000e+00 : f32
      %9 = vector.broadcast %cst_6 : f32 to vector<37x37xf32>
      %c0_7 = arith.constant 0 : index
      %c0_8 = arith.constant 0 : index
      %10 = vector.load %arg3[%c0_7, %c0_8] : memref<37x37xf32, #tpu.memory_space<vmem>>, vector<37x37xf32>
      tpu.vector_store %arg3[%c0_7, %c0_8], %9 {strides = array<i32>} : memref<37x37xf32, #tpu.memory_space<vmem>>, vector<37x37xf32>,
    } else {
    }
    %cst = arith.constant 0.000000e+00 : f32
    %3 = vector.broadcast %cst : f32 to vector<37x37xf32>
    %c0_i32_1 = arith.constant 0 : i32
    %c75_i32 = arith.constant 75 : i32
    %4 = arith.addi %c0_i32_1, %c75_i32 : i32
    %c1_i32 = arith.constant 1 : i32
    %5 = scf.for %arg4 = %c0_i32_1 to %4 step %c1_i32 iter_args(%arg5 = %3) -> (vector<37x37xf32>)  : i32 {
      %c0_6 = arith.constant 0 : index
      %9 = arith.index_cast %arg4 : i32 to index
      %c0_7 = arith.constant 0 : index
      %c0_8 = arith.constant 0 : index
      %10 = vector.load %arg1[%c0_6, %9, %c0_7, %c0_8] : memref<1x75x37x128xbf16, #tpu.memory_space<vmem>>, vector<1x1x37x128xbf16>
      %11 = vector.shape_cast %10 : vector<1x1x37x128xbf16> to vector<37x128xbf16>
      %12 = arith.extf %11 : vector<37x128xbf16> to vector<37x128xf32>
      %c0_9 = arith.constant 0 : index
      %13 = arith.index_cast %arg4 : i32 to index
      %c0_10 = arith.constant 0 : index
      %14 = vector.load %arg2[%c0_9, %13, %c0_10] : memref<1x75x128xf32, #tpu.memory_space<vmem>>, vector<1x1x128xf32>
      %15 = vector.shape_cast %14 : vector<1x1x128xf32> to vector<1x128xf32>
      %16 = vector.extract_strided_slice %12 {offsets = [0, 0], sizes = [37, 37], strides = [1, 1]} : vector<37x128xf32> to vector<37x37xf32>
      %17 = vector.extract_strided_slice %15 {offsets = [0, 0], sizes = [1, 1], strides = [1, 1]} : vector<1x128xf32> to vector<1x1xf32>
      %18 = vector.extract %17[0, 0] : f32 from vector<1x1xf32>
      %19 = vector.broadcast %18 : f32 to vector<37x37xf32>
      %20 = arith.mulf %16, %19 : vector<37x37xf32>
      %21 = arith.addf %arg5, %20 : vector<37x37xf32>
      %22 = vector.extract_strided_slice %12 {offsets = [0, 1], sizes = [37, 37], strides = [1, 1]} : vector<37x128xf32> to vector<37x37xf32>
      %23 = vector.extract_strided_slice %15 {offsets = [0, 1], sizes = [1, 1], strides = [1, 1]} : vector<1x128xf32> to vector<1x1xf32>
      %24 = vector.extract %23[0, 0] : f32 from vector<1x1xf32>
      %25 = vector.broadcast %24 : f32 to vector<37x37xf32>
      %26 = arith.mulf %22, %25 : vector<37x37xf32>
      %27 = arith.addf %21, %26 : vector<37x37xf32>
      scf.yield %27 : vector<37x37xf32>
    }
    %c75_i32_2 = arith.constant 75 : i32
    %c0 = arith.constant 0 : index
    %c0_3 = arith.constant 0 : index
    %6 = vector.load %arg3[%c0, %c0_3] : memref<37x37xf32, #tpu.memory_space<vmem>>, vector<37x37xf32>
    %7 = arith.addf %6, %5 : vector<37x37xf32>
    %c0_4 = arith.constant 0 : index
    %c0_5 = arith.constant 0 : index
    %8 = vector.load %arg3[%c0_4, %c0_5] : memref<37x37xf32, #tpu.memory_space<vmem>>, vector<37x37xf32>
    tpu.vector_store %arg3[%c0_4, %c0_5], %7 {strides = array<i32>} : memref<37x37xf32, #tpu.memory_space<vmem>>, vector<37x37xf32>,
    return
  }
  func.func @transform_0(%arg0: i32) -> (i32, i32, i32, i32) {
    %c0_i32 = arith.constant 0 : i32
    %c0_i32_0 = arith.constant 0 : i32
    %c0_i32_1 = arith.constant 0 : i32
    %c0_i32_2 = arith.constant 0 : i32
    return %arg0, %c0_i32, %c0_i32_0, %c0_i32_1 : i32, i32, i32, i32
  }
  func.func @transform_1(%arg0: i32) -> (i32, i32, i32) {
    %c0_i32 = arith.constant 0 : i32
    %c0_i32_0 = arith.constant 0 : i32
    %c0_i32_1 = arith.constant 0 : i32
    return %arg0, %c0_i32, %c0_i32_0 : i32, i32, i32
  }
  func.func @transform_2(%arg0: i32) -> (i32, i32) {
    %c0_i32 = arith.constant 0 : i32
    %c0_i32_0 = arith.constant 0 : i32
    %c0_i32_1 = arith.constant 0 : i32
    return %c0_i32, %c0_i32_0 : i32, i32
  }
}

module attributes {stable_mosaic.version = 11 : i64} {
  func.func @_conv_accum_kernel(%arg0: i32, %arg1: memref<1x27x37x128xbf16, #tpu.memory_space<vmem>>, %arg2: memref<1x27x128xf32, #tpu.memory_space<vmem>>, %arg3: memref<37x37xf32, #tpu.memory_space<vmem>>) attributes {dimension_semantics = [#tpu.dimension_semantics<arbitrary>], iteration_bounds = array<i64: 2>, scalar_prefetch = 0 : i64, scratch_operands = 0 : i64, tpu.core_type = #tpu.core_type<tc>, window_params = [{transform_indices = @transform_0, window_bounds = array<i64: 1, 27, 37, 128>}, {transform_indices = @transform_1, window_bounds = array<i64: 1, 27, 128>}, {pipeline_mode = #tpu.pipeline_mode<synchronous>, transform_indices = @transform_2, window_bounds = array<i64: 37, 37>}]} {
    %c0_i32 = arith.constant 0 : i32
    %0 = arith.cmpi eq, %arg0, %c0_i32 : i32
    %1 = arith.extui %0 : i1 to i32
    %c0_i32_0 = arith.constant 0 : i32
    %2 = arith.cmpi ne, %1, %c0_i32_0 : i32
    scf.if %2 {
      %cst_6 = arith.constant 0.000000e+00 : f32
      %9 = vector.broadcast %cst_6 : f32 to vector<37x37xf32>
      %c0_7 = arith.constant 0 : index
      %c0_8 = arith.constant 0 : index
      %10 = vector.load %arg3[%c0_7, %c0_8] : memref<37x37xf32, #tpu.memory_space<vmem>>, vector<37x37xf32>
      tpu.vector_store %arg3[%c0_7, %c0_8], %9 {strides = array<i32>} : memref<37x37xf32, #tpu.memory_space<vmem>>, vector<37x37xf32>,
    } else {
    }
    %cst = arith.constant 0.000000e+00 : f32
    %3 = vector.broadcast %cst : f32 to vector<37x37xf32>
    %c0_i32_1 = arith.constant 0 : i32
    %c27_i32 = arith.constant 27 : i32
    %4 = arith.addi %c0_i32_1, %c27_i32 : i32
    %c1_i32 = arith.constant 1 : i32
    %5 = scf.for %arg4 = %c0_i32_1 to %4 step %c1_i32 iter_args(%arg5 = %3) -> (vector<37x37xf32>)  : i32 {
      %c0_6 = arith.constant 0 : index
      %9 = arith.index_cast %arg4 : i32 to index
      %c0_7 = arith.constant 0 : index
      %c0_8 = arith.constant 0 : index
      %10 = vector.load %arg1[%c0_6, %9, %c0_7, %c0_8] : memref<1x27x37x128xbf16, #tpu.memory_space<vmem>>, vector<1x1x37x128xbf16>
      %11 = vector.shape_cast %10 : vector<1x1x37x128xbf16> to vector<37x128xbf16>
      %12 = arith.extf %11 : vector<37x128xbf16> to vector<37x128xf32>
      %c0_9 = arith.constant 0 : index
      %13 = arith.index_cast %arg4 : i32 to index
      %c0_10 = arith.constant 0 : index
      %14 = vector.load %arg2[%c0_9, %13, %c0_10] : memref<1x27x128xf32, #tpu.memory_space<vmem>>, vector<1x1x128xf32>
      %15 = vector.shape_cast %14 : vector<1x1x128xf32> to vector<1x128xf32>
      %16 = vector.extract_strided_slice %12 {offsets = [0, 0], sizes = [37, 37], strides = [1, 1]} : vector<37x128xf32> to vector<37x37xf32>
      %17 = vector.extract_strided_slice %15 {offsets = [0, 0], sizes = [1, 1], strides = [1, 1]} : vector<1x128xf32> to vector<1x1xf32>
      %18 = vector.extract %17[0, 0] : f32 from vector<1x1xf32>
      %19 = vector.broadcast %18 : f32 to vector<37x37xf32>
      %20 = arith.mulf %16, %19 : vector<37x37xf32>
      %21 = arith.addf %arg5, %20 : vector<37x37xf32>
      %22 = vector.extract_strided_slice %12 {offsets = [0, 1], sizes = [37, 37], strides = [1, 1]} : vector<37x128xf32> to vector<37x37xf32>
      %23 = vector.extract_strided_slice %15 {offsets = [0, 1], sizes = [1, 1], strides = [1, 1]} : vector<1x128xf32> to vector<1x1xf32>
      %24 = vector.extract %23[0, 0] : f32 from vector<1x1xf32>
      %25 = vector.broadcast %24 : f32 to vector<37x37xf32>
      %26 = arith.mulf %22, %25 : vector<37x37xf32>
      %27 = arith.addf %21, %26 : vector<37x37xf32>
      scf.yield %27 : vector<37x37xf32>
    }
    %c27_i32_2 = arith.constant 27 : i32
    %c0 = arith.constant 0 : index
    %c0_3 = arith.constant 0 : index
    %6 = vector.load %arg3[%c0, %c0_3] : memref<37x37xf32, #tpu.memory_space<vmem>>, vector<37x37xf32>
    %7 = arith.addf %6, %5 : vector<37x37xf32>
    %c0_4 = arith.constant 0 : index
    %c0_5 = arith.constant 0 : index
    %8 = vector.load %arg3[%c0_4, %c0_5] : memref<37x37xf32, #tpu.memory_space<vmem>>, vector<37x37xf32>
    tpu.vector_store %arg3[%c0_4, %c0_5], %7 {strides = array<i32>} : memref<37x37xf32, #tpu.memory_space<vmem>>, vector<37x37xf32>,
    return
  }
  func.func @transform_0(%arg0: i32) -> (i32, i32, i32, i32) {
    %c0_i32 = arith.constant 0 : i32
    %c0_i32_0 = arith.constant 0 : i32
    %c0_i32_1 = arith.constant 0 : i32
    %c0_i32_2 = arith.constant 0 : i32
    return %arg0, %c0_i32, %c0_i32_0, %c0_i32_1 : i32, i32, i32, i32
  }
  func.func @transform_1(%arg0: i32) -> (i32, i32, i32) {
    %c0_i32 = arith.constant 0 : i32
    %c0_i32_0 = arith.constant 0 : i32
    %c0_i32_1 = arith.constant 0 : i32
    return %arg0, %c0_i32, %c0_i32_0 : i32, i32, i32
  }
  func.func @transform_2(%arg0: i32) -> (i32, i32) {
    %c0_i32 = arith.constant 0 : i32
    %c0_i32_0 = arith.constant 0 : i32
    %c0_i32_1 = arith.constant 0 : i32
    return %c0_i32, %c0_i32_0 : i32, i32
  }
}

module attributes {stable_mosaic.version = 11 : i64} {
  func.func @_head_fc_kernel(%arg0: memref<38x38xf32, #tpu.memory_space<vmem>>, %arg1: memref<44x44xf32, #tpu.memory_space<vmem>>, %arg2: memref<38x38xf32, #tpu.memory_space<vmem>>, %arg3: memref<37x37xf32, #tpu.memory_space<vmem>>, %arg4: memref<37x37xf32, #tpu.memory_space<vmem>>, %arg5: memref<37x37xf32, #tpu.memory_space<vmem>>, %arg6: memref<37x37xf32, #tpu.memory_space<vmem>>, %arg7: memref<37x37xf32, #tpu.memory_space<vmem>>, %arg8: memref<1x8xf32, #tpu.memory_space<vmem>>, %arg9: memref<4x8x37x37xf32, #tpu.memory_space<vmem>>, %arg10: memref<1x4xf32, #tpu.memory_space<vmem>>, %arg11: memref<8x128xf32, #tpu.memory_space<vmem>>) attributes {dimension_semantics = [], scalar_prefetch = 0 : i64, scratch_operands = 0 : i64, tpu.core_type = #tpu.core_type<tc>} {
    %c0 = arith.constant 0 : index
    %c0_0 = arith.constant 0 : index
    %0 = vector.load %arg0[%c0, %c0_0] : memref<38x38xf32, #tpu.memory_space<vmem>>, vector<38x38xf32>
    %1 = vector.extract_strided_slice %0 {offsets = [0, 0], sizes = [38, 37], strides = [1, 1]} : vector<38x38xf32> to vector<38x37xf32>
    %2 = vector.extract_strided_slice %0 {offsets = [0, 1], sizes = [38, 37], strides = [1, 1]} : vector<38x38xf32> to vector<38x37xf32>
    %3 = arith.maximumf %1, %2 : vector<38x37xf32>
    %4 = vector.extract_strided_slice %3 {offsets = [0, 0], sizes = [37, 37], strides = [1, 1]} : vector<38x37xf32> to vector<37x37xf32>
    %5 = vector.extract_strided_slice %3 {offsets = [1, 0], sizes = [37, 37], strides = [1, 1]} : vector<38x37xf32> to vector<37x37xf32>
    %6 = arith.maximumf %4, %5 : vector<37x37xf32>
    %c0_1 = arith.constant 0 : index
    %c0_2 = arith.constant 0 : index
    %7 = vector.load %arg1[%c0_1, %c0_2] : memref<44x44xf32, #tpu.memory_space<vmem>>, vector<44x44xf32>
    %8 = vector.extract_strided_slice %7 {offsets = [0, 0], sizes = [44, 37], strides = [1, 1]} : vector<44x44xf32> to vector<44x37xf32>
    %9 = vector.extract_strided_slice %7 {offsets = [0, 1], sizes = [44, 37], strides = [1, 1]} : vector<44x44xf32> to vector<44x37xf32>
    %10 = arith.maximumf %8, %9 : vector<44x37xf32>
    %11 = vector.extract_strided_slice %7 {offsets = [0, 2], sizes = [44, 37], strides = [1, 1]} : vector<44x44xf32> to vector<44x37xf32>
    %12 = arith.maximumf %10, %11 : vector<44x37xf32>
    %13 = vector.extract_strided_slice %7 {offsets = [0, 3], sizes = [44, 37], strides = [1, 1]} : vector<44x44xf32> to vector<44x37xf32>
    %14 = arith.maximumf %12, %13 : vector<44x37xf32>
    %15 = vector.extract_strided_slice %7 {offsets = [0, 4], sizes = [44, 37], strides = [1, 1]} : vector<44x44xf32> to vector<44x37xf32>
    %16 = arith.maximumf %14, %15 : vector<44x37xf32>
    %17 = vector.extract_strided_slice %7 {offsets = [0, 5], sizes = [44, 37], strides = [1, 1]} : vector<44x44xf32> to vector<44x37xf32>
    %18 = arith.maximumf %16, %17 : vector<44x37xf32>
    %19 = vector.extract_strided_slice %7 {offsets = [0, 6], sizes = [44, 37], strides = [1, 1]} : vector<44x44xf32> to vector<44x37xf32>
    %20 = arith.maximumf %18, %19 : vector<44x37xf32>
    %21 = vector.extract_strided_slice %7 {offsets = [0, 7], sizes = [44, 37], strides = [1, 1]} : vector<44x44xf32> to vector<44x37xf32>
    %22 = arith.maximumf %20, %21 : vector<44x37xf32>
    %23 = vector.extract_strided_slice %22 {offsets = [0, 0], sizes = [37, 37], strides = [1, 1]} : vector<44x37xf32> to vector<37x37xf32>
    %24 = vector.extract_strided_slice %22 {offsets = [1, 0], sizes = [37, 37], strides = [1, 1]} : vector<44x37xf32> to vector<37x37xf32>
    %25 = arith.maximumf %23, %24 : vector<37x37xf32>
    %26 = vector.extract_strided_slice %22 {offsets = [2, 0], sizes = [37, 37], strides = [1, 1]} : vector<44x37xf32> to vector<37x37xf32>
    %27 = arith.maximumf %25, %26 : vector<37x37xf32>
    %28 = vector.extract_strided_slice %22 {offsets = [3, 0], sizes = [37, 37], strides = [1, 1]} : vector<44x37xf32> to vector<37x37xf32>
    %29 = arith.maximumf %27, %28 : vector<37x37xf32>
    %30 = vector.extract_strided_slice %22 {offsets = [4, 0], sizes = [37, 37], strides = [1, 1]} : vector<44x37xf32> to vector<37x37xf32>
    %31 = arith.maximumf %29, %30 : vector<37x37xf32>
    %32 = vector.extract_strided_slice %22 {offsets = [5, 0], sizes = [37, 37], strides = [1, 1]} : vector<44x37xf32> to vector<37x37xf32>
    %33 = arith.maximumf %31, %32 : vector<37x37xf32>
    %34 = vector.extract_strided_slice %22 {offsets = [6, 0], sizes = [37, 37], strides = [1, 1]} : vector<44x37xf32> to vector<37x37xf32>
    %35 = arith.maximumf %33, %34 : vector<37x37xf32>
    %36 = vector.extract_strided_slice %22 {offsets = [7, 0], sizes = [37, 37], strides = [1, 1]} : vector<44x37xf32> to vector<37x37xf32>
    %37 = arith.maximumf %35, %36 : vector<37x37xf32>
    %c0_3 = arith.constant 0 : index
    %c0_4 = arith.constant 0 : index
    %38 = vector.load %arg2[%c0_3, %c0_4] : memref<38x38xf32, #tpu.memory_space<vmem>>, vector<38x38xf32>
    %39 = vector.extract_strided_slice %38 {offsets = [0, 0], sizes = [38, 37], strides = [1, 1]} : vector<38x38xf32> to vector<38x37xf32>
    %40 = vector.extract_strided_slice %38 {offsets = [0, 1], sizes = [38, 37], strides = [1, 1]} : vector<38x38xf32> to vector<38x37xf32>
    %41 = arith.maximumf %39, %40 : vector<38x37xf32>
    %42 = vector.extract_strided_slice %41 {offsets = [0, 0], sizes = [37, 37], strides = [1, 1]} : vector<38x37xf32> to vector<37x37xf32>
    %43 = vector.extract_strided_slice %41 {offsets = [1, 0], sizes = [37, 37], strides = [1, 1]} : vector<38x37xf32> to vector<37x37xf32>
    %44 = arith.maximumf %42, %43 : vector<37x37xf32>
    %c0_5 = arith.constant 0 : index
    %c0_6 = arith.constant 0 : index
    %45 = vector.load %arg3[%c0_5, %c0_6] : memref<37x37xf32, #tpu.memory_space<vmem>>, vector<37x37xf32>
    %c0_7 = arith.constant 0 : index
    %c0_8 = arith.constant 0 : index
    %46 = vector.load %arg4[%c0_7, %c0_8] : memref<37x37xf32, #tpu.memory_space<vmem>>, vector<37x37xf32>
    %c0_9 = arith.constant 0 : index
    %c0_10 = arith.constant 0 : index
    %47 = vector.load %arg5[%c0_9, %c0_10] : memref<37x37xf32, #tpu.memory_space<vmem>>, vector<37x37xf32>
    %c0_11 = arith.constant 0 : index
    %c0_12 = arith.constant 0 : index
    %48 = vector.load %arg6[%c0_11, %c0_12] : memref<37x37xf32, #tpu.memory_space<vmem>>, vector<37x37xf32>
    %c0_13 = arith.constant 0 : index
    %c0_14 = arith.constant 0 : index
    %49 = vector.load %arg7[%c0_13, %c0_14] : memref<37x37xf32, #tpu.memory_space<vmem>>, vector<37x37xf32>
    %c0_15 = arith.constant 0 : index
    %c0_16 = arith.constant 0 : index
    %50 = vector.load %arg8[%c0_15, %c0_16] : memref<1x8xf32, #tpu.memory_space<vmem>>, vector<1x1xf32>
    %51 = vector.extract %50[0, 0] : f32 from vector<1x1xf32>
    %52 = vector.broadcast %51 : f32 to vector<37x37xf32>
    %53 = arith.addf %6, %52 : vector<37x37xf32>
    %cst = arith.constant 0.000000e+00 : f32
    %54 = vector.broadcast %cst : f32 to vector<37x37xf32>
    %55 = arith.maximumf %53, %54 : vector<37x37xf32>
    %56 = vector.shape_cast %55 : vector<37x37xf32> to vector<1x37x37xf32>
    %cst_17 = arith.constant dense<0.000000e+00> : vector<1xf32>
    %57 = vector.multi_reduction <add>, %56, %cst_17 [1, 2] : vector<1x37x37xf32> to vector<1xf32>
    %58 = vector.shape_cast %57 : vector<1xf32> to vector<1x1x1xf32>
    %59 = vector.extract %58[0, 0, 0] : f32 from vector<1x1x1xf32>
    %cst_18 = arith.constant 1.369000e+03 : f32
    %60 = arith.divf %59, %cst_18 : f32
    %61 = vector.broadcast %60 : f32 to vector<37x37xf32>
    %62 = arith.subf %55, %61 : vector<37x37xf32>
    %63 = vector.broadcast %60 : f32 to vector<37x37xf32>
    %64 = arith.subf %55, %63 : vector<37x37xf32>
    %65 = arith.mulf %62, %64 : vector<37x37xf32>
    %66 = vector.shape_cast %65 : vector<37x37xf32> to vector<1x37x37xf32>
    %cst_19 = arith.constant dense<0.000000e+00> : vector<1xf32>
    %67 = vector.multi_reduction <add>, %66, %cst_19 [1, 2] : vector<1x37x37xf32> to vector<1xf32>
    %68 = vector.shape_cast %67 : vector<1xf32> to vector<1x1x1xf32>
    %69 = vector.extract %68[0, 0, 0] : f32 from vector<1x1x1xf32>
    %cst_20 = arith.constant 1.369000e+03 : f32
    %70 = arith.divf %69, %cst_20 : f32
    %71 = vector.broadcast %60 : f32 to vector<37x37xf32>
    %72 = arith.subf %55, %71 : vector<37x37xf32>
    %cst_21 = arith.constant 9.99999974E-6 : f32
    %73 = arith.addf %70, %cst_21 : f32
    %74 = math.rsqrt %73 : f32
    %75 = vector.broadcast %74 : f32 to vector<37x37xf32>
    %76 = arith.mulf %72, %75 : vector<37x37xf32>
    %cst_22 = arith.constant 0.000000e+00 : f32
    %77 = vector.broadcast %cst_22 : f32 to vector<37x37xf32>
    %78 = arith.maximumf %76, %77 : vector<37x37xf32>
    %c0_23 = arith.constant 0 : index
    %c1 = arith.constant 1 : index
    %79 = vector.load %arg8[%c0_23, %c1] : memref<1x8xf32, #tpu.memory_space<vmem>>, vector<1x1xf32>
    %80 = vector.extract %79[0, 0] : f32 from vector<1x1xf32>
    %81 = vector.broadcast %80 : f32 to vector<37x37xf32>
    %82 = arith.addf %37, %81 : vector<37x37xf32>
    %cst_24 = arith.constant 0.000000e+00 : f32
    %83 = vector.broadcast %cst_24 : f32 to vector<37x37xf32>
    %84 = arith.maximumf %82, %83 : vector<37x37xf32>
    %85 = vector.shape_cast %84 : vector<37x37xf32> to vector<1x37x37xf32>
    %cst_25 = arith.constant dense<0.000000e+00> : vector<1xf32>
    %86 = vector.multi_reduction <add>, %85, %cst_25 [1, 2] : vector<1x37x37xf32> to vector<1xf32>
    %87 = vector.shape_cast %86 : vector<1xf32> to vector<1x1x1xf32>
    %88 = vector.extract %87[0, 0, 0] : f32 from vector<1x1x1xf32>
    %cst_26 = arith.constant 1.369000e+03 : f32
    %89 = arith.divf %88, %cst_26 : f32
    %90 = vector.broadcast %89 : f32 to vector<37x37xf32>
    %91 = arith.subf %84, %90 : vector<37x37xf32>
    %92 = vector.broadcast %89 : f32 to vector<37x37xf32>
    %93 = arith.subf %84, %92 : vector<37x37xf32>
    %94 = arith.mulf %91, %93 : vector<37x37xf32>
    %95 = vector.shape_cast %94 : vector<37x37xf32> to vector<1x37x37xf32>
    %cst_27 = arith.constant dense<0.000000e+00> : vector<1xf32>
    %96 = vector.multi_reduction <add>, %95, %cst_27 [1, 2] : vector<1x37x37xf32> to vector<1xf32>
    %97 = vector.shape_cast %96 : vector<1xf32> to vector<1x1x1xf32>
    %98 = vector.extract %97[0, 0, 0] : f32 from vector<1x1x1xf32>
    %cst_28 = arith.constant 1.369000e+03 : f32
    %99 = arith.divf %98, %cst_28 : f32
    %100 = vector.broadcast %89 : f32 to vector<37x37xf32>
    %101 = arith.subf %84, %100 : vector<37x37xf32>
    %cst_29 = arith.constant 9.99999974E-6 : f32
    %102 = arith.addf %99, %cst_29 : f32
    %103 = math.rsqrt %102 : f32
    %104 = vector.broadcast %103 : f32 to vector<37x37xf32>
    %105 = arith.mulf %101, %104 : vector<37x37xf32>
    %cst_30 = arith.constant 0.000000e+00 : f32
    %106 = vector.broadcast %cst_30 : f32 to vector<37x37xf32>
    %107 = arith.maximumf %105, %106 : vector<37x37xf32>
    %c0_31 = arith.constant 0 : index
    %c2 = arith.constant 2 : index
    %108 = vector.load %arg8[%c0_31, %c2] : memref<1x8xf32, #tpu.memory_space<vmem>>, vector<1x1xf32>
    %109 = vector.extract %108[0, 0] : f32 from vector<1x1xf32>
    %110 = vector.broadcast %109 : f32 to vector<37x37xf32>
    %111 = arith.addf %44, %110 : vector<37x37xf32>
    %cst_32 = arith.constant 0.000000e+00 : f32
    %112 = vector.broadcast %cst_32 : f32 to vector<37x37xf32>
    %113 = arith.maximumf %111, %112 : vector<37x37xf32>
    %114 = vector.shape_cast %113 : vector<37x37xf32> to vector<1x37x37xf32>
    %cst_33 = arith.constant dense<0.000000e+00> : vector<1xf32>
    %115 = vector.multi_reduction <add>, %114, %cst_33 [1, 2] : vector<1x37x37xf32> to vector<1xf32>
    %116 = vector.shape_cast %115 : vector<1xf32> to vector<1x1x1xf32>
    %117 = vector.extract %116[0, 0, 0] : f32 from vector<1x1x1xf32>
    %cst_34 = arith.constant 1.369000e+03 : f32
    %118 = arith.divf %117, %cst_34 : f32
    %119 = vector.broadcast %118 : f32 to vector<37x37xf32>
    %120 = arith.subf %113, %119 : vector<37x37xf32>
    %121 = vector.broadcast %118 : f32 to vector<37x37xf32>
    %122 = arith.subf %113, %121 : vector<37x37xf32>
    %123 = arith.mulf %120, %122 : vector<37x37xf32>
    %124 = vector.shape_cast %123 : vector<37x37xf32> to vector<1x37x37xf32>
    %cst_35 = arith.constant dense<0.000000e+00> : vector<1xf32>
    %125 = vector.multi_reduction <add>, %124, %cst_35 [1, 2] : vector<1x37x37xf32> to vector<1xf32>
    %126 = vector.shape_cast %125 : vector<1xf32> to vector<1x1x1xf32>
    %127 = vector.extract %126[0, 0, 0] : f32 from vector<1x1x1xf32>
    %cst_36 = arith.constant 1.369000e+03 : f32
    %128 = arith.divf %127, %cst_36 : f32
    %129 = vector.broadcast %118 : f32 to vector<37x37xf32>
    %130 = arith.subf %113, %129 : vector<37x37xf32>
    %cst_37 = arith.constant 9.99999974E-6 : f32
    %131 = arith.addf %128, %cst_37 : f32
    %132 = math.rsqrt %131 : f32
    %133 = vector.broadcast %132 : f32 to vector<37x37xf32>
    %134 = arith.mulf %130, %133 : vector<37x37xf32>
    %cst_38 = arith.constant 0.000000e+00 : f32
    %135 = vector.broadcast %cst_38 : f32 to vector<37x37xf32>
    %136 = arith.maximumf %134, %135 : vector<37x37xf32>
    %c0_39 = arith.constant 0 : index
    %c3 = arith.constant 3 : index
    %137 = vector.load %arg8[%c0_39, %c3] : memref<1x8xf32, #tpu.memory_space<vmem>>, vector<1x1xf32>
    %138 = vector.extract %137[0, 0] : f32 from vector<1x1xf32>
    %139 = vector.broadcast %138 : f32 to vector<37x37xf32>
    %140 = arith.addf %45, %139 : vector<37x37xf32>
    %cst_40 = arith.constant 0.000000e+00 : f32
    %141 = vector.broadcast %cst_40 : f32 to vector<37x37xf32>
    %142 = arith.maximumf %140, %141 : vector<37x37xf32>
    %143 = vector.shape_cast %142 : vector<37x37xf32> to vector<1x37x37xf32>
    %cst_41 = arith.constant dense<0.000000e+00> : vector<1xf32>
    %144 = vector.multi_reduction <add>, %143, %cst_41 [1, 2] : vector<1x37x37xf32> to vector<1xf32>
    %145 = vector.shape_cast %144 : vector<1xf32> to vector<1x1x1xf32>
    %146 = vector.extract %145[0, 0, 0] : f32 from vector<1x1x1xf32>
    %cst_42 = arith.constant 1.369000e+03 : f32
    %147 = arith.divf %146, %cst_42 : f32
    %148 = vector.broadcast %147 : f32 to vector<37x37xf32>
    %149 = arith.subf %142, %148 : vector<37x37xf32>
    %150 = vector.broadcast %147 : f32 to vector<37x37xf32>
    %151 = arith.subf %142, %150 : vector<37x37xf32>
    %152 = arith.mulf %149, %151 : vector<37x37xf32>
    %153 = vector.shape_cast %152 : vector<37x37xf32> to vector<1x37x37xf32>
    %cst_43 = arith.constant dense<0.000000e+00> : vector<1xf32>
    %154 = vector.multi_reduction <add>, %153, %cst_43 [1, 2] : vector<1x37x37xf32> to vector<1xf32>
    %155 = vector.shape_cast %154 : vector<1xf32> to vector<1x1x1xf32>
    %156 = vector.extract %155[0, 0, 0] : f32 from vector<1x1x1xf32>
    %cst_44 = arith.constant 1.369000e+03 : f32
    %157 = arith.divf %156, %cst_44 : f32
    %158 = vector.broadcast %147 : f32 to vector<37x37xf32>
    %159 = arith.subf %142, %158 : vector<37x37xf32>
    %cst_45 = arith.constant 9.99999974E-6 : f32
    %160 = arith.addf %157, %cst_45 : f32
    %161 = math.rsqrt %160 : f32
    %162 = vector.broadcast %161 : f32 to vector<37x37xf32>
    %163 = arith.mulf %159, %162 : vector<37x37xf32>
    %cst_46 = arith.constant 0.000000e+00 : f32
    %164 = vector.broadcast %cst_46 : f32 to vector<37x37xf32>
    %165 = arith.maximumf %163, %164 : vector<37x37xf32>
    %c0_47 = arith.constant 0 : index
    %c4 = arith.constant 4 : index
    %166 = vector.load %arg8[%c0_47, %c4] : memref<1x8xf32, #tpu.memory_space<vmem>>, vector<1x1xf32>
    %167 = vector.extract %166[0, 0] : f32 from vector<1x1xf32>
    %168 = vector.broadcast %167 : f32 to vector<37x37xf32>
    %169 = arith.addf %46, %168 : vector<37x37xf32>
    %cst_48 = arith.constant 0.000000e+00 : f32
    %170 = vector.broadcast %cst_48 : f32 to vector<37x37xf32>
    %171 = arith.maximumf %169, %170 : vector<37x37xf32>
    %172 = vector.shape_cast %171 : vector<37x37xf32> to vector<1x37x37xf32>
    %cst_49 = arith.constant dense<0.000000e+00> : vector<1xf32>
    %173 = vector.multi_reduction <add>, %172, %cst_49 [1, 2] : vector<1x37x37xf32> to vector<1xf32>
    %174 = vector.shape_cast %173 : vector<1xf32> to vector<1x1x1xf32>
    %175 = vector.extract %174[0, 0, 0] : f32 from vector<1x1x1xf32>
    %cst_50 = arith.constant 1.369000e+03 : f32
    %176 = arith.divf %175, %cst_50 : f32
    %177 = vector.broadcast %176 : f32 to vector<37x37xf32>
    %178 = arith.subf %171, %177 : vector<37x37xf32>
    %179 = vector.broadcast %176 : f32 to vector<37x37xf32>
    %180 = arith.subf %171, %179 : vector<37x37xf32>
    %181 = arith.mulf %178, %180 : vector<37x37xf32>
    %182 = vector.shape_cast %181 : vector<37x37xf32> to vector<1x37x37xf32>
    %cst_51 = arith.constant dense<0.000000e+00> : vector<1xf32>
    %183 = vector.multi_reduction <add>, %182, %cst_51 [1, 2] : vector<1x37x37xf32> to vector<1xf32>
    %184 = vector.shape_cast %183 : vector<1xf32> to vector<1x1x1xf32>
    %185 = vector.extract %184[0, 0, 0] : f32 from vector<1x1x1xf32>
    %cst_52 = arith.constant 1.369000e+03 : f32
    %186 = arith.divf %185, %cst_52 : f32
    %187 = vector.broadcast %176 : f32 to vector<37x37xf32>
    %188 = arith.subf %171, %187 : vector<37x37xf32>
    %cst_53 = arith.constant 9.99999974E-6 : f32
    %189 = arith.addf %186, %cst_53 : f32
    %190 = math.rsqrt %189 : f32
    %191 = vector.broadcast %190 : f32 to vector<37x37xf32>
    %192 = arith.mulf %188, %191 : vector<37x37xf32>
    %cst_54 = arith.constant 0.000000e+00 : f32
    %193 = vector.broadcast %cst_54 : f32 to vector<37x37xf32>
    %194 = arith.maximumf %192, %193 : vector<37x37xf32>
    %c0_55 = arith.constant 0 : index
    %c5 = arith.constant 5 : index
    %195 = vector.load %arg8[%c0_55, %c5] : memref<1x8xf32, #tpu.memory_space<vmem>>, vector<1x1xf32>
    %196 = vector.extract %195[0, 0] : f32 from vector<1x1xf32>
    %197 = vector.broadcast %196 : f32 to vector<37x37xf32>
    %198 = arith.addf %47, %197 : vector<37x37xf32>
    %cst_56 = arith.constant 0.000000e+00 : f32
    %199 = vector.broadcast %cst_56 : f32 to vector<37x37xf32>
    %200 = arith.maximumf %198, %199 : vector<37x37xf32>
    %201 = vector.shape_cast %200 : vector<37x37xf32> to vector<1x37x37xf32>
    %cst_57 = arith.constant dense<0.000000e+00> : vector<1xf32>
    %202 = vector.multi_reduction <add>, %201, %cst_57 [1, 2] : vector<1x37x37xf32> to vector<1xf32>
    %203 = vector.shape_cast %202 : vector<1xf32> to vector<1x1x1xf32>
    %204 = vector.extract %203[0, 0, 0] : f32 from vector<1x1x1xf32>
    %cst_58 = arith.constant 1.369000e+03 : f32
    %205 = arith.divf %204, %cst_58 : f32
    %206 = vector.broadcast %205 : f32 to vector<37x37xf32>
    %207 = arith.subf %200, %206 : vector<37x37xf32>
    %208 = vector.broadcast %205 : f32 to vector<37x37xf32>
    %209 = arith.subf %200, %208 : vector<37x37xf32>
    %210 = arith.mulf %207, %209 : vector<37x37xf32>
    %211 = vector.shape_cast %210 : vector<37x37xf32> to vector<1x37x37xf32>
    %cst_59 = arith.constant dense<0.000000e+00> : vector<1xf32>
    %212 = vector.multi_reduction <add>, %211, %cst_59 [1, 2] : vector<1x37x37xf32> to vector<1xf32>
    %213 = vector.shape_cast %212 : vector<1xf32> to vector<1x1x1xf32>
    %214 = vector.extract %213[0, 0, 0] : f32 from vector<1x1x1xf32>
    %cst_60 = arith.constant 1.369000e+03 : f32
    %215 = arith.divf %214, %cst_60 : f32
    %216 = vector.broadcast %205 : f32 to vector<37x37xf32>
    %217 = arith.subf %200, %216 : vector<37x37xf32>
    %cst_61 = arith.constant 9.99999974E-6 : f32
    %218 = arith.addf %215, %cst_61 : f32
    %219 = math.rsqrt %218 : f32
    %220 = vector.broadcast %219 : f32 to vector<37x37xf32>
    %221 = arith.mulf %217, %220 : vector<37x37xf32>
    %cst_62 = arith.constant 0.000000e+00 : f32
    %222 = vector.broadcast %cst_62 : f32 to vector<37x37xf32>
    %223 = arith.maximumf %221, %222 : vector<37x37xf32>
    %c0_63 = arith.constant 0 : index
    %c6 = arith.constant 6 : index
    %224 = vector.load %arg8[%c0_63, %c6] : memref<1x8xf32, #tpu.memory_space<vmem>>, vector<1x1xf32>
    %225 = vector.extract %224[0, 0] : f32 from vector<1x1xf32>
    %226 = vector.broadcast %225 : f32 to vector<37x37xf32>
    %227 = arith.addf %48, %226 : vector<37x37xf32>
    %cst_64 = arith.constant 0.000000e+00 : f32
    %228 = vector.broadcast %cst_64 : f32 to vector<37x37xf32>
    %229 = arith.maximumf %227, %228 : vector<37x37xf32>
    %230 = vector.shape_cast %229 : vector<37x37xf32> to vector<1x37x37xf32>
    %cst_65 = arith.constant dense<0.000000e+00> : vector<1xf32>
    %231 = vector.multi_reduction <add>, %230, %cst_65 [1, 2] : vector<1x37x37xf32> to vector<1xf32>
    %232 = vector.shape_cast %231 : vector<1xf32> to vector<1x1x1xf32>
    %233 = vector.extract %232[0, 0, 0] : f32 from vector<1x1x1xf32>
    %cst_66 = arith.constant 1.369000e+03 : f32
    %234 = arith.divf %233, %cst_66 : f32
    %235 = vector.broadcast %234 : f32 to vector<37x37xf32>
    %236 = arith.subf %229, %235 : vector<37x37xf32>
    %237 = vector.broadcast %234 : f32 to vector<37x37xf32>
    %238 = arith.subf %229, %237 : vector<37x37xf32>
    %239 = arith.mulf %236, %238 : vector<37x37xf32>
    %240 = vector.shape_cast %239 : vector<37x37xf32> to vector<1x37x37xf32>
    %cst_67 = arith.constant dense<0.000000e+00> : vector<1xf32>
    %241 = vector.multi_reduction <add>, %240, %cst_67 [1, 2] : vector<1x37x37xf32> to vector<1xf32>
    %242 = vector.shape_cast %241 : vector<1xf32> to vector<1x1x1xf32>
    %243 = vector.extract %242[0, 0, 0] : f32 from vector<1x1x1xf32>
    %cst_68 = arith.constant 1.369000e+03 : f32
    %244 = arith.divf %243, %cst_68 : f32
    %245 = vector.broadcast %234 : f32 to vector<37x37xf32>
    %246 = arith.subf %229, %245 : vector<37x37xf32>
    %cst_69 = arith.constant 9.99999974E-6 : f32
    %247 = arith.addf %244, %cst_69 : f32
    %248 = math.rsqrt %247 : f32
    %249 = vector.broadcast %248 : f32 to vector<37x37xf32>
    %250 = arith.mulf %246, %249 : vector<37x37xf32>
    %cst_70 = arith.constant 0.000000e+00 : f32
    %251 = vector.broadcast %cst_70 : f32 to vector<37x37xf32>
    %252 = arith.maximumf %250, %251 : vector<37x37xf32>
    %c0_71 = arith.constant 0 : index
    %c7 = arith.constant 7 : index
    %253 = vector.load %arg8[%c0_71, %c7] : memref<1x8xf32, #tpu.memory_space<vmem>>, vector<1x1xf32>
    %254 = vector.extract %253[0, 0] : f32 from vector<1x1xf32>
    %255 = vector.broadcast %254 : f32 to vector<37x37xf32>
    %256 = arith.addf %49, %255 : vector<37x37xf32>
    %cst_72 = arith.constant 0.000000e+00 : f32
    %257 = vector.broadcast %cst_72 : f32 to vector<37x37xf32>
    %258 = arith.maximumf %256, %257 : vector<37x37xf32>
    %259 = vector.shape_cast %258 : vector<37x37xf32> to vector<1x37x37xf32>
    %cst_73 = arith.constant dense<0.000000e+00> : vector<1xf32>
    %260 = vector.multi_reduction <add>, %259, %cst_73 [1, 2] : vector<1x37x37xf32> to vector<1xf32>
    %261 = vector.shape_cast %260 : vector<1xf32> to vector<1x1x1xf32>
    %262 = vector.extract %261[0, 0, 0] : f32 from vector<1x1x1xf32>
    %cst_74 = arith.constant 1.369000e+03 : f32
    %263 = arith.divf %262, %cst_74 : f32
    %264 = vector.broadcast %263 : f32 to vector<37x37xf32>
    %265 = arith.subf %258, %264 : vector<37x37xf32>
    %266 = vector.broadcast %263 : f32 to vector<37x37xf32>
    %267 = arith.subf %258, %266 : vector<37x37xf32>
    %268 = arith.mulf %265, %267 : vector<37x37xf32>
    %269 = vector.shape_cast %268 : vector<37x37xf32> to vector<1x37x37xf32>
    %cst_75 = arith.constant dense<0.000000e+00> : vector<1xf32>
    %270 = vector.multi_reduction <add>, %269, %cst_75 [1, 2] : vector<1x37x37xf32> to vector<1xf32>
    %271 = vector.shape_cast %270 : vector<1xf32> to vector<1x1x1xf32>
    %272 = vector.extract %271[0, 0, 0] : f32 from vector<1x1x1xf32>
    %cst_76 = arith.constant 1.369000e+03 : f32
    %273 = arith.divf %272, %cst_76 : f32
    %274 = vector.broadcast %263 : f32 to vector<37x37xf32>
    %275 = arith.subf %258, %274 : vector<37x37xf32>
    %cst_77 = arith.constant 9.99999974E-6 : f32
    %276 = arith.addf %273, %cst_77 : f32
    %277 = math.rsqrt %276 : f32
    %278 = vector.broadcast %277 : f32 to vector<37x37xf32>
    %279 = arith.mulf %275, %278 : vector<37x37xf32>
    %cst_78 = arith.constant 0.000000e+00 : f32
    %280 = vector.broadcast %cst_78 : f32 to vector<37x37xf32>
    %281 = arith.maximumf %279, %280 : vector<37x37xf32>
    %c0_79 = arith.constant 0 : index
    %c0_80 = arith.constant 0 : index
    %282 = vector.load %arg10[%c0_79, %c0_80] : memref<1x4xf32, #tpu.memory_space<vmem>>, vector<1x1xf32>
    %283 = vector.extract %282[0, 0] : f32 from vector<1x1xf32>
    %c0_81 = arith.constant 0 : index
    %c0_82 = arith.constant 0 : index
    %c0_83 = arith.constant 0 : index
    %c0_84 = arith.constant 0 : index
    %284 = vector.load %arg9[%c0_81, %c0_82, %c0_83, %c0_84] : memref<4x8x37x37xf32, #tpu.memory_space<vmem>>, vector<1x1x37x37xf32>
    %285 = vector.shape_cast %284 : vector<1x1x37x37xf32> to vector<37x37xf32>
    %286 = arith.mulf %78, %285 : vector<37x37xf32>
    %287 = vector.shape_cast %286 : vector<37x37xf32> to vector<1x37x37xf32>
    %cst_85 = arith.constant dense<0.000000e+00> : vector<1xf32>
    %288 = vector.multi_reduction <add>, %287, %cst_85 [1, 2] : vector<1x37x37xf32> to vector<1xf32>
    %289 = vector.shape_cast %288 : vector<1xf32> to vector<1x1x1xf32>
    %290 = vector.extract %289[0, 0, 0] : f32 from vector<1x1x1xf32>
    %291 = arith.addf %283, %290 : f32
    %c0_86 = arith.constant 0 : index
    %c1_87 = arith.constant 1 : index
    %c0_88 = arith.constant 0 : index
    %c0_89 = arith.constant 0 : index
    %292 = vector.load %arg9[%c0_86, %c1_87, %c0_88, %c0_89] : memref<4x8x37x37xf32, #tpu.memory_space<vmem>>, vector<1x1x37x37xf32>
    %293 = vector.shape_cast %292 : vector<1x1x37x37xf32> to vector<37x37xf32>
    %294 = arith.mulf %107, %293 : vector<37x37xf32>
    %295 = vector.shape_cast %294 : vector<37x37xf32> to vector<1x37x37xf32>
    %cst_90 = arith.constant dense<0.000000e+00> : vector<1xf32>
    %296 = vector.multi_reduction <add>, %295, %cst_90 [1, 2] : vector<1x37x37xf32> to vector<1xf32>
    %297 = vector.shape_cast %296 : vector<1xf32> to vector<1x1x1xf32>
    %298 = vector.extract %297[0, 0, 0] : f32 from vector<1x1x1xf32>
    %299 = arith.addf %291, %298 : f32
    %c0_91 = arith.constant 0 : index
    %c2_92 = arith.constant 2 : index
    %c0_93 = arith.constant 0 : index
    %c0_94 = arith.constant 0 : index
    %300 = vector.load %arg9[%c0_91, %c2_92, %c0_93, %c0_94] : memref<4x8x37x37xf32, #tpu.memory_space<vmem>>, vector<1x1x37x37xf32>
    %301 = vector.shape_cast %300 : vector<1x1x37x37xf32> to vector<37x37xf32>
    %302 = arith.mulf %136, %301 : vector<37x37xf32>
    %303 = vector.shape_cast %302 : vector<37x37xf32> to vector<1x37x37xf32>
    %cst_95 = arith.constant dense<0.000000e+00> : vector<1xf32>
    %304 = vector.multi_reduction <add>, %303, %cst_95 [1, 2] : vector<1x37x37xf32> to vector<1xf32>
    %305 = vector.shape_cast %304 : vector<1xf32> to vector<1x1x1xf32>
    %306 = vector.extract %305[0, 0, 0] : f32 from vector<1x1x1xf32>
    %307 = arith.addf %299, %306 : f32
    %c0_96 = arith.constant 0 : index
    %c3_97 = arith.constant 3 : index
    %c0_98 = arith.constant 0 : index
    %c0_99 = arith.constant 0 : index
    %308 = vector.load %arg9[%c0_96, %c3_97, %c0_98, %c0_99] : memref<4x8x37x37xf32, #tpu.memory_space<vmem>>, vector<1x1x37x37xf32>
    %309 = vector.shape_cast %308 : vector<1x1x37x37xf32> to vector<37x37xf32>
    %310 = arith.mulf %165, %309 : vector<37x37xf32>
    %311 = vector.shape_cast %310 : vector<37x37xf32> to vector<1x37x37xf32>
    %cst_100 = arith.constant dense<0.000000e+00> : vector<1xf32>
    %312 = vector.multi_reduction <add>, %311, %cst_100 [1, 2] : vector<1x37x37xf32> to vector<1xf32>
    %313 = vector.shape_cast %312 : vector<1xf32> to vector<1x1x1xf32>
    %314 = vector.extract %313[0, 0, 0] : f32 from vector<1x1x1xf32>
    %315 = arith.addf %307, %314 : f32
    %c0_101 = arith.constant 0 : index
    %c4_102 = arith.constant 4 : index
    %c0_103 = arith.constant 0 : index
    %c0_104 = arith.constant 0 : index
    %316 = vector.load %arg9[%c0_101, %c4_102, %c0_103, %c0_104] : memref<4x8x37x37xf32, #tpu.memory_space<vmem>>, vector<1x1x37x37xf32>
    %317 = vector.shape_cast %316 : vector<1x1x37x37xf32> to vector<37x37xf32>
    %318 = arith.mulf %194, %317 : vector<37x37xf32>
    %319 = vector.shape_cast %318 : vector<37x37xf32> to vector<1x37x37xf32>
    %cst_105 = arith.constant dense<0.000000e+00> : vector<1xf32>
    %320 = vector.multi_reduction <add>, %319, %cst_105 [1, 2] : vector<1x37x37xf32> to vector<1xf32>
    %321 = vector.shape_cast %320 : vector<1xf32> to vector<1x1x1xf32>
    %322 = vector.extract %321[0, 0, 0] : f32 from vector<1x1x1xf32>
    %323 = arith.addf %315, %322 : f32
    %c0_106 = arith.constant 0 : index
    %c5_107 = arith.constant 5 : index
    %c0_108 = arith.constant 0 : index
    %c0_109 = arith.constant 0 : index
    %324 = vector.load %arg9[%c0_106, %c5_107, %c0_108, %c0_109] : memref<4x8x37x37xf32, #tpu.memory_space<vmem>>, vector<1x1x37x37xf32>
    %325 = vector.shape_cast %324 : vector<1x1x37x37xf32> to vector<37x37xf32>
    %326 = arith.mulf %223, %325 : vector<37x37xf32>
    %327 = vector.shape_cast %326 : vector<37x37xf32> to vector<1x37x37xf32>
    %cst_110 = arith.constant dense<0.000000e+00> : vector<1xf32>
    %328 = vector.multi_reduction <add>, %327, %cst_110 [1, 2] : vector<1x37x37xf32> to vector<1xf32>
    %329 = vector.shape_cast %328 : vector<1xf32> to vector<1x1x1xf32>
    %330 = vector.extract %329[0, 0, 0] : f32 from vector<1x1x1xf32>
    %331 = arith.addf %323, %330 : f32
    %c0_111 = arith.constant 0 : index
    %c6_112 = arith.constant 6 : index
    %c0_113 = arith.constant 0 : index
    %c0_114 = arith.constant 0 : index
    %332 = vector.load %arg9[%c0_111, %c6_112, %c0_113, %c0_114] : memref<4x8x37x37xf32, #tpu.memory_space<vmem>>, vector<1x1x37x37xf32>
    %333 = vector.shape_cast %332 : vector<1x1x37x37xf32> to vector<37x37xf32>
    %334 = arith.mulf %252, %333 : vector<37x37xf32>
    %335 = vector.shape_cast %334 : vector<37x37xf32> to vector<1x37x37xf32>
    %cst_115 = arith.constant dense<0.000000e+00> : vector<1xf32>
    %336 = vector.multi_reduction <add>, %335, %cst_115 [1, 2] : vector<1x37x37xf32> to vector<1xf32>
    %337 = vector.shape_cast %336 : vector<1xf32> to vector<1x1x1xf32>
    %338 = vector.extract %337[0, 0, 0] : f32 from vector<1x1x1xf32>
    %339 = arith.addf %331, %338 : f32
    %c0_116 = arith.constant 0 : index
    %c7_117 = arith.constant 7 : index
    %c0_118 = arith.constant 0 : index
    %c0_119 = arith.constant 0 : index
    %340 = vector.load %arg9[%c0_116, %c7_117, %c0_118, %c0_119] : memref<4x8x37x37xf32, #tpu.memory_space<vmem>>, vector<1x1x37x37xf32>
    %341 = vector.shape_cast %340 : vector<1x1x37x37xf32> to vector<37x37xf32>
    %342 = arith.mulf %281, %341 : vector<37x37xf32>
    %343 = vector.shape_cast %342 : vector<37x37xf32> to vector<1x37x37xf32>
    %cst_120 = arith.constant dense<0.000000e+00> : vector<1xf32>
    %344 = vector.multi_reduction <add>, %343, %cst_120 [1, 2] : vector<1x37x37xf32> to vector<1xf32>
    %345 = vector.shape_cast %344 : vector<1xf32> to vector<1x1x1xf32>
    %346 = vector.extract %345[0, 0, 0] : f32 from vector<1x1x1xf32>
    %347 = arith.addf %339, %346 : f32
    %cst_121 = arith.constant 0.000000e+00 : f32
    %348 = arith.maximumf %347, %cst_121 : f32
    %349 = vector.broadcast %348 : f32 to vector<1x128xf32>
    %c0_122 = arith.constant 0 : index
    %c0_123 = arith.constant 0 : index
    %350 = vector.load %arg11[%c0_122, %c0_123] : memref<8x128xf32, #tpu.memory_space<vmem>>, vector<1x128xf32>
    tpu.vector_store %arg11[%c0_122, %c0_123], %349 {strides = array<i32>} : memref<8x128xf32, #tpu.memory_space<vmem>>, vector<1x128xf32>,
    %c0_124 = arith.constant 0 : index
    %c1_125 = arith.constant 1 : index
    %351 = vector.load %arg10[%c0_124, %c1_125] : memref<1x4xf32, #tpu.memory_space<vmem>>, vector<1x1xf32>
    %352 = vector.extract %351[0, 0] : f32 from vector<1x1xf32>
    %c1_126 = arith.constant 1 : index
    %c0_127 = arith.constant 0 : index
    %c0_128 = arith.constant 0 : index
    %c0_129 = arith.constant 0 : index
    %353 = vector.load %arg9[%c1_126, %c0_127, %c0_128, %c0_129] : memref<4x8x37x37xf32, #tpu.memory_space<vmem>>, vector<1x1x37x37xf32>
    %354 = vector.shape_cast %353 : vector<1x1x37x37xf32> to vector<37x37xf32>
    %355 = arith.mulf %78, %354 : vector<37x37xf32>
    %356 = vector.shape_cast %355 : vector<37x37xf32> to vector<1x37x37xf32>
    %cst_130 = arith.constant dense<0.000000e+00> : vector<1xf32>
    %357 = vector.multi_reduction <add>, %356, %cst_130 [1, 2] : vector<1x37x37xf32> to vector<1xf32>
    %358 = vector.shape_cast %357 : vector<1xf32> to vector<1x1x1xf32>
    %359 = vector.extract %358[0, 0, 0] : f32 from vector<1x1x1xf32>
    %360 = arith.addf %352, %359 : f32
    %c1_131 = arith.constant 1 : index
    %c1_132 = arith.constant 1 : index
    %c0_133 = arith.constant 0 : index
    %c0_134 = arith.constant 0 : index
    %361 = vector.load %arg9[%c1_131, %c1_132, %c0_133, %c0_134] : memref<4x8x37x37xf32, #tpu.memory_space<vmem>>, vector<1x1x37x37xf32>
    %362 = vector.shape_cast %361 : vector<1x1x37x37xf32> to vector<37x37xf32>
    %363 = arith.mulf %107, %362 : vector<37x37xf32>
    %364 = vector.shape_cast %363 : vector<37x37xf32> to vector<1x37x37xf32>
    %cst_135 = arith.constant dense<0.000000e+00> : vector<1xf32>
    %365 = vector.multi_reduction <add>, %364, %cst_135 [1, 2] : vector<1x37x37xf32> to vector<1xf32>
    %366 = vector.shape_cast %365 : vector<1xf32> to vector<1x1x1xf32>
    %367 = vector.extract %366[0, 0, 0] : f32 from vector<1x1x1xf32>
    %368 = arith.addf %360, %367 : f32
    %c1_136 = arith.constant 1 : index
    %c2_137 = arith.constant 2 : index
    %c0_138 = arith.constant 0 : index
    %c0_139 = arith.constant 0 : index
    %369 = vector.load %arg9[%c1_136, %c2_137, %c0_138, %c0_139] : memref<4x8x37x37xf32, #tpu.memory_space<vmem>>, vector<1x1x37x37xf32>
    %370 = vector.shape_cast %369 : vector<1x1x37x37xf32> to vector<37x37xf32>
    %371 = arith.mulf %136, %370 : vector<37x37xf32>
    %372 = vector.shape_cast %371 : vector<37x37xf32> to vector<1x37x37xf32>
    %cst_140 = arith.constant dense<0.000000e+00> : vector<1xf32>
    %373 = vector.multi_reduction <add>, %372, %cst_140 [1, 2] : vector<1x37x37xf32> to vector<1xf32>
    %374 = vector.shape_cast %373 : vector<1xf32> to vector<1x1x1xf32>
    %375 = vector.extract %374[0, 0, 0] : f32 from vector<1x1x1xf32>
    %376 = arith.addf %368, %375 : f32
    %c1_141 = arith.constant 1 : index
    %c3_142 = arith.constant 3 : index
    %c0_143 = arith.constant 0 : index
    %c0_144 = arith.constant 0 : index
    %377 = vector.load %arg9[%c1_141, %c3_142, %c0_143, %c0_144] : memref<4x8x37x37xf32, #tpu.memory_space<vmem>>, vector<1x1x37x37xf32>
    %378 = vector.shape_cast %377 : vector<1x1x37x37xf32> to vector<37x37xf32>
    %379 = arith.mulf %165, %378 : vector<37x37xf32>
    %380 = vector.shape_cast %379 : vector<37x37xf32> to vector<1x37x37xf32>
    %cst_145 = arith.constant dense<0.000000e+00> : vector<1xf32>
    %381 = vector.multi_reduction <add>, %380, %cst_145 [1, 2] : vector<1x37x37xf32> to vector<1xf32>
    %382 = vector.shape_cast %381 : vector<1xf32> to vector<1x1x1xf32>
    %383 = vector.extract %382[0, 0, 0] : f32 from vector<1x1x1xf32>
    %384 = arith.addf %376, %383 : f32
    %c1_146 = arith.constant 1 : index
    %c4_147 = arith.constant 4 : index
    %c0_148 = arith.constant 0 : index
    %c0_149 = arith.constant 0 : index
    %385 = vector.load %arg9[%c1_146, %c4_147, %c0_148, %c0_149] : memref<4x8x37x37xf32, #tpu.memory_space<vmem>>, vector<1x1x37x37xf32>
    %386 = vector.shape_cast %385 : vector<1x1x37x37xf32> to vector<37x37xf32>
    %387 = arith.mulf %194, %386 : vector<37x37xf32>
    %388 = vector.shape_cast %387 : vector<37x37xf32> to vector<1x37x37xf32>
    %cst_150 = arith.constant dense<0.000000e+00> : vector<1xf32>
    %389 = vector.multi_reduction <add>, %388, %cst_150 [1, 2] : vector<1x37x37xf32> to vector<1xf32>
    %390 = vector.shape_cast %389 : vector<1xf32> to vector<1x1x1xf32>
    %391 = vector.extract %390[0, 0, 0] : f32 from vector<1x1x1xf32>
    %392 = arith.addf %384, %391 : f32
    %c1_151 = arith.constant 1 : index
    %c5_152 = arith.constant 5 : index
    %c0_153 = arith.constant 0 : index
    %c0_154 = arith.constant 0 : index
    %393 = vector.load %arg9[%c1_151, %c5_152, %c0_153, %c0_154] : memref<4x8x37x37xf32, #tpu.memory_space<vmem>>, vector<1x1x37x37xf32>
    %394 = vector.shape_cast %393 : vector<1x1x37x37xf32> to vector<37x37xf32>
    %395 = arith.mulf %223, %394 : vector<37x37xf32>
    %396 = vector.shape_cast %395 : vector<37x37xf32> to vector<1x37x37xf32>
    %cst_155 = arith.constant dense<0.000000e+00> : vector<1xf32>
    %397 = vector.multi_reduction <add>, %396, %cst_155 [1, 2] : vector<1x37x37xf32> to vector<1xf32>
    %398 = vector.shape_cast %397 : vector<1xf32> to vector<1x1x1xf32>
    %399 = vector.extract %398[0, 0, 0] : f32 from vector<1x1x1xf32>
    %400 = arith.addf %392, %399 : f32
    %c1_156 = arith.constant 1 : index
    %c6_157 = arith.constant 6 : index
    %c0_158 = arith.constant 0 : index
    %c0_159 = arith.constant 0 : index
    %401 = vector.load %arg9[%c1_156, %c6_157, %c0_158, %c0_159] : memref<4x8x37x37xf32, #tpu.memory_space<vmem>>, vector<1x1x37x37xf32>
    %402 = vector.shape_cast %401 : vector<1x1x37x37xf32> to vector<37x37xf32>
    %403 = arith.mulf %252, %402 : vector<37x37xf32>
    %404 = vector.shape_cast %403 : vector<37x37xf32> to vector<1x37x37xf32>
    %cst_160 = arith.constant dense<0.000000e+00> : vector<1xf32>
    %405 = vector.multi_reduction <add>, %404, %cst_160 [1, 2] : vector<1x37x37xf32> to vector<1xf32>
    %406 = vector.shape_cast %405 : vector<1xf32> to vector<1x1x1xf32>
    %407 = vector.extract %406[0, 0, 0] : f32 from vector<1x1x1xf32>
    %408 = arith.addf %400, %407 : f32
    %c1_161 = arith.constant 1 : index
    %c7_162 = arith.constant 7 : index
    %c0_163 = arith.constant 0 : index
    %c0_164 = arith.constant 0 : index
    %409 = vector.load %arg9[%c1_161, %c7_162, %c0_163, %c0_164] : memref<4x8x37x37xf32, #tpu.memory_space<vmem>>, vector<1x1x37x37xf32>
    %410 = vector.shape_cast %409 : vector<1x1x37x37xf32> to vector<37x37xf32>
    %411 = arith.mulf %281, %410 : vector<37x37xf32>
    %412 = vector.shape_cast %411 : vector<37x37xf32> to vector<1x37x37xf32>
    %cst_165 = arith.constant dense<0.000000e+00> : vector<1xf32>
    %413 = vector.multi_reduction <add>, %412, %cst_165 [1, 2] : vector<1x37x37xf32> to vector<1xf32>
    %414 = vector.shape_cast %413 : vector<1xf32> to vector<1x1x1xf32>
    %415 = vector.extract %414[0, 0, 0] : f32 from vector<1x1x1xf32>
    %416 = arith.addf %408, %415 : f32
    %cst_166 = arith.constant 0.000000e+00 : f32
    %417 = arith.maximumf %416, %cst_166 : f32
    %418 = vector.broadcast %417 : f32 to vector<1x128xf32>
    %c1_167 = arith.constant 1 : index
    %c0_168 = arith.constant 0 : index
    %419 = vector.load %arg11[%c1_167, %c0_168] : memref<8x128xf32, #tpu.memory_space<vmem>>, vector<1x128xf32>
    tpu.vector_store %arg11[%c1_167, %c0_168], %418 {strides = array<i32>} : memref<8x128xf32, #tpu.memory_space<vmem>>, vector<1x128xf32>,
    %c0_169 = arith.constant 0 : index
    %c2_170 = arith.constant 2 : index
    %420 = vector.load %arg10[%c0_169, %c2_170] : memref<1x4xf32, #tpu.memory_space<vmem>>, vector<1x1xf32>
    %421 = vector.extract %420[0, 0] : f32 from vector<1x1xf32>
    %c2_171 = arith.constant 2 : index
    %c0_172 = arith.constant 0 : index
    %c0_173 = arith.constant 0 : index
    %c0_174 = arith.constant 0 : index
    %422 = vector.load %arg9[%c2_171, %c0_172, %c0_173, %c0_174] : memref<4x8x37x37xf32, #tpu.memory_space<vmem>>, vector<1x1x37x37xf32>
    %423 = vector.shape_cast %422 : vector<1x1x37x37xf32> to vector<37x37xf32>
    %424 = arith.mulf %78, %423 : vector<37x37xf32>
    %425 = vector.shape_cast %424 : vector<37x37xf32> to vector<1x37x37xf32>
    %cst_175 = arith.constant dense<0.000000e+00> : vector<1xf32>
    %426 = vector.multi_reduction <add>, %425, %cst_175 [1, 2] : vector<1x37x37xf32> to vector<1xf32>
    %427 = vector.shape_cast %426 : vector<1xf32> to vector<1x1x1xf32>
    %428 = vector.extract %427[0, 0, 0] : f32 from vector<1x1x1xf32>
    %429 = arith.addf %421, %428 : f32
    %c2_176 = arith.constant 2 : index
    %c1_177 = arith.constant 1 : index
    %c0_178 = arith.constant 0 : index
    %c0_179 = arith.constant 0 : index
    %430 = vector.load %arg9[%c2_176, %c1_177, %c0_178, %c0_179] : memref<4x8x37x37xf32, #tpu.memory_space<vmem>>, vector<1x1x37x37xf32>
    %431 = vector.shape_cast %430 : vector<1x1x37x37xf32> to vector<37x37xf32>
    %432 = arith.mulf %107, %431 : vector<37x37xf32>
    %433 = vector.shape_cast %432 : vector<37x37xf32> to vector<1x37x37xf32>
    %cst_180 = arith.constant dense<0.000000e+00> : vector<1xf32>
    %434 = vector.multi_reduction <add>, %433, %cst_180 [1, 2] : vector<1x37x37xf32> to vector<1xf32>
    %435 = vector.shape_cast %434 : vector<1xf32> to vector<1x1x1xf32>
    %436 = vector.extract %435[0, 0, 0] : f32 from vector<1x1x1xf32>
    %437 = arith.addf %429, %436 : f32
    %c2_181 = arith.constant 2 : index
    %c2_182 = arith.constant 2 : index
    %c0_183 = arith.constant 0 : index
    %c0_184 = arith.constant 0 : index
    %438 = vector.load %arg9[%c2_181, %c2_182, %c0_183, %c0_184] : memref<4x8x37x37xf32, #tpu.memory_space<vmem>>, vector<1x1x37x37xf32>
    %439 = vector.shape_cast %438 : vector<1x1x37x37xf32> to vector<37x37xf32>
    %440 = arith.mulf %136, %439 : vector<37x37xf32>
    %441 = vector.shape_cast %440 : vector<37x37xf32> to vector<1x37x37xf32>
    %cst_185 = arith.constant dense<0.000000e+00> : vector<1xf32>
    %442 = vector.multi_reduction <add>, %441, %cst_185 [1, 2] : vector<1x37x37xf32> to vector<1xf32>
    %443 = vector.shape_cast %442 : vector<1xf32> to vector<1x1x1xf32>
    %444 = vector.extract %443[0, 0, 0] : f32 from vector<1x1x1xf32>
    %445 = arith.addf %437, %444 : f32
    %c2_186 = arith.constant 2 : index
    %c3_187 = arith.constant 3 : index
    %c0_188 = arith.constant 0 : index
    %c0_189 = arith.constant 0 : index
    %446 = vector.load %arg9[%c2_186, %c3_187, %c0_188, %c0_189] : memref<4x8x37x37xf32, #tpu.memory_space<vmem>>, vector<1x1x37x37xf32>
    %447 = vector.shape_cast %446 : vector<1x1x37x37xf32> to vector<37x37xf32>
    %448 = arith.mulf %165, %447 : vector<37x37xf32>
    %449 = vector.shape_cast %448 : vector<37x37xf32> to vector<1x37x37xf32>
    %cst_190 = arith.constant dense<0.000000e+00> : vector<1xf32>
    %450 = vector.multi_reduction <add>, %449, %cst_190 [1, 2] : vector<1x37x37xf32> to vector<1xf32>
    %451 = vector.shape_cast %450 : vector<1xf32> to vector<1x1x1xf32>
    %452 = vector.extract %451[0, 0, 0] : f32 from vector<1x1x1xf32>
    %453 = arith.addf %445, %452 : f32
    %c2_191 = arith.constant 2 : index
    %c4_192 = arith.constant 4 : index
    %c0_193 = arith.constant 0 : index
    %c0_194 = arith.constant 0 : index
    %454 = vector.load %arg9[%c2_191, %c4_192, %c0_193, %c0_194] : memref<4x8x37x37xf32, #tpu.memory_space<vmem>>, vector<1x1x37x37xf32>
    %455 = vector.shape_cast %454 : vector<1x1x37x37xf32> to vector<37x37xf32>
    %456 = arith.mulf %194, %455 : vector<37x37xf32>
    %457 = vector.shape_cast %456 : vector<37x37xf32> to vector<1x37x37xf32>
    %cst_195 = arith.constant dense<0.000000e+00> : vector<1xf32>
    %458 = vector.multi_reduction <add>, %457, %cst_195 [1, 2] : vector<1x37x37xf32> to vector<1xf32>
    %459 = vector.shape_cast %458 : vector<1xf32> to vector<1x1x1xf32>
    %460 = vector.extract %459[0, 0, 0] : f32 from vector<1x1x1xf32>
    %461 = arith.addf %453, %460 : f32
    %c2_196 = arith.constant 2 : index
    %c5_197 = arith.constant 5 : index
    %c0_198 = arith.constant 0 : index
    %c0_199 = arith.constant 0 : index
    %462 = vector.load %arg9[%c2_196, %c5_197, %c0_198, %c0_199] : memref<4x8x37x37xf32, #tpu.memory_space<vmem>>, vector<1x1x37x37xf32>
    %463 = vector.shape_cast %462 : vector<1x1x37x37xf32> to vector<37x37xf32>
    %464 = arith.mulf %223, %463 : vector<37x37xf32>
    %465 = vector.shape_cast %464 : vector<37x37xf32> to vector<1x37x37xf32>
    %cst_200 = arith.constant dense<0.000000e+00> : vector<1xf32>
    %466 = vector.multi_reduction <add>, %465, %cst_200 [1, 2] : vector<1x37x37xf32> to vector<1xf32>
    %467 = vector.shape_cast %466 : vector<1xf32> to vector<1x1x1xf32>
    %468 = vector.extract %467[0, 0, 0] : f32 from vector<1x1x1xf32>
    %469 = arith.addf %461, %468 : f32
    %c2_201 = arith.constant 2 : index
    %c6_202 = arith.constant 6 : index
    %c0_203 = arith.constant 0 : index
    %c0_204 = arith.constant 0 : index
    %470 = vector.load %arg9[%c2_201, %c6_202, %c0_203, %c0_204] : memref<4x8x37x37xf32, #tpu.memory_space<vmem>>, vector<1x1x37x37xf32>
    %471 = vector.shape_cast %470 : vector<1x1x37x37xf32> to vector<37x37xf32>
    %472 = arith.mulf %252, %471 : vector<37x37xf32>
    %473 = vector.shape_cast %472 : vector<37x37xf32> to vector<1x37x37xf32>
    %cst_205 = arith.constant dense<0.000000e+00> : vector<1xf32>
    %474 = vector.multi_reduction <add>, %473, %cst_205 [1, 2] : vector<1x37x37xf32> to vector<1xf32>
    %475 = vector.shape_cast %474 : vector<1xf32> to vector<1x1x1xf32>
    %476 = vector.extract %475[0, 0, 0] : f32 from vector<1x1x1xf32>
    %477 = arith.addf %469, %476 : f32
    %c2_206 = arith.constant 2 : index
    %c7_207 = arith.constant 7 : index
    %c0_208 = arith.constant 0 : index
    %c0_209 = arith.constant 0 : index
    %478 = vector.load %arg9[%c2_206, %c7_207, %c0_208, %c0_209] : memref<4x8x37x37xf32, #tpu.memory_space<vmem>>, vector<1x1x37x37xf32>
    %479 = vector.shape_cast %478 : vector<1x1x37x37xf32> to vector<37x37xf32>
    %480 = arith.mulf %281, %479 : vector<37x37xf32>
    %481 = vector.shape_cast %480 : vector<37x37xf32> to vector<1x37x37xf32>
    %cst_210 = arith.constant dense<0.000000e+00> : vector<1xf32>
    %482 = vector.multi_reduction <add>, %481, %cst_210 [1, 2] : vector<1x37x37xf32> to vector<1xf32>
    %483 = vector.shape_cast %482 : vector<1xf32> to vector<1x1x1xf32>
    %484 = vector.extract %483[0, 0, 0] : f32 from vector<1x1x1xf32>
    %485 = arith.addf %477, %484 : f32
    %cst_211 = arith.constant 0.000000e+00 : f32
    %486 = arith.maximumf %485, %cst_211 : f32
    %487 = vector.broadcast %486 : f32 to vector<1x128xf32>
    %c2_212 = arith.constant 2 : index
    %c0_213 = arith.constant 0 : index
    %488 = vector.load %arg11[%c2_212, %c0_213] : memref<8x128xf32, #tpu.memory_space<vmem>>, vector<1x128xf32>
    tpu.vector_store %arg11[%c2_212, %c0_213], %487 {strides = array<i32>} : memref<8x128xf32, #tpu.memory_space<vmem>>, vector<1x128xf32>,
    %c0_214 = arith.constant 0 : index
    %c3_215 = arith.constant 3 : index
    %489 = vector.load %arg10[%c0_214, %c3_215] : memref<1x4xf32, #tpu.memory_space<vmem>>, vector<1x1xf32>
    %490 = vector.extract %489[0, 0] : f32 from vector<1x1xf32>
    %c3_216 = arith.constant 3 : index
    %c0_217 = arith.constant 0 : index
    %c0_218 = arith.constant 0 : index
    %c0_219 = arith.constant 0 : index
    %491 = vector.load %arg9[%c3_216, %c0_217, %c0_218, %c0_219] : memref<4x8x37x37xf32, #tpu.memory_space<vmem>>, vector<1x1x37x37xf32>
    %492 = vector.shape_cast %491 : vector<1x1x37x37xf32> to vector<37x37xf32>
    %493 = arith.mulf %78, %492 : vector<37x37xf32>
    %494 = vector.shape_cast %493 : vector<37x37xf32> to vector<1x37x37xf32>
    %cst_220 = arith.constant dense<0.000000e+00> : vector<1xf32>
    %495 = vector.multi_reduction <add>, %494, %cst_220 [1, 2] : vector<1x37x37xf32> to vector<1xf32>
    %496 = vector.shape_cast %495 : vector<1xf32> to vector<1x1x1xf32>
    %497 = vector.extract %496[0, 0, 0] : f32 from vector<1x1x1xf32>
    %498 = arith.addf %490, %497 : f32
    %c3_221 = arith.constant 3 : index
    %c1_222 = arith.constant 1 : index
    %c0_223 = arith.constant 0 : index
    %c0_224 = arith.constant 0 : index
    %499 = vector.load %arg9[%c3_221, %c1_222, %c0_223, %c0_224] : memref<4x8x37x37xf32, #tpu.memory_space<vmem>>, vector<1x1x37x37xf32>
    %500 = vector.shape_cast %499 : vector<1x1x37x37xf32> to vector<37x37xf32>
    %501 = arith.mulf %107, %500 : vector<37x37xf32>
    %502 = vector.shape_cast %501 : vector<37x37xf32> to vector<1x37x37xf32>
    %cst_225 = arith.constant dense<0.000000e+00> : vector<1xf32>
    %503 = vector.multi_reduction <add>, %502, %cst_225 [1, 2] : vector<1x37x37xf32> to vector<1xf32>
    %504 = vector.shape_cast %503 : vector<1xf32> to vector<1x1x1xf32>
    %505 = vector.extract %504[0, 0, 0] : f32 from vector<1x1x1xf32>
    %506 = arith.addf %498, %505 : f32
    %c3_226 = arith.constant 3 : index
    %c2_227 = arith.constant 2 : index
    %c0_228 = arith.constant 0 : index
    %c0_229 = arith.constant 0 : index
    %507 = vector.load %arg9[%c3_226, %c2_227, %c0_228, %c0_229] : memref<4x8x37x37xf32, #tpu.memory_space<vmem>>, vector<1x1x37x37xf32>
    %508 = vector.shape_cast %507 : vector<1x1x37x37xf32> to vector<37x37xf32>
    %509 = arith.mulf %136, %508 : vector<37x37xf32>
    %510 = vector.shape_cast %509 : vector<37x37xf32> to vector<1x37x37xf32>
    %cst_230 = arith.constant dense<0.000000e+00> : vector<1xf32>
    %511 = vector.multi_reduction <add>, %510, %cst_230 [1, 2] : vector<1x37x37xf32> to vector<1xf32>
    %512 = vector.shape_cast %511 : vector<1xf32> to vector<1x1x1xf32>
    %513 = vector.extract %512[0, 0, 0] : f32 from vector<1x1x1xf32>
    %514 = arith.addf %506, %513 : f32
    %c3_231 = arith.constant 3 : index
    %c3_232 = arith.constant 3 : index
    %c0_233 = arith.constant 0 : index
    %c0_234 = arith.constant 0 : index
    %515 = vector.load %arg9[%c3_231, %c3_232, %c0_233, %c0_234] : memref<4x8x37x37xf32, #tpu.memory_space<vmem>>, vector<1x1x37x37xf32>
    %516 = vector.shape_cast %515 : vector<1x1x37x37xf32> to vector<37x37xf32>
    %517 = arith.mulf %165, %516 : vector<37x37xf32>
    %518 = vector.shape_cast %517 : vector<37x37xf32> to vector<1x37x37xf32>
    %cst_235 = arith.constant dense<0.000000e+00> : vector<1xf32>
    %519 = vector.multi_reduction <add>, %518, %cst_235 [1, 2] : vector<1x37x37xf32> to vector<1xf32>
    %520 = vector.shape_cast %519 : vector<1xf32> to vector<1x1x1xf32>
    %521 = vector.extract %520[0, 0, 0] : f32 from vector<1x1x1xf32>
    %522 = arith.addf %514, %521 : f32
    %c3_236 = arith.constant 3 : index
    %c4_237 = arith.constant 4 : index
    %c0_238 = arith.constant 0 : index
    %c0_239 = arith.constant 0 : index
    %523 = vector.load %arg9[%c3_236, %c4_237, %c0_238, %c0_239] : memref<4x8x37x37xf32, #tpu.memory_space<vmem>>, vector<1x1x37x37xf32>
    %524 = vector.shape_cast %523 : vector<1x1x37x37xf32> to vector<37x37xf32>
    %525 = arith.mulf %194, %524 : vector<37x37xf32>
    %526 = vector.shape_cast %525 : vector<37x37xf32> to vector<1x37x37xf32>
    %cst_240 = arith.constant dense<0.000000e+00> : vector<1xf32>
    %527 = vector.multi_reduction <add>, %526, %cst_240 [1, 2] : vector<1x37x37xf32> to vector<1xf32>
    %528 = vector.shape_cast %527 : vector<1xf32> to vector<1x1x1xf32>
    %529 = vector.extract %528[0, 0, 0] : f32 from vector<1x1x1xf32>
    %530 = arith.addf %522, %529 : f32
    %c3_241 = arith.constant 3 : index
    %c5_242 = arith.constant 5 : index
    %c0_243 = arith.constant 0 : index
    %c0_244 = arith.constant 0 : index
    %531 = vector.load %arg9[%c3_241, %c5_242, %c0_243, %c0_244] : memref<4x8x37x37xf32, #tpu.memory_space<vmem>>, vector<1x1x37x37xf32>
    %532 = vector.shape_cast %531 : vector<1x1x37x37xf32> to vector<37x37xf32>
    %533 = arith.mulf %223, %532 : vector<37x37xf32>
    %534 = vector.shape_cast %533 : vector<37x37xf32> to vector<1x37x37xf32>
    %cst_245 = arith.constant dense<0.000000e+00> : vector<1xf32>
    %535 = vector.multi_reduction <add>, %534, %cst_245 [1, 2] : vector<1x37x37xf32> to vector<1xf32>
    %536 = vector.shape_cast %535 : vector<1xf32> to vector<1x1x1xf32>
    %537 = vector.extract %536[0, 0, 0] : f32 from vector<1x1x1xf32>
    %538 = arith.addf %530, %537 : f32
    %c3_246 = arith.constant 3 : index
    %c6_247 = arith.constant 6 : index
    %c0_248 = arith.constant 0 : index
    %c0_249 = arith.constant 0 : index
    %539 = vector.load %arg9[%c3_246, %c6_247, %c0_248, %c0_249] : memref<4x8x37x37xf32, #tpu.memory_space<vmem>>, vector<1x1x37x37xf32>
    %540 = vector.shape_cast %539 : vector<1x1x37x37xf32> to vector<37x37xf32>
    %541 = arith.mulf %252, %540 : vector<37x37xf32>
    %542 = vector.shape_cast %541 : vector<37x37xf32> to vector<1x37x37xf32>
    %cst_250 = arith.constant dense<0.000000e+00> : vector<1xf32>
    %543 = vector.multi_reduction <add>, %542, %cst_250 [1, 2] : vector<1x37x37xf32> to vector<1xf32>
    %544 = vector.shape_cast %543 : vector<1xf32> to vector<1x1x1xf32>
    %545 = vector.extract %544[0, 0, 0] : f32 from vector<1x1x1xf32>
    %546 = arith.addf %538, %545 : f32
    %c3_251 = arith.constant 3 : index
    %c7_252 = arith.constant 7 : index
    %c0_253 = arith.constant 0 : index
    %c0_254 = arith.constant 0 : index
    %547 = vector.load %arg9[%c3_251, %c7_252, %c0_253, %c0_254] : memref<4x8x37x37xf32, #tpu.memory_space<vmem>>, vector<1x1x37x37xf32>
    %548 = vector.shape_cast %547 : vector<1x1x37x37xf32> to vector<37x37xf32>
    %549 = arith.mulf %281, %548 : vector<37x37xf32>
    %550 = vector.shape_cast %549 : vector<37x37xf32> to vector<1x37x37xf32>
    %cst_255 = arith.constant dense<0.000000e+00> : vector<1xf32>
    %551 = vector.multi_reduction <add>, %550, %cst_255 [1, 2] : vector<1x37x37xf32> to vector<1xf32>
    %552 = vector.shape_cast %551 : vector<1xf32> to vector<1x1x1xf32>
    %553 = vector.extract %552[0, 0, 0] : f32 from vector<1x1x1xf32>
    %554 = arith.addf %546, %553 : f32
    %cst_256 = arith.constant 0.000000e+00 : f32
    %555 = arith.maximumf %554, %cst_256 : f32
    %556 = vector.broadcast %555 : f32 to vector<1x128xf32>
    %c3_257 = arith.constant 3 : index
    %c0_258 = arith.constant 0 : index
    %557 = vector.load %arg11[%c3_257, %c0_258] : memref<8x128xf32, #tpu.memory_space<vmem>>, vector<1x128xf32>
    tpu.vector_store %arg11[%c3_257, %c0_258], %556 {strides = array<i32>} : memref<8x128xf32, #tpu.memory_space<vmem>>, vector<1x128xf32>,
    %cst_259 = arith.constant 0.000000e+00 : f32
    %558 = vector.broadcast %cst_259 : f32 to vector<1x128xf32>
    %c4_260 = arith.constant 4 : index
    %c0_261 = arith.constant 0 : index
    %559 = vector.load %arg11[%c4_260, %c0_261] : memref<8x128xf32, #tpu.memory_space<vmem>>, vector<1x128xf32>
    tpu.vector_store %arg11[%c4_260, %c0_261], %558 {strides = array<i32>} : memref<8x128xf32, #tpu.memory_space<vmem>>, vector<1x128xf32>,
    %cst_262 = arith.constant 0.000000e+00 : f32
    %560 = vector.broadcast %cst_262 : f32 to vector<1x128xf32>
    %c5_263 = arith.constant 5 : index
    %c0_264 = arith.constant 0 : index
    %561 = vector.load %arg11[%c5_263, %c0_264] : memref<8x128xf32, #tpu.memory_space<vmem>>, vector<1x128xf32>
    tpu.vector_store %arg11[%c5_263, %c0_264], %560 {strides = array<i32>} : memref<8x128xf32, #tpu.memory_space<vmem>>, vector<1x128xf32>,
    %cst_265 = arith.constant 0.000000e+00 : f32
    %562 = vector.broadcast %cst_265 : f32 to vector<1x128xf32>
    %c6_266 = arith.constant 6 : index
    %c0_267 = arith.constant 0 : index
    %563 = vector.load %arg11[%c6_266, %c0_267] : memref<8x128xf32, #tpu.memory_space<vmem>>, vector<1x128xf32>
    tpu.vector_store %arg11[%c6_266, %c0_267], %562 {strides = array<i32>} : memref<8x128xf32, #tpu.memory_space<vmem>>, vector<1x128xf32>,
    %cst_268 = arith.constant 0.000000e+00 : f32
    %564 = vector.broadcast %cst_268 : f32 to vector<1x128xf32>
    %c7_269 = arith.constant 7 : index
    %c0_270 = arith.constant 0 : index
    %565 = vector.load %arg11[%c7_269, %c0_270] : memref<8x128xf32, #tpu.memory_space<vmem>>, vector<1x128xf32>
    tpu.vector_store %arg11[%c7_269, %c0_270], %564 {strides = array<i32>} : memref<8x128xf32, #tpu.memory_space<vmem>>, vector<1x128xf32>,
    return
  }
}

</mosaic_0001>

<bundles_post_ra>
// kernel: net_forward.10
= control target key start
LH: loop header
LB: loop body
LE: loop exit
PB: predicated region body
PF: predicated region fallthrough
CT: control target
= control target key end

     0   :  { %s1823_s9 = smov 0   ;;  %s2754_s0 = inlined_call_operand.vmem [shape: bf16[32,48,44,128], index: 0, kind: input, shape index: {}]   ;;  %s2755_s1 = inlined_call_operand.vmem [shape: f32[32,48,128], index: 1, kind: input, shape index: {}]   ;;  %s2756_s2 = inlined_call_operand.vmem [shape: f32[44,44], index: 2, kind: output, shape index: {}]  }
   0x1 LB: > { %s1530_s10 = sadd.s32 4294967295, %s1746_s9   ;;  %p1533_p0 = scmp.ge.s32.totalorder %s1746_s9, 1  ;;  %s1746_s9 = sphi %s1823_s9, %s12_s9  }
   0x2   : > { %p117_p1 = scmp.lt.s32.totalorder %s1746_s9, 33 }
   0x4   : > { %p118_p2 = pnand %p1533_p0, %p117_p1 }
   0x5   : > { %p139_p3 = scmp.lt.s32.totalorder (!%p118_p2), %s1530_s10, 31  ;;  %p1536_p4 = scmp.ne.s32.totalorder (!%p118_p2), %s1530_s10, 0 }
   0x6   : > { %121 = sbr.rel (%p118_p2) target bundleno = 1671 (0x687), region = 28 }
   0xd   : > { %s140_s11 = scalar_select %p139_p3, %s1530_s10, 31 }
   0xe   : > { %152 = sbr.rel (%p1536_p4) target bundleno = 21 (0x15), region = 32  ;;  %vm153_vm0 = vcmask (!%p1536_p4), 359424   ;;  %vm159_vm1 = vcmask (!%p1536_p4), 355328   ;;  %v1776_v0 = vmov (!%p1536_p4), 0.0  }
   0xf   : > { %s1550_s12 = smul.u32 1152, %s140_s11  ;;  %154 = vst.msk [vmem:[%s2756_s2] sm:$0xff] (!%p1536_p4), %vm153_vm0, %v1776_v0  ;;  %155 = vst.msk [vmem:[%s2756_s2 + $0x8] sm:$0xff] (!%p1536_p4), %vm153_vm0, %v1776_v0 }
  0x10   : > { %s1551_s13 = smul.u32 48, %s140_s11  ;;  %156 = vst.msk [vmem:[%s2756_s2 + $0x10] sm:$0xff] (!%p1536_p4), %vm153_vm0, %v1776_v0  ;;  %157 = vst.msk [vmem:[%s2756_s2 + $0x18] sm:$0xff] (!%p1536_p4), %vm153_vm0, %v1776_v0 }
  0x11   : > { %s1834_s16 = scalar_lea.vmem %s2754_s0, %s1550_s12  ;;  %158 = vst.msk [vmem:[%s2756_s2 + $0x20] sm:$0xff] (!%p1536_p4), %vm153_vm0, %v1776_v0 }
  0x12   : > { %s1839_s19 = scalar_lea.vmem %s2755_s1, %s1551_s13  ;;  %160 = vst.msk [vmem:[%s2756_s2 + $0x28] sm:$0xf] (!%p1536_p4), %vm159_vm1, %v1776_v0 }
  0x15 PF: > { %v1859_v1 = vmov 0.0   ;;  %v1861_v2 = vmov 0.0   ;;  %v1863_v3 = vmov 0.0   ;;  %v1865_v4 = vmov 0.0   ;;  %s1871_s4 = smov 0  }
  0x16   : > { %v1867_v5 = vmov 0.0   ;;  %v1869_v6 = vmov 0.0  }
  0x17 LB: >> { %2765 = vst [vmem:[#allocation2_spill] sm:$0xff] %v1750_v1  ;;  %2766 = vst [vmem:[#allocation3_spill] sm:$0xff] %v1754_v2  ;;  %s188_s5 = scalar_lea.vmem %s1839_s19, %s1774_s4  ;;  %s1777_s6 = smov 127   ;;  %s1774_s4 = sphi %s1871_s4, %s166_s4   ;;  %v1770_v6 = vphi %v1869_v6, %v2894_v6   ;;  %v1766_v5 = vphi %v1867_v5, %v2893_v5   ;;  %v1762_v4 = vphi %v1865_v4, %v2892_v4   ;;  %v1758_v3 = vphi %v1863_v3, %v2891_v3   ;;  %v1754_v2 = vphi %v1861_v2, %v2890_v2   ;;  %v1750_v1 = vphi %v1859_v1, %v2889_v1  }
  0x18   : >> { %v1896_v7 = vld [vmem:[%s188_s5] sm:$0x1]  ;;  %s1778_s7 = smov 126   ;;  %s1779_s8 = smov 125  }
  0x19   : >> { %204 = vrot.lane.b32.xlu0 %v1896_v7, %s1777_s6  ;;  %244 = vrot.lane.b32.xlu1 %v1896_v7, %s1778_s7  ;;  %1552 = vpush %v1896_v7  ;;  %s1780_s10 = smov 124   ;;  %s1781_s11 = smov 123  }
  0x1a   : >> { %s1782_s12 = smov 122   ;;  %s1783_s13 = smov 121  }
  0x1b   : >> { %s1784_s14 = smov 120   ;;  %s1785_s15 = smov 119  }
  0x1c   : >> { %s1786_s17 = smov 118   ;;  %s1787_s18 = smov 117  }
  0x1d   : >> { %284 = vrot.lane.b32.xlu0 %v1896_v7, %s1779_s8  ;;  %324 = vrot.lane.b32.xlu1 %v1896_v7, %s1780_s10  ;;  %s1788_s20 = smov 116   ;;  %s1789_s21 = smov 115  }
  0x1e   : >> { %s1540_s22 = smul.u32 24, %s1774_s4  ;;  %s166_s4 = sadd.s32 1, %s1774_s4  }
  0x1f   : >> { %p163_p5 = scmp.ge.s32.totalorder %s166_s4, 48  }
  0x20   : >> { %s175_s23 = scalar_lea.vmem %s1834_s16, %s1540_s22  ;;  %s1794_s22 = smov 110   ;;  %vm1456_vm2 = vcmask (%p163_p5), 359424   ;;  %vm1462_vm3 = vcmask (%p163_p5), 355328  }
  0x21   : >> { %364 = vrot.lane.b32.xlu0 %v1896_v7, %s1781_s11  ;;  %404 = vrot.lane.b32.xlu1 %v1896_v7, %s1782_s12  ;;  %v1542_v21 = vld [vmem:[%s175_s23] sm:$0xff]   ;;  %v1549_v24 = vld [vmem:[%s175_s23 + $0x8] sm:$0xff]  }
  0x22   : >> { %v1927_v22 = vunpack.c.l.bf16 %v1542_v21  ;;  %v1929_v23 = vunpack.c.h.bf16 %v1542_v21  ;;  %v1933_v26 = vunpack.c.l.bf16 %v1549_v24  ;;  %v1935_v27 = vunpack.c.h.bf16 %v1549_v24  ;;  %v180_v30 = vld [vmem:[%s175_s23 + $0x10] sm:$0xf]  ;;  %v181_v31 = vld [vmem:[%s175_s23 + $0x14] sm:$0x3]  ;;  %s1795_s23 = smov 109  }
  0x23   : >> { %v1941_v32 = vunpack.c.l.bf16 %v180_v30  ;;  %v1943_v33 = vunpack.c.l.bf16 %v181_v31 }
  0x24   : >> { %2767 = vst [vmem:[#allocation4_spill] sm:$0xff] %v1927_v22  ;;  %2768 = vst [vmem:[#allocation5_spill] sm:$0xff] %v1933_v26 }
  0x25   : >> { %444 = vrot.lane.b32.xlu0 %v1896_v7, %s1783_s13  ;;  %484 = vrot.lane.b32.xlu1 %v1896_v7, %s1784_s14  ;;  %2769 = vst [vmem:[#allocation6_spill] sm:$0xff] %v1941_v32  ;;  %2770 = vst [vmem:[#allocation7_spill] sm:$0xff] %v1943_v33 }
  0x29   : >> { %524 = vrot.lane.b32.xlu0 %v1896_v7, %s1785_s15  ;;  %564 = vrot.lane.b32.xlu1 %v1896_v7, %s1786_s17 }
  0x2d   : >> { %604 = vrot.lane.b32.xlu0 %v1896_v7, %s1787_s18  ;;  %644 = vrot.lane.b32.xlu1 %v1896_v7, %s1788_s20 }
  0x31   : >> { %684 = vrot.lane.b32.xlu0 %v1896_v7, %s1789_s21 }
  0x4a   : >> { %s1931_s24 = spop %1552 }
  0x8b   : >> { %v205_v8 = vpop.permute.xlu0 %204  ;;  %v245_v9 = vpop.permute.xlu1 %244 }
  0x8c   : >> { %1554 = vpush %v205_v8 }
  0x8d   : >> { %1556 = vpush %v245_v9 }
  0x8f   : >> { %v285_v10 = vpop.permute.xlu0 %284  ;;  %v325_v11 = vpop.permute.xlu1 %324 }
  0x90   : >> { %1558 = vpush %v285_v10 }
  0x91   : >> { %1560 = vpush %v325_v11 }
  0x93   : >> { %v365_v12 = vpop.permute.xlu0 %364  ;;  %v405_v13 = vpop.permute.xlu1 %404 }
  0x94   : >> { %1562 = vpush %v365_v12 }
  0x95   : >> { %1564 = vpush %v405_v13 }
  0x97   : >> { %v445_v14 = vpop.permute.xlu0 %444  ;;  %v485_v15 = vpop.permute.xlu1 %484 }
  0x98   : >> { %1566 = vpush %v445_v14 }
  0x99   : >> { %1568 = vpush %v485_v15 }
  0x9b   : >> { %v525_v16 = vpop.permute.xlu0 %524  ;;  %v565_v17 = vpop.permute.xlu1 %564 }
  0x9c   : >> { %1570 = vpush %v525_v16 }
  0x9d   : >> { %1572 = vpush %v565_v17 }
  0x9f   : >> { %v605_v18 = vpop.permute.xlu0 %604  ;;  %v645_v19 = vpop.permute.xlu1 %644 }
  0xa0   : >> { %1574 = vpush %v605_v18 }
  0xa1   : >> { %1576 = vpush %v645_v19 }
  0xa3   : >> { %v685_v20 = vpop.permute.xlu0 %684 }
  0xa4   : >> { %1578 = vpush %v685_v20 }
  0xbd   : >> { %s1555_s25 = spop %1554 }
  0xbe   : >> { %v207_v25 = vstv %s1555_s25  ;;  %s1557_s26 = spop %1556  ;;  %s1796_s25 = smov 107  }
  0xbf   : >> { %v209_v28 = vmul.f32 %v1929_v23, %v207_v25  ;;  %v208_v29 = vmul.f32 %v1927_v22, %v207_v25  ;;  %v210_v34 = vmul.f32 %v1933_v26, %v207_v25  ;;  %v211_v35 = vmul.f32 %v1935_v27, %v207_v25 }
  0xc0   : >> { %v247_v36 = vstv %s1557_s26  ;;  %v212_v37 = vmul.f32 %v207_v25, %v1941_v32  ;;  %v213_v38 = vmul.f32 %v207_v25, %v1943_v33  ;;  %s1797_s26 = smov 105  }
  0xc1   : >> { %222 = vrot.lane.b32.xlu1 %v209_v28, %s1777_s6  ;;  %220 = vrot.lane.b32.xlu0 %v208_v29, %s1777_s6  ;;  %v249_v39 = vmul.f32 %v1929_v23, %v247_v36  ;;  %v248_v40 = vmul.f32 %v1927_v22, %v247_v36  ;;  %v251_v41 = vmul.f32 %v1935_v27, %v247_v36  ;;  %s1559_s27 = spop %1558 }
  0xc2   : >> { %v250_v42 = vmul.f32 %v1933_v26, %v247_v36  ;;  %v287_v43 = vstv %s1559_s27  ;;  %v253_v44 = vmul.f32 %v247_v36, %v1943_v33  ;;  %v252_v45 = vmul.f32 %v247_v36, %v1941_v32  ;;  %s1561_s28 = spop %1560  ;;  %s1798_s27 = smov 103  }
  0xc3   : >> { %v288_v46 = vmul.f32 %v1927_v22, %v287_v43  ;;  %v289_v47 = vmul.f32 %v1929_v23, %v287_v43  ;;  %v290_v48 = vmul.f32 %v1933_v26, %v287_v43  ;;  %v291_v49 = vmul.f32 %v1935_v27, %v287_v43 }
  0xc4   : >> { %v327_v50 = vstv %s1561_s28  ;;  %v292_v51 = vmul.f32 %v287_v43, %v1941_v32  ;;  %v293_v52 = vmul.f32 %v287_v43, %v1943_v33  ;;  %s1799_s28 = smov 101  }
  0xc5   : >> { %224 = vrot.lane.b32.xlu1 %v210_v34, %s1777_s6  ;;  %226 = vrot.lane.b32.xlu0 %v211_v35, %s1777_s6  ;;  %v329_v53 = vmul.f32 %v1929_v23, %v327_v50  ;;  %v328_v54 = vmul.f32 %v1927_v22, %v327_v50  ;;  %v331_v55 = vmul.f32 %v1935_v27, %v327_v50  ;;  %s1563_s29 = spop %1562 }
  0xc6   : >> { %v330_v56 = vmul.f32 %v1933_v26, %v327_v50  ;;  %v367_v57 = vstv %s1563_s29  ;;  %v333_v58 = vmul.f32 %v327_v50, %v1943_v33  ;;  %v332_v59 = vmul.f32 %v327_v50, %v1941_v32  ;;  %s1565_s30 = spop %1564  ;;  %s1800_s29 = smov 99  }
  0xc7   : >> { %v368_v60 = vmul.f32 %v1927_v22, %v367_v57  ;;  %v369_v61 = vmul.f32 %v1929_v23, %v367_v57  ;;  %v370_v62 = vmul.f32 %v1933_v26, %v367_v57  ;;  %v371_v63 = vmul.f32 %v1935_v27, %v367_v57 }
  0xc8   : >> { %v407_v0 = vstv %s1565_s30  ;;  %v372_v8 = vmul.f32 %v367_v57, %v1941_v32  ;;  %v373_v9 = vmul.f32 %v367_v57, %v1943_v33  ;;  %s1801_s30 = smov 97  }
  0xc9   : >> { %228 = vrot.lane.b32.xlu1 %v212_v37, %s1777_s6  ;;  %230 = vrot.lane.b32.xlu0 %v213_v38, %s1777_s6  ;;  %v409_v10 = vmul.f32 %v1929_v23, %v407_v0  ;;  %v408_v11 = vmul.f32 %v1927_v22, %v407_v0  ;;  %v411_v12 = vmul.f32 %v1935_v27, %v407_v0  ;;  %s1567_s3 = spop %1566 }
  0xca   : >> { %v410_v13 = vmul.f32 %v1933_v26, %v407_v0  ;;  %v447_v14 = vstv %s1567_s3  ;;  %v413_v15 = vmul.f32 %v407_v0, %v1943_v33  ;;  %v412_v16 = vmul.f32 %v407_v0, %v1941_v32  ;;  %s1569_s5 = spop %1568 }
  0xcb   : >> { %v448_v17 = vmul.f32 %v1927_v22, %v447_v14  ;;  %v449_v18 = vmul.f32 %v1929_v23, %v447_v14  ;;  %v450_v19 = vmul.f32 %v1933_v26, %v447_v14  ;;  %v451_v20 = vmul.f32 %v1935_v27, %v447_v14 }
  0xcc   : >> { %v487_v21 = vstv %s1569_s5  ;;  %v452_v24 = vmul.f32 %v447_v14, %v1941_v32  ;;  %v453_v25 = vmul.f32 %v447_v14, %v1943_v33 }
  0xcd   : >> { %262 = vrot.lane.b32.xlu1 %v249_v39, %s1778_s7  ;;  %260 = vrot.lane.b32.xlu0 %v248_v40, %s1778_s7  ;;  %v489_v28 = vmul.f32 %v1929_v23, %v487_v21  ;;  %v488_v29 = vmul.f32 %v1927_v22, %v487_v21  ;;  %v491_v30 = vmul.f32 %v1935_v27, %v487_v21  ;;  %s1571_s6 = spop %1570 }
  0xce   : >> { %v490_v31 = vmul.f32 %v1933_v26, %v487_v21  ;;  %v527_v34 = vstv %s1571_s6  ;;  %v493_v35 = vmul.f32 %v487_v21, %v1943_v33  ;;  %v492_v36 = vmul.f32 %v487_v21, %v1941_v32  ;;  %s1802_s6 = smov 108  }
  0xcf   : >> { %v528_v37 = vmul.f32 %v1927_v22, %v527_v34  ;;  %v529_v38 = vmul.f32 %v1929_v23, %v527_v34  ;;  %v530_v39 = vmul.f32 %v1933_v26, %v527_v34  ;;  %v531_v40 = vmul.f32 %v1935_v27, %v527_v34 }
  0xd0   : >> { %v533_v43 = vmul.f32 %v527_v34, %v1943_v33 }
  0xd1   : >> { %266 = vrot.lane.b32.xlu1 %v251_v41, %s1778_s7  ;;  %264 = vrot.lane.b32.xlu0 %v250_v42, %s1778_s7  ;;  %v532_v42 = vmul.f32 %v527_v34, %v1941_v32 }
  0xd5   : >> { %270 = vrot.lane.b32.xlu1 %v253_v44, %s1778_s7  ;;  %268 = vrot.lane.b32.xlu0 %v252_v45, %s1778_s7  ;;  %s1573_s7 = spop %1572 }
  0xd6   : >> { %v567_v41 = vstv %s1573_s7  ;;  %s1803_s7 = smov 106  }
  0xd7   : >> { %v569_v44 = vmul.f32 %v1929_v23, %v567_v41  ;;  %v568_v45 = vmul.f32 %v1927_v22, %v567_v41  ;;  %v573_v50 = vmul.f32 %v567_v41, %v1943_v33 }
  0xd9   : >> { %300 = vrot.lane.b32.xlu1 %v288_v46, %s1779_s8  ;;  %302 = vrot.lane.b32.xlu0 %v289_v47, %s1779_s8  ;;  %v571_v46 = vmul.f32 %v1935_v27, %v567_v41  ;;  %v570_v47 = vmul.f32 %v1933_v26, %v567_v41 }
  0xdd   : >> { %304 = vrot.lane.b32.xlu1 %v290_v48, %s1779_s8  ;;  %306 = vrot.lane.b32.xlu0 %v291_v49, %s1779_s8 }
  0xe1   : >> { %308 = vrot.lane.b32.xlu1 %v292_v51, %s1779_s8  ;;  %310 = vrot.lane.b32.xlu0 %v293_v52, %s1779_s8  ;;  %s1575_s8 = spop %1574  ;;  %v572_v51 = vmul.f32 %v567_v41, %v1941_v32 }
  0xe2   : >> { %v607_v48 = vstv %s1575_s8  ;;  %s1804_s8 = smov 104  }
  0xe3   : >> { %v608_v52 = vmul.f32 %v1927_v22, %v607_v48  ;;  %v611_v57 = vmul.f32 %v1935_v27, %v607_v48 }
  0xe5   : >> { %342 = vrot.lane.b32.xlu1 %v329_v53, %s1780_s10  ;;  %340 = vrot.lane.b32.xlu0 %v328_v54, %s1780_s10  ;;  %v609_v53 = vmul.f32 %v1929_v23, %v607_v48 }
  0xe9   : >> { %346 = vrot.lane.b32.xlu1 %v331_v55, %s1780_s10  ;;  %344 = vrot.lane.b32.xlu0 %v330_v56, %s1780_s10  ;;  %v610_v56 = vmul.f32 %v1933_v26, %v607_v48 }
  0xed   : >> { %350 = vrot.lane.b32.xlu1 %v333_v58, %s1780_s10  ;;  %348 = vrot.lane.b32.xlu0 %v332_v59, %s1780_s10  ;;  %s1577_s10 = spop %1576 }
  0xee   : >> { %v647_v58 = vstv %s1577_s10  ;;  %s1805_s10 = smov 102  }
  0xef   : >> { %v652_v14 = vmul.f32 %v647_v58, %v1941_v32 }
  0xf1   : >> { %380 = vrot.lane.b32.xlu1 %v368_v60, %s1781_s11  ;;  %382 = vrot.lane.b32.xlu0 %v369_v61, %s1781_s11  ;;  %v612_v60 = vmul.f32 %v607_v48, %v1941_v32  ;;  %v613_v61 = vmul.f32 %v607_v48, %v1943_v33 }
  0xf5   : >> { %384 = vrot.lane.b32.xlu1 %v370_v62, %s1781_s11  ;;  %386 = vrot.lane.b32.xlu0 %v371_v63, %s1781_s11  ;;  %v649_v62 = vmul.f32 %v1929_v23, %v647_v58  ;;  %v648_v63 = vmul.f32 %v1927_v22, %v647_v58 }
  0xf9   : >> { %388 = vrot.lane.b32.xlu1 %v372_v8, %s1781_s11  ;;  %390 = vrot.lane.b32.xlu0 %v373_v9, %s1781_s11  ;;  %v651_v9 = vmul.f32 %v1935_v27, %v647_v58  ;;  %s1579_s11 = spop %1578 }
  0xfd   : >> { %422 = vrot.lane.b32.xlu1 %v409_v10, %s1782_s12  ;;  %420 = vrot.lane.b32.xlu0 %v408_v11, %s1782_s12  ;;  %v650_v10 = vmul.f32 %v1933_v26, %v647_v58  ;;  %v687_v11 = vstv %s1579_s11  ;;  %s1806_s11 = smov 100  }
 0x101   : >> { %426 = vrot.lane.b32.xlu1 %v411_v12, %s1782_s12  ;;  %424 = vrot.lane.b32.xlu0 %v410_v13, %s1782_s12  ;;  %v653_v13 = vmul.f32 %v647_v58, %v1943_v33 }
 0x105   : >> { %430 = vrot.lane.b32.xlu1 %v413_v15, %s1782_s12  ;;  %428 = vrot.lane.b32.xlu0 %v412_v16, %s1782_s12  ;;  %v688_v15 = vmul.f32 %v1927_v22, %v687_v11  ;;  %v689_v16 = vmul.f32 %v1929_v23, %v687_v11  ;;  %s1790_s12 = smov 114  }
 0x109   : >> { %460 = vrot.lane.b32.xlu1 %v448_v17, %s1783_s13  ;;  %462 = vrot.lane.b32.xlu0 %v449_v18, %s1783_s13 }
 0x10d   : >> { %464 = vrot.lane.b32.xlu1 %v450_v19, %s1783_s13  ;;  %466 = vrot.lane.b32.xlu0 %v451_v20, %s1783_s13  ;;  %v690_v19 = vmul.f32 %v1933_v26, %v687_v11  ;;  %v691_v20 = vmul.f32 %v1935_v27, %v687_v11 }
 0x111   : >> { %468 = vrot.lane.b32.xlu1 %v452_v24, %s1783_s13  ;;  %470 = vrot.lane.b32.xlu0 %v453_v25, %s1783_s13  ;;  %v692_v24 = vmul.f32 %v687_v11, %v1941_v32  ;;  %v693_v25 = vmul.f32 %v687_v11, %v1943_v33 }
 0x115   : >> { %502 = vrot.lane.b32.xlu1 %v489_v28, %s1784_s14  ;;  %500 = vrot.lane.b32.xlu0 %v488_v29, %s1784_s14 }
 0x119   : >> { %506 = vrot.lane.b32.xlu1 %v491_v30, %s1784_s14  ;;  %504 = vrot.lane.b32.xlu0 %v490_v31, %s1784_s14 }
 0x11d   : >> { %510 = vrot.lane.b32.xlu1 %v493_v35, %s1784_s14  ;;  %508 = vrot.lane.b32.xlu0 %v492_v36, %s1784_s14  ;;  %s1791_s14 = smov 113  }
 0x121   : >> { %540 = vrot.lane.b32.xlu1 %v528_v37, %s1785_s15  ;;  %542 = vrot.lane.b32.xlu0 %v529_v38, %s1785_s15 }
 0x125   : >> { %544 = vrot.lane.b32.xlu1 %v530_v39, %s1785_s15  ;;  %546 = vrot.lane.b32.xlu0 %v531_v40, %s1785_s15 }
 0x129   : >> { %548 = vrot.lane.b32.xlu1 %v532_v42, %s1785_s15  ;;  %550 = vrot.lane.b32.xlu0 %v533_v43, %s1785_s15 }
 0x12d   : >> { %582 = vrot.lane.b32.xlu1 %v569_v44, %s1786_s17  ;;  %580 = vrot.lane.b32.xlu0 %v568_v45, %s1786_s17 }
 0x131   : >> { %586 = vrot.lane.b32.xlu1 %v571_v46, %s1786_s17  ;;  %584 = vrot.lane.b32.xlu0 %v570_v47, %s1786_s17 }
 0x133   : >> { %v2057_v49 = vpop.permute.xlu1 %222  ;;  %v2145_v43 = vpop.permute.xlu0 %220 }
 0x135   : >> { %590 = vrot.lane.b32.xlu1 %v573_v50, %s1786_s17  ;;  %588 = vrot.lane.b32.xlu0 %v572_v51, %s1786_s17  ;;  %s1792_s17 = smov 112  }
 0x137   : >> { %v2065_v54 = vpop.permute.xlu1 %224  ;;  %v2151_v46 = vpop.permute.xlu0 %226 }
 0x139   : >> { %620 = vrot.lane.b32.xlu1 %v608_v52, %s1787_s18  ;;  %622 = vrot.lane.b32.xlu0 %v609_v53, %s1787_s18 }
 0x13b   : >> { %v2069_v55 = vpop.permute.xlu1 %228  ;;  %v2155_v48 = vpop.permute.xlu0 %230 }
 0x13c   : >> { %2771 = vst [vmem:[#allocation8_spill] sm:$0xff] %v2069_v55  ;;  %2783 = vst [vmem:[#allocation20_spill] sm:$0xff] %v2155_v48 }
 0x13d   : >> { %624 = vrot.lane.b32.xlu1 %v610_v56, %s1787_s18  ;;  %626 = vrot.lane.b32.xlu0 %v611_v57, %s1787_s18 }
 0x13f   : >> { %v2075_v59 = vpop.permute.xlu1 %262  ;;  %v2161_v52 = vpop.permute.xlu0 %260 }
 0x141   : >> { %628 = vrot.lane.b32.xlu1 %v612_v60, %s1787_s18  ;;  %630 = vrot.lane.b32.xlu0 %v613_v61, %s1787_s18 }
 0x143   : >> { %v2083_v0 = vpop.permute.xlu1 %266  ;;  %v2165_v56 = vpop.permute.xlu0 %264 }
 0x145   : >> { %662 = vrot.lane.b32.xlu1 %v649_v62, %s1788_s20  ;;  %660 = vrot.lane.b32.xlu0 %v648_v63, %s1788_s20 }
 0x147   : >> { %v2087_v8 = vpop.permute.xlu1 %270  ;;  %v2171_v60 = vpop.permute.xlu0 %268 }
 0x148   : >> { %2772 = vst [vmem:[#allocation9_spill] sm:$0xff] %v2087_v8  ;;  %2788 = vst [vmem:[#allocation25_spill] sm:$0xff] %v2171_v60 }
 0x149   : >> { %666 = vrot.lane.b32.xlu1 %v651_v9, %s1788_s20  ;;  %664 = vrot.lane.b32.xlu0 %v650_v10, %s1788_s20 }
 0x14b   : >> { %v2093_v12 = vpop.permute.xlu1 %300  ;;  %v2175_v62 = vpop.permute.xlu0 %302 }
 0x14d   : >> { %670 = vrot.lane.b32.xlu1 %v653_v13, %s1788_s20  ;;  %668 = vrot.lane.b32.xlu0 %v652_v14, %s1788_s20  ;;  %s1793_s20 = smov 111  }
 0x14f   : >> { %v2101_v17 = vpop.permute.xlu1 %304  ;;  %v2181_v10 = vpop.permute.xlu0 %306 }
 0x151   : >> { %700 = vrot.lane.b32.xlu1 %v688_v15, %s1789_s21  ;;  %702 = vrot.lane.b32.xlu0 %v689_v16, %s1789_s21 }
 0x153   : >> { %v2105_v18 = vpop.permute.xlu1 %308  ;;  %v2185_v13 = vpop.permute.xlu0 %310 }
 0x154   : >> { %2773 = vst [vmem:[#allocation10_spill] sm:$0xff] %v2105_v18  ;;  %2792 = vst [vmem:[#allocation29_spill] sm:$0xff] %v2185_v13 }
 0x155   : >> { %704 = vrot.lane.b32.xlu1 %v690_v19, %s1789_s21  ;;  %706 = vrot.lane.b32.xlu0 %v691_v20, %s1789_s21 }
 0x157   : >> { %v2111_v21 = vpop.permute.xlu1 %342  ;;  %v2191_v16 = vpop.permute.xlu0 %340 }
 0x159   : >> { %708 = vrot.lane.b32.xlu1 %v692_v24, %s1789_s21  ;;  %710 = vrot.lane.b32.xlu0 %v693_v25, %s1789_s21 }
 0x15b   : >> { %v2117_v28 = vpop.permute.xlu1 %346  ;;  %v2195_v20 = vpop.permute.xlu0 %344 }
 0x15d   : >> { %724 = vrot.lane.b32.xlu1 %v1896_v7, %s1790_s12 }
 0x15f   : >> { %v2121_v29 = vpop.permute.xlu1 %350 }
 0x160   : >> { %2774 = vst [vmem:[#allocation11_spill] sm:$0xff] %v2121_v29 }
 0x163   : >> { %v2123_v30 = vpop.permute.xlu1 %380 }
 0x167   : >> { %v2125_v31 = vpop.permute.xlu1 %384 }
 0x16b   : >> { %v2127_v34 = vpop.permute.xlu1 %388 }
 0x16c   : >> { %2775 = vst [vmem:[#allocation12_spill] sm:$0xff] %v2127_v34 }
 0x16f   : >> { %v2129_v35 = vpop.permute.xlu1 %422 }
 0x170   : >> { %2776 = vst [vmem:[#allocation13_spill] sm:$0xff] %v2129_v35 }
 0x173   : >> { %v2131_v36 = vpop.permute.xlu1 %426 }
 0x174   : >> { %2777 = vst [vmem:[#allocation14_spill] sm:$0xff] %v2131_v36 }
 0x177   : >> { %v2133_v37 = vpop.permute.xlu1 %430 }
 0x178   : >> { %2778 = vst [vmem:[#allocation15_spill] sm:$0xff] %v2133_v37 }
 0x17b   : >> { %v2135_v38 = vpop.permute.xlu1 %460 }
 0x17f   : >> { %v2137_v39 = vpop.permute.xlu1 %464 }
 0x183   : >> { %v2139_v40 = vpop.permute.xlu1 %468 }
 0x184   : >> { %2779 = vst [vmem:[#allocation16_spill] sm:$0xff] %v2139_v40 }
 0x187   : >> { %v2141_v41 = vpop.permute.xlu1 %502 }
 0x188   : >> { %2780 = vst [vmem:[#allocation17_spill] sm:$0xff] %v2141_v41 }
 0x18b   : >> { %v2143_v42 = vpop.permute.xlu1 %506 }
 0x18c   : >> { %2781 = vst [vmem:[#allocation18_spill] sm:$0xff] %v2143_v42 }
 0x18f   : >> { %v2147_v44 = vpop.permute.xlu1 %510 }
 0x190   : >> { %2782 = vst [vmem:[#allocation19_spill] sm:$0xff] %v2147_v44 }
 0x193   : >> { %v2149_v45 = vpop.permute.xlu1 %540 }
 0x197   : >> { %v2153_v47 = vpop.permute.xlu1 %544 }
 0x19b   : >> { %v2157_v50 = vpop.permute.xlu1 %548 }
 0x19c   : >> { %2784 = vst [vmem:[#allocation21_spill] sm:$0xff] %v2157_v50 }
 0x19f   : >> { %v2159_v51 = vpop.permute.xlu1 %582 }
 0x1a0   : >> { %2785 = vst [vmem:[#allocation22_spill] sm:$0xff] %v2159_v51 }
 0x1a3   : >> { %v2163_v53 = vpop.permute.xlu1 %586 }
 0x1a4   : >> { %2786 = vst [vmem:[#allocation23_spill] sm:$0xff] %v2163_v53 }
 0x1a7   : >> { %v2167_v57 = vpop.permute.xlu1 %590 }
 0x1a8   : >> { %2787 = vst [vmem:[#allocation24_spill] sm:$0xff] %v2167_v57 }
 0x1ab   : >> { %v2169_v58 = vpop.permute.xlu1 %620 }
 0x1af   : >> { %v2173_v61 = vpop.permute.xlu1 %624 }
 0x1b3   : >> { %v2177_v63 = vpop.permute.xlu1 %628 }
 0x1b4   : >> { %2789 = vst [vmem:[#allocation26_spill] sm:$0xff] %v2177_v63  ;;  %v2199_v63 = vpop.permute.xlu0 %348 }
 0x1b5   : >> { %2795 = vst [vmem:[#allocation32_spill] sm:$0xff] %v2199_v63 }
 0x1b7   : >> { %v2179_v9 = vpop.permute.xlu1 %662 }
 0x1b8   : >> { %2790 = vst [vmem:[#allocation27_spill] sm:$0xff] %v2179_v9  ;;  %v2201_v57 = vpop.permute.xlu0 %382 }
 0x1bb   : >> { %v2183_v11 = vpop.permute.xlu1 %666 }
 0x1bc   : >> { %2791 = vst [vmem:[#allocation28_spill] sm:$0xff] %v2183_v11  ;;  %v2203_v50 = vpop.permute.xlu0 %386 }
 0x1bd   : >> { %2796 = vst [vmem:[#allocation33_spill] sm:$0xff] %v2203_v50 }
 0x1bf   : >> { %v2187_v14 = vpop.permute.xlu1 %670 }
 0x1c0   : >> { %2793 = vst [vmem:[#allocation30_spill] sm:$0xff] %v2187_v14  ;;  %v2205_v44 = vpop.permute.xlu0 %390 }
 0x1c1   : >> { %2797 = vst [vmem:[#allocation34_spill] sm:$0xff] %v2205_v44 }
 0x1c3   : >> { %v2189_v15 = vpop.permute.xlu1 %700 }
 0x1c4   : >> { %v2207_v14 = vpop.permute.xlu0 %420 }
 0x1c7   : >> { %v2193_v19 = vpop.permute.xlu1 %704 }
 0x1c8   : >> { %v2209_v40 = vpop.permute.xlu0 %424 }
 0x1cb   : >> { %v2197_v24 = vpop.permute.xlu1 %708 }
 0x1cc   : >> { %2794 = vst [vmem:[#allocation31_spill] sm:$0xff] %v2197_v24  ;;  %v2211_v37 = vpop.permute.xlu0 %428 }
 0x1cd   : >> { %2798 = vst [vmem:[#allocation35_spill] sm:$0xff] %v2211_v37 }
 0x1cf   : >> { %v725_v25 = vpop.permute.xlu1 %724 }
 0x1d0   : >> { %1580 = vpush %v725_v25  ;;  %v2213_v34 = vpop.permute.xlu0 %462 }
 0x1d1   : >> { %2799 = vst [vmem:[#allocation36_spill] sm:$0xff] %v2213_v34 }
 0x1d4   : >> { %v2215_v29 = vpop.permute.xlu0 %466 }
 0x1d5   : >> { %2800 = vst [vmem:[#allocation37_spill] sm:$0xff] %v2215_v29 }
 0x1d8   : >> { %v2221_v44 = vpop.permute.xlu0 %470 }
 0x1d9   : >> { %2801 = vst [vmem:[#allocation38_spill] sm:$0xff] %v2221_v44 }
 0x1dc   : >> { %v2229_v8 = vpop.permute.xlu0 %500 }
 0x201   : >> { %s1581_s13 = spop %1580 }
 0x202   : >> { %v727_v25 = vstv %s1581_s13 }
 0x203   : >> { %v729_v24 = vmul.f32 %v1929_v23, %v727_v25  ;;  %v728_v63 = vmul.f32 %v1927_v22, %v727_v25  ;;  %v731_v13 = vmul.f32 %v1935_v27, %v727_v25  ;;  %v730_v37 = vmul.f32 %v1933_v26, %v727_v25 }
 0x204   : >> { %v733_v18 = vmul.f32 %v727_v25, %v1943_v33  ;;  %v732_v60 = vmul.f32 %v727_v25, %v1941_v32 }
 0x205   : >> { %742 = vrot.lane.b32.xlu1 %v729_v24, %s1790_s12  ;;  %740 = vrot.lane.b32.xlu0 %v728_v63, %s1790_s12  ;;  %v2235_v63 = vpop.permute.xlu0 %504 }
 0x209   : >> { %746 = vrot.lane.b32.xlu1 %v731_v13, %s1790_s12  ;;  %744 = vrot.lane.b32.xlu0 %v730_v37, %s1790_s12  ;;  %v2237_v24 = vpop.permute.xlu0 %508 }
 0x20a   : >> { %2802 = vst [vmem:[#allocation39_spill] sm:$0xff] %v2237_v24 }
 0x20d   : >> { %750 = vrot.lane.b32.xlu1 %v733_v18, %s1790_s12  ;;  %748 = vrot.lane.b32.xlu0 %v732_v60, %s1790_s12  ;;  %v2239_v13 = vpop.permute.xlu0 %542  ;;  %s1807_s12 = smov 98  }
 0x20e   : >> { %2803 = vst [vmem:[#allocation40_spill] sm:$0xff] %v2239_v13 }
 0x211   : >> { %764 = vrot.lane.b32.xlu0 %v1896_v7, %s1791_s14  ;;  %v2241_v37 = vpop.permute.xlu0 %546 }
 0x212   : >> { %2804 = vst [vmem:[#allocation41_spill] sm:$0xff] %v2241_v37 }
 0x215   : >> { %v2243_v44 = vpop.permute.xlu0 %550 }
 0x216   : >> { %2805 = vst [vmem:[#allocation42_spill] sm:$0xff] %v2243_v44 }
 0x219   : >> { %v2245_v25 = vpop.permute.xlu0 %580 }
 0x21d   : >> { %v2247_v48 = vpop.permute.xlu0 %584 }
 0x221   : >> { %v2249_v18 = vpop.permute.xlu0 %588 }
 0x222   : >> { %2806 = vst [vmem:[#allocation43_spill] sm:$0xff] %v2249_v18 }
 0x225   : >> { %v2251_v60 = vpop.permute.xlu0 %622 }
 0x226   : >> { %2807 = vst [vmem:[#allocation44_spill] sm:$0xff] %v2251_v60 }
 0x229   : >> { %v2253_v55 = vpop.permute.xlu0 %626 }
 0x22a   : >> { %2808 = vst [vmem:[#allocation45_spill] sm:$0xff] %v2253_v55 }
 0x22d   : >> { %v2255_v1 = vpop.permute.xlu0 %630 }
 0x22e   : >> { %2809 = vst [vmem:[#allocation46_spill] sm:$0xff] %v2255_v1 }
 0x231   : >> { %v2257_v2 = vpop.permute.xlu0 %660 }
 0x235   : >> { %v2259_v24 = vpop.permute.xlu0 %664 }
 0x239   : >> { %v2261_v11 = vpop.permute.xlu0 %668 }
 0x23a   : >> { %2810 = vst [vmem:[#allocation47_spill] sm:$0xff] %v2261_v11 }
 0x23d   : >> { %v2263_v9 = vpop.permute.xlu0 %702 }
 0x23e   : >> { %2811 = vst [vmem:[#allocation48_spill] sm:$0xff] %v2263_v9 }
 0x241   : >> { %v2265_v44 = vpop.permute.xlu0 %706 }
 0x242   : >> { %2812 = vst [vmem:[#allocation49_spill] sm:$0xff] %v2265_v44 }
 0x245   : >> { %v2267_v53 = vpop.permute.xlu0 %710 }
 0x246   : >> { %2813 = vst [vmem:[#allocation50_spill] sm:$0xff] %v2267_v53 }
 0x277   : >> { %v2269_v37 = vpop.permute.xlu0 %740 }
 0x27b   : >> { %v2271_v18 = vpop.permute.xlu0 %744 }
 0x27f   : >> { %v2273_v60 = vpop.permute.xlu0 %748 }
 0x280   : >> { %2814 = vst [vmem:[#allocation51_spill] sm:$0xff] %v2273_v60 }
 0x283   : >> { %v765_v55 = vpop.permute.xlu0 %764 }
 0x284   : >> { %1582 = vpush %v765_v55 }
 0x2b5   : >> { %s1583_s15 = spop %1582 }
 0x2b6   : >> { %v767_v1 = vstv %s1583_s15 }
 0x2b7   : >> { %v769_v51 = vmul.f32 %v1929_v23, %v767_v1  ;;  %v768_v11 = vmul.f32 %v1927_v22, %v767_v1  ;;  %v771_v53 = vmul.f32 %v1935_v27, %v767_v1  ;;  %v770_v44 = vmul.f32 %v1933_v26, %v767_v1 }
 0x2b8   : >> { %v773_v55 = vmul.f32 %v767_v1, %v1943_v33  ;;  %v772_v60 = vmul.f32 %v767_v1, %v1941_v32 }
 0x2b9   : >> { %782 = vrot.lane.b32.xlu0 %v769_v51, %s1791_s14  ;;  %780 = vrot.lane.b32.xlu1 %v768_v11, %s1791_s14  ;;  %v2288_v51 = vpop.permute.xlu1 %742 }
 0x2ba   : >> { %2815 = vst [vmem:[#allocation52_spill] sm:$0xff] %v2288_v51 }
 0x2bd   : >> { %786 = vrot.lane.b32.xlu0 %v771_v53, %s1791_s14  ;;  %784 = vrot.lane.b32.xlu1 %v770_v44, %s1791_s14  ;;  %v2290_v11 = vpop.permute.xlu1 %746 }
 0x2be   : >> { %2816 = vst [vmem:[#allocation53_spill] sm:$0xff] %v2290_v11 }
 0x2c1   : >> { %790 = vrot.lane.b32.xlu0 %v773_v55, %s1791_s14  ;;  %788 = vrot.lane.b32.xlu1 %v772_v60, %s1791_s14  ;;  %v2292_v9 = vpop.permute.xlu1 %750 }
 0x2c2   : >> { %2817 = vst [vmem:[#allocation54_spill] sm:$0xff] %v2292_v9 }
 0x2c5   : >> { %804 = vrot.lane.b32.xlu1 %v1896_v7, %s1792_s17 }
 0x32b   : >> { %v2294_v53 = vpop.permute.xlu1 %780 }
 0x32f   : >> { %v2296_v44 = vpop.permute.xlu1 %784 }
 0x333   : >> { %v2298_v42 = vpop.permute.xlu1 %788 }
 0x334   : >> { %2818 = vst [vmem:[#allocation55_spill] sm:$0xff] %v2298_v42 }
 0x337   : >> { %v805_v1 = vpop.permute.xlu1 %804 }
 0x338   : >> { %1584 = vpush %v805_v1  ;;  %v2307_v1 = vpop.permute.xlu0 %782 }
 0x339   : >> { %2819 = vst [vmem:[#allocation56_spill] sm:$0xff] %v2307_v1 }
 0x33c   : >> { %v2309_v29 = vpop.permute.xlu0 %786 }
 0x33d   : >> { %2820 = vst [vmem:[#allocation57_spill] sm:$0xff] %v2309_v29 }
 0x369   : >> { %s1585_s18 = spop %1584 }
 0x36a   : >> { %v807_v55 = vstv %s1585_s18 }
 0x36b   : >> { %v809_v60 = vmul.f32 %v1929_v23, %v807_v55  ;;  %v808_v13 = vmul.f32 %v1927_v22, %v807_v55  ;;  %v811_v11 = vmul.f32 %v1935_v27, %v807_v55  ;;  %v810_v9 = vmul.f32 %v1933_v26, %v807_v55 }
 0x36c   : >> { %v813_v51 = vmul.f32 %v807_v55, %v1943_v33  ;;  %v812_v42 = vmul.f32 %v807_v55, %v1941_v32 }
 0x36d   : >> { %822 = vrot.lane.b32.xlu1 %v809_v60, %s1792_s17  ;;  %820 = vrot.lane.b32.xlu0 %v808_v13, %s1792_s17  ;;  %v2311_v13 = vpop.permute.xlu0 %790 }
 0x36e   : >> { %2821 = vst [vmem:[#allocation58_spill] sm:$0xff] %v2311_v13 }
 0x371   : >> { %826 = vrot.lane.b32.xlu1 %v811_v11, %s1792_s17  ;;  %824 = vrot.lane.b32.xlu0 %v810_v9, %s1792_s17 }
 0x375   : >> { %830 = vrot.lane.b32.xlu1 %v813_v51, %s1792_s17  ;;  %828 = vrot.lane.b32.xlu0 %v812_v42, %s1792_s17 }
 0x379   : >> { %844 = vrot.lane.b32.xlu0 %v1896_v7, %s1793_s20 }
 0x3df   : >> { %v2313_v60 = vpop.permute.xlu0 %820 }
 0x3e3   : >> { %v2315_v41 = vpop.permute.xlu0 %824 }
 0x3e7   : >> { %v2317_v9 = vpop.permute.xlu0 %828 }
 0x3e8   : >> { %2822 = vst [vmem:[#allocation59_spill] sm:$0xff] %v2317_v9 }
 0x3eb   : >> { %v845_v11 = vpop.permute.xlu0 %844 }
 0x3ec   : >> { %1586 = vpush %v845_v11 }
 0x41d   : >> { %s1587_s21 = spop %1586 }
 0x41e   : >> { %v847_v51 = vstv %s1587_s21 }
 0x41f   : >> { %v849_v42 = vmul.f32 %v1929_v23, %v847_v51  ;;  %v848_v55 = vmul.f32 %v1927_v22, %v847_v51  ;;  %v851_v29 = vmul.f32 %v1935_v27, %v847_v51  ;;  %v850_v13 = vmul.f32 %v1933_v26, %v847_v51 }
 0x420   : >> { %v853_v1 = vmul.f32 %v847_v51, %v1943_v33  ;;  %v852_v9 = vmul.f32 %v847_v51, %v1941_v32 }
 0x421   : >> { %862 = vrot.lane.b32.xlu0 %v849_v42, %s1793_s20  ;;  %860 = vrot.lane.b32.xlu1 %v848_v55, %s1793_s20 }
 0x425   : >> { %866 = vrot.lane.b32.xlu0 %v851_v29, %s1793_s20  ;;  %864 = vrot.lane.b32.xlu1 %v850_v13, %s1793_s20  ;;  %v2341_v29 = vpop.permute.xlu1 %822 }
 0x426   : >> { %2823 = vst [vmem:[#allocation60_spill] sm:$0xff] %v2341_v29 }
 0x429   : >> { %870 = vrot.lane.b32.xlu0 %v853_v1, %s1793_s20  ;;  %868 = vrot.lane.b32.xlu1 %v852_v9, %s1793_s20  ;;  %v2343_v1 = vpop.permute.xlu1 %826 }
 0x42a   : >> { %2824 = vst [vmem:[#allocation61_spill] sm:$0xff] %v2343_v1 }
 0x42d   : >> { %884 = vrot.lane.b32.xlu1 %v1896_v7, %s1794_s22  ;;  %v2345_v13 = vpop.permute.xlu1 %830 }
 0x42e   : >> { %2825 = vst [vmem:[#allocation62_spill] sm:$0xff] %v2345_v13 }
 0x431   : >> { %924 = vrot.lane.b32.xlu1 %v1896_v7, %s1795_s23 }
 0x435   : >> { %1004 = vrot.lane.b32.xlu1 %v1896_v7, %s1796_s25 }
 0x439   : >> { %1084 = vrot.lane.b32.xlu1 %v1896_v7, %s1797_s26 }
 0x43d   : >> { %1164 = vrot.lane.b32.xlu1 %v1896_v7, %s1798_s27 }
 0x441   : >> { %1244 = vrot.lane.b32.xlu1 %v1896_v7, %s1799_s28 }
 0x445   : >> { %1324 = vrot.lane.b32.xlu1 %v1896_v7, %s1800_s29 }
 0x449   : >> { %1404 = vrot.lane.b32.xlu1 %v1896_v7, %s1801_s30 }
 0x493   : >> { %v2347_v9 = vpop.permute.xlu1 %860 }
 0x497   : >> { %v2349_v11 = vpop.permute.xlu1 %864 }
 0x49b   : >> { %v2351_v51 = vpop.permute.xlu1 %868 }
 0x49c   : >> { %2826 = vst [vmem:[#allocation63_spill] sm:$0xff] %v2351_v51 }
 0x49f   : >> { %v885_v42 = vpop.permute.xlu1 %884 }
 0x4a0   : >> { %1588 = vpush %v885_v42 }
 0x4a3   : >> { %v925_v55 = vpop.permute.xlu1 %924 }
 0x4a4   : >> { %1590 = vpush %v925_v55 }
 0x4a7   : >> { %v1005_v51 = vpop.permute.xlu1 %1004 }
 0x4d1   : >> { %s1589_s3 = spop %1588 }
 0x4d2   : >> { %v887_v36 = vstv %s1589_s3 }
 0x4d3   : >> { %v890_v34 = vmul.f32 %v1933_v26, %v887_v36  ;;  %v888_v29 = vmul.f32 %v1927_v22, %v887_v36  ;;  %v892_v1 = vmul.f32 %v887_v36, %v1941_v32  ;;  %v891_v55 = vmul.f32 %v1935_v27, %v887_v36 }
 0x4d5   : >> { %904 = vrot.lane.b32.xlu1 %v890_v34, %s1794_s22  ;;  %900 = vrot.lane.b32.xlu0 %v888_v29, %s1794_s22  ;;  %s1591_s5 = spop %1590 }
 0x4d6   : >> { %v927_v13 = vstv %s1591_s5 }
 0x4d7   : >> { %v928_v42 = vmul.f32 %v1927_v22, %v927_v13  ;;  %v930_v34 = vmul.f32 %v1933_v26, %v927_v13  ;;  %v932_v29 = vmul.f32 %v927_v13, %v1941_v32 }
 0x4d9   : >> { %908 = vrot.lane.b32.xlu1 %v892_v1, %s1794_s22  ;;  %964 = vrot.lane.b32.xlu0 %v1896_v7, %s1802_s6  ;;  %v889_v1 = vmul.f32 %v1929_v23, %v887_v36 }
 0x4dd   : >> { %1044 = vrot.lane.b32.xlu0 %v1896_v7, %s1803_s7  ;;  %940 = vrot.lane.b32.xlu1 %v928_v42, %s1795_s23  ;;  %v893_v42 = vmul.f32 %v887_v36, %v1943_v33 }
 0x4e1   : >> { %1124 = vrot.lane.b32.xlu0 %v1896_v7, %s1804_s8  ;;  %944 = vrot.lane.b32.xlu1 %v930_v34, %s1795_s23  ;;  %v929_v34 = vmul.f32 %v1929_v23, %v927_v13 }
 0x4e5   : >> { %1204 = vrot.lane.b32.xlu0 %v1896_v7, %s1805_s10  ;;  %948 = vrot.lane.b32.xlu1 %v932_v29, %s1795_s23  ;;  %v931_v29 = vmul.f32 %v1935_v27, %v927_v13 }
 0x4e9   : >> { %1284 = vrot.lane.b32.xlu0 %v1896_v7, %s1806_s11 }
 0x4ed   : >> { %1364 = vrot.lane.b32.xlu0 %v1896_v7, %s1807_s12  ;;  %v933_v7 = vmul.f32 %v927_v13, %v1943_v33 }
 0x4f1   : >> { %902 = vrot.lane.b32.xlu0 %v889_v1, %s1794_s22  ;;  %v2390_v1 = vstv %s1931_s24 }
 0x4f2   : >> { %v192_v36 = vmul.f32 %v1927_v22, %v2390_v1 }
 0x4f5   : >> { %906 = vrot.lane.b32.xlu0 %v891_v55, %s1794_s22  ;;  %v2394_v55 = vpop.permute.xlu1 %1084 }
 0x4f9   : >> { %910 = vrot.lane.b32.xlu0 %v893_v42, %s1794_s22  ;;  %v198_v42 = vadd.f32 %v1770_v6, %v192_v36 }
 0x4fb   : >> { %v238_v32 = vadd.f32 %v2145_v43, %v198_v42  ;;  %v2414_v43 = vpop.permute.xlu0 %862 }
 0x4fd   : >> { %942 = vrot.lane.b32.xlu0 %v929_v34, %s1795_s23  ;;  %v194_v34 = vmul.f32 %v1933_v26, %v2390_v1  ;;  %v278_v13 = vadd.f32 %v2161_v52, %v238_v32 }
 0x4ff   : >> { %v318_v50 = vadd.f32 %v2093_v12, %v278_v13 }
 0x501   : >> { %946 = vrot.lane.b32.xlu0 %v931_v29, %s1795_s23  ;;  %v200_v29 = vadd.f32 %v1762_v4, %v194_v34  ;;  %v358_v35 = vadd.f32 %v2191_v16, %v318_v50 }
 0x503   : >> { %v240_v33 = vadd.f32 %v2065_v54, %v200_v29  ;;  %v398_v36 = vadd.f32 %v2123_v30, %v358_v35  ;;  %v2424_v30 = vpop.permute.xlu0 %866 }
 0x505   : >> { %950 = vrot.lane.b32.xlu0 %v933_v7, %s1795_s23  ;;  %v2402_v7 = vpop.permute.xlu1 %1164  ;;  %v280_v22 = vadd.f32 %v2165_v56, %v240_v33  ;;  %v438_v32 = vadd.f32 %v2207_v14, %v398_v36 }
 0x507   : >> { %v320_v6 = vadd.f32 %v2101_v17, %v280_v22  ;;  %v478_v12 = vadd.f32 %v2135_v38, %v438_v32  ;;  %v2434_v16 = vpop.permute.xlu0 %870 }
 0x509   : >> { %v2410_v26 = vpop.permute.xlu1 %1244  ;;  %v360_v4 = vadd.f32 %v2195_v20, %v320_v6  ;;  %v518_v50 = vadd.f32 %v2229_v8, %v478_v12  ;;  %v193_v20 = vmul.f32 %v1929_v23, %v2390_v1 }
 0x50b   : >> { %v400_v54 = vadd.f32 %v2125_v31, %v360_v4  ;;  %v558_v17 = vadd.f32 %v2149_v45, %v518_v50 }
 0x50d   : >> { %v440_v33 = vadd.f32 %v2209_v40, %v400_v54  ;;  %v2420_v52 = vpop.permute.xlu1 %1324  ;;  %v598_v56 = vadd.f32 %v2245_v25, %v558_v17 }
 0x50f   : >> { %v480_v22 = vadd.f32 %v2137_v39, %v440_v33  ;;  %v638_v38 = vadd.f32 %v2169_v58, %v598_v56 }
 0x511   : >> { %v520_v35 = vadd.f32 %v2235_v63, %v480_v22  ;;  %v2430_v14 = vpop.permute.xlu1 %1404  ;;  %v678_v40 = vadd.f32 %v2257_v2, %v638_v38  ;;  %v199_v2 = vadd.f32 %v1766_v5, %v193_v20 }
 0x513   : >> { %v560_v31 = vadd.f32 %v2153_v47, %v520_v35  ;;  %v718_v45 = vadd.f32 %v2189_v15, %v678_v40 }
 0x515   : >> { %v600_v8 = vadd.f32 %v2247_v48, %v560_v31  ;;  %v758_v47 = vadd.f32 %v2269_v37, %v718_v45  ;;  %v2832_v31 = vld [vmem:[#allocation37_spill] sm:$0xff] }
 0x517   : >> { %v640_v39 = vadd.f32 %v2173_v61, %v600_v8  ;;  %v798_v48 = vadd.f32 %v2294_v53, %v758_v47  ;;  %v195_v61 = vmul.f32 %v1935_v27, %v2390_v1 }
 0x519   : >> { %v680_v63 = vadd.f32 %v2259_v24, %v640_v39  ;;  %v838_v34 = vadd.f32 %v2313_v60, %v798_v48  ;;  %v239_v24 = vadd.f32 %v2057_v49, %v199_v2  ;;  %v201_v5 = vadd.f32 %v1758_v3, %v195_v61  ;;  %v2835_v39 = vld [vmem:[#allocation22_spill] sm:$0xff]  ;;  %v2839_v48 = vld [vmem:[#allocation27_spill] sm:$0xff] }
 0x51b   : >> { %v720_v42 = vadd.f32 %v2193_v19, %v680_v63  ;;  %v878_v19 = vadd.f32 %v2347_v9, %v838_v34  ;;  %v279_v53 = vadd.f32 %v2075_v59, %v239_v24  ;;  %v241_v4 = vadd.f32 %v2151_v46, %v201_v5  ;;  %v2836_v63 = vld [vmem:[#allocation41_spill] sm:$0xff]  ;;  %v2842_v24 = vld [vmem:[#allocation28_spill] sm:$0xff] }
 0x51d   : >> { %v760_v15 = vadd.f32 %v2271_v18, %v720_v42  ;;  %v319_v32 = vadd.f32 %v2175_v62, %v279_v53  ;;  %v281_v3 = vadd.f32 %v2083_v0, %v241_v4  ;;  %v2828_v0 = vld [vmem:[#allocation33_spill] sm:$0xff] }
 0x51e   : >> { %v2846_v4 = vld [vmem:[#allocation53_spill] sm:$0xff] }
 0x51f   : >> { %v800_v37 = vadd.f32 %v2296_v44, %v760_v15  ;;  %v359_v59 = vadd.f32 %v2111_v21, %v319_v32  ;;  %v321_v54 = vadd.f32 %v2181_v10, %v281_v3  ;;  %v2829_v21 = vld [vmem:[#allocation36_spill] sm:$0xff]  ;;  %v2830_v10 = vld [vmem:[#allocation14_spill] sm:$0xff]  ;;  %v2840_v15 = vld [vmem:[#allocation45_spill] sm:$0xff] }
 0x520   : >> { %v2847_v32 = vld [vmem:[#allocation60_spill] sm:$0xff] }
 0x521   : >> { %v840_v6 = vadd.f32 %v2315_v41, %v800_v37  ;;  %v399_v46 = vadd.f32 %v2201_v57, %v359_v59  ;;  %v361_v62 = vadd.f32 %v2117_v28, %v321_v54  ;;  %v2831_v57 = vld [vmem:[#allocation17_spill] sm:$0xff]  ;;  %v2834_v28 = vld [vmem:[#allocation18_spill] sm:$0xff] }
 0x522   : >> { %v2848_v59 = vld [vmem:[#allocation57_spill] sm:$0xff] }
 0x523   : >> { %v880_v49 = vadd.f32 %v2349_v11, %v840_v6  ;;  %v2827_v11 = vld [vmem:[#allocation13_spill] sm:$0xff]  ;;  %v401_v50 = vadd.f32 %v2828_v0, %v361_v62 }
 0x524   : >> { %v2844_v6 = vld [vmem:[#allocation49_spill] sm:$0xff] }
 0x525   : >> { %v441_v17 = vadd.f32 %v2830_v10, %v401_v50  ;;  %v2850_v10 = vld [vmem:[#allocation4_spill] sm:$0xff] }
 0x527   : >> { %v481_v38 = vadd.f32 %v2832_v31, %v441_v17 }
 0x529   : >> { %v521_v40 = vadd.f32 %v2834_v28, %v481_v38  ;;  %v2853_v38 = vld [vmem:[#allocation6_spill] sm:$0xff] }
 0x52b   : >> { %v561_v47 = vadd.f32 %v2836_v63, %v521_v40 }
 0x547   : >> { %v901_v58 = vpop.permute.xlu0 %900  ;;  %v905_v25 = vpop.permute.xlu1 %904 }
 0x548   : >> { %v918_v18 = vadd.f32 %v901_v58, %v878_v19  ;;  %v920_v9 = vadd.f32 %v905_v25, %v880_v49  ;;  %v2838_v25 = vld [vmem:[#allocation23_spill] sm:$0xff]  ;;  %v2843_v19 = vld [vmem:[#allocation52_spill] sm:$0xff] }
 0x549   : >> { %v601_v42 = vadd.f32 %v2838_v25, %v561_v47 }
 0x54b   : >> { %v965_v29 = vpop.permute.xlu0 %964  ;;  %v2449_v13 = vpop.permute.xlu1 %908  ;;  %v641_v34 = vadd.f32 %v2840_v15, %v601_v42 }
 0x54c   : >> { %1592 = vpush %v965_v29 }
 0x54d   : >> { %1594 = vpush %v1005_v51  ;;  %v681_v37 = vadd.f32 %v2842_v24, %v641_v34 }
 0x54f   : >> { %v1045_v36 = vpop.permute.xlu0 %1044  ;;  %v941_v60 = vpop.permute.xlu1 %940 }
 0x550   : >> { %v2460_v44 = vadd.f32 %v941_v60, %v918_v18  ;;  %1596 = vpush %v1045_v36  ;;  %v721_v18 = vadd.f32 %v2844_v6, %v681_v37  ;;  %v2845_v36 = vld [vmem:[#allocation56_spill] sm:$0xff] }
 0x551   : >> { %1598 = vpush %v2394_v55  ;;  %v439_v55 = vadd.f32 %v2827_v11, %v399_v46 }
 0x553   : >> { %v1125_v41 = vpop.permute.xlu0 %1124  ;;  %v945_v51 = vpop.permute.xlu1 %944  ;;  %v479_v22 = vadd.f32 %v2829_v21, %v439_v55 }
 0x554   : >> { %v2467_v12 = vadd.f32 %v945_v51, %v920_v9  ;;  %1600 = vpush %v1125_v41  ;;  %v2849_v51 = vld [vmem:[#allocation61_spill] sm:$0xff] }
 0x555   : >> { %1602 = vpush %v2402_v7  ;;  %v519_v35 = vadd.f32 %v2831_v57, %v479_v22  ;;  %v2833_v7 = vld [vmem:[#allocation40_spill] sm:$0xff]  ;;  %v2851_v57 = vld [vmem:[#allocation5_spill] sm:$0xff] }
 0x557   : >> { %v1205_v33 = vpop.permute.xlu0 %1204  ;;  %v559_v8 = vadd.f32 %v2833_v7, %v519_v35 }
 0x558   : >> { %1604 = vpush %v1205_v33 }
 0x559   : >> { %1606 = vpush %v2410_v26  ;;  %v599_v45 = vadd.f32 %v2835_v39, %v559_v8  ;;  %v2837_v26 = vld [vmem:[#allocation44_spill] sm:$0xff] }
 0x55b   : >> { %v1285_v56 = vpop.permute.xlu0 %1284  ;;  %v639_v58 = vadd.f32 %v2837_v26, %v599_v45 }
 0x55c   : >> { %1608 = vpush %v1285_v56  ;;  %v2852_v56 = vld [vmem:[#allocation7_spill] sm:$0xff] }
 0x55d   : >> { %1610 = vpush %v2420_v52  ;;  %v679_v2 = vadd.f32 %v2839_v48, %v639_v58  ;;  %v2841_v52 = vld [vmem:[#allocation48_spill] sm:$0xff] }
 0x55f   : >> { %v1365_v20 = vpop.permute.xlu0 %1364  ;;  %v719_v29 = vadd.f32 %v2841_v52, %v679_v2 }
 0x560   : >> { %1612 = vpush %v1365_v20 }
 0x561   : >> { %1614 = vpush %v2430_v14  ;;  %v759_v5 = vadd.f32 %v2843_v19, %v719_v29  ;;  %v761_v14 = vadd.f32 %v2846_v4, %v721_v18 }
 0x563   : >> { %v903_v61 = vpop.permute.xlu0 %902  ;;  %v799_v60 = vadd.f32 %v2845_v36, %v759_v5  ;;  %v801_v9 = vadd.f32 %v2848_v59, %v761_v14 }
 0x565   : >> { %v839_v49 = vadd.f32 %v2847_v32, %v799_v60  ;;  %v841_v54 = vadd.f32 %v2849_v51, %v801_v9 }
 0x567   : >> { %v907_v53 = vpop.permute.xlu0 %906  ;;  %v879_v41 = vadd.f32 %v2414_v43, %v839_v49  ;;  %v881_v11 = vadd.f32 %v2424_v30, %v841_v54 }
 0x569   : >> { %v919_v46 = vadd.f32 %v903_v61, %v879_v41  ;;  %v921_v33 = vadd.f32 %v907_v53, %v881_v11 }
 0x56b   : >> { %v2495_v3 = vpop.permute.xlu0 %910 }
 0x56f   : >> { %v943_v62 = vpop.permute.xlu0 %942 }
 0x570   : >> { %v2501_v55 = vadd.f32 %v943_v62, %v919_v46 }
 0x573   : >> { %v947_v0 = vpop.permute.xlu0 %946 }
 0x574   : >> { %v2503_v50 = vadd.f32 %v947_v0, %v921_v33 }
 0x57d   : >> { %s1593_s24 = spop %1592 }
 0x57e   : >> { %v967_v21 = vstv %s1593_s24  ;;  %s1595_s13 = spop %1594 }
 0x57f   : >> { %v969_v22 = vmul.f32 %v1929_v23, %v967_v21  ;;  %v968_v17 = vmul.f32 %v2850_v10, %v967_v21  ;;  %v971_v43 = vmul.f32 %v1935_v27, %v967_v21  ;;  %v970_v30 = vmul.f32 %v2851_v57, %v967_v21 }
 0x580   : >> { %v1007_v35 = vstv %s1595_s13  ;;  %v973_v31 = vmul.f32 %v967_v21, %v2852_v56  ;;  %v972_v7 = vmul.f32 %v967_v21, %v2853_v38  ;;  %v196_v21 = vmul.f32 %v2390_v1, %v2853_v38 }
 0x581   : >> { %982 = vrot.lane.b32.xlu0 %v969_v22, %s1802_s6  ;;  %980 = vrot.lane.b32.xlu1 %v968_v17, %s1802_s6  ;;  %v1009_v8 = vmul.f32 %v1929_v23, %v1007_v35  ;;  %v1008_v28 = vmul.f32 %v2850_v10, %v1007_v35  ;;  %v1011_v40 = vmul.f32 %v1935_v27, %v1007_v35  ;;  %s1597_s14 = spop %1596 }
 0x582   : >> { %v1010_v39 = vmul.f32 %v2851_v57, %v1007_v35  ;;  %v1047_v45 = vstv %s1597_s14  ;;  %v1013_v20 = vmul.f32 %v1007_v35, %v2852_v56  ;;  %v1012_v63 = vmul.f32 %v1007_v35, %v2853_v38  ;;  %s1599_s15 = spop %1598 }
 0x583   : >> { %v1049_v47 = vmul.f32 %v1929_v23, %v1047_v45  ;;  %v1048_v26 = vmul.f32 %v2850_v10, %v1047_v45  ;;  %v1051_v58 = vmul.f32 %v1935_v27, %v1047_v45  ;;  %v1050_v25 = vmul.f32 %v2851_v57, %v1047_v45 }
 0x584   : >> { %v1087_v42 = vstv %s1599_s15  ;;  %v1053_v48 = vmul.f32 %v1047_v45, %v2852_v56  ;;  %v1052_v2 = vmul.f32 %v1047_v45, %v2853_v38  ;;  %v197_v22 = vmul.f32 %v2390_v1, %v2852_v56 }
 0x585   : >> { %986 = vrot.lane.b32.xlu0 %v971_v43, %s1802_s6  ;;  %984 = vrot.lane.b32.xlu1 %v970_v30, %s1802_s6  ;;  %v1089_v61 = vmul.f32 %v1929_v23, %v1087_v42  ;;  %v1088_v15 = vmul.f32 %v2850_v10, %v1087_v42  ;;  %v1091_v34 = vmul.f32 %v1935_v27, %v1087_v42  ;;  %s1601_s17 = spop %1600  ;;  %v2854_v30 = vld [vmem:[#allocation3_spill] sm:$0xff] }
 0x586   : >> { %v1090_v52 = vmul.f32 %v2851_v57, %v1087_v42  ;;  %v1127_v29 = vstv %s1601_s17  ;;  %v1093_v24 = vmul.f32 %v1087_v42, %v2852_v56  ;;  %v1092_v37 = vmul.f32 %v1087_v42, %v2853_v38  ;;  %s1603_s18 = spop %1602  ;;  %v2861_v42 = vld [vmem:[#allocation29_spill] sm:$0xff] }
 0x587   : >> { %v1129_v19 = vmul.f32 %v1929_v23, %v1127_v29  ;;  %v1128_v5 = vmul.f32 %v2850_v10, %v1127_v29  ;;  %v1131_v53 = vmul.f32 %v1935_v27, %v1127_v29  ;;  %v1130_v6 = vmul.f32 %v2851_v57, %v1127_v29 }
 0x588   : >> { %v1167_v18 = vstv %s1603_s18  ;;  %v1133_v36 = vmul.f32 %v1127_v29, %v2852_v56  ;;  %v1132_v60 = vmul.f32 %v1127_v29, %v2853_v38  ;;  %v202_v35 = vadd.f32 %v2854_v30, %v196_v21  ;;  %v2863_v29 = vld [vmem:[#allocation32_spill] sm:$0xff]  ;;  %v2873_v21 = vld [vmem:[#allocation42_spill] sm:$0xff] }
 0x589   : >> { %990 = vrot.lane.b32.xlu0 %v973_v31, %s1802_s6  ;;  %988 = vrot.lane.b32.xlu1 %v972_v7, %s1802_s6  ;;  %v1169_v4 = vmul.f32 %v1929_v23, %v1167_v18  ;;  %v1168_v14 = vmul.f32 %v2850_v10, %v1167_v18  ;;  %v1171_v32 = vmul.f32 %v1935_v27, %v1167_v18  ;;  %s1605_s20 = spop %1604  ;;  %v2855_v31 = vld [vmem:[#allocation2_spill] sm:$0xff] }
 0x58a   : >> { %v1170_v49 = vmul.f32 %v2851_v57, %v1167_v18  ;;  %v1207_v59 = vstv %s1605_s20  ;;  %v1173_v9 = vmul.f32 %v1167_v18, %v2852_v56  ;;  %v1172_v41 = vmul.f32 %v1167_v18, %v2853_v38  ;;  %s1607_s21 = spop %1606 }
 0x58b   : >> { %v1209_v51 = vmul.f32 %v1929_v23, %v1207_v59  ;;  %v1208_v54 = vmul.f32 %v2850_v10, %v1207_v59  ;;  %v1211_v46 = vmul.f32 %v1935_v27, %v1207_v59  ;;  %v1210_v62 = vmul.f32 %v2851_v57, %v1207_v59 }
 0x58c   : >> { %v1247_v11 = vstv %s1607_s21  ;;  %v1213_v33 = vmul.f32 %v1207_v59, %v2852_v56  ;;  %v1212_v0 = vmul.f32 %v1207_v59, %v2853_v38  ;;  %v203_v7 = vadd.f32 %v2855_v31, %v197_v22  ;;  %v2869_v59 = vld [vmem:[#allocation38_spill] sm:$0xff] }
 0x58d   : >> { %1022 = vrot.lane.b32.xlu0 %v1009_v8, %s1796_s25  ;;  %1020 = vrot.lane.b32.xlu1 %v1008_v28, %s1796_s25  ;;  %v1249_v17 = vmul.f32 %v1929_v23, %v1247_v11  ;;  %v1248_v43 = vmul.f32 %v2850_v10, %v1247_v11  ;;  %v2856_v8 = vld [vmem:[#allocation8_spill] sm:$0xff]  ;;  %v1250_v45 = vmul.f32 %v2851_v57, %v1247_v11  ;;  %s1609_s22 = spop %1608 }
 0x58e   : >> { %v242_v28 = vadd.f32 %v2856_v8, %v202_v35  ;;  %s1611_s23 = spop %1610  ;;  %v2874_v35 = vld [vmem:[#allocation24_spill] sm:$0xff] }
 0x591   : >> { %1026 = vrot.lane.b32.xlu0 %v1011_v40, %s1796_s25  ;;  %1024 = vrot.lane.b32.xlu1 %v1010_v39, %s1796_s25  ;;  %v2857_v40 = vld [vmem:[#allocation20_spill] sm:$0xff]  ;;  %v1251_v39 = vmul.f32 %v1935_v27, %v1247_v11 }
 0x592   : >> { %v243_v1 = vadd.f32 %v2857_v40, %v203_v7  ;;  %v2875_v7 = vld [vmem:[#allocation43_spill] sm:$0xff] }
 0x595   : >> { %1030 = vrot.lane.b32.xlu0 %v1013_v20, %s1796_s25  ;;  %1028 = vrot.lane.b32.xlu1 %v1012_v63, %s1796_s25  ;;  %v2858_v20 = vld [vmem:[#allocation9_spill] sm:$0xff]  ;;  %s1613_s25 = spop %1612 }
 0x596   : >> { %v283_v63 = vadd.f32 %v2858_v20, %v243_v1  ;;  %v2876_v1 = vld [vmem:[#allocation26_spill] sm:$0xff] }
 0x599   : >> { %1062 = vrot.lane.b32.xlu0 %v1049_v47, %s1803_s7  ;;  %1060 = vrot.lane.b32.xlu1 %v1048_v26, %s1803_s7  ;;  %v2859_v47 = vld [vmem:[#allocation25_spill] sm:$0xff] }
 0x59a   : >> { %v282_v26 = vadd.f32 %v2859_v47, %v242_v28 }
 0x59d   : >> { %1066 = vrot.lane.b32.xlu0 %v1051_v58, %s1803_s7  ;;  %1064 = vrot.lane.b32.xlu1 %v1050_v25, %s1803_s7  ;;  %v2860_v58 = vld [vmem:[#allocation10_spill] sm:$0xff] }
 0x59e   : >> { %v322_v25 = vadd.f32 %v2860_v58, %v282_v26  ;;  %v2879_v26 = vld [vmem:[#allocation47_spill] sm:$0xff] }
 0x5a1   : >> { %1070 = vrot.lane.b32.xlu0 %v1053_v48, %s1803_s7  ;;  %1068 = vrot.lane.b32.xlu1 %v1052_v2, %s1803_s7  ;;  %v323_v48 = vadd.f32 %v2861_v42, %v283_v63  ;;  %v1287_v2 = vstv %s1609_s22  ;;  %v2878_v63 = vld [vmem:[#allocation30_spill] sm:$0xff] }
 0x5a2   : >> { %v1292_v30 = vmul.f32 %v1287_v2, %v2853_v38 }
 0x5a5   : >> { %1102 = vrot.lane.b32.xlu0 %v1089_v61, %s1797_s26  ;;  %1100 = vrot.lane.b32.xlu1 %v1088_v15, %s1797_s26  ;;  %v1253_v61 = vmul.f32 %v1247_v11, %v2852_v56  ;;  %v1252_v15 = vmul.f32 %v1247_v11, %v2853_v38 }
 0x5a9   : >> { %1106 = vrot.lane.b32.xlu0 %v1091_v34, %s1797_s26  ;;  %1104 = vrot.lane.b32.xlu1 %v1090_v52, %s1797_s26  ;;  %v2862_v34 = vld [vmem:[#allocation11_spill] sm:$0xff] }
 0x5aa   : >> { %v363_v52 = vadd.f32 %v2862_v34, %v323_v48  ;;  %v2881_v48 = vld [vmem:[#allocation50_spill] sm:$0xff] }
 0x5ad   : >> { %1110 = vrot.lane.b32.xlu0 %v1093_v24, %s1797_s26  ;;  %1108 = vrot.lane.b32.xlu1 %v1092_v37, %s1797_s26  ;;  %v362_v24 = vadd.f32 %v2863_v29, %v322_v25  ;;  %v1289_v37 = vmul.f32 %v1929_v23, %v1287_v2  ;;  %v2880_v25 = vld [vmem:[#allocation31_spill] sm:$0xff]  ;;  %v2882_v29 = vld [vmem:[#allocation54_spill] sm:$0xff]  ;;  %s1615_s26 = spop %1614 }
 0x5b1   : >> { %1142 = vrot.lane.b32.xlu0 %v1129_v19, %s1804_s8  ;;  %1140 = vrot.lane.b32.xlu1 %v1128_v5, %s1804_s8  ;;  %v1288_v19 = vmul.f32 %v2850_v10, %v1287_v2  ;;  %v2864_v5 = vld [vmem:[#allocation12_spill] sm:$0xff] }
 0x5b5   : >> { %1146 = vrot.lane.b32.xlu0 %v1131_v53, %s1804_s8  ;;  %1144 = vrot.lane.b32.xlu1 %v1130_v6, %s1804_s8  ;;  %v402_v53 = vadd.f32 %v2864_v5, %v362_v24  ;;  %v2865_v6 = vld [vmem:[#allocation34_spill] sm:$0xff] }
 0x5b6   : >> { %v403_v18 = vadd.f32 %v2865_v6, %v363_v52  ;;  %v2884_v5 = vld [vmem:[#allocation58_spill] sm:$0xff]  ;;  %v2885_v6 = vld [vmem:[#allocation55_spill] sm:$0xff] }
 0x5b9   : >> { %1150 = vrot.lane.b32.xlu0 %v1133_v36, %s1804_s8  ;;  %1148 = vrot.lane.b32.xlu1 %v1132_v60, %s1804_s8  ;;  %v2866_v36 = vld [vmem:[#allocation15_spill] sm:$0xff] }
 0x5ba   : >> { %v443_v60 = vadd.f32 %v2866_v36, %v403_v18  ;;  %v1367_v36 = vstv %s1613_s25 }
 0x5bd   : >> { %1182 = vrot.lane.b32.xlu0 %v1169_v4, %s1798_s27  ;;  %1180 = vrot.lane.b32.xlu1 %v1168_v14, %s1798_s27  ;;  %v2867_v4 = vld [vmem:[#allocation35_spill] sm:$0xff] }
 0x5be   : >> { %v442_v14 = vadd.f32 %v2867_v4, %v402_v53 }
 0x5c1   : >> { %1186 = vrot.lane.b32.xlu0 %v1171_v32, %s1798_s27  ;;  %1184 = vrot.lane.b32.xlu1 %v1170_v49, %s1798_s27  ;;  %v2868_v32 = vld [vmem:[#allocation16_spill] sm:$0xff] }
 0x5c2   : >> { %v482_v49 = vadd.f32 %v2868_v32, %v442_v14 }
 0x5c5   : >> { %1190 = vrot.lane.b32.xlu0 %v1173_v9, %s1798_s27  ;;  %1188 = vrot.lane.b32.xlu1 %v1172_v41, %s1798_s27  ;;  %v483_v9 = vadd.f32 %v2869_v59, %v443_v60  ;;  %v1291_v41 = vmul.f32 %v1935_v27, %v1287_v2 }
 0x5c9   : >> { %1222 = vrot.lane.b32.xlu0 %v1209_v51, %s1805_s10  ;;  %1220 = vrot.lane.b32.xlu1 %v1208_v54, %s1805_s10  ;;  %v1290_v51 = vmul.f32 %v2851_v57, %v1287_v2  ;;  %v2870_v54 = vld [vmem:[#allocation19_spill] sm:$0xff] }
 0x5cd   : >> { %1226 = vrot.lane.b32.xlu0 %v1211_v46, %s1805_s10  ;;  %1224 = vrot.lane.b32.xlu1 %v1210_v62, %s1805_s10  ;;  %v523_v46 = vadd.f32 %v2870_v54, %v483_v9  ;;  %v2871_v62 = vld [vmem:[#allocation39_spill] sm:$0xff] }
 0x5ce   : >> { %v522_v11 = vadd.f32 %v2871_v62, %v482_v49  ;;  %v2886_v49 = vld [vmem:[#allocation62_spill] sm:$0xff]  ;;  %v2887_v9 = vld [vmem:[#allocation59_spill] sm:$0xff]  ;;  %v1368_v62 = vmul.f32 %v2850_v10, %v1367_v36 }
 0x5cf   : >> { %v563_v22 = vadd.f32 %v2873_v21, %v523_v46  ;;  %v1369_v46 = vmul.f32 %v1929_v23, %v1367_v36 }
 0x5d1   : >> { %1230 = vrot.lane.b32.xlu0 %v1213_v33, %s1805_s10  ;;  %1228 = vrot.lane.b32.xlu1 %v1212_v0, %s1805_s10  ;;  %v2872_v33 = vld [vmem:[#allocation21_spill] sm:$0xff]  ;;  %v603_v31 = vadd.f32 %v2874_v35, %v563_v22 }
 0x5d2   : >> { %v562_v0 = vadd.f32 %v2872_v33, %v522_v11  ;;  %v2888_v33 = vld [vmem:[#allocation63_spill] sm:$0xff] }
 0x5d4   : >> { %v602_v8 = vadd.f32 %v2875_v7, %v562_v0  ;;  %v1371_v7 = vmul.f32 %v1935_v27, %v1367_v36 }
 0x5d5   : >> { %1262 = vrot.lane.b32.xlu0 %v1249_v17, %s1799_s28  ;;  %1260 = vrot.lane.b32.xlu1 %v1248_v43, %s1799_s28  ;;  %v1327_v17 = vstv %s1611_s23  ;;  %v1293_v43 = vmul.f32 %v1287_v2, %v2852_v56 }
 0x5d6   : >> { %v1329_v28 = vmul.f32 %v1929_v23, %v1327_v17  ;;  %v1328_v40 = vmul.f32 %v2850_v10, %v1327_v17  ;;  %v1331_v34 = vmul.f32 %v1935_v27, %v1327_v17  ;;  %v1330_v52 = vmul.f32 %v2851_v57, %v1327_v17 }
 0x5d7   : >> { %v1333_v14 = vmul.f32 %v1327_v17, %v2852_v56  ;;  %v1332_v32 = vmul.f32 %v1327_v17, %v2853_v38 }
 0x5d9   : >> { %1266 = vrot.lane.b32.xlu0 %v1251_v39, %s1799_s28  ;;  %1264 = vrot.lane.b32.xlu1 %v1250_v45, %s1799_s28  ;;  %v642_v39 = vadd.f32 %v2876_v1, %v602_v8  ;;  %v2877_v45 = vld [vmem:[#allocation46_spill] sm:$0xff]  ;;  %v1370_v8 = vmul.f32 %v2851_v57, %v1367_v36  ;;  %v1372_v1 = vmul.f32 %v1367_v36, %v2853_v38 }
 0x5da   : >> { %v643_v20 = vadd.f32 %v2877_v45, %v603_v31 }
 0x5db   : >> { %v682_v58 = vadd.f32 %v2879_v26, %v642_v39 }
 0x5dc   : >> { %v683_v47 = vadd.f32 %v2878_v63, %v643_v20 }
 0x5dd   : >> { %1270 = vrot.lane.b32.xlu0 %v1253_v61, %s1799_s28  ;;  %1268 = vrot.lane.b32.xlu1 %v1252_v15, %s1799_s28  ;;  %v722_v42 = vadd.f32 %v2880_v25, %v682_v58  ;;  %v949_v61 = vpop.permute.xlu1 %948  ;;  %v951_v15 = vpop.permute.xlu0 %950 }
 0x5de   : >> { %v723_v2 = vadd.f32 %v2881_v48, %v683_v47 }
 0x5e0   : >> { %v763_v24 = vadd.f32 %v2882_v29, %v723_v2 }
 0x5e1   : >> { %1302 = vrot.lane.b32.xlu0 %v1289_v37, %s1806_s11  ;;  %1300 = vrot.lane.b32.xlu1 %v1288_v19, %s1806_s11  ;;  %v2883_v37 = vld [vmem:[#allocation51_spill] sm:$0xff] }
 0x5e2   : >> { %v762_v19 = vadd.f32 %v2883_v37, %v722_v42  ;;  %v803_v53 = vadd.f32 %v2884_v5, %v763_v24 }
 0x5e4   : >> { %v802_v18 = vadd.f32 %v2885_v6, %v762_v19  ;;  %v843_v59 = vadd.f32 %v2886_v49, %v803_v53 }
 0x5e5   : >> { %1306 = vrot.lane.b32.xlu0 %v1291_v41, %s1806_s11  ;;  %1304 = vrot.lane.b32.xlu1 %v1290_v51, %s1806_s11 }
 0x5e6   : >> { %v842_v41 = vadd.f32 %v2887_v9, %v802_v18  ;;  %v883_v11 = vadd.f32 %v2434_v16, %v843_v59 }
 0x5e8   : >> { %v882_v0 = vadd.f32 %v2888_v33, %v842_v41 }
 0x5e9   : >> { %1310 = vrot.lane.b32.xlu0 %v1293_v43, %s1806_s11  ;;  %1308 = vrot.lane.b32.xlu1 %v1292_v30, %s1806_s11 }
 0x5ea   : >> { %v922_v17 = vadd.f32 %v2449_v13, %v882_v0 }
 0x5ec   : >> { %v962_v30 = vadd.f32 %v949_v61, %v922_v17 }
 0x5ed   : >> { %1342 = vrot.lane.b32.xlu0 %v1329_v28, %s1800_s29  ;;  %1340 = vrot.lane.b32.xlu1 %v1328_v40, %s1800_s29  ;;  %v1373_v40 = vmul.f32 %v1367_v36, %v2852_v56 }
 0x5f1   : >> { %1346 = vrot.lane.b32.xlu0 %v1331_v34, %s1800_s29  ;;  %1344 = vrot.lane.b32.xlu1 %v1330_v52, %s1800_s29 }
 0x5f3   : >> { %v983_v60 = vpop.permute.xlu0 %982  ;;  %v981_v4 = vpop.permute.xlu1 %980 }
 0x5f4   : >> { %v999_v51 = vadd.f32 %v983_v60, %v2501_v55  ;;  %v998_v54 = vadd.f32 %v981_v4, %v2460_v44  ;;  %v923_v55 = vadd.f32 %v2495_v3, %v883_v11 }
 0x5f5   : >> { %1350 = vrot.lane.b32.xlu0 %v1333_v14, %s1800_s29  ;;  %1348 = vrot.lane.b32.xlu1 %v1332_v32, %s1800_s29 }
 0x5f6   : >> { %v963_v35 = vadd.f32 %v951_v15, %v923_v55 }
 0x5f7   : >> { %v987_v21 = vpop.permute.xlu0 %986  ;;  %v985_v22 = vpop.permute.xlu1 %984 }
 0x5f8   : >> { %v1001_v44 = vadd.f32 %v987_v21, %v2503_v50  ;;  %v1000_v43 = vadd.f32 %v985_v22, %v2467_v12  ;;  %v1407_v12 = vstv %s1615_s26 }
 0x5f9   : >> { %1382 = vrot.lane.b32.xlu0 %v1369_v46, %s1807_s12  ;;  %1380 = vrot.lane.b32.xlu1 %v1368_v62, %s1807_s12  ;;  %v1409_v20 = vmul.f32 %v1929_v23, %v1407_v12  ;;  %v1408_v63 = vmul.f32 %v2850_v10, %v1407_v12  ;;  %v1411_v2 = vmul.f32 %v1935_v27, %v1407_v12 }
 0x5fa   : >> { %v1410_v61 = vmul.f32 %v2851_v57, %v1407_v12  ;;  %v1413_v52 = vmul.f32 %v1407_v12, %v2852_v56  ;;  %v1412_v29 = vmul.f32 %v1407_v12, %v2853_v38 }
 0x5fb   : >> { %v991_v31 = vpop.permute.xlu0 %990  ;;  %v989_v16 = vpop.permute.xlu1 %988 }
 0x5fc   : >> { %v1003_v13 = vadd.f32 %v991_v31, %v963_v35  ;;  %v1002_v28 = vadd.f32 %v989_v16, %v962_v30 }
 0x5fd   : >> { %1386 = vrot.lane.b32.xlu0 %v1371_v7, %s1807_s12  ;;  %1384 = vrot.lane.b32.xlu1 %v1370_v8, %s1807_s12 }
 0x5ff   : >> { %v1023_v3 = vpop.permute.xlu0 %1022  ;;  %v1021_v50 = vpop.permute.xlu1 %1020 }
 0x600   : >> { %v1039_v39 = vadd.f32 %v1023_v3, %v999_v51  ;;  %v1038_v45 = vadd.f32 %v1021_v50, %v998_v54 }
 0x601   : >> { %1390 = vrot.lane.b32.xlu0 %v1373_v40, %s1807_s12  ;;  %1388 = vrot.lane.b32.xlu1 %v1372_v1, %s1807_s12 }
 0x603   : >> { %v1027_v47 = vpop.permute.xlu0 %1026  ;;  %v1025_v26 = vpop.permute.xlu1 %1024 }
 0x604   : >> { %v1041_v58 = vadd.f32 %v1027_v47, %v1001_v44  ;;  %v1040_v25 = vadd.f32 %v1025_v26, %v1000_v43 }
 0x605   : >> { %1422 = vrot.lane.b32.xlu0 %v1409_v20, %s1801_s30  ;;  %1420 = vrot.lane.b32.xlu1 %v1408_v63, %s1801_s30 }
 0x607   : >> { %v1031_v42 = vpop.permute.xlu0 %1030  ;;  %v1029_v48 = vpop.permute.xlu1 %1028 }
 0x608   : >> { %v1043_v15 = vadd.f32 %v1031_v42, %v1003_v13  ;;  %v1042_v34 = vadd.f32 %v1029_v48, %v1002_v28 }
 0x609   : >> { %1426 = vrot.lane.b32.xlu0 %v1411_v2, %s1801_s30  ;;  %1424 = vrot.lane.b32.xlu1 %v1410_v61, %s1801_s30 }
 0x60b   : >> { %v1063_v23 = vpop.permute.xlu0 %1062  ;;  %v1061_v10 = vpop.permute.xlu1 %1060 }
 0x60c   : >> { %v1079_v24 = vadd.f32 %v1063_v23, %v1039_v39  ;;  %v1078_v37 = vadd.f32 %v1061_v10, %v1038_v45 }
 0x60d   : >> { %1430 = vrot.lane.b32.xlu0 %v1413_v52, %s1801_s30  ;;  %1428 = vrot.lane.b32.xlu1 %v1412_v29, %s1801_s30 }
 0x60f   : >> { %v1067_v27 = vpop.permute.xlu0 %1066  ;;  %v1065_v57 = vpop.permute.xlu1 %1064 }
 0x610   : >> { %v1081_v19 = vadd.f32 %v1067_v27, %v1041_v58  ;;  %v1080_v5 = vadd.f32 %v1065_v57, %v1040_v25 }
 0x613   : >> { %v1071_v53 = vpop.permute.xlu0 %1070  ;;  %v1069_v6 = vpop.permute.xlu1 %1068 }
 0x614   : >> { %v1083_v18 = vadd.f32 %v1071_v53, %v1043_v15  ;;  %v1082_v36 = vadd.f32 %v1069_v6, %v1042_v34 }
 0x617   : >> { %v1103_v60 = vpop.permute.xlu0 %1102  ;;  %v1101_v4 = vpop.permute.xlu1 %1100 }
 0x618   : >> { %v1119_v14 = vadd.f32 %v1103_v60, %v1079_v24  ;;  %v1118_v56 = vadd.f32 %v1101_v4, %v1078_v37 }
 0x61b   : >> { %v1107_v32 = vpop.permute.xlu0 %1106  ;;  %v1105_v38 = vpop.permute.xlu1 %1104 }
 0x61c   : >> { %v1121_v49 = vadd.f32 %v1107_v32, %v1081_v19  ;;  %v1120_v59 = vadd.f32 %v1105_v38, %v1080_v5 }
 0x61f   : >> { %v1111_v9 = vpop.permute.xlu0 %1110  ;;  %v1109_v41 = vpop.permute.xlu1 %1108 }
 0x620   : >> { %v1123_v51 = vadd.f32 %v1111_v9, %v1083_v18  ;;  %v1122_v54 = vadd.f32 %v1109_v41, %v1082_v36 }
 0x623   : >> { %v1143_v46 = vpop.permute.xlu0 %1142  ;;  %v1141_v62 = vpop.permute.xlu1 %1140 }
 0x624   : >> { %v1159_v11 = vadd.f32 %v1143_v46, %v1119_v14  ;;  %v1158_v33 = vadd.f32 %v1141_v62, %v1118_v56 }
 0x627   : >> { %v1147_v0 = vpop.permute.xlu0 %1146  ;;  %v1145_v21 = vpop.permute.xlu1 %1144 }
 0x628   : >> { %v1161_v22 = vadd.f32 %v1147_v0, %v1121_v49  ;;  %v1160_v17 = vadd.f32 %v1145_v21, %v1120_v59 }
 0x62b   : >> { %v1151_v55 = vpop.permute.xlu0 %1150  ;;  %v1149_v44 = vpop.permute.xlu1 %1148 }
 0x62c   : >> { %v1163_v43 = vadd.f32 %v1151_v55, %v1123_v51  ;;  %v1162_v30 = vadd.f32 %v1149_v44, %v1122_v54 }
 0x62f   : >> { %v1183_v35 = vpop.permute.xlu0 %1182  ;;  %v1181_v31 = vpop.permute.xlu1 %1180 }
 0x630   : >> { %v1199_v16 = vadd.f32 %v1183_v35, %v1159_v11  ;;  %v1198_v7 = vadd.f32 %v1181_v31, %v1158_v33 }
 0x633   : >> { %v1187_v8 = vpop.permute.xlu0 %1186  ;;  %v1185_v13 = vpop.permute.xlu1 %1184 }
 0x634   : >> { %v1201_v28 = vadd.f32 %v1187_v8, %v1161_v22  ;;  %v1200_v12 = vadd.f32 %v1185_v13, %v1160_v17 }
 0x637   : >> { %v1191_v3 = vpop.permute.xlu0 %1190  ;;  %v1189_v50 = vpop.permute.xlu1 %1188 }
 0x638   : >> { %v1203_v49 = vadd.f32 %v1191_v3, %v1163_v43  ;;  %v1202_v59 = vadd.f32 %v1189_v50, %v1162_v30 }
 0x63b   : >> { %v1223_v40 = vpop.permute.xlu0 %1222  ;;  %v1221_v1 = vpop.permute.xlu1 %1220 }
 0x63c   : >> { %v1239_v53 = vadd.f32 %v1223_v40, %v1199_v16  ;;  %v1238_v6 = vadd.f32 %v1221_v1, %v1198_v7 }
 0x63f   : >> { %v1227_v39 = vpop.permute.xlu0 %1226  ;;  %v1225_v45 = vpop.permute.xlu1 %1224 }
 0x640   : >> { %v1241_v14 = vadd.f32 %v1227_v39, %v1201_v28  ;;  %v1240_v56 = vadd.f32 %v1225_v45, %v1200_v12 }
 0x643   : >> { %v1231_v20 = vpop.permute.xlu0 %1230  ;;  %v1229_v63 = vpop.permute.xlu1 %1228 }
 0x644   : >> { %v1243_v11 = vadd.f32 %v1231_v20, %v1203_v49  ;;  %v1242_v33 = vadd.f32 %v1229_v63, %v1202_v59 }
 0x647   : >> { %v1263_v47 = vpop.permute.xlu0 %1262  ;;  %v1261_v26 = vpop.permute.xlu1 %1260 }
 0x648   : >> { %v1279_v60 = vadd.f32 %v1263_v47, %v1239_v53  ;;  %v1278_v4 = vadd.f32 %v1261_v26, %v1238_v6 }
 0x64b   : >> { %v1267_v58 = vpop.permute.xlu0 %1266  ;;  %v1265_v25 = vpop.permute.xlu1 %1264 }
 0x64c   : >> { %v1281_v51 = vadd.f32 %v1267_v58, %v1241_v14  ;;  %v1280_v54 = vadd.f32 %v1265_v25, %v1240_v56 }
 0x64f   : >> { %v1271_v42 = vpop.permute.xlu0 %1270  ;;  %v1269_v48 = vpop.permute.xlu1 %1268 }
 0x650   : >> { %v1283_v55 = vadd.f32 %v1271_v42, %v1243_v11  ;;  %v1282_v44 = vadd.f32 %v1269_v48, %v1242_v33  ;;  %v1444_v42 = vld [vmem:[%s2756_s2] sm:$0xff] (%p163_p5)  ;;  %v1445_v48 = vld [vmem:[%s2756_s2 + $0x8] sm:$0xff] (%p163_p5) }
 0x653   : >> { %v1303_v2 = vpop.permute.xlu0 %1302  ;;  %v1301_v61 = vpop.permute.xlu1 %1300 }
 0x654   : >> { %v1319_v32 = vadd.f32 %v1303_v2, %v1279_v60  ;;  %v1318_v38 = vadd.f32 %v1301_v61, %v1278_v4  ;;  %v1446_v61 = vld [vmem:[%s2756_s2 + $0x10] sm:$0xff] (%p163_p5) }
 0x657   : >> { %v1307_v15 = vpop.permute.xlu0 %1306  ;;  %v1305_v34 = vpop.permute.xlu1 %1304 }
 0x658   : >> { %v1321_v0 = vadd.f32 %v1307_v15, %v1281_v51  ;;  %v1320_v21 = vadd.f32 %v1305_v34, %v1280_v54 }
 0x65b   : >> { %v1311_v23 = vpop.permute.xlu0 %1310  ;;  %v1309_v10 = vpop.permute.xlu1 %1308 }
 0x65c   : >> { %v1323_v8 = vadd.f32 %v1311_v23, %v1283_v55  ;;  %v1322_v13 = vadd.f32 %v1309_v10, %v1282_v44  ;;  %v1447_v10 = vld [vmem:[%s2756_s2 + $0x18] sm:$0xff] (%p163_p5) }
 0x65f   : >> { %v1343_v52 = vpop.permute.xlu0 %1342  ;;  %v1341_v29 = vpop.permute.xlu1 %1340 }
 0x660   : >> { %v1359_v46 = vadd.f32 %v1343_v52, %v1319_v32  ;;  %v1358_v62 = vadd.f32 %v1341_v29, %v1318_v38  ;;  %v1449_v52 = vld [vmem:[%s2756_s2 + $0x28] sm:$0xf] (%p163_p5) }
 0x663   : >> { %v1347_v24 = vpop.permute.xlu0 %1346  ;;  %v1345_v37 = vpop.permute.xlu1 %1344 }
 0x664   : >> { %v1361_v16 = vadd.f32 %v1347_v24, %v1321_v0  ;;  %v1360_v7 = vadd.f32 %v1345_v37, %v1320_v21 }
 0x667   : >> { %v1351_v27 = vpop.permute.xlu0 %1350  ;;  %v1349_v57 = vpop.permute.xlu1 %1348 }
 0x668   : >> { %v1363_v40 = vadd.f32 %v1351_v27, %v1323_v8  ;;  %v1362_v1 = vadd.f32 %v1349_v57, %v1322_v13 }
 0x66b   : >> { %v1383_v19 = vpop.permute.xlu0 %1382  ;;  %v1381_v5 = vpop.permute.xlu1 %1380 }
 0x66c   : >> { %v1399_v22 = vadd.f32 %v1383_v19, %v1359_v46  ;;  %v1398_v17 = vadd.f32 %v1381_v5, %v1358_v62 }
 0x66f   : >> { %v1387_v18 = vpop.permute.xlu0 %1386  ;;  %v1385_v36 = vpop.permute.xlu1 %1384 }
 0x670   : >> { %v1401_v28 = vadd.f32 %v1387_v18, %v1361_v16  ;;  %v1400_v12 = vadd.f32 %v1385_v36, %v1360_v7 }
 0x673   : >> { %v1391_v9 = vpop.permute.xlu0 %1390  ;;  %v1389_v41 = vpop.permute.xlu1 %1388 }
 0x674   : >> { %v1403_v20 = vadd.f32 %v1391_v9, %v1363_v40  ;;  %v1402_v63 = vadd.f32 %v1389_v41, %v1362_v1 }
 0x677   : >> { %v1423_v35 = vpop.permute.xlu0 %1422  ;;  %v1421_v31 = vpop.permute.xlu1 %1420 }
 0x678   : >> { %v1439_v43 = vadd.f32 %v1423_v35, %v1399_v22   ;;  %v1438_v30 = vadd.f32 %v1421_v31, %v1398_v17  }
 0x67a   : >> { %v2893_v5 = vmov %v1439_v43  ;;  %v2894_v6 = vmov %v1438_v30  ;;  %v1450_v15 = vadd.f32 (%p163_p5), %v1444_v42, %v1438_v30  ;;  %v1451_v34 = vadd.f32 (%p163_p5), %v1445_v48, %v1439_v43 }
 0x67b   : >> { %v1427_v3 = vpop.permute.xlu0 %1426  ;;  %v1425_v50 = vpop.permute.xlu1 %1424 }
 0x67c   : >> { %v1441_v39 = vadd.f32 %v1427_v3, %v1401_v28   ;;  %v1440_v45 = vadd.f32 %v1425_v50, %v1400_v12   ;;  %165 = sbr.rel (!%p163_p5) target bundleno = 23 (0x17), region = 70  ;;  %1457 = vst.msk [vmem:[%s2756_s2] sm:$0xff] (%p163_p5), %vm1456_vm2, %v1450_v15  ;;  %1458 = vst.msk [vmem:[%s2756_s2 + $0x8] sm:$0xff] (%p163_p5), %vm1456_vm2, %v1451_v34 }
 0x67e   : >> { %v2891_v3 = vmov %v1441_v39  ;;  %v2892_v4 = vmov %v1440_v45  ;;  %v1452_v23 = vadd.f32 (%p163_p5), %v1446_v61, %v1440_v45  ;;  %v1453_v29 = vadd.f32 (%p163_p5), %v1447_v10, %v1441_v39 }
 0x67f   : >> { %v1431_v47 = vpop.permute.xlu0 %1430  ;;  %v1429_v26 = vpop.permute.xlu1 %1428 }
 0x680   : >> { %v1443_v58 = vadd.f32 %v1431_v47, %v1403_v20   ;;  %v1442_v25 = vadd.f32 %v1429_v26, %v1402_v63   ;;  %1459 = vst.msk [vmem:[%s2756_s2 + $0x10] sm:$0xff] (%p163_p5), %vm1456_vm2, %v1452_v23  ;;  %1460 = vst.msk [vmem:[%s2756_s2 + $0x18] sm:$0xff] (%p163_p5), %vm1456_vm2, %v1453_v29 }
 0x682   : >> { %v2889_v1 = vmov %v1443_v58  ;;  %v2890_v2 = vmov %v1442_v25  ;;  %v1455_v37 = vadd.f32 (%p163_p5), %v1449_v52, %v1443_v58 }
 0x683   : > { %v1448_v2 = vld [vmem:[%s2756_s2 + $0x20] sm:$0xff] }
 0x684   : > { %v1454_v24 = vadd.f32 %v1448_v2, %v1442_v25  ;;  %1463 = vst.msk [vmem:[%s2756_s2 + $0x28] sm:$0xf] %vm1462_vm3, %v1455_v37 }
 0x686   : > { %1461 = vst.msk [vmem:[%s2756_s2 + $0x20] sm:$0xff] %vm1456_vm2, %v1454_v24 }
 0x687 PF: > { %s12_s9 = sadd.s32 1, %s1746_s9  }
 0x688   : > { %p9_p6 = scmp.ge.s32.totalorder %s12_s9, 34  }
 0x68a   :  { %11 = sbr.rel (!%p9_p6) target bundleno = 1 (0x1), region = 81 }

// kernel: net_forward.9
= control target key start
LH: loop header
LB: loop body
LE: loop exit
PB: predicated region body
PF: predicated region fallthrough
CT: control target
= control target key end

     0   :  { %s1837_s9 = smov 0   ;;  %s2715_s0 = inlined_call_operand.vmem [shape: bf16[38,48,38,128], index: 0, kind: input, shape index: {}]   ;;  %s2716_s1 = inlined_call_operand.vmem [shape: f32[38,48,128], index: 1, kind: input, shape index: {}]   ;;  %s2717_s2 = inlined_call_operand.vmem [shape: f32[38,38], index: 2, kind: output, shape index: {}]  }
   0x1 LB: > { %s1536_s10 = sadd.s32 4294967295, %s1758_s9   ;;  %p1539_p0 = scmp.ge.s32.totalorder %s1758_s9, 1  ;;  %s1758_s9 = sphi %s1837_s9, %s12_s9  }
   0x2   : > { %p117_p1 = scmp.lt.s32.totalorder %s1758_s9, 39 }
   0x4   : > { %p118_p2 = pnand %p1539_p0, %p117_p1 }
   0x5   : > { %p139_p3 = scmp.lt.s32.totalorder (!%p118_p2), %s1536_s10, 37  ;;  %p1542_p4 = scmp.ne.s32.totalorder (!%p118_p2), %s1536_s10, 0 }
   0x6   : > { %121 = sbr.rel (%p118_p2) target bundleno = 1811 (0x713), region = 28 }
   0xd   : > { %s140_s11 = scalar_select %p139_p3, %s1536_s10, 37 }
   0xe   : > { %152 = sbr.rel (%p1542_p4) target bundleno = 21 (0x15), region = 32  ;;  %vm153_vm0 = vcmask (!%p1542_p4), 310272   ;;  %vm158_vm1 = vcmask (!%p1542_p4), 308224   ;;  %v1784_v0 = vmov (!%p1542_p4), 0.0  }
   0xf   : > { %s1556_s12 = smul.u32 960, %s140_s11  ;;  %154 = vst.msk [vmem:[%s2717_s2] sm:$0xff] (!%p1542_p4), %vm153_vm0, %v1784_v0  ;;  %155 = vst.msk [vmem:[%s2717_s2 + $0x8] sm:$0xff] (!%p1542_p4), %vm153_vm0, %v1784_v0 }
  0x10   : > { %s1557_s13 = smul.u32 48, %s140_s11  ;;  %156 = vst.msk [vmem:[%s2717_s2 + $0x10] sm:$0xff] (!%p1542_p4), %vm153_vm0, %v1784_v0  ;;  %157 = vst.msk [vmem:[%s2717_s2 + $0x18] sm:$0xff] (!%p1542_p4), %vm153_vm0, %v1784_v0 }
  0x11   : > { %s1848_s16 = scalar_lea.vmem %s2715_s0, %s1556_s12  ;;  %159 = vst.msk [vmem:[%s2717_s2 + $0x20] sm:$0x3f] (!%p1542_p4), %vm158_vm1, %v1784_v0 }
  0x12   : > { %s1853_s19 = scalar_lea.vmem %s2716_s1, %s1557_s13 }
  0x15 PF: > { %v1870_v1 = vmov 0.0   ;;  %v1872_v2 = vmov 0.0   ;;  %v1874_v3 = vmov 0.0   ;;  %v1876_v4 = vmov 0.0   ;;  %s1880_s30 = smov 0  }
  0x16   : > { %v1878_v5 = vmov 0.0  }
  0x17 LB: >> { %s184_s3 = scalar_lea.vmem %s1853_s19, %s1782_s30  ;;  %s1785_s4 = smov 127   ;;  %s1782_s30 = sphi %s1880_s30, %s165_s30   ;;  %v1778_v5 = vphi %v1878_v5, %v2846_v5   ;;  %v1774_v4 = vphi %v1876_v4, %v2845_v4   ;;  %v1770_v3 = vphi %v1874_v3, %v2844_v3   ;;  %v1766_v2 = vphi %v1872_v2, %v2843_v2   ;;  %v1762_v1 = vphi %v1870_v1, %v2842_v1  }
  0x18   : >> { %v1902_v6 = vld [vmem:[%s184_s3] sm:$0x1]  ;;  %s1786_s5 = smov 126   ;;  %s1787_s6 = smov 125  }
  0x19   : >> { %198 = vrot.lane.b32.xlu0 %v1902_v6, %s1785_s4  ;;  %1558 = vpush %v1902_v6  ;;  %s1788_s7 = smov 124   ;;  %s1789_s8 = smov 123  }
  0x1a   : >> { %s1790_s10 = smov 122   ;;  %s1791_s11 = smov 121  }
  0x1b   : >> { %s1792_s12 = smov 120   ;;  %s1793_s13 = smov 119  }
  0x1c   : >> { %s1794_s14 = smov 118   ;;  %s1795_s15 = smov 117  }
  0x1d   : >> { %232 = vrot.lane.b32.xlu0 %v1902_v6, %s1786_s5  ;;  %s1796_s17 = smov 116   ;;  %s1797_s18 = smov 115  }
  0x1e   : >> { %s1798_s20 = smov 114   ;;  %s1799_s21 = smov 113  }
  0x1f   : >> { %s1546_s22 = smul.u32 20, %s1782_s30  ;;  %s165_s30 = sadd.s32 1, %s1782_s30  }
  0x20   : >> { %p162_p5 = scmp.ge.s32.totalorder %s165_s30, 48  }
  0x21   : >> { %266 = vrot.lane.b32.xlu0 %v1902_v6, %s1787_s6  ;;  %s173_s23 = scalar_lea.vmem %s1848_s16, %s1546_s22  ;;  %vm1466_vm2 = vcmask (%p162_p5), 310272   ;;  %vm1471_vm3 = vcmask (%p162_p5), 308224  }
  0x22   : >> { %v1548_v19 = vld [vmem:[%s173_s23] sm:$0xff]   ;;  %v1555_v23 = vld [vmem:[%s173_s23 + $0x8] sm:$0xff]   ;;  %v178_v30 = vld [vmem:[%s173_s23 + $0x10] sm:$0x7] }
  0x23   : >> { %v1937_v20 = vunpack.c.l.bf16 %v1548_v19  ;;  %v1939_v21 = vunpack.c.h.bf16 %v1548_v19  ;;  %v1943_v25 = vunpack.c.l.bf16 %v1555_v23  ;;  %v1945_v26 = vunpack.c.h.bf16 %v1555_v23 }
  0x24   : >> { %v1951_v32 = vunpack.c.l.bf16 %v178_v30 }
  0x25   : >> { %300 = vrot.lane.b32.xlu0 %v1902_v6, %s1788_s7 }
  0x29   : >> { %334 = vrot.lane.b32.xlu0 %v1902_v6, %s1789_s8 }
  0x2d   : >> { %368 = vrot.lane.b32.xlu0 %v1902_v6, %s1790_s10 }
  0x31   : >> { %402 = vrot.lane.b32.xlu0 %v1902_v6, %s1791_s11 }
  0x35   : >> { %436 = vrot.lane.b32.xlu0 %v1902_v6, %s1792_s12 }
  0x39   : >> { %470 = vrot.lane.b32.xlu0 %v1902_v6, %s1793_s13 }
  0x3d   : >> { %504 = vrot.lane.b32.xlu0 %v1902_v6, %s1794_s14 }
  0x41   : >> { %538 = vrot.lane.b32.xlu0 %v1902_v6, %s1795_s15 }
  0x45   : >> { %572 = vrot.lane.b32.xlu0 %v1902_v6, %s1796_s17 }
  0x49   : >> { %606 = vrot.lane.b32.xlu0 %v1902_v6, %s1797_s18 }
  0x4a   : >> { %s1941_s24 = spop %1558 }
  0x4d   : >> { %640 = vrot.lane.b32.xlu0 %v1902_v6, %s1798_s20 }
  0x51   : >> { %674 = vrot.lane.b32.xlu0 %v1902_v6, %s1799_s21 }
  0x8b   : >> { %v199_v7 = vpop.permute.xlu0 %198 }
  0x8c   : >> { %1560 = vpush %v199_v7 }
  0x8f   : >> { %v233_v8 = vpop.permute.xlu0 %232 }
  0x90   : >> { %1562 = vpush %v233_v8 }
  0x93   : >> { %v267_v9 = vpop.permute.xlu0 %266 }
  0x94   : >> { %1564 = vpush %v267_v9 }
  0x97   : >> { %v301_v10 = vpop.permute.xlu0 %300 }
  0x98   : >> { %1566 = vpush %v301_v10 }
  0x9b   : >> { %v335_v11 = vpop.permute.xlu0 %334 }
  0x9c   : >> { %1568 = vpush %v335_v11 }
  0x9f   : >> { %v369_v12 = vpop.permute.xlu0 %368 }
  0xa0   : >> { %1570 = vpush %v369_v12 }
  0xa3   : >> { %v403_v13 = vpop.permute.xlu0 %402 }
  0xa4   : >> { %1572 = vpush %v403_v13 }
  0xa7   : >> { %v437_v14 = vpop.permute.xlu0 %436 }
  0xa8   : >> { %1574 = vpush %v437_v14 }
  0xab   : >> { %v471_v15 = vpop.permute.xlu0 %470 }
  0xac   : >> { %1576 = vpush %v471_v15 }
  0xaf   : >> { %v505_v16 = vpop.permute.xlu0 %504 }
  0xb0   : >> { %1578 = vpush %v505_v16 }
  0xb3   : >> { %v539_v17 = vpop.permute.xlu0 %538 }
  0xb4   : >> { %1580 = vpush %v539_v17 }
  0xb7   : >> { %v573_v18 = vpop.permute.xlu0 %572 }
  0xb8   : >> { %1582 = vpush %v573_v18 }
  0xbb   : >> { %v607_v22 = vpop.permute.xlu0 %606 }
  0xbc   : >> { %1584 = vpush %v607_v22 }
  0xbd   : >> { %s1561_s25 = spop %1560 }
  0xbe   : >> { %v201_v24 = vstv %s1561_s25  ;;  %s1804_s25 = smov 108  }
  0xbf   : >> { %v203_v27 = vmul.f32 %v1939_v21, %v201_v24  ;;  %v202_v28 = vmul.f32 %v1937_v20, %v201_v24  ;;  %v641_v29 = vpop.permute.xlu0 %640  ;;  %v204_v33 = vmul.f32 %v1943_v25, %v201_v24  ;;  %v205_v34 = vmul.f32 %v1945_v26, %v201_v24 }
  0xc0   : >> { %1586 = vpush %v641_v29  ;;  %v206_v37 = vmul.f32 %v201_v24, %v1951_v32 }
  0xc1   : >> { %214 = vrot.lane.b32.xlu1 %v203_v27, %s1785_s4  ;;  %212 = vrot.lane.b32.xlu0 %v202_v28, %s1785_s4  ;;  %s1563_s26 = spop %1562 }
  0xc2   : >> { %v235_v31 = vstv %s1563_s26 }
  0xc3   : >> { %v675_v35 = vpop.permute.xlu0 %674  ;;  %v237_v36 = vmul.f32 %v1939_v21, %v235_v31  ;;  %v236_v39 = vmul.f32 %v1937_v20, %v235_v31  ;;  %v239_v40 = vmul.f32 %v1945_v26, %v235_v31  ;;  %v238_v42 = vmul.f32 %v1943_v25, %v235_v31 }
  0xc4   : >> { %1588 = vpush %v675_v35  ;;  %v240_v44 = vmul.f32 %v235_v31, %v1951_v32 }
  0xc5   : >> { %216 = vrot.lane.b32.xlu1 %v204_v33, %s1785_s4  ;;  %218 = vrot.lane.b32.xlu0 %v205_v34, %s1785_s4  ;;  %s1565_s27 = spop %1564 }
  0xc6   : >> { %v269_v38 = vstv %s1565_s27  ;;  %s1805_s27 = smov 107  }
  0xc7   : >> { %v271_v41 = vmul.f32 %v1939_v21, %v269_v38  ;;  %v273_v45 = vmul.f32 %v1945_v26, %v269_v38  ;;  %v270_v47 = vmul.f32 %v1937_v20, %v269_v38  ;;  %v272_v49 = vmul.f32 %v1943_v25, %v269_v38 }
  0xc8   : >> { %v274_v52 = vmul.f32 %v269_v38, %v1951_v32 }
  0xc9   : >> { %220 = vrot.lane.b32.xlu1 %v206_v37, %s1785_s4  ;;  %248 = vrot.lane.b32.xlu0 %v237_v36, %s1786_s5  ;;  %s1567_s28 = spop %1566 }
  0xca   : >> { %v303_v43 = vstv %s1567_s28 }
  0xcb   : >> { %v305_v46 = vmul.f32 %v1939_v21, %v303_v43  ;;  %v307_v50 = vmul.f32 %v1945_v26, %v303_v43  ;;  %v304_v54 = vmul.f32 %v1937_v20, %v303_v43  ;;  %v306_v57 = vmul.f32 %v1943_v25, %v303_v43 }
  0xcc   : >> { %v308_v59 = vmul.f32 %v303_v43, %v1951_v32 }
  0xcd   : >> { %246 = vrot.lane.b32.xlu1 %v236_v39, %s1786_s5  ;;  %252 = vrot.lane.b32.xlu0 %v239_v40, %s1786_s5  ;;  %s1569_s29 = spop %1568 }
  0xce   : >> { %v337_v48 = vstv %s1569_s29  ;;  %s1806_s29 = smov 105  }
  0xcf   : >> { %v339_v51 = vmul.f32 %v1939_v21, %v337_v48  ;;  %v341_v55 = vmul.f32 %v1945_v26, %v337_v48  ;;  %v338_v62 = vmul.f32 %v1937_v20, %v337_v48  ;;  %v340_v0 = vmul.f32 %v1943_v25, %v337_v48 }
  0xd0   : >> { %v342_v9 = vmul.f32 %v337_v48, %v1951_v32 }
  0xd1   : >> { %250 = vrot.lane.b32.xlu1 %v238_v42, %s1786_s5  ;;  %282 = vrot.lane.b32.xlu0 %v271_v41, %s1787_s6  ;;  %s1571_s3 = spop %1570 }
  0xd2   : >> { %v371_v53 = vstv %s1571_s3  ;;  %s1807_s3 = smov 106  }
  0xd3   : >> { %v373_v56 = vmul.f32 %v1939_v21, %v371_v53  ;;  %v375_v60 = vmul.f32 %v1945_v26, %v371_v53  ;;  %v372_v11 = vmul.f32 %v1937_v20, %v371_v53  ;;  %v374_v14 = vmul.f32 %v1943_v25, %v371_v53 }
  0xd4   : >> { %v376_v16 = vmul.f32 %v371_v53, %v1951_v32 }
  0xd5   : >> { %254 = vrot.lane.b32.xlu1 %v240_v44, %s1786_s5  ;;  %286 = vrot.lane.b32.xlu0 %v273_v45, %s1787_s6  ;;  %s1573_s4 = spop %1572 }
  0xd6   : >> { %v405_v58 = vstv %s1573_s4  ;;  %s1808_s4 = smov 103  }
  0xd7   : >> { %v407_v61 = vmul.f32 %v1939_v21, %v405_v58  ;;  %v409_v7 = vmul.f32 %v1945_v26, %v405_v58  ;;  %v406_v19 = vmul.f32 %v1937_v20, %v405_v58  ;;  %v408_v23 = vmul.f32 %v1943_v25, %v405_v58 }
  0xd8   : >> { %v410_v28 = vmul.f32 %v405_v58, %v1951_v32 }
  0xd9   : >> { %280 = vrot.lane.b32.xlu1 %v270_v47, %s1787_s6  ;;  %316 = vrot.lane.b32.xlu0 %v305_v46, %s1788_s7  ;;  %s1575_s5 = spop %1574 }
  0xda   : >> { %v439_v63 = vstv %s1575_s5  ;;  %s1809_s5 = smov 104  }
  0xdb   : >> { %v441_v8 = vmul.f32 %v1939_v21, %v439_v63  ;;  %v443_v12 = vmul.f32 %v1945_v26, %v439_v63  ;;  %v440_v30 = vmul.f32 %v1937_v20, %v439_v63  ;;  %v442_v34 = vmul.f32 %v1943_v25, %v439_v63 }
  0xdc   : >> { %v444_v36 = vmul.f32 %v439_v63, %v1951_v32 }
  0xdd   : >> { %284 = vrot.lane.b32.xlu1 %v272_v49, %s1787_s6  ;;  %320 = vrot.lane.b32.xlu0 %v307_v50, %s1788_s7 }
  0xe1   : >> { %288 = vrot.lane.b32.xlu1 %v274_v52, %s1787_s6  ;;  %350 = vrot.lane.b32.xlu0 %v339_v51, %s1789_s8  ;;  %s1577_s6 = spop %1576 }
  0xe2   : >> { %v473_v10 = vstv %s1577_s6  ;;  %s1810_s6 = smov 101  }
  0xe3   : >> { %v475_v13 = vmul.f32 %v1939_v21, %v473_v10  ;;  %v477_v17 = vmul.f32 %v1945_v26, %v473_v10  ;;  %v474_v39 = vmul.f32 %v1937_v20, %v473_v10  ;;  %v476_v41 = vmul.f32 %v1943_v25, %v473_v10 }
  0xe4   : >> { %v478_v44 = vmul.f32 %v473_v10, %v1951_v32 }
  0xe5   : >> { %314 = vrot.lane.b32.xlu1 %v304_v54, %s1788_s7  ;;  %354 = vrot.lane.b32.xlu0 %v341_v55, %s1789_s8 }
  0xe9   : >> { %318 = vrot.lane.b32.xlu1 %v306_v57, %s1788_s7  ;;  %384 = vrot.lane.b32.xlu0 %v373_v56, %s1790_s10 }
  0xed   : >> { %322 = vrot.lane.b32.xlu1 %v308_v59, %s1788_s7  ;;  %388 = vrot.lane.b32.xlu0 %v375_v60, %s1790_s10  ;;  %s1579_s7 = spop %1578 }
  0xee   : >> { %v507_v15 = vstv %s1579_s7  ;;  %s1811_s7 = smov 102  }
  0xef   : >> { %v509_v18 = vmul.f32 %v1939_v21, %v507_v15  ;;  %v511_v24 = vmul.f32 %v1945_v26, %v507_v15  ;;  %v508_v46 = vmul.f32 %v1937_v20, %v507_v15  ;;  %v510_v49 = vmul.f32 %v1943_v25, %v507_v15 }
  0xf0   : >> { %v512_v51 = vmul.f32 %v507_v15, %v1951_v32 }
  0xf1   : >> { %348 = vrot.lane.b32.xlu1 %v338_v62, %s1789_s8  ;;  %418 = vrot.lane.b32.xlu0 %v407_v61, %s1791_s11 }
  0xf5   : >> { %352 = vrot.lane.b32.xlu1 %v340_v0, %s1789_s8  ;;  %422 = vrot.lane.b32.xlu0 %v409_v7, %s1791_s11 }
  0xf9   : >> { %356 = vrot.lane.b32.xlu1 %v342_v9, %s1789_s8  ;;  %452 = vrot.lane.b32.xlu0 %v441_v8, %s1792_s12  ;;  %s1581_s8 = spop %1580 }
  0xfa   : >> { %v2025_v22 = vstv %s1581_s8  ;;  %s1812_s8 = smov 99  }
  0xfb   : >> { %v543_v27 = vmul.f32 %v1939_v21, %v2025_v22  ;;  %v545_v31 = vmul.f32 %v1945_v26, %v2025_v22  ;;  %v542_v54 = vmul.f32 %v1937_v20, %v2025_v22  ;;  %v544_v56 = vmul.f32 %v1943_v25, %v2025_v22 }
  0xfc   : >> { %v546_v58 = vmul.f32 %v2025_v22, %v1951_v32 }
  0xfd   : >> { %382 = vrot.lane.b32.xlu1 %v372_v11, %s1790_s10  ;;  %456 = vrot.lane.b32.xlu0 %v443_v12, %s1792_s12 }
 0x101   : >> { %386 = vrot.lane.b32.xlu1 %v374_v14, %s1790_s10  ;;  %486 = vrot.lane.b32.xlu0 %v475_v13, %s1793_s13 }
 0x105   : >> { %390 = vrot.lane.b32.xlu1 %v376_v16, %s1790_s10  ;;  %490 = vrot.lane.b32.xlu0 %v477_v17, %s1793_s13  ;;  %s1583_s10 = spop %1582 }
 0x106   : >> { %v575_v29 = vstv %s1583_s10  ;;  %s1585_s22 = spop %1584  ;;  %s1813_s10 = smov 100  }
 0x107   : >> { %v577_v33 = vmul.f32 %v1939_v21, %v575_v29  ;;  %v609_v35 = vstv %s1585_s22  ;;  %v579_v37 = vmul.f32 %v1945_v26, %v575_v29  ;;  %v576_v60 = vmul.f32 %v1937_v20, %v575_v29  ;;  %s1814_s22 = smov 97  }
 0x108   : >> { %v611_v38 = vmul.f32 %v1939_v21, %v609_v35  ;;  %v613_v42 = vmul.f32 %v1945_v26, %v609_v35  ;;  %v578_v62 = vmul.f32 %v1943_v25, %v575_v29  ;;  %v580_v0 = vmul.f32 %v575_v29, %v1951_v32 }
 0x109   : >> { %416 = vrot.lane.b32.xlu1 %v406_v19, %s1791_s11  ;;  %520 = vrot.lane.b32.xlu0 %v509_v18, %s1794_s14  ;;  %v610_v8 = vmul.f32 %v1937_v20, %v609_v35  ;;  %v612_v10 = vmul.f32 %v1943_v25, %v609_v35  ;;  %v614_v12 = vmul.f32 %v609_v35, %v1951_v32 }
 0x10d   : >> { %420 = vrot.lane.b32.xlu1 %v408_v23, %s1791_s11  ;;  %524 = vrot.lane.b32.xlu0 %v511_v24, %s1794_s14 }
 0x111   : >> { %424 = vrot.lane.b32.xlu1 %v410_v28, %s1791_s11  ;;  %554 = vrot.lane.b32.xlu0 %v543_v27, %s1795_s15  ;;  %s1587_s11 = spop %1586 }
 0x112   : >> { %v643_v40 = vstv %s1587_s11  ;;  %s1815_s11 = smov 98  }
 0x113   : >> { %v645_v43 = vmul.f32 %v1939_v21, %v643_v40  ;;  %v647_v47 = vmul.f32 %v1945_v26, %v643_v40  ;;  %v644_v14 = vmul.f32 %v1937_v20, %v643_v40  ;;  %v646_v16 = vmul.f32 %v1943_v25, %v643_v40 }
 0x114   : >> { %v648_v18 = vmul.f32 %v643_v40, %v1951_v32 }
 0x115   : >> { %450 = vrot.lane.b32.xlu1 %v440_v30, %s1792_s12  ;;  %558 = vrot.lane.b32.xlu0 %v545_v31, %s1795_s15 }
 0x119   : >> { %454 = vrot.lane.b32.xlu1 %v442_v34, %s1792_s12  ;;  %588 = vrot.lane.b32.xlu0 %v577_v33, %s1796_s17 }
 0x11d   : >> { %458 = vrot.lane.b32.xlu1 %v444_v36, %s1792_s12  ;;  %592 = vrot.lane.b32.xlu0 %v579_v37, %s1796_s17  ;;  %s1589_s12 = spop %1588 }
 0x11e   : >> { %v677_v45 = vstv %s1589_s12  ;;  %s1816_s12 = smov 95  }
 0x11f   : >> { %v679_v48 = vmul.f32 %v1939_v21, %v677_v45  ;;  %v681_v52 = vmul.f32 %v1945_v26, %v677_v45  ;;  %v678_v22 = vmul.f32 %v1937_v20, %v677_v45  ;;  %v680_v24 = vmul.f32 %v1943_v25, %v677_v45 }
 0x120   : >> { %v682_v28 = vmul.f32 %v677_v45, %v1951_v32 }
 0x121   : >> { %484 = vrot.lane.b32.xlu1 %v474_v39, %s1793_s13  ;;  %622 = vrot.lane.b32.xlu0 %v611_v38, %s1797_s18 }
 0x125   : >> { %488 = vrot.lane.b32.xlu1 %v476_v41, %s1793_s13  ;;  %626 = vrot.lane.b32.xlu0 %v613_v42, %s1797_s18 }
 0x129   : >> { %492 = vrot.lane.b32.xlu1 %v478_v44, %s1793_s13  ;;  %656 = vrot.lane.b32.xlu0 %v645_v43, %s1798_s20  ;;  %s1800_s13 = smov 112  }
 0x12d   : >> { %518 = vrot.lane.b32.xlu1 %v508_v46, %s1794_s14  ;;  %660 = vrot.lane.b32.xlu0 %v647_v47, %s1798_s20 }
 0x131   : >> { %522 = vrot.lane.b32.xlu1 %v510_v49, %s1794_s14  ;;  %690 = vrot.lane.b32.xlu0 %v679_v48, %s1799_s21 }
 0x133   : >> { %v2069_v50 = vpop.permute.xlu0 %212 }
 0x135   : >> { %526 = vrot.lane.b32.xlu1 %v512_v51, %s1794_s14  ;;  %694 = vrot.lane.b32.xlu0 %v681_v52, %s1799_s21 }
 0x137   : >> { %v2075_v53 = vpop.permute.xlu0 %218 }
 0x139   : >> { %552 = vrot.lane.b32.xlu1 %v542_v54, %s1795_s15  ;;  %708 = vrot.lane.b32.xlu0 %v1902_v6, %s1800_s13 }
 0x13b   : >> { %v2082_v55 = vpop.permute.xlu0 %248 }
 0x13d   : >> { %556 = vrot.lane.b32.xlu1 %v544_v56, %s1795_s15 }
 0x13f   : >> { %v2087_v57 = vpop.permute.xlu0 %252 }
 0x141   : >> { %560 = vrot.lane.b32.xlu1 %v546_v58, %s1795_s15  ;;  %s1801_s15 = smov 111  }
 0x143   : >> { %v2092_v59 = vpop.permute.xlu0 %282 }
 0x145   : >> { %586 = vrot.lane.b32.xlu1 %v576_v60, %s1796_s17 }
 0x147   : >> { %v2096_v61 = vpop.permute.xlu0 %286 }
 0x149   : >> { %590 = vrot.lane.b32.xlu1 %v578_v62, %s1796_s17 }
 0x14b   : >> { %v2100_v63 = vpop.permute.xlu0 %316 }
 0x14d   : >> { %594 = vrot.lane.b32.xlu1 %v580_v0, %s1796_s17 }
 0x14f   : >> { %v2104_v7 = vpop.permute.xlu0 %320 }
 0x151   : >> { %620 = vrot.lane.b32.xlu1 %v610_v8, %s1797_s18  ;;  %v2186_v8 = vpop.permute.xlu1 %214 }
 0x153   : >> { %v2108_v9 = vpop.permute.xlu0 %350 }
 0x155   : >> { %624 = vrot.lane.b32.xlu1 %v612_v10, %s1797_s18 }
 0x157   : >> { %v2112_v11 = vpop.permute.xlu0 %354 }
 0x159   : >> { %628 = vrot.lane.b32.xlu1 %v614_v12, %s1797_s18  ;;  %s1802_s18 = smov 110  }
 0x15b   : >> { %v2116_v13 = vpop.permute.xlu0 %384 }
 0x15d   : >> { %654 = vrot.lane.b32.xlu1 %v644_v14, %s1798_s20  ;;  %v2191_v14 = vpop.permute.xlu1 %216 }
 0x15f   : >> { %v2120_v15 = vpop.permute.xlu0 %388 }
 0x161   : >> { %658 = vrot.lane.b32.xlu1 %v646_v16, %s1798_s20 }
 0x163   : >> { %v2124_v17 = vpop.permute.xlu0 %418 }
 0x165   : >> { %662 = vrot.lane.b32.xlu1 %v648_v18, %s1798_s20 }
 0x167   : >> { %v2128_v19 = vpop.permute.xlu0 %422 }
 0x168   : >> { %2718 = vst [vmem:[#allocation2_spill] sm:$0xff] %v2128_v19 }
 0x169   : >> { %688 = vrot.lane.b32.xlu1 %v678_v22, %s1799_s21 }
 0x16b   : >> { %v2132_v23 = vpop.permute.xlu0 %452 }
 0x16d   : >> { %692 = vrot.lane.b32.xlu1 %v680_v24, %s1799_s21  ;;  %v2197_v24 = vpop.permute.xlu1 %220 }
 0x16f   : >> { %v2136_v27 = vpop.permute.xlu0 %456 }
 0x170   : >> { %2719 = vst [vmem:[#allocation3_spill] sm:$0xff] %v2136_v27 }
 0x171   : >> { %696 = vrot.lane.b32.xlu1 %v682_v28, %s1799_s21  ;;  %s1803_s21 = smov 109  }
 0x173   : >> { %v2140_v29 = vpop.permute.xlu0 %486 }
 0x174   : >> { %2720 = vst [vmem:[#allocation4_spill] sm:$0xff] %v2140_v29 }
 0x177   : >> { %v2142_v30 = vpop.permute.xlu0 %490 }
 0x178   : >> { %2721 = vst [vmem:[#allocation5_spill] sm:$0xff] %v2142_v30 }
 0x17b   : >> { %v2144_v31 = vpop.permute.xlu0 %520 }
 0x17c   : >> { %2722 = vst [vmem:[#allocation6_spill] sm:$0xff] %v2144_v31 }
 0x17f   : >> { %v2146_v33 = vpop.permute.xlu0 %524 }
 0x180   : >> { %2723 = vst [vmem:[#allocation7_spill] sm:$0xff] %v2146_v33 }
 0x183   : >> { %v2148_v34 = vpop.permute.xlu0 %554 }
 0x184   : >> { %2724 = vst [vmem:[#allocation8_spill] sm:$0xff] %v2148_v34 }
 0x187   : >> { %v2150_v35 = vpop.permute.xlu0 %558 }
 0x188   : >> { %2725 = vst [vmem:[#allocation9_spill] sm:$0xff] %v2150_v35 }
 0x18b   : >> { %v2152_v36 = vpop.permute.xlu0 %588 }
 0x18c   : >> { %2726 = vst [vmem:[#allocation10_spill] sm:$0xff] %v2152_v36 }
 0x18f   : >> { %v2154_v37 = vpop.permute.xlu0 %592 }
 0x190   : >> { %2727 = vst [vmem:[#allocation11_spill] sm:$0xff] %v2154_v37 }
 0x193   : >> { %v2156_v38 = vpop.permute.xlu0 %622 }
 0x194   : >> { %2728 = vst [vmem:[#allocation12_spill] sm:$0xff] %v2156_v38 }
 0x197   : >> { %v2158_v39 = vpop.permute.xlu0 %626 }
 0x198   : >> { %2729 = vst [vmem:[#allocation13_spill] sm:$0xff] %v2158_v39 }
 0x19b   : >> { %v2160_v40 = vpop.permute.xlu0 %656 }
 0x19c   : >> { %2730 = vst [vmem:[#allocation14_spill] sm:$0xff] %v2160_v40 }
 0x19f   : >> { %v2162_v41 = vpop.permute.xlu0 %660 }
 0x1a0   : >> { %2731 = vst [vmem:[#allocation15_spill] sm:$0xff] %v2162_v41 }
 0x1a3   : >> { %v2164_v42 = vpop.permute.xlu0 %690 }
 0x1a4   : >> { %2732 = vst [vmem:[#allocation16_spill] sm:$0xff] %v2164_v42 }
 0x1a7   : >> { %v2166_v43 = vpop.permute.xlu0 %694 }
 0x1a8   : >> { %2733 = vst [vmem:[#allocation17_spill] sm:$0xff] %v2166_v43 }
 0x1ab   : >> { %v709_v44 = vpop.permute.xlu0 %708 }
 0x1ac   : >> { %1590 = vpush %v709_v44 }
 0x1dd   : >> { %s1591_s14 = spop %1590 }
 0x1de   : >> { %v711_v45 = vstv %s1591_s14  ;;  %s1818_s14 = smov 93  }
 0x1df   : >> { %v713_v46 = vmul.f32 %v1939_v21, %v711_v45  ;;  %v712_v47 = vmul.f32 %v1937_v20, %v711_v45  ;;  %v715_v48 = vmul.f32 %v1945_v26, %v711_v45  ;;  %v714_v49 = vmul.f32 %v1943_v25, %v711_v45 }
 0x1e0   : >> { %v716_v51 = vmul.f32 %v711_v45, %v1951_v32 }
 0x1e1   : >> { %724 = vrot.lane.b32.xlu0 %v713_v46, %s1800_s13  ;;  %722 = vrot.lane.b32.xlu1 %v712_v47, %s1800_s13  ;;  %v2201_v46 = vpop.permute.xlu1 %246 }
 0x1e5   : >> { %728 = vrot.lane.b32.xlu0 %v715_v48, %s1800_s13  ;;  %726 = vrot.lane.b32.xlu1 %v714_v49, %s1800_s13 }
 0x1e9   : >> { %742 = vrot.lane.b32.xlu0 %v1902_v6, %s1801_s15  ;;  %730 = vrot.lane.b32.xlu1 %v716_v51, %s1800_s13  ;;  %v2206_v51 = vpop.permute.xlu1 %250  ;;  %s1817_s13 = smov 96  }
 0x253   : >> { %v2179_v52 = vpop.permute.xlu0 %724 }
 0x254   : >> { %2734 = vst [vmem:[#allocation18_spill] sm:$0xff] %v2179_v52 }
 0x257   : >> { %v2181_v54 = vpop.permute.xlu0 %728 }
 0x258   : >> { %2735 = vst [vmem:[#allocation19_spill] sm:$0xff] %v2181_v54 }
 0x25b   : >> { %v743_v56 = vpop.permute.xlu0 %742 }
 0x25c   : >> { %1592 = vpush %v743_v56 }
 0x28d   : >> { %s1593_s17 = spop %1592 }
 0x28e   : >> { %v745_v58 = vstv %s1593_s17  ;;  %s1820_s17 = smov 91  }
 0x28f   : >> { %v747_v60 = vmul.f32 %v1939_v21, %v745_v58  ;;  %v746_v62 = vmul.f32 %v1937_v20, %v745_v58  ;;  %v749_v0 = vmul.f32 %v1945_v26, %v745_v58  ;;  %v748_v10 = vmul.f32 %v1943_v25, %v745_v58 }
 0x290   : >> { %v750_v12 = vmul.f32 %v745_v58, %v1951_v32 }
 0x291   : >> { %758 = vrot.lane.b32.xlu0 %v747_v60, %s1801_s15  ;;  %756 = vrot.lane.b32.xlu1 %v746_v62, %s1801_s15  ;;  %v2213_v62 = vpop.permute.xlu1 %254 }
 0x295   : >> { %762 = vrot.lane.b32.xlu0 %v749_v0, %s1801_s15  ;;  %760 = vrot.lane.b32.xlu1 %v748_v10, %s1801_s15 }
 0x299   : >> { %776 = vrot.lane.b32.xlu0 %v1902_v6, %s1802_s18  ;;  %764 = vrot.lane.b32.xlu1 %v750_v12, %s1801_s15  ;;  %s1819_s15 = smov 94  }
 0x303   : >> { %v2193_v16 = vpop.permute.xlu0 %758 }
 0x304   : >> { %2736 = vst [vmem:[#allocation20_spill] sm:$0xff] %v2193_v16 }
 0x307   : >> { %v2195_v18 = vpop.permute.xlu0 %762 }
 0x308   : >> { %2737 = vst [vmem:[#allocation21_spill] sm:$0xff] %v2195_v18 }
 0x30b   : >> { %v777_v22 = vpop.permute.xlu0 %776 }
 0x30c   : >> { %1594 = vpush %v777_v22  ;;  %v2217_v22 = vpop.permute.xlu1 %280 }
 0x33d   : >> { %s1595_s20 = spop %1594 }
 0x33e   : >> { %v779_v28 = vstv %s1595_s20 }
 0x33f   : >> { %v780_v44 = vmul.f32 %v1937_v20, %v779_v28  ;;  %v781_v45 = vmul.f32 %v1939_v21, %v779_v28  ;;  %v782_v47 = vmul.f32 %v1943_v25, %v779_v28  ;;  %v783_v48 = vmul.f32 %v1945_v26, %v779_v28 }
 0x340   : >> { %v784_v49 = vmul.f32 %v779_v28, %v1951_v32 }
 0x341   : >> { %792 = vrot.lane.b32.xlu0 %v781_v45, %s1802_s18  ;;  %790 = vrot.lane.b32.xlu1 %v780_v44, %s1802_s18 }
 0x345   : >> { %796 = vrot.lane.b32.xlu0 %v783_v48, %s1802_s18  ;;  %794 = vrot.lane.b32.xlu1 %v782_v47, %s1802_s18  ;;  %v2222_v47 = vpop.permute.xlu1 %284 }
 0x349   : >> { %810 = vrot.lane.b32.xlu0 %v1902_v6, %s1803_s21  ;;  %798 = vrot.lane.b32.xlu1 %v784_v49, %s1802_s18  ;;  %s1821_s18 = smov 92  }
 0x3b3   : >> { %v2209_v56 = vpop.permute.xlu0 %792 }
 0x3b4   : >> { %2738 = vst [vmem:[#allocation22_spill] sm:$0xff] %v2209_v56 }
 0x3b7   : >> { %v2211_v58 = vpop.permute.xlu0 %796 }
 0x3b8   : >> { %2739 = vst [vmem:[#allocation23_spill] sm:$0xff] %v2211_v58 }
 0x3bb   : >> { %v811_v60 = vpop.permute.xlu0 %810 }
 0x3bc   : >> { %1596 = vpush %v811_v60 }
 0x3ed   : >> { %s1597_s23 = spop %1596 }
 0x3ee   : >> { %v813_v0 = vstv %s1597_s23 }
 0x3ef   : >> { %v814_v10 = vmul.f32 %v1937_v20, %v813_v0  ;;  %v815_v12 = vmul.f32 %v1939_v21, %v813_v0  ;;  %v816_v28 = vmul.f32 %v1943_v25, %v813_v0  ;;  %v817_v44 = vmul.f32 %v1945_v26, %v813_v0 }
 0x3f0   : >> { %v818_v45 = vmul.f32 %v813_v0, %v1951_v32 }
 0x3f1   : >> { %826 = vrot.lane.b32.xlu0 %v815_v12, %s1803_s21  ;;  %824 = vrot.lane.b32.xlu1 %v814_v10, %s1803_s21  ;;  %v2229_v10 = vpop.permute.xlu1 %288 }
 0x3f5   : >> { %830 = vrot.lane.b32.xlu0 %v817_v44, %s1803_s21  ;;  %828 = vrot.lane.b32.xlu1 %v816_v28, %s1803_s21  ;;  %v2231_v12 = vpop.permute.xlu1 %314 }
 0x3f9   : >> { %844 = vrot.lane.b32.xlu0 %v1902_v6, %s1804_s25  ;;  %832 = vrot.lane.b32.xlu1 %v818_v45, %s1803_s21  ;;  %v2235_v58 = vpop.permute.xlu1 %318 }
 0x463   : >> { %v2225_v48 = vpop.permute.xlu0 %826 }
 0x464   : >> { %2740 = vst [vmem:[#allocation24_spill] sm:$0xff] %v2225_v48  ;;  %v2240_v48 = vpop.permute.xlu1 %322 }
 0x467   : >> { %v2227_v49 = vpop.permute.xlu0 %830 }
 0x468   : >> { %2741 = vst [vmem:[#allocation25_spill] sm:$0xff] %v2227_v49  ;;  %v2244_v18 = vpop.permute.xlu1 %348 }
 0x46b   : >> { %v845_v60 = vpop.permute.xlu0 %844 }
 0x46c   : >> { %1598 = vpush %v845_v60 }
 0x49d   : >> { %s1599_s26 = spop %1598 }
 0x49e   : >> { %v847_v28 = vstv %s1599_s26 }
 0x49f   : >> { %v848_v0 = vmul.f32 %v1937_v20, %v847_v28  ;;  %v849_v44 = vmul.f32 %v1939_v21, %v847_v28  ;;  %v850_v45 = vmul.f32 %v1943_v25, %v847_v28  ;;  %v851_v49 = vmul.f32 %v1945_v26, %v847_v28 }
 0x4a0   : >> { %v852_v60 = vmul.f32 %v847_v28, %v1951_v32 }
 0x4a1   : >> { %860 = vrot.lane.b32.xlu0 %v849_v44, %s1804_s25  ;;  %858 = vrot.lane.b32.xlu1 %v848_v0, %s1804_s25  ;;  %v2246_v0 = vpop.permute.xlu1 %352 }
 0x4a5   : >> { %864 = vrot.lane.b32.xlu0 %v851_v49, %s1804_s25  ;;  %862 = vrot.lane.b32.xlu1 %v850_v45, %s1804_s25  ;;  %v2248_v44 = vpop.permute.xlu1 %356 }
 0x4a9   : >> { %878 = vrot.lane.b32.xlu0 %v1902_v6, %s1805_s27  ;;  %866 = vrot.lane.b32.xlu1 %v852_v60, %s1804_s25  ;;  %v2250_v56 = vpop.permute.xlu1 %382 }
 0x4ad   : >> { %v2252_v54 = vpop.permute.xlu1 %386 }
 0x4b1   : >> { %v2254_v49 = vpop.permute.xlu1 %390 }
 0x4b5   : >> { %v2256_v28 = vpop.permute.xlu1 %416 }
 0x4b9   : >> { %v2258_v45 = vpop.permute.xlu1 %420 }
 0x4bd   : >> { %v2260_v16 = vpop.permute.xlu1 %424 }
 0x4be   : >> { %2742 = vst [vmem:[#allocation26_spill] sm:$0xff] %v2260_v16 }
 0x4c1   : >> { %v2262_v43 = vpop.permute.xlu1 %450 }
 0x4c5   : >> { %v2264_v60 = vpop.permute.xlu1 %454 }
 0x4c9   : >> { %v2266_v52 = vpop.permute.xlu1 %458 }
 0x4ca   : >> { %2743 = vst [vmem:[#allocation27_spill] sm:$0xff] %v2266_v52 }
 0x4cd   : >> { %v2268_v41 = vpop.permute.xlu1 %484 }
 0x4d1   : >> { %v2270_v42 = vpop.permute.xlu1 %488 }
 0x4d5   : >> { %v2272_v39 = vpop.permute.xlu1 %492 }
 0x4d6   : >> { %2744 = vst [vmem:[#allocation28_spill] sm:$0xff] %v2272_v39 }
 0x4d9   : >> { %v2274_v40 = vpop.permute.xlu1 %518 }
 0x4dd   : >> { %v2276_v37 = vpop.permute.xlu1 %522 }
 0x4e1   : >> { %v2280_v35 = vpop.permute.xlu1 %526 }
 0x4e2   : >> { %2746 = vst [vmem:[#allocation30_spill] sm:$0xff] %v2280_v35 }
 0x4e5   : >> { %v2284_v33 = vpop.permute.xlu1 %552 }
 0x4e6   : >> { %2748 = vst [vmem:[#allocation32_spill] sm:$0xff] %v2284_v33 }
 0x4e9   : >> { %v2286_v30 = vpop.permute.xlu1 %556 }
 0x4ea   : >> { %2749 = vst [vmem:[#allocation33_spill] sm:$0xff] %v2286_v30 }
 0x4ed   : >> { %v2288_v31 = vpop.permute.xlu1 %560 }
 0x4ee   : >> { %2750 = vst [vmem:[#allocation34_spill] sm:$0xff] %v2288_v31 }
 0x4f1   : >> { %v2290_v52 = vpop.permute.xlu1 %586 }
 0x4f2   : >> { %2751 = vst [vmem:[#allocation35_spill] sm:$0xff] %v2290_v52 }
 0x4f5   : >> { %v2292_v39 = vpop.permute.xlu1 %590 }
 0x4f6   : >> { %2752 = vst [vmem:[#allocation36_spill] sm:$0xff] %v2292_v39 }
 0x4f9   : >> { %v2294_v27 = vpop.permute.xlu1 %594 }
 0x4fa   : >> { %2753 = vst [vmem:[#allocation37_spill] sm:$0xff] %v2294_v27 }
 0x4fd   : >> { %v2296_v29 = vpop.permute.xlu1 %620 }
 0x4fe   : >> { %2754 = vst [vmem:[#allocation38_spill] sm:$0xff] %v2296_v29 }
 0x513   : >> { %v2278_v38 = vpop.permute.xlu0 %860 }
 0x514   : >> { %2745 = vst [vmem:[#allocation29_spill] sm:$0xff] %v2278_v38  ;;  %v2298_v38 = vpop.permute.xlu1 %624 }
 0x515   : >> { %2755 = vst [vmem:[#allocation39_spill] sm:$0xff] %v2298_v38 }
 0x517   : >> { %v2282_v36 = vpop.permute.xlu0 %864 }
 0x518   : >> { %2747 = vst [vmem:[#allocation31_spill] sm:$0xff] %v2282_v36  ;;  %v2300_v35 = vpop.permute.xlu1 %628 }
 0x519   : >> { %2756 = vst [vmem:[#allocation40_spill] sm:$0xff] %v2300_v35 }
 0x51b   : >> { %v879_v34 = vpop.permute.xlu0 %878 }
 0x51c   : >> { %1600 = vpush %v879_v34  ;;  %v2304_v16 = vpop.permute.xlu1 %654 }
 0x51d   : >> { %2757 = vst [vmem:[#allocation41_spill] sm:$0xff] %v2304_v16 }
 0x520   : >> { %v2312_v35 = vpop.permute.xlu1 %658 }
 0x521   : >> { %2758 = vst [vmem:[#allocation42_spill] sm:$0xff] %v2312_v35 }
 0x54d   : >> { %s1601_s28 = spop %1600 }
 0x54e   : >> { %v881_v36 = vstv %s1601_s28 }
 0x54f   : >> { %v882_v34 = vmul.f32 %v1937_v20, %v881_v36  ;;  %v883_v33 = vmul.f32 %v1939_v21, %v881_v36  ;;  %v884_v31 = vmul.f32 %v1943_v25, %v881_v36 }
 0x551   : >> { %894 = vrot.lane.b32.xlu0 %v883_v33, %s1805_s27  ;;  %892 = vrot.lane.b32.xlu1 %v882_v34, %s1805_s27  ;;  %v2318_v33 = vpop.permute.xlu1 %662 }
 0x552   : >> { %2759 = vst [vmem:[#allocation43_spill] sm:$0xff] %v2318_v33 }
 0x555   : >> { %946 = vrot.lane.b32.xlu0 %v1902_v6, %s1806_s29  ;;  %912 = vrot.lane.b32.xlu1 %v1902_v6, %s1807_s3  ;;  %v2328_v34 = vpop.permute.xlu1 %688 }
 0x556   : >> { %2760 = vst [vmem:[#allocation44_spill] sm:$0xff] %v2328_v34 }
 0x559   : >> { %1014 = vrot.lane.b32.xlu0 %v1902_v6, %s1808_s4  ;;  %980 = vrot.lane.b32.xlu1 %v1902_v6, %s1809_s5  ;;  %v2334_v33 = vpop.permute.xlu1 %692 }
 0x55a   : >> { %2761 = vst [vmem:[#allocation45_spill] sm:$0xff] %v2334_v33  ;;  %v885_v33 = vmul.f32 %v1945_v26, %v881_v36 }
 0x55d   : >> { %1082 = vrot.lane.b32.xlu0 %v1902_v6, %s1810_s6  ;;  %1048 = vrot.lane.b32.xlu1 %v1902_v6, %s1811_s7  ;;  %v2344_v27 = vpop.permute.xlu1 %696 }
 0x55e   : >> { %2762 = vst [vmem:[#allocation46_spill] sm:$0xff] %v2344_v27  ;;  %v886_v27 = vmul.f32 %v881_v36, %v1951_v32 }
 0x561   : >> { %1150 = vrot.lane.b32.xlu0 %v1902_v6, %s1812_s8  ;;  %1116 = vrot.lane.b32.xlu1 %v1902_v6, %s1813_s10  ;;  %v2350_v34 = vpop.permute.xlu1 %722 }
 0x562   : >> { %2763 = vst [vmem:[#allocation47_spill] sm:$0xff] %v2350_v34 }
 0x565   : >> { %1218 = vrot.lane.b32.xlu0 %v1902_v6, %s1814_s22  ;;  %1184 = vrot.lane.b32.xlu1 %v1902_v6, %s1815_s11  ;;  %v2357_v16 = vpop.permute.xlu1 %726 }
 0x566   : >> { %2764 = vst [vmem:[#allocation48_spill] sm:$0xff] %v2357_v16 }
 0x569   : >> { %1286 = vrot.lane.b32.xlu0 %v1902_v6, %s1816_s12  ;;  %1252 = vrot.lane.b32.xlu1 %v1902_v6, %s1817_s13  ;;  %v2360_v35 = vpop.permute.xlu1 %730 }
 0x56a   : >> { %2765 = vst [vmem:[#allocation49_spill] sm:$0xff] %v2360_v35 }
 0x56d   : >> { %1354 = vrot.lane.b32.xlu0 %v1902_v6, %s1818_s14  ;;  %1320 = vrot.lane.b32.xlu1 %v1902_v6, %s1819_s15  ;;  %v2362_v29 = vpop.permute.xlu1 %756 }
 0x56e   : >> { %2766 = vst [vmem:[#allocation50_spill] sm:$0xff] %v2362_v29 }
 0x571   : >> { %1422 = vrot.lane.b32.xlu0 %v1902_v6, %s1820_s17  ;;  %1388 = vrot.lane.b32.xlu1 %v1902_v6, %s1821_s18  ;;  %v2364_v6 = vpop.permute.xlu1 %760 }
 0x572   : >> { %2767 = vst [vmem:[#allocation51_spill] sm:$0xff] %v2364_v6 }
 0x575   : >> { %898 = vrot.lane.b32.xlu0 %v885_v33, %s1805_s27  ;;  %896 = vrot.lane.b32.xlu1 %v884_v31, %s1805_s27  ;;  %v2366_v34 = vpop.permute.xlu1 %764 }
 0x576   : >> { %2768 = vst [vmem:[#allocation52_spill] sm:$0xff] %v2366_v34 }
 0x579   : >> { %900 = vrot.lane.b32.xlu1 %v886_v27, %s1805_s27  ;;  %v2368_v38 = vpop.permute.xlu1 %790 }
 0x57a   : >> { %2769 = vst [vmem:[#allocation53_spill] sm:$0xff] %v2368_v38 }
 0x57d   : >> { %v2370_v52 = vpop.permute.xlu1 %794 }
 0x57e   : >> { %2770 = vst [vmem:[#allocation54_spill] sm:$0xff] %v2370_v52 }
 0x581   : >> { %v2372_v33 = vpop.permute.xlu1 %798 }
 0x582   : >> { %2771 = vst [vmem:[#allocation55_spill] sm:$0xff] %v2372_v33 }
 0x585   : >> { %v2374_v31 = vpop.permute.xlu1 %824 }
 0x586   : >> { %2772 = vst [vmem:[#allocation56_spill] sm:$0xff] %v2374_v31 }
 0x589   : >> { %v2376_v36 = vpop.permute.xlu1 %828 }
 0x58a   : >> { %2773 = vst [vmem:[#allocation57_spill] sm:$0xff] %v2376_v36 }
 0x58d   : >> { %v2378_v16 = vpop.permute.xlu1 %832 }
 0x58e   : >> { %2774 = vst [vmem:[#allocation58_spill] sm:$0xff] %v2378_v16 }
 0x591   : >> { %v2380_v27 = vpop.permute.xlu1 %858 }
 0x592   : >> { %2775 = vst [vmem:[#allocation59_spill] sm:$0xff] %v2380_v27 }
 0x595   : >> { %v2382_v35 = vpop.permute.xlu1 %862 }
 0x596   : >> { %2776 = vst [vmem:[#allocation60_spill] sm:$0xff] %v2382_v35 }
 0x599   : >> { %v2384_v29 = vpop.permute.xlu1 %866 }
 0x59a   : >> { %2777 = vst [vmem:[#allocation61_spill] sm:$0xff] %v2384_v29 }
 0x5c3   : >> { %v2386_v6 = vpop.permute.xlu0 %894  ;;  %v2388_v34 = vpop.permute.xlu1 %892 }
 0x5c4   : >> { %2778 = vst [vmem:[#allocation62_spill] sm:$0xff] %v2386_v6  ;;  %2779 = vst [vmem:[#allocation63_spill] sm:$0xff] %v2388_v34 }
 0x5c7   : >> { %v947_v38 = vpop.permute.xlu0 %946  ;;  %v913_v52 = vpop.permute.xlu1 %912 }
 0x5c8   : >> { %1602 = vpush %v913_v52 }
 0x5c9   : >> { %1604 = vpush %v947_v38 }
 0x5cb   : >> { %v1015_v33 = vpop.permute.xlu0 %1014  ;;  %v981_v31 = vpop.permute.xlu1 %980 }
 0x5cc   : >> { %1606 = vpush %v981_v31 }
 0x5cd   : >> { %1608 = vpush %v1015_v33 }
 0x5cf   : >> { %v1083_v36 = vpop.permute.xlu0 %1082  ;;  %v1049_v16 = vpop.permute.xlu1 %1048 }
 0x5d0   : >> { %1610 = vpush %v1049_v16 }
 0x5d1   : >> { %1612 = vpush %v1083_v36 }
 0x5d3   : >> { %v1151_v27 = vpop.permute.xlu0 %1150  ;;  %v1117_v35 = vpop.permute.xlu1 %1116 }
 0x5d4   : >> { %1614 = vpush %v1117_v35 }
 0x5d5   : >> { %1616 = vpush %v1151_v27 }
 0x5d7   : >> { %v1219_v29 = vpop.permute.xlu0 %1218  ;;  %v1185_v6 = vpop.permute.xlu1 %1184 }
 0x5d8   : >> { %1618 = vpush %v1185_v6 }
 0x5d9   : >> { %1620 = vpush %v1219_v29 }
 0x5db   : >> { %v1287_v34 = vpop.permute.xlu0 %1286  ;;  %v1253_v39 = vpop.permute.xlu1 %1252 }
 0x5dc   : >> { %1622 = vpush %v1253_v39 }
 0x5dd   : >> { %1624 = vpush %v1287_v34 }
 0x5df   : >> { %v1355_v38 = vpop.permute.xlu0 %1354  ;;  %v1321_v52 = vpop.permute.xlu1 %1320 }
 0x5e0   : >> { %1626 = vpush %v1321_v52 }
 0x5e1   : >> { %1628 = vpush %v1355_v38 }
 0x5e3   : >> { %v1389_v33 = vpop.permute.xlu1 %1388  ;;  %v1423_v31 = vpop.permute.xlu0 %1422 }
 0x5e4   : >> { %1630 = vpush %v1389_v33 }
 0x5e5   : >> { %1632 = vpush %v1423_v31 }
 0x5f9   : >> { %s1603_s20 = spop %1602 }
 0x5fa   : >> { %v915_v16 = vstv %s1603_s20  ;;  %s1605_s21 = spop %1604 }
 0x5fb   : >> { %v916_v35 = vmul.f32 %v1937_v20, %v915_v16  ;;  %v917_v36 = vmul.f32 %v1939_v21, %v915_v16  ;;  %v949_v29 = vstv %s1605_s21  ;;  %v918_v39 = vmul.f32 %v1943_v25, %v915_v16 }
 0x5fc   : >> { %v919_v34 = vmul.f32 %v1945_v26, %v915_v16  ;;  %v950_v6 = vmul.f32 %v1937_v20, %v949_v29  ;;  %v920_v27 = vmul.f32 %v915_v16, %v1951_v32  ;;  %v951_v38 = vmul.f32 %v1939_v21, %v949_v29 }
 0x5fd   : >> { %928 = vrot.lane.b32.xlu1 %v917_v36, %s1807_s3  ;;  %926 = vrot.lane.b32.xlu0 %v916_v35, %s1807_s3  ;;  %v952_v52 = vmul.f32 %v1943_v25, %v949_v29  ;;  %s1607_s23 = spop %1606  ;;  %v953_v31 = vmul.f32 %v1945_v26, %v949_v29  ;;  %v954_v35 = vmul.f32 %v949_v29, %v1951_v32 }
 0x5fe   : >> { %v983_v33 = vstv %s1607_s23  ;;  %s1609_s25 = spop %1608 }
 0x5ff   : >> { %v984_v16 = vmul.f32 %v1937_v20, %v983_v33  ;;  %v985_v36 = vmul.f32 %v1939_v21, %v983_v33 }
 0x601   : >> { %932 = vrot.lane.b32.xlu1 %v919_v34, %s1807_s3  ;;  %930 = vrot.lane.b32.xlu0 %v918_v39, %s1807_s3  ;;  %v1017_v39 = vstv %s1609_s25  ;;  %v986_v34 = vmul.f32 %v1943_v25, %v983_v33  ;;  %s1611_s26 = spop %1610 }
 0x602   : >> { %v1018_v29 = vmul.f32 %v1937_v20, %v1017_v39  ;;  %s1613_s27 = spop %1612 }
 0x605   : >> { %960 = vrot.lane.b32.xlu1 %v950_v6, %s1806_s29  ;;  %934 = vrot.lane.b32.xlu0 %v920_v27, %s1807_s3  ;;  %v987_v6 = vmul.f32 %v1945_v26, %v983_v33  ;;  %v988_v27 = vmul.f32 %v983_v33, %v1951_v32  ;;  %s1615_s28 = spop %1614 }
 0x609   : >> { %964 = vrot.lane.b32.xlu1 %v952_v52, %s1806_s29  ;;  %962 = vrot.lane.b32.xlu0 %v951_v38, %s1806_s29  ;;  %v1019_v38 = vmul.f32 %v1939_v21, %v1017_v39  ;;  %v1020_v52 = vmul.f32 %v1943_v25, %v1017_v39 }
 0x60d   : >> { %968 = vrot.lane.b32.xlu1 %v954_v35, %s1806_s29  ;;  %966 = vrot.lane.b32.xlu0 %v953_v31, %s1806_s29  ;;  %v1051_v31 = vstv %s1611_s26  ;;  %v1021_v35 = vmul.f32 %v1945_v26, %v1017_v39  ;;  %s1617_s29 = spop %1616 }
 0x60e   : >> { %v1052_v33 = vmul.f32 %v1937_v20, %v1051_v31  ;;  %s1619_s3 = spop %1618 }
 0x611   : >> { %996 = vrot.lane.b32.xlu1 %v985_v36, %s1809_s5  ;;  %994 = vrot.lane.b32.xlu0 %v984_v16, %s1809_s5  ;;  %v1022_v16 = vmul.f32 %v1017_v39, %v1951_v32  ;;  %v1053_v36 = vmul.f32 %v1939_v21, %v1051_v31 }
 0x615   : >> { %1000 = vrot.lane.b32.xlu1 %v987_v6, %s1809_s5  ;;  %998 = vrot.lane.b32.xlu0 %v986_v34, %s1809_s5  ;;  %v1085_v34 = vstv %s1613_s27  ;;  %v1054_v6 = vmul.f32 %v1943_v25, %v1051_v31 }
 0x616   : >> { %v1086_v39 = vmul.f32 %v1937_v20, %v1085_v34 }
 0x619   : >> { %1028 = vrot.lane.b32.xlu1 %v1018_v29, %s1808_s4  ;;  %1002 = vrot.lane.b32.xlu0 %v988_v27, %s1809_s5  ;;  %v1055_v29 = vmul.f32 %v1945_v26, %v1051_v31  ;;  %v1056_v27 = vmul.f32 %v1051_v31, %v1951_v32 }
 0x61d   : >> { %1032 = vrot.lane.b32.xlu1 %v1020_v52, %s1808_s4  ;;  %1030 = vrot.lane.b32.xlu0 %v1019_v38, %s1808_s4  ;;  %v1087_v38 = vmul.f32 %v1939_v21, %v1085_v34  ;;  %v1088_v52 = vmul.f32 %v1943_v25, %v1085_v34 }
 0x621   : >> { %1036 = vrot.lane.b32.xlu1 %v1022_v16, %s1808_s4  ;;  %1034 = vrot.lane.b32.xlu0 %v1021_v35, %s1808_s4  ;;  %v1119_v35 = vstv %s1615_s28  ;;  %v1089_v16 = vmul.f32 %v1945_v26, %v1085_v34 }
 0x622   : >> { %v1120_v31 = vmul.f32 %v1937_v20, %v1119_v35 }
 0x625   : >> { %1064 = vrot.lane.b32.xlu1 %v1053_v36, %s1811_s7  ;;  %1062 = vrot.lane.b32.xlu0 %v1052_v33, %s1811_s7  ;;  %v1090_v33 = vmul.f32 %v1085_v34, %v1951_v32  ;;  %v1121_v36 = vmul.f32 %v1939_v21, %v1119_v35 }
 0x629   : >> { %1068 = vrot.lane.b32.xlu1 %v1055_v29, %s1811_s7  ;;  %1066 = vrot.lane.b32.xlu0 %v1054_v6, %s1811_s7  ;;  %v1153_v6 = vstv %s1617_s29  ;;  %v1122_v29 = vmul.f32 %v1943_v25, %v1119_v35 }
 0x62a   : >> { %v1154_v34 = vmul.f32 %v1937_v20, %v1153_v6 }
 0x62d   : >> { %1096 = vrot.lane.b32.xlu1 %v1086_v39, %s1810_s6  ;;  %1070 = vrot.lane.b32.xlu0 %v1056_v27, %s1811_s7  ;;  %v1123_v39 = vmul.f32 %v1945_v26, %v1119_v35  ;;  %v1124_v27 = vmul.f32 %v1119_v35, %v1951_v32  ;;  %v1157_v35 = vmul.f32 %v1945_v26, %v1153_v6 }
 0x631   : >> { %1100 = vrot.lane.b32.xlu1 %v1088_v52, %s1810_s6  ;;  %1098 = vrot.lane.b32.xlu0 %v1087_v38, %s1810_s6  ;;  %v187_v38 = vstv %s1941_s24  ;;  %v1155_v52 = vmul.f32 %v1939_v21, %v1153_v6  ;;  %s1621_s24 = spop %1620 }
 0x632   : >> { %v191_v30 = vmul.f32 %v1945_v26, %v187_v38  ;;  %s1623_s4 = spop %1622 }
 0x633   : >> { %s1625_s5 = spop %1624 }
 0x635   : >> { %1104 = vrot.lane.b32.xlu1 %v1090_v33, %s1810_s6  ;;  %1102 = vrot.lane.b32.xlu0 %v1089_v16, %s1810_s6  ;;  %v1156_v16 = vmul.f32 %v1943_v25, %v1153_v6  ;;  %v190_v33 = vmul.f32 %v1943_v25, %v187_v38  ;;  %s1627_s6 = spop %1626 }
 0x636   : >> { %s1629_s7 = spop %1628 }
 0x639   : >> { %1132 = vrot.lane.b32.xlu1 %v1121_v36, %s1813_s10  ;;  %1130 = vrot.lane.b32.xlu0 %v1120_v31, %s1813_s10  ;;  %v188_v31 = vmul.f32 %v1937_v20, %v187_v38  ;;  %v1187_v36 = vstv %s1619_s3 }
 0x63d   : >> { %1136 = vrot.lane.b32.xlu1 %v1123_v39, %s1813_s10  ;;  %1134 = vrot.lane.b32.xlu0 %v1122_v29, %s1813_s10  ;;  %v1158_v29 = vmul.f32 %v1153_v6, %v1951_v32  ;;  %v195_v39 = vadd.f32 %v1770_v3, %v190_v33  ;;  %v192_v33 = vmul.f32 %v187_v38, %v1951_v32 }
 0x63f   : >> { %v229_v19 = vadd.f32 %v2191_v14, %v195_v39  ;;  %v1221_v14 = vstv %s1621_s24  ;;  %v1190_v39 = vmul.f32 %v1943_v25, %v1187_v36 }
 0x641   : >> { %1164 = vrot.lane.b32.xlu1 %v1154_v34, %s1812_s8  ;;  %1138 = vrot.lane.b32.xlu0 %v1124_v27, %s1813_s10  ;;  %v1188_v34 = vmul.f32 %v1937_v20, %v1187_v36  ;;  %v1189_v27 = vmul.f32 %v1939_v21, %v1187_v36  ;;  %v263_v3 = vadd.f32 %v2206_v51, %v229_v19 }
 0x645   : >> { %1168 = vrot.lane.b32.xlu1 %v1156_v16, %s1812_s8  ;;  %1166 = vrot.lane.b32.xlu0 %v1155_v52, %s1812_s8  ;;  %v189_v16 = vmul.f32 %v1939_v21, %v187_v38  ;;  %v193_v52 = vadd.f32 %v1778_v5, %v188_v31  ;;  %v297_v5 = vadd.f32 %v2222_v47, %v263_v3 }
 0x646   : >> { %v196_v31 = vadd.f32 %v1766_v2, %v191_v30 }
 0x647   : >> { %v227_v6 = vadd.f32 %v2069_v50, %v193_v52  ;;  %v1191_v50 = vmul.f32 %v1945_v26, %v1187_v36  ;;  %v331_v38 = vadd.f32 %v2235_v58, %v297_v5  ;;  %v1255_v52 = vstv %s1623_s4 }
 0x649   : >> { %1172 = vrot.lane.b32.xlu1 %v1158_v29, %s1812_s8  ;;  %1170 = vrot.lane.b32.xlu0 %v1157_v35, %s1812_s8  ;;  %v194_v35 = vadd.f32 %v1774_v4, %v189_v16  ;;  %v261_v29 = vadd.f32 %v2201_v46, %v227_v6  ;;  %v230_v4 = vadd.f32 %v2075_v53, %v196_v31  ;;  %s1631_s8 = spop %1630 }
 0x64a   : >> { %v1222_v46 = vmul.f32 %v1937_v20, %v1221_v14  ;;  %s1633_s10 = spop %1632 }
 0x64b   : >> { %v228_v19 = vadd.f32 %v2186_v8, %v194_v35  ;;  %v295_v51 = vadd.f32 %v2217_v22, %v261_v29  ;;  %v365_v8 = vadd.f32 %v2246_v0, %v331_v38  ;;  %v264_v58 = vadd.f32 %v2087_v57, %v230_v4  ;;  %v2781_v35 = vld [vmem:[#allocation2_spill] sm:$0xff]  ;;  %v2787_v38 = vld [vmem:[#allocation27_spill] sm:$0xff] }
 0x64c   : >> { %v2782_v29 = vld [vmem:[#allocation26_spill] sm:$0xff]  ;;  %v2789_v4 = vld [vmem:[#allocation35_spill] sm:$0xff] }
 0x64d   : >> { %1200 = vrot.lane.b32.xlu1 %v1189_v27, %s1815_s11  ;;  %1198 = vrot.lane.b32.xlu0 %v1188_v34, %s1815_s11  ;;  %v197_v34 = vadd.f32 %v1762_v1, %v192_v33  ;;  %v262_v2 = vadd.f32 %v2082_v55, %v228_v19  ;;  %v329_v30 = vadd.f32 %v2231_v12, %v295_v51  ;;  %v2780_v33 = vld [vmem:[#allocation33_spill] sm:$0xff]  ;;  %v2786_v19 = vld [vmem:[#allocation3_spill] sm:$0xff] }
 0x64e   : >> { %v1192_v1 = vmul.f32 %v1187_v36, %v1951_v32  ;;  %v399_v27 = vadd.f32 %v2252_v54, %v365_v8  ;;  %v298_v55 = vadd.f32 %v2096_v61, %v264_v58  ;;  %v1223_v54 = vmul.f32 %v1939_v21, %v1221_v14 }
 0x64f   : >> { %v231_v22 = vadd.f32 %v2197_v24, %v197_v34  ;;  %v296_v53 = vadd.f32 %v2092_v59, %v262_v2  ;;  %v363_v47 = vadd.f32 %v2244_v18, %v329_v30  ;;  %v2790_v2 = vld [vmem:[#allocation39_spill] sm:$0xff]  ;;  %v1289_v8 = vstv %s1625_s5 }
 0x650   : >> { %v433_v12 = vadd.f32 %v2258_v45, %v399_v27  ;;  %v332_v59 = vadd.f32 %v2104_v7, %v298_v55  ;;  %v1259_v27 = vmul.f32 %v1945_v26, %v1255_v52 }
 0x651   : >> { %1204 = vrot.lane.b32.xlu1 %v1191_v50, %s1815_s11  ;;  %1202 = vrot.lane.b32.xlu0 %v1190_v39, %s1815_s11  ;;  %v265_v16 = vadd.f32 %v2213_v62, %v231_v22  ;;  %v330_v24 = vadd.f32 %v2100_v63, %v296_v53  ;;  %v397_v57 = vadd.f32 %v2250_v56, %v363_v47  ;;  %v2785_v39 = vld [vmem:[#allocation36_spill] sm:$0xff]  ;;  %v2791_v22 = vld [vmem:[#allocation5_spill] sm:$0xff] }
 0x652   : >> { %v1224_v62 = vmul.f32 %v1943_v25, %v1221_v14  ;;  %v467_v36 = vadd.f32 %v2264_v60, %v433_v12  ;;  %v366_v63 = vadd.f32 %v2112_v11, %v332_v59  ;;  %v1226_v60 = vmul.f32 %v1221_v14, %v1951_v32  ;;  %v2795_v12 = vld [vmem:[#allocation42_spill] sm:$0xff] }
 0x653   : >> { %v299_v18 = vadd.f32 %v2229_v10, %v265_v16  ;;  %v364_v61 = vadd.f32 %v2108_v9, %v330_v24  ;;  %v431_v0 = vadd.f32 %v2256_v28, %v397_v57  ;;  %v1225_v28 = vmul.f32 %v1945_v26, %v1221_v14  ;;  %v2784_v14 = vld [vmem:[#allocation32_spill] sm:$0xff]  ;;  %v2794_v24 = vld [vmem:[#allocation38_spill] sm:$0xff] }
 0x654   : >> { %v501_v45 = vadd.f32 %v2270_v42, %v467_v36  ;;  %v400_v11 = vadd.f32 %v2120_v15, %v366_v63  ;;  %v1256_v42 = vmul.f32 %v1937_v20, %v1255_v52  ;;  %v1258_v47 = vmul.f32 %v1943_v25, %v1255_v52  ;;  %v2793_v16 = vld [vmem:[#allocation8_spill] sm:$0xff]  ;;  %v2798_v63 = vld [vmem:[#allocation10_spill] sm:$0xff] }
 0x655   : >> { %1232 = vrot.lane.b32.xlu1 %v1222_v46, %s1814_s22  ;;  %1206 = vrot.lane.b32.xlu0 %v1192_v1, %s1815_s11  ;;  %v333_v56 = vadd.f32 %v2240_v48, %v299_v18  ;;  %v398_v7 = vadd.f32 %v2116_v13, %v364_v61  ;;  %v465_v10 = vadd.f32 %v2262_v43, %v431_v0  ;;  %v2792_v1 = vld [vmem:[#allocation28_spill] sm:$0xff]  ;;  %v2796_v18 = vld [vmem:[#allocation7_spill] sm:$0xff]  ;;  %v897_v0 = vpop.permute.xlu1 %896 }
 0x656   : >> { %v535_v3 = vadd.f32 %v2276_v37, %v501_v45  ;;  %v1257_v43 = vmul.f32 %v1939_v21, %v1255_v52  ;;  %v1290_v36 = vmul.f32 %v1937_v20, %v1289_v8  ;;  %v2800_v45 = vld [vmem:[#allocation45_spill] sm:$0xff] }
 0x657   : >> { %v367_v9 = vadd.f32 %v2248_v44, %v333_v56  ;;  %v432_v48 = vadd.f32 %v2124_v17, %v398_v7  ;;  %v499_v6 = vadd.f32 %v2268_v41, %v465_v10  ;;  %v434_v41 = vadd.f32 %v2781_v35, %v400_v11  ;;  %v2799_v7 = vld [vmem:[#allocation41_spill] sm:$0xff]  ;;  %v2802_v11 = vld [vmem:[#allocation34_spill] sm:$0xff] }
 0x658   : >> { %v569_v17 = vadd.f32 %v2780_v33, %v535_v3  ;;  %v2803_v3 = vld [vmem:[#allocation12_spill] sm:$0xff]  ;;  %v2806_v33 = vld [vmem:[#allocation11_spill] sm:$0xff]  ;;  %v2807_v35 = vld [vmem:[#allocation37_spill] sm:$0xff] }
 0x659   : >> { %1236 = vrot.lane.b32.xlu1 %v1224_v62, %s1814_s22  ;;  %1234 = vrot.lane.b32.xlu0 %v1223_v54, %s1814_s22  ;;  %v401_v13 = vadd.f32 %v2254_v49, %v367_v9  ;;  %v466_v44 = vadd.f32 %v2132_v23, %v432_v48  ;;  %v533_v15 = vadd.f32 %v2274_v40, %v499_v6  ;;  %v2783_v49 = vld [vmem:[#allocation4_spill] sm:$0xff]  ;;  %v2788_v23 = vld [vmem:[#allocation6_spill] sm:$0xff] }
 0x65a   : >> { %v603_v50 = vadd.f32 %v2785_v39, %v569_v17  ;;  %v468_v51 = vadd.f32 %v2786_v19, %v434_v41  ;;  %v2797_v62 = vld [vmem:[#allocation30_spill] sm:$0xff]  ;;  %v1260_v6 = vmul.f32 %v1255_v52, %v1951_v32 }
 0x65b   : >> { %v435_v37 = vadd.f32 %v2782_v29, %v401_v13  ;;  %v500_v5 = vadd.f32 %v2783_v49, %v466_v44  ;;  %v567_v31 = vadd.f32 %v2784_v14, %v533_v15  ;;  %v2805_v44 = vld [vmem:[#allocation48_spill] sm:$0xff]  ;;  %v2808_v29 = vld [vmem:[#allocation14_spill] sm:$0xff]  ;;  %v2809_v49 = vld [vmem:[#allocation47_spill] sm:$0xff] }
 0x65c   : >> { %v637_v30 = vadd.f32 %v2790_v2, %v603_v50  ;;  %v502_v58 = vadd.f32 %v2791_v22, %v468_v51  ;;  %v2810_v14 = vld [vmem:[#allocation51_spill] sm:$0xff]  ;;  %v2812_v50 = vld [vmem:[#allocation40_spill] sm:$0xff]  ;;  %v2586_v51 = vpop.permute.xlu0 %898 }
 0x65d   : >> { %1240 = vrot.lane.b32.xlu1 %v1226_v60, %s1814_s22  ;;  %1238 = vrot.lane.b32.xlu0 %v1225_v28, %s1814_s22  ;;  %v469_v34 = vadd.f32 %v2787_v38, %v435_v37  ;;  %v534_v40 = vadd.f32 %v2788_v23, %v500_v5  ;;  %v601_v46 = vadd.f32 %v2789_v4, %v567_v31  ;;  %v2801_v28 = vld [vmem:[#allocation9_spill] sm:$0xff]  ;;  %v2588_v38 = vpop.permute.xlu1 %900 }
 0x65e   : >> { %v671_v59 = vadd.f32 %v2795_v12, %v637_v30  ;;  %v536_v54 = vadd.f32 %v2796_v18, %v502_v58  ;;  %v2811_v31 = vld [vmem:[#allocation13_spill] sm:$0xff]  ;;  %v1292_v23 = vmul.f32 %v1943_v25, %v1289_v8  ;;  %v2815_v30 = vld [vmem:[#allocation54_spill] sm:$0xff]  ;;  %v2816_v58 = vld [vmem:[#allocation15_spill] sm:$0xff] }
 0x65f   : >> { %v503_v53 = vadd.f32 %v2792_v1, %v469_v34  ;;  %v568_v55 = vadd.f32 %v2793_v16, %v534_v40  ;;  %v635_v57 = vadd.f32 %v2794_v24, %v601_v46  ;;  %v1291_v34 = vmul.f32 %v1939_v21, %v1289_v8  ;;  %v2813_v40 = vld [vmem:[#allocation16_spill] sm:$0xff]  ;;  %v2814_v46 = vld [vmem:[#allocation50_spill] sm:$0xff]  ;;  %v2821_v18 = vld [vmem:[#allocation17_spill] sm:$0xff] }
 0x660   : >> { %v705_v9 = vadd.f32 %v2800_v45, %v671_v59  ;;  %v570_v60 = vadd.f32 %v2801_v28, %v536_v54  ;;  %v1323_v59 = vstv %s1627_s6 }
 0x661   : >> { %1268 = vrot.lane.b32.xlu1 %v1257_v43, %s1817_s13  ;;  %1266 = vrot.lane.b32.xlu0 %v1256_v42, %s1817_s13  ;;  %v537_v61 = vadd.f32 %v2797_v62, %v503_v53  ;;  %v602_v56 = vadd.f32 %v2798_v63, %v568_v55  ;;  %v669_v10 = vadd.f32 %v2799_v7, %v635_v57  ;;  %v2804_v42 = vld [vmem:[#allocation44_spill] sm:$0xff]  ;;  %v2817_v53 = vld [vmem:[#allocation43_spill] sm:$0xff]  ;;  %v2819_v55 = vld [vmem:[#allocation53_spill] sm:$0xff] }
 0x662   : >> { %v739_v15 = vadd.f32 %v2805_v44, %v705_v9  ;;  %v604_v17 = vadd.f32 %v2806_v33, %v570_v60  ;;  %v2820_v57 = vld [vmem:[#allocation57_spill] sm:$0xff]  ;;  %v1293_v62 = vmul.f32 %v1945_v26, %v1289_v8  ;;  %v2824_v9 = vld [vmem:[#allocation56_spill] sm:$0xff] }
 0x663   : >> { %v571_v48 = vadd.f32 %v2802_v11, %v537_v61  ;;  %v636_v13 = vadd.f32 %v2803_v3, %v602_v56  ;;  %v703_v43 = vadd.f32 %v2804_v42, %v669_v10  ;;  %v1294_v61 = vmul.f32 %v1289_v8, %v1951_v32  ;;  %v2822_v56 = vld [vmem:[#allocation46_spill] sm:$0xff]  ;;  %v2823_v10 = vld [vmem:[#allocation20_spill] sm:$0xff] }
 0x664   : >> { %v773_v52 = vadd.f32 %v2810_v14, %v739_v15  ;;  %v638_v39 = vadd.f32 %v2811_v31, %v604_v17  ;;  %v2825_v60 = vld [vmem:[#allocation60_spill] sm:$0xff]  ;;  %v1324_v3 = vmul.f32 %v1937_v20, %v1323_v59  ;;  %v1325_v8 = vmul.f32 %v1939_v21, %v1323_v59  ;;  %v2829_v15 = vld [vmem:[#allocation59_spill] sm:$0xff] }
 0x665   : >> { %1272 = vrot.lane.b32.xlu1 %v1259_v27, %s1817_s13  ;;  %1270 = vrot.lane.b32.xlu0 %v1258_v47, %s1817_s13  ;;  %v605_v41 = vadd.f32 %v2807_v35, %v571_v48  ;;  %v670_v37 = vadd.f32 %v2808_v29, %v636_v13  ;;  %v737_v5 = vadd.f32 %v2809_v49, %v703_v43  ;;  %v2818_v27 = vld [vmem:[#allocation18_spill] sm:$0xff]  ;;  %v2826_v48 = vld [vmem:[#allocation19_spill] sm:$0xff]  ;;  %v2827_v13 = vld [vmem:[#allocation49_spill] sm:$0xff] }
 0x666   : >> { %v807_v22 = vadd.f32 %v2815_v30, %v773_v52  ;;  %v672_v1 = vadd.f32 %v2816_v58, %v638_v39  ;;  %v2828_v43 = vld [vmem:[#allocation22_spill] sm:$0xff]  ;;  %v2830_v35 = vld [vmem:[#allocation21_spill] sm:$0xff]  ;;  %v2831_v49 = vld [vmem:[#allocation52_spill] sm:$0xff]  ;;  %v1326_v30 = vmul.f32 %v1943_v25, %v1323_v59 }
 0x667   : >> { %v639_v19 = vadd.f32 %v2812_v50, %v605_v41  ;;  %v704_v4 = vadd.f32 %v2813_v40, %v670_v37  ;;  %v771_v2 = vadd.f32 %v2814_v46, %v737_v5  ;;  %v2832_v14 = vld [vmem:[#allocation24_spill] sm:$0xff]  ;;  %v2833_v31 = vld [vmem:[#allocation63_spill] sm:$0xff]  ;;  %v2836_v40 = vld [vmem:[#allocation29_spill] sm:$0xff] }
 0x668   : >> { %v841_v12 = vadd.f32 %v2820_v57, %v807_v22  ;;  %v706_v54 = vadd.f32 %v2821_v18, %v672_v1  ;;  %v1327_v22 = vmul.f32 %v1945_v26, %v1323_v59  ;;  %v2840_v18 = vld [vmem:[#allocation31_spill] sm:$0xff] }
 0x669   : >> { %1300 = vrot.lane.b32.xlu1 %v1290_v36, %s1816_s12  ;;  %1274 = vrot.lane.b32.xlu0 %v1260_v6, %s1817_s13  ;;  %v673_v47 = vadd.f32 %v2817_v53, %v639_v19  ;;  %v738_v16 = vadd.f32 %v2818_v27, %v704_v4  ;;  %v805_v24 = vadd.f32 %v2819_v55, %v771_v2  ;;  %v2834_v19 = vld [vmem:[#allocation23_spill] sm:$0xff]  ;;  %v1357_v2 = vstv %s1629_s7  ;;  %v2837_v53 = vld [vmem:[#allocation25_spill] sm:$0xff]  ;;  %v2838_v27 = vld [vmem:[#allocation58_spill] sm:$0xff] }
 0x66a   : >> { %v875_v11 = vadd.f32 %v2825_v60, %v841_v12  ;;  %v740_v6 = vadd.f32 %v2826_v48, %v706_v54  ;;  %v2839_v55 = vld [vmem:[#allocation62_spill] sm:$0xff]  ;;  %v1358_v12 = vmul.f32 %v1937_v20, %v1357_v2 }
 0x66b   : >> { %v707_v7 = vadd.f32 %v2822_v56, %v673_v47  ;;  %v772_v45 = vadd.f32 %v2823_v10, %v738_v16  ;;  %v839_v28 = vadd.f32 %v2824_v9, %v805_v24  ;;  %v1328_v56 = vmul.f32 %v1323_v59, %v1951_v32 }
 0x66c   : >> { %v909_v17 = vadd.f32 %v897_v0, %v875_v11  ;;  %v774_v41 = vadd.f32 %v2830_v35, %v740_v6  ;;  %v1359_v6 = vmul.f32 %v1939_v21, %v1357_v2 }
 0x66d   : >> { %1304 = vrot.lane.b32.xlu1 %v1292_v23, %s1816_s12  ;;  %1302 = vrot.lane.b32.xlu0 %v1291_v34, %s1816_s12  ;;  %v741_v42 = vadd.f32 %v2827_v13, %v707_v7  ;;  %v806_v44 = vadd.f32 %v2828_v43, %v772_v45  ;;  %v873_v33 = vadd.f32 %v2829_v15, %v839_v28  ;;  %v2835_v23 = vld [vmem:[#allocation55_spill] sm:$0xff] }
 0x66e   : >> { %v808_v34 = vadd.f32 %v2834_v19, %v774_v41 }
 0x66f   : >> { %v927_v36 = vpop.permute.xlu0 %926  ;;  %v929_v63 = vpop.permute.xlu1 %928  ;;  %v775_v5 = vadd.f32 %v2831_v49, %v741_v42  ;;  %v840_v52 = vadd.f32 %v2832_v14, %v806_v44  ;;  %v907_v39 = vadd.f32 %v2833_v31, %v873_v33  ;;  %v1362_v42 = vmul.f32 %v1357_v2, %v1951_v32 }
 0x670   : >> { %v842_v47 = vadd.f32 %v2837_v53, %v808_v34 }
 0x671   : >> { %1308 = vrot.lane.b32.xlu1 %v1294_v61, %s1816_s12  ;;  %1306 = vrot.lane.b32.xlu0 %v1293_v62, %s1816_s12  ;;  %v809_v0 = vadd.f32 %v2835_v23, %v775_v5  ;;  %v874_v4 = vadd.f32 %v2836_v40, %v840_v52  ;;  %v941_v46 = vadd.f32 %v927_v36, %v907_v39  ;;  %v2841_v62 = vld [vmem:[#allocation61_spill] sm:$0xff]  ;;  %v1425_v5 = vstv %s1633_s10 }
 0x672   : >> { %v876_v54 = vadd.f32 %v2840_v18, %v842_v47  ;;  %v1426_v34 = vmul.f32 %v1937_v20, %v1425_v5  ;;  %v1429_v53 = vmul.f32 %v1945_v26, %v1425_v5  ;;  %v1430_v47 = vmul.f32 %v1425_v5, %v1951_v32 }
 0x673   : >> { %v931_v29 = vpop.permute.xlu0 %930  ;;  %v933_v37 = vpop.permute.xlu1 %932  ;;  %v843_v16 = vadd.f32 %v2838_v27, %v809_v0  ;;  %v908_v24 = vadd.f32 %v2839_v55, %v874_v4 }
 0x674   : >> { %v943_v50 = vadd.f32 %v931_v29, %v909_v17  ;;  %v910_v45 = vadd.f32 %v2586_v51, %v876_v54  ;;  %v1391_v51 = vstv %s1631_s8 }
 0x675   : >> { %1336 = vrot.lane.b32.xlu1 %v1325_v8, %s1819_s15  ;;  %1334 = vrot.lane.b32.xlu0 %v1324_v3, %s1819_s15  ;;  %v877_v61 = vadd.f32 %v2841_v62, %v843_v16  ;;  %v942_v36 = vadd.f32 %v929_v63, %v908_v24  ;;  %v1360_v63 = vmul.f32 %v1943_v25, %v1357_v2 }
 0x676   : >> { %v944_v11 = vadd.f32 %v933_v37, %v910_v45  ;;  %v1392_v17 = vmul.f32 %v1937_v20, %v1391_v51  ;;  %v1393_v35 = vmul.f32 %v1939_v21, %v1391_v51  ;;  %v1394_v14 = vmul.f32 %v1943_v25, %v1391_v51 }
 0x677   : >> { %v935_v58 = vpop.permute.xlu0 %934  ;;  %v961_v1 = vpop.permute.xlu1 %960  ;;  %v911_v9 = vadd.f32 %v2588_v38, %v877_v61  ;;  %v1361_v38 = vmul.f32 %v1945_v26, %v1357_v2  ;;  %v1395_v52 = vmul.f32 %v1945_v26, %v1391_v51  ;;  %v1396_v23 = vmul.f32 %v1391_v51, %v1951_v32 }
 0x678   : >> { %v975_v57 = vadd.f32 %v961_v1, %v941_v46  ;;  %v1427_v2 = vmul.f32 %v1939_v21, %v1425_v5 }
 0x679   : >> { %1340 = vrot.lane.b32.xlu1 %v1327_v22, %s1819_s15  ;;  %1338 = vrot.lane.b32.xlu0 %v1326_v30, %s1819_s15  ;;  %v945_v48 = vadd.f32 %v935_v58, %v911_v9  ;;  %v1428_v30 = vmul.f32 %v1943_v25, %v1425_v5 }
 0x67b   : >> { %v963_v7 = vpop.permute.xlu0 %962  ;;  %v965_v10 = vpop.permute.xlu1 %964 }
 0x67c   : >> { %v976_v28 = vadd.f32 %v963_v7, %v942_v36  ;;  %v977_v60 = vadd.f32 %v965_v10, %v943_v50 }
 0x67d   : >> { %1368 = vrot.lane.b32.xlu1 %v1358_v12, %s1818_s14  ;;  %1342 = vrot.lane.b32.xlu0 %v1328_v56, %s1819_s15 }
 0x67f   : >> { %v967_v3 = vpop.permute.xlu0 %966  ;;  %v969_v59 = vpop.permute.xlu1 %968 }
 0x680   : >> { %v978_v8 = vadd.f32 %v967_v3, %v944_v11  ;;  %v979_v13 = vadd.f32 %v969_v59, %v945_v48 }
 0x681   : >> { %1372 = vrot.lane.b32.xlu1 %v1360_v63, %s1818_s14  ;;  %1370 = vrot.lane.b32.xlu0 %v1359_v6, %s1818_s14 }
 0x683   : >> { %v995_v43 = vpop.permute.xlu0 %994  ;;  %v997_v44 = vpop.permute.xlu1 %996 }
 0x684   : >> { %v1009_v15 = vadd.f32 %v995_v43, %v975_v57  ;;  %v1010_v33 = vadd.f32 %v997_v44, %v976_v28 }
 0x685   : >> { %1376 = vrot.lane.b32.xlu1 %v1362_v42, %s1818_s14  ;;  %1374 = vrot.lane.b32.xlu0 %v1361_v38, %s1818_s14 }
 0x687   : >> { %v999_v41 = vpop.permute.xlu0 %998  ;;  %v1001_v29 = vpop.permute.xlu1 %1000 }
 0x688   : >> { %v1011_v37 = vadd.f32 %v999_v41, %v977_v60  ;;  %v1012_v49 = vadd.f32 %v1001_v29, %v978_v8 }
 0x689   : >> { %1404 = vrot.lane.b32.xlu1 %v1393_v35, %s1821_s18  ;;  %1402 = vrot.lane.b32.xlu0 %v1392_v17, %s1821_s18 }
 0x68b   : >> { %v1003_v31 = vpop.permute.xlu0 %1002  ;;  %v1029_v39 = vpop.permute.xlu1 %1028 }
 0x68c   : >> { %v1013_v50 = vadd.f32 %v1003_v31, %v979_v13  ;;  %v1043_v19 = vadd.f32 %v1029_v39, %v1009_v15 }
 0x68d   : >> { %1408 = vrot.lane.b32.xlu1 %v1395_v52, %s1821_s18  ;;  %1406 = vrot.lane.b32.xlu0 %v1394_v14, %s1821_s18 }
 0x68f   : >> { %v1031_v0 = vpop.permute.xlu0 %1030  ;;  %v1033_v40 = vpop.permute.xlu1 %1032 }
 0x690   : >> { %v1044_v4 = vadd.f32 %v1031_v0, %v1010_v33  ;;  %v1045_v46 = vadd.f32 %v1033_v40, %v1011_v37 }
 0x691   : >> { %1436 = vrot.lane.b32.xlu1 %v1426_v34, %s1820_s17  ;;  %1410 = vrot.lane.b32.xlu0 %v1396_v23, %s1821_s18 }
 0x693   : >> { %v1035_v22 = vpop.permute.xlu0 %1034  ;;  %v1037_v20 = vpop.permute.xlu1 %1036 }
 0x694   : >> { %v1046_v58 = vadd.f32 %v1035_v22, %v1012_v49  ;;  %v1047_v1 = vadd.f32 %v1037_v20, %v1013_v50 }
 0x695   : >> { %1440 = vrot.lane.b32.xlu1 %v1428_v30, %s1820_s17  ;;  %1438 = vrot.lane.b32.xlu0 %v1427_v2, %s1820_s17 }
 0x697   : >> { %v1063_v27 = vpop.permute.xlu0 %1062  ;;  %v1065_v16 = vpop.permute.xlu1 %1064 }
 0x698   : >> { %v1077_v55 = vadd.f32 %v1063_v27, %v1043_v19  ;;  %v1078_v24 = vadd.f32 %v1065_v16, %v1044_v4 }
 0x699   : >> { %1444 = vrot.lane.b32.xlu1 %v1430_v47, %s1820_s17  ;;  %1442 = vrot.lane.b32.xlu0 %v1429_v53, %s1820_s17 }
 0x69b   : >> { %v1067_v21 = vpop.permute.xlu0 %1066  ;;  %v1069_v25 = vpop.permute.xlu1 %1068 }
 0x69c   : >> { %v1079_v57 = vadd.f32 %v1067_v21, %v1045_v46  ;;  %v1080_v12 = vadd.f32 %v1069_v25, %v1046_v58 }
 0x69f   : >> { %v1071_v18 = vpop.permute.xlu0 %1070  ;;  %v1097_v54 = vpop.permute.xlu1 %1096 }
 0x6a0   : >> { %v1081_v62 = vadd.f32 %v1071_v18, %v1047_v1  ;;  %v1111_v61 = vadd.f32 %v1097_v54, %v1077_v55 }
 0x6a3   : >> { %v1099_v36 = vpop.permute.xlu0 %1098  ;;  %v1101_v26 = vpop.permute.xlu1 %1100 }
 0x6a4   : >> { %v1112_v56 = vadd.f32 %v1099_v36, %v1078_v24  ;;  %v1113_v32 = vadd.f32 %v1101_v26, %v1079_v57 }
 0x6a7   : >> { %v1103_v7 = vpop.permute.xlu0 %1102  ;;  %v1105_v10 = vpop.permute.xlu1 %1104 }
 0x6a8   : >> { %v1114_v45 = vadd.f32 %v1103_v7, %v1080_v12  ;;  %v1115_v9 = vadd.f32 %v1105_v10, %v1081_v62 }
 0x6ab   : >> { %v1131_v28 = vpop.permute.xlu0 %1130  ;;  %v1133_v60 = vpop.permute.xlu1 %1132 }
 0x6ac   : >> { %v1145_v11 = vadd.f32 %v1131_v28, %v1111_v61  ;;  %v1146_v48 = vadd.f32 %v1133_v60, %v1112_v56 }
 0x6af   : >> { %v1135_v6 = vpop.permute.xlu0 %1134  ;;  %v1137_v63 = vpop.permute.xlu1 %1136 }
 0x6b0   : >> { %v1147_v3 = vadd.f32 %v1135_v6, %v1113_v32  ;;  %v1148_v59 = vadd.f32 %v1137_v63, %v1114_v45 }
 0x6b3   : >> { %v1139_v8 = vpop.permute.xlu0 %1138  ;;  %v1165_v13 = vpop.permute.xlu1 %1164 }
 0x6b4   : >> { %v1149_v51 = vadd.f32 %v1139_v8, %v1115_v9  ;;  %v1179_v38 = vadd.f32 %v1165_v13, %v1145_v11 }
 0x6b7   : >> { %v1167_v42 = vpop.permute.xlu0 %1166  ;;  %v1169_v43 = vpop.permute.xlu1 %1168 }
 0x6b8   : >> { %v1180_v44 = vadd.f32 %v1167_v42, %v1146_v48  ;;  %v1181_v15 = vadd.f32 %v1169_v43, %v1147_v3 }
 0x6bb   : >> { %v1171_v33 = vpop.permute.xlu0 %1170  ;;  %v1173_v17 = vpop.permute.xlu1 %1172 }
 0x6bc   : >> { %v1182_v35 = vadd.f32 %v1171_v33, %v1148_v59  ;;  %v1183_v41 = vadd.f32 %v1173_v17, %v1149_v51 }
 0x6bf   : >> { %v1199_v29 = vpop.permute.xlu0 %1198  ;;  %v1201_v37 = vpop.permute.xlu1 %1200 }
 0x6c0   : >> { %v1213_v21 = vadd.f32 %v1199_v29, %v1179_v38  ;;  %v1214_v18 = vadd.f32 %v1201_v37, %v1180_v44 }
 0x6c3   : >> { %v1203_v49 = vpop.permute.xlu0 %1202  ;;  %v1205_v5 = vpop.permute.xlu1 %1204 }
 0x6c4   : >> { %v1215_v54 = vadd.f32 %v1203_v49, %v1181_v15  ;;  %v1216_v7 = vadd.f32 %v1205_v5, %v1182_v35 }
 0x6c7   : >> { %v1207_v14 = vpop.permute.xlu0 %1206  ;;  %v1233_v52 = vpop.permute.xlu1 %1232 }
 0x6c8   : >> { %v1247_v12 = vadd.f32 %v1233_v52, %v1213_v21  ;;  %v1217_v10 = vadd.f32 %v1207_v14, %v1183_v41 }
 0x6cb   : >> { %v1235_v31 = vpop.permute.xlu0 %1234  ;;  %v1237_v39 = vpop.permute.xlu1 %1236 }
 0x6cc   : >> { %v1248_v26 = vadd.f32 %v1235_v31, %v1214_v18  ;;  %v1249_v56 = vadd.f32 %v1237_v39, %v1215_v54 }
 0x6cf   : >> { %v1239_v50 = vpop.permute.xlu0 %1238  ;;  %v1241_v19 = vpop.permute.xlu1 %1240 }
 0x6d0   : >> { %v1250_v60 = vadd.f32 %v1239_v50, %v1216_v7  ;;  %v1251_v6 = vadd.f32 %v1241_v19, %v1217_v10 }
 0x6d3   : >> { %v1267_v34 = vpop.permute.xlu0 %1266  ;;  %v1269_v23 = vpop.permute.xlu1 %1268 }
 0x6d4   : >> { %v1281_v62 = vadd.f32 %v1267_v34, %v1247_v12  ;;  %v1282_v45 = vadd.f32 %v1269_v23, %v1248_v26 }
 0x6d7   : >> { %v1271_v0 = vpop.permute.xlu0 %1270  ;;  %v1273_v40 = vpop.permute.xlu1 %1272 }
 0x6d8   : >> { %v1283_v9 = vadd.f32 %v1271_v0, %v1249_v56  ;;  %v1284_v8 = vadd.f32 %v1273_v40, %v1250_v60 }
 0x6db   : >> { %v1275_v4 = vpop.permute.xlu0 %1274  ;;  %v1301_v46 = vpop.permute.xlu1 %1300 }
 0x6dc   : >> { %v1315_v32 = vadd.f32 %v1301_v46, %v1281_v62  ;;  %v1285_v13 = vadd.f32 %v1275_v4, %v1251_v6 }
 0x6df   : >> { %v1303_v2 = vpop.permute.xlu0 %1302  ;;  %v1305_v30 = vpop.permute.xlu1 %1304 }
 0x6e0   : >> { %v1316_v63 = vadd.f32 %v1303_v2, %v1282_v45  ;;  %v1317_v3 = vadd.f32 %v1305_v30, %v1283_v9 }
 0x6e3   : >> { %v1307_v22 = vpop.permute.xlu0 %1306  ;;  %v1309_v20 = vpop.permute.xlu1 %1308 }
 0x6e4   : >> { %v1318_v43 = vadd.f32 %v1307_v22, %v1284_v8  ;;  %v1319_v33 = vadd.f32 %v1309_v20, %v1285_v13  ;;  %v1456_v22 = vld [vmem:[%s2717_s2] sm:$0xff] (%p162_p5)  ;;  %v1457_v20 = vld [vmem:[%s2717_s2 + $0x8] sm:$0xff] (%p162_p5) }
 0x6e7   : >> { %v1335_v58 = vpop.permute.xlu0 %1334  ;;  %v1337_v1 = vpop.permute.xlu1 %1336 }
 0x6e8   : >> { %v1349_v28 = vadd.f32 %v1335_v58, %v1315_v32  ;;  %v1350_v51 = vadd.f32 %v1337_v1, %v1316_v63  ;;  %v1458_v58 = vld [vmem:[%s2717_s2 + $0x10] sm:$0xff] (%p162_p5) }
 0x6eb   : >> { %v1339_v53 = vpop.permute.xlu0 %1338  ;;  %v1341_v47 = vpop.permute.xlu1 %1340 }
 0x6ec   : >> { %v1351_v38 = vadd.f32 %v1339_v53, %v1317_v3  ;;  %v1352_v29 = vadd.f32 %v1341_v47, %v1318_v43 }
 0x6ef   : >> { %v1343_v27 = vpop.permute.xlu0 %1342  ;;  %v1369_v16 = vpop.permute.xlu1 %1368 }
 0x6f0   : >> { %v1383_v59 = vadd.f32 %v1369_v16, %v1349_v28  ;;  %v1353_v37 = vadd.f32 %v1343_v27, %v1319_v33  ;;  %v1459_v16 = vld [vmem:[%s2717_s2 + $0x18] sm:$0xff] (%p162_p5) }
 0x6f3   : >> { %v1371_v55 = vpop.permute.xlu0 %1370  ;;  %v1373_v24 = vpop.permute.xlu1 %1372 }
 0x6f4   : >> { %v1384_v17 = vadd.f32 %v1371_v55, %v1350_v51  ;;  %v1385_v35 = vadd.f32 %v1373_v24, %v1351_v38 }
 0x6f7   : >> { %v1375_v25 = vpop.permute.xlu0 %1374  ;;  %v1377_v57 = vpop.permute.xlu1 %1376 }
 0x6f8   : >> { %v1386_v31 = vadd.f32 %v1375_v25, %v1352_v29  ;;  %v1387_v39 = vadd.f32 %v1377_v57, %v1353_v37 }
 0x6fb   : >> { %v1403_v61 = vpop.permute.xlu0 %1402  ;;  %v1405_v36 = vpop.permute.xlu1 %1404 }
 0x6fc   : >> { %v1417_v42 = vadd.f32 %v1403_v61, %v1383_v59  ;;  %v1418_v49 = vadd.f32 %v1405_v36, %v1384_v17 }
 0x6ff   : >> { %v1407_v11 = vpop.permute.xlu0 %1406  ;;  %v1409_v48 = vpop.permute.xlu1 %1408 }
 0x700   : >> { %v1419_v5 = vadd.f32 %v1407_v11, %v1385_v35  ;;  %v1420_v34 = vadd.f32 %v1409_v48, %v1386_v31 }
 0x703   : >> { %v1411_v44 = vpop.permute.xlu0 %1410  ;;  %v1437_v15 = vpop.permute.xlu1 %1436 }
 0x704   : >> { %v1451_v41 = vadd.f32 %v1437_v15, %v1417_v42   ;;  %v1421_v23 = vadd.f32 %v1411_v44, %v1387_v39 }
 0x706   : > { %v1461_v53 = vadd.f32 (%p162_p5), %v1456_v22, %v1451_v41 }
 0x707   : >> { %v1439_v14 = vpop.permute.xlu0 %1438  ;;  %v1441_v52 = vpop.permute.xlu1 %1440 }
 0x708   : >> { %v1452_v50 = vadd.f32 %v1439_v14, %v1418_v49   ;;  %v1453_v19 = vadd.f32 %v1441_v52, %v1419_v5   ;;  %v2846_v5 = vmov %v1451_v41  ;;  %164 = sbr.rel (!%p162_p5) target bundleno = 23 (0x17), region = 70  ;;  %1467 = vst.msk [vmem:[%s2717_s2] sm:$0xff] (%p162_p5), %vm1466_vm2, %v1461_v53 }
 0x70a   : >> { %v2844_v3 = vmov %v1453_v19  ;;  %v2845_v4 = vmov %v1452_v50  ;;  %v1462_v47 = vadd.f32 (%p162_p5), %v1457_v20, %v1452_v50  ;;  %v1463_v27 = vadd.f32 (%p162_p5), %v1458_v58, %v1453_v19 }
 0x70b   : >> { %v1443_v0 = vpop.permute.xlu0 %1442  ;;  %v1445_v40 = vpop.permute.xlu1 %1444  ;;  %v1460_v4 = vld [vmem:[%s2717_s2 + $0x20] sm:$0x3f] (%p162_p5) }
 0x70c   : >> { %v1454_v46 = vadd.f32 %v1443_v0, %v1420_v34   ;;  %v1455_v30 = vadd.f32 %v1445_v40, %v1421_v23   ;;  %1468 = vst.msk [vmem:[%s2717_s2 + $0x8] sm:$0xff] (%p162_p5), %vm1466_vm2, %v1462_v47  ;;  %1469 = vst.msk [vmem:[%s2717_s2 + $0x10] sm:$0xff] (%p162_p5), %vm1466_vm2, %v1463_v27 }
 0x70e   : >> { %v2842_v1 = vmov %v1455_v30  ;;  %v2843_v2 = vmov %v1454_v46 }
 0x70f   : > { %v1464_v2 = vadd.f32 %v1459_v16, %v1454_v46  ;;  %v1465_v1 = vadd.f32 %v1460_v4, %v1455_v30 }
 0x711   : > { %1470 = vst.msk [vmem:[%s2717_s2 + $0x18] sm:$0xff] %vm1466_vm2, %v1464_v2 }
 0x712   : > { %1472 = vst.msk [vmem:[%s2717_s2 + $0x20] sm:$0x3f] %vm1471_vm3, %v1465_v1 }
 0x713 PF: > { %s12_s9 = sadd.s32 1, %s1758_s9  }
 0x714   : > { %p9_p6 = scmp.ge.s32.totalorder %s12_s9, 40  }
 0x716   :  { %11 = sbr.rel (!%p9_p6) target bundleno = 1 (0x1), region = 81 }

// kernel: net_forward.11
= control target key start
LH: loop header
LB: loop body
LE: loop exit
PB: predicated region body
PF: predicated region fallthrough
CT: control target
= control target key end

     0   :  { %s887_s9 = smov 0   ;;  %s1155_s0 = inlined_call_operand.vmem [shape: bf16[13,108,38,128], index: 0, kind: input, shape index: {}]   ;;  %s1156_s1 = inlined_call_operand.vmem [shape: f32[13,108,128], index: 1, kind: input, shape index: {}]   ;;  %s1157_s2 = inlined_call_operand.vmem [shape: f32[38,38], index: 2, kind: output, shape index: {}]  }
   0x1 LB: > { %s686_s10 = sadd.s32 4294967295, %s833_s9   ;;  %p689_p0 = scmp.ge.s32.totalorder %s833_s9, 1  ;;  %s833_s9 = sphi %s887_s9, %s12_s9  }
   0x2   : > { %p117_p1 = scmp.lt.s32.totalorder %s833_s9, 14 }
   0x4   : > { %p118_p2 = pnand %p689_p0, %p117_p1 }
   0x5   : > { %p139_p3 = scmp.lt.s32.totalorder (!%p118_p2), %s686_s10, 12  ;;  %p692_p4 = scmp.ne.s32.totalorder (!%p118_p2), %s686_s10, 0 }
   0x6   : > { %121 = sbr.rel (%p118_p2) target bundleno = 430 (0x1ae), region = 28 }
   0xd   : > { %s140_s11 = scalar_select %p139_p3, %s686_s10, 12 }
   0xe   : > { %152 = sbr.rel (%p692_p4) target bundleno = 21 (0x15), region = 32  ;;  %vm153_vm0 = vcmask (!%p692_p4), 310272   ;;  %vm158_vm1 = vcmask (!%p692_p4), 308224   ;;  %v859_v0 = vmov (!%p692_p4), 0.0  }
   0xf   : > { %s706_s12 = smul.u32 2160, %s140_s11  ;;  %154 = vst.msk [vmem:[%s1157_s2] sm:$0xff] (!%p692_p4), %vm153_vm0, %v859_v0  ;;  %155 = vst.msk [vmem:[%s1157_s2 + $0x8] sm:$0xff] (!%p692_p4), %vm153_vm0, %v859_v0 }
  0x10   : > { %s707_s13 = smul.u32 112, %s140_s11  ;;  %156 = vst.msk [vmem:[%s1157_s2 + $0x10] sm:$0xff] (!%p692_p4), %vm153_vm0, %v859_v0  ;;  %157 = vst.msk [vmem:[%s1157_s2 + $0x18] sm:$0xff] (!%p692_p4), %vm153_vm0, %v859_v0 }
  0x11   : > { %s898_s16 = scalar_lea.vmem %s1155_s0, %s706_s12  ;;  %159 = vst.msk [vmem:[%s1157_s2 + $0x20] sm:$0x3f] (!%p692_p4), %vm158_vm1, %v859_v0 }
  0x12   : > { %s903_s19 = scalar_lea.vmem %s1156_s1, %s707_s13 }
  0x15 PF: > { %v920_v1 = vmov 0.0   ;;  %v922_v2 = vmov 0.0   ;;  %v924_v3 = vmov 0.0   ;;  %v926_v4 = vmov 0.0   ;;  %s930_s30 = smov 0  }
  0x16   : > { %v928_v5 = vmov 0.0  }
  0x17 LB: >> { %s184_s3 = scalar_lea.vmem %s903_s19, %s857_s30  ;;  %s860_s4 = smov 127   ;;  %s857_s30 = sphi %s930_s30, %s165_s30   ;;  %v853_v5 = vphi %v928_v5, %v1162_v5   ;;  %v849_v4 = vphi %v926_v4, %v1161_v4   ;;  %v845_v3 = vphi %v924_v3, %v1160_v3   ;;  %v841_v2 = vphi %v922_v2, %v1159_v2   ;;  %v837_v1 = vphi %v920_v1, %v1158_v1  }
  0x18   : >> { %v185_v6 = vld [vmem:[%s184_s3] sm:$0x1]  ;;  %s861_s5 = smov 125   ;;  %s862_s6 = smov 126  }
  0x19   : >> { %198 = vrot.lane.b32.xlu0 %v185_v6, %s860_s4  ;;  %266 = vrot.lane.b32.xlu1 %v185_v6, %s861_s5  ;;  %708 = vpush %v185_v6  ;;  %s863_s7 = smov 124   ;;  %s864_s8 = smov 123  }
  0x1a   : >> { %s865_s10 = smov 122   ;;  %s866_s11 = smov 121  }
  0x1b   : >> { %s867_s12 = smov 120   ;;  %s868_s13 = smov 119  }
  0x1c   : >> { %s869_s14 = smov 118   ;;  %s870_s15 = smov 117  }
  0x1d   : >> { %232 = vrot.lane.b32.xlu0 %v185_v6, %s862_s6  ;;  %300 = vrot.lane.b32.xlu1 %v185_v6, %s863_s7  ;;  %s871_s17 = smov 116   ;;  %s696_s18 = smul.u32 20, %s857_s30 }
  0x1e   : >> { %s165_s30 = sadd.s32 1, %s857_s30  }
  0x1f   : >> { %s173_s20 = scalar_lea.vmem %s898_s16, %s696_s18  ;;  %p162_p5 = scmp.ge.s32.totalorder %s165_s30, 108  }
  0x20   : >> { %v698_v19 = vld [vmem:[%s173_s20] sm:$0xff]   ;;  %v705_v22 = vld [vmem:[%s173_s20 + $0x8] sm:$0xff]   ;;  %v178_v28 = vld [vmem:[%s173_s20 + $0x10] sm:$0x7]  ;;  %vm616_vm2 = vcmask (%p162_p5), 310272   ;;  %vm621_vm3 = vcmask (%p162_p5), 308224  }
  0x21   : >> { %334 = vrot.lane.b32.xlu0 %v185_v6, %s864_s8  ;;  %368 = vrot.lane.b32.xlu1 %v185_v6, %s865_s10  ;;  %v966_v20 = vunpack.c.l.bf16 %v698_v19  ;;  %v968_v21 = vunpack.c.h.bf16 %v698_v19  ;;  %v972_v24 = vunpack.c.l.bf16 %v705_v22  ;;  %v974_v25 = vunpack.c.h.bf16 %v705_v22 }
  0x22   : >> { %v980_v30 = vunpack.c.l.bf16 %v178_v28 }
  0x25   : >> { %402 = vrot.lane.b32.xlu0 %v185_v6, %s866_s11  ;;  %436 = vrot.lane.b32.xlu1 %v185_v6, %s867_s12 }
  0x29   : >> { %470 = vrot.lane.b32.xlu0 %v185_v6, %s868_s13  ;;  %504 = vrot.lane.b32.xlu1 %v185_v6, %s869_s14 }
  0x2d   : >> { %538 = vrot.lane.b32.xlu0 %v185_v6, %s870_s15  ;;  %572 = vrot.lane.b32.xlu1 %v185_v6, %s871_s17 }
  0x4a   : >> { %s970_s21 = spop %708 }
  0x8b   : >> { %v199_v7 = vpop.permute.xlu0 %198  ;;  %v267_v8 = vpop.permute.xlu1 %266 }
  0x8c   : >> { %710 = vpush %v199_v7 }
  0x8f   : >> { %v233_v9 = vpop.permute.xlu0 %232  ;;  %v301_v10 = vpop.permute.xlu1 %300 }
  0x90   : >> { %712 = vpush %v233_v9 }
  0x91   : >> { %714 = vpush %v267_v8 }
  0x92   : >> { %716 = vpush %v301_v10 }
  0x93   : >> { %v335_v11 = vpop.permute.xlu0 %334  ;;  %v369_v12 = vpop.permute.xlu1 %368 }
  0x94   : >> { %718 = vpush %v335_v11 }
  0x95   : >> { %720 = vpush %v369_v12 }
  0x97   : >> { %v403_v13 = vpop.permute.xlu0 %402  ;;  %v437_v14 = vpop.permute.xlu1 %436 }
  0x98   : >> { %722 = vpush %v403_v13 }
  0x99   : >> { %724 = vpush %v437_v14 }
  0x9b   : >> { %v471_v15 = vpop.permute.xlu0 %470  ;;  %v505_v16 = vpop.permute.xlu1 %504 }
  0x9c   : >> { %726 = vpush %v471_v15 }
  0x9d   : >> { %728 = vpush %v505_v16 }
  0x9f   : >> { %v539_v17 = vpop.permute.xlu0 %538  ;;  %v573_v18 = vpop.permute.xlu1 %572 }
  0xa0   : >> { %730 = vpush %v539_v17 }
  0xa1   : >> { %732 = vpush %v573_v18 }
  0xbd   : >> { %s711_s22 = spop %710 }
  0xbe   : >> { %v201_v23 = vstv %s711_s22 }
  0xbf   : >> { %v203_v26 = vmul.f32 %v968_v21, %v201_v23  ;;  %v202_v27 = vmul.f32 %v966_v20, %v201_v23  ;;  %v205_v31 = vmul.f32 %v974_v25, %v201_v23  ;;  %v204_v32 = vmul.f32 %v972_v24, %v201_v23 }
  0xc0   : >> { %v206_v34 = vmul.f32 %v201_v23, %v980_v30 }
  0xc1   : >> { %214 = vrot.lane.b32.xlu1 %v203_v26, %s860_s4  ;;  %212 = vrot.lane.b32.xlu0 %v202_v27, %s860_s4  ;;  %s713_s23 = spop %712 }
  0xc2   : >> { %v235_v29 = vstv %s713_s23  ;;  %s715_s24 = spop %714 }
  0xc3   : >> { %v236_v33 = vmul.f32 %v966_v20, %v235_v29  ;;  %v238_v35 = vmul.f32 %v972_v24, %v235_v29  ;;  %v237_v36 = vmul.f32 %v968_v21, %v235_v29  ;;  %v269_v37 = vstv %s715_s24  ;;  %s717_s25 = spop %716 }
  0xc4   : >> { %v240_v38 = vmul.f32 %v235_v29, %v980_v30  ;;  %v239_v39 = vmul.f32 %v974_v25, %v235_v29  ;;  %v271_v40 = vmul.f32 %v968_v21, %v269_v37  ;;  %v270_v41 = vmul.f32 %v966_v20, %v269_v37 }
  0xc5   : >> { %218 = vrot.lane.b32.xlu1 %v205_v31, %s860_s4  ;;  %216 = vrot.lane.b32.xlu0 %v204_v32, %s860_s4  ;;  %v303_v42 = vstv %s717_s25  ;;  %v273_v43 = vmul.f32 %v974_v25, %v269_v37  ;;  %v272_v44 = vmul.f32 %v972_v24, %v269_v37  ;;  %v274_v46 = vmul.f32 %v269_v37, %v980_v30  ;;  %s719_s26 = spop %718 }
  0xc6   : >> { %v304_v45 = vmul.f32 %v966_v20, %v303_v42  ;;  %v306_v47 = vmul.f32 %v972_v24, %v303_v42  ;;  %v305_v48 = vmul.f32 %v968_v21, %v303_v42  ;;  %v337_v49 = vstv %s719_s26  ;;  %s721_s27 = spop %720 }
  0xc7   : >> { %v308_v50 = vmul.f32 %v303_v42, %v980_v30  ;;  %v307_v51 = vmul.f32 %v974_v25, %v303_v42  ;;  %v339_v52 = vmul.f32 %v968_v21, %v337_v49  ;;  %v338_v53 = vmul.f32 %v966_v20, %v337_v49 }
  0xc8   : >> { %v371_v54 = vstv %s721_s27  ;;  %v341_v55 = vmul.f32 %v974_v25, %v337_v49  ;;  %v340_v56 = vmul.f32 %v972_v24, %v337_v49  ;;  %v342_v58 = vmul.f32 %v337_v49, %v980_v30 }
  0xc9   : >> { %246 = vrot.lane.b32.xlu1 %v236_v33, %s862_s6  ;;  %220 = vrot.lane.b32.xlu0 %v206_v34, %s860_s4  ;;  %v372_v57 = vmul.f32 %v966_v20, %v371_v54  ;;  %v374_v59 = vmul.f32 %v972_v24, %v371_v54  ;;  %v373_v60 = vmul.f32 %v968_v21, %v371_v54  ;;  %s723_s28 = spop %722 }
  0xca   : >> { %v405_v61 = vstv %s723_s28  ;;  %v376_v62 = vmul.f32 %v371_v54, %v980_v30  ;;  %v375_v63 = vmul.f32 %v974_v25, %v371_v54  ;;  %s725_s29 = spop %724 }
  0xcb   : >> { %v407_v0 = vmul.f32 %v968_v21, %v405_v61  ;;  %v406_v6 = vmul.f32 %v966_v20, %v405_v61  ;;  %v439_v7 = vstv %s725_s29  ;;  %v409_v8 = vmul.f32 %v974_v25, %v405_v61 }
  0xcc   : >> { %v408_v9 = vmul.f32 %v972_v24, %v405_v61  ;;  %v440_v10 = vmul.f32 %v966_v20, %v439_v7  ;;  %v410_v11 = vmul.f32 %v405_v61, %v980_v30  ;;  %v442_v12 = vmul.f32 %v972_v24, %v439_v7 }
  0xcd   : >> { %250 = vrot.lane.b32.xlu1 %v238_v35, %s862_s6  ;;  %248 = vrot.lane.b32.xlu0 %v237_v36, %s862_s6  ;;  %v441_v13 = vmul.f32 %v968_v21, %v439_v7  ;;  %s727_s3 = spop %726  ;;  %v444_v15 = vmul.f32 %v439_v7, %v980_v30  ;;  %v443_v16 = vmul.f32 %v974_v25, %v439_v7 }
  0xce   : >> { %v473_v14 = vstv %s727_s3  ;;  %s729_s4 = spop %728 }
  0xcf   : >> { %v475_v17 = vmul.f32 %v968_v21, %v473_v14  ;;  %v474_v18 = vmul.f32 %v966_v20, %v473_v14  ;;  %v507_v19 = vstv %s729_s4  ;;  %v477_v22 = vmul.f32 %v974_v25, %v473_v14 }
  0xd0   : >> { %v476_v23 = vmul.f32 %v972_v24, %v473_v14  ;;  %v508_v26 = vmul.f32 %v966_v20, %v507_v19  ;;  %v478_v27 = vmul.f32 %v473_v14, %v980_v30  ;;  %v510_v28 = vmul.f32 %v972_v24, %v507_v19 }
  0xd1   : >> { %254 = vrot.lane.b32.xlu1 %v240_v38, %s862_s6  ;;  %252 = vrot.lane.b32.xlu0 %v239_v39, %s862_s6  ;;  %v509_v29 = vmul.f32 %v968_v21, %v507_v19  ;;  %v512_v32 = vmul.f32 %v507_v19, %v980_v30  ;;  %v511_v33 = vmul.f32 %v974_v25, %v507_v19 }
  0xd5   : >> { %282 = vrot.lane.b32.xlu1 %v271_v40, %s861_s5  ;;  %280 = vrot.lane.b32.xlu0 %v270_v41, %s861_s5 }
  0xd9   : >> { %286 = vrot.lane.b32.xlu1 %v273_v43, %s861_s5  ;;  %284 = vrot.lane.b32.xlu0 %v272_v44, %s861_s5  ;;  %v187_v43 = vstv %s970_s21 }
  0xdd   : >> { %314 = vrot.lane.b32.xlu1 %v304_v45, %s863_s7  ;;  %288 = vrot.lane.b32.xlu0 %v274_v46, %s861_s5  ;;  %s731_s5 = spop %730 }
  0xde   : >> { %v541_v31 = vstv %s731_s5  ;;  %s733_s6 = spop %732 }
  0xdf   : >> { %v543_v34 = vmul.f32 %v968_v21, %v541_v31  ;;  %v542_v35 = vmul.f32 %v966_v20, %v541_v31  ;;  %v575_v36 = vstv %s733_s6  ;;  %v545_v37 = vmul.f32 %v974_v25, %v541_v31 }
  0xe0   : >> { %v544_v38 = vmul.f32 %v972_v24, %v541_v31  ;;  %v576_v39 = vmul.f32 %v966_v20, %v575_v36  ;;  %v546_v40 = vmul.f32 %v541_v31, %v980_v30  ;;  %v578_v41 = vmul.f32 %v972_v24, %v575_v36 }
  0xe1   : >> { %318 = vrot.lane.b32.xlu1 %v306_v47, %s863_s7  ;;  %316 = vrot.lane.b32.xlu0 %v305_v48, %s863_s7  ;;  %v577_v42 = vmul.f32 %v968_v21, %v575_v36  ;;  %v580_v46 = vmul.f32 %v575_v36, %v980_v30  ;;  %v579_v47 = vmul.f32 %v974_v25, %v575_v36 }
  0xe2   : >> { %v188_v48 = vmul.f32 %v966_v20, %v187_v43 }
  0xe5   : >> { %322 = vrot.lane.b32.xlu1 %v308_v50, %s863_s7  ;;  %320 = vrot.lane.b32.xlu0 %v307_v51, %s863_s7  ;;  %v189_v51 = vmul.f32 %v968_v21, %v187_v43 }
  0xe9   : >> { %350 = vrot.lane.b32.xlu1 %v339_v52, %s864_s8  ;;  %348 = vrot.lane.b32.xlu0 %v338_v53, %s864_s8  ;;  %v193_v52 = vadd.f32 %v853_v5, %v188_v48  ;;  %v190_v53 = vmul.f32 %v972_v24, %v187_v43 }
  0xeb   : >> { %v195_v20 = vadd.f32 %v845_v3, %v190_v53 }
  0xed   : >> { %354 = vrot.lane.b32.xlu1 %v341_v55, %s864_s8  ;;  %352 = vrot.lane.b32.xlu0 %v340_v56, %s864_s8  ;;  %v191_v55 = vmul.f32 %v974_v25, %v187_v43 }
  0xef   : >> { %v196_v5 = vadd.f32 %v841_v2, %v191_v55 }
  0xf1   : >> { %382 = vrot.lane.b32.xlu1 %v372_v57, %s865_s10  ;;  %356 = vrot.lane.b32.xlu0 %v342_v58, %s864_s8  ;;  %v194_v58 = vadd.f32 %v849_v4, %v189_v51 }
  0xf5   : >> { %386 = vrot.lane.b32.xlu1 %v374_v59, %s865_s10  ;;  %384 = vrot.lane.b32.xlu0 %v373_v60, %s865_s10  ;;  %v192_v60 = vmul.f32 %v187_v43, %v980_v30 }
  0xf7   : >> { %v197_v24 = vadd.f32 %v837_v1, %v192_v60 }
  0xf9   : >> { %390 = vrot.lane.b32.xlu1 %v376_v62, %s865_s10  ;;  %388 = vrot.lane.b32.xlu0 %v375_v63, %s865_s10 }
  0xfd   : >> { %418 = vrot.lane.b32.xlu1 %v407_v0, %s866_s11  ;;  %416 = vrot.lane.b32.xlu0 %v406_v6, %s866_s11 }
 0x101   : >> { %422 = vrot.lane.b32.xlu1 %v409_v8, %s866_s11  ;;  %420 = vrot.lane.b32.xlu0 %v408_v9, %s866_s11 }
 0x105   : >> { %450 = vrot.lane.b32.xlu1 %v440_v10, %s867_s12  ;;  %424 = vrot.lane.b32.xlu0 %v410_v11, %s866_s11 }
 0x109   : >> { %454 = vrot.lane.b32.xlu1 %v442_v12, %s867_s12  ;;  %452 = vrot.lane.b32.xlu0 %v441_v13, %s867_s12 }
 0x10d   : >> { %458 = vrot.lane.b32.xlu1 %v444_v15, %s867_s12  ;;  %456 = vrot.lane.b32.xlu0 %v443_v16, %s867_s12 }
 0x111   : >> { %486 = vrot.lane.b32.xlu1 %v475_v17, %s868_s13  ;;  %484 = vrot.lane.b32.xlu0 %v474_v18, %s868_s13 }
 0x115   : >> { %490 = vrot.lane.b32.xlu1 %v477_v22, %s868_s13  ;;  %488 = vrot.lane.b32.xlu0 %v476_v23, %s868_s13 }
 0x119   : >> { %518 = vrot.lane.b32.xlu1 %v508_v26, %s869_s14  ;;  %492 = vrot.lane.b32.xlu0 %v478_v27, %s868_s13 }
 0x11d   : >> { %522 = vrot.lane.b32.xlu1 %v510_v28, %s869_s14  ;;  %520 = vrot.lane.b32.xlu0 %v509_v29, %s869_s14 }
 0x121   : >> { %526 = vrot.lane.b32.xlu1 %v512_v32, %s869_s14  ;;  %524 = vrot.lane.b32.xlu0 %v511_v33, %s869_s14 }
 0x125   : >> { %554 = vrot.lane.b32.xlu1 %v543_v34, %s870_s15  ;;  %552 = vrot.lane.b32.xlu0 %v542_v35, %s870_s15 }
 0x129   : >> { %558 = vrot.lane.b32.xlu1 %v545_v37, %s870_s15  ;;  %556 = vrot.lane.b32.xlu0 %v544_v38, %s870_s15 }
 0x12d   : >> { %586 = vrot.lane.b32.xlu1 %v576_v39, %s871_s17  ;;  %560 = vrot.lane.b32.xlu0 %v546_v40, %s870_s15 }
 0x131   : >> { %590 = vrot.lane.b32.xlu1 %v578_v41, %s871_s17  ;;  %588 = vrot.lane.b32.xlu0 %v577_v42, %s871_s17 }
 0x133   : >> { %v215_v44 = vpop.permute.xlu1 %214  ;;  %v213_v45 = vpop.permute.xlu0 %212 }
 0x134   : >> { %v227_v54 = vadd.f32 %v213_v45, %v193_v52  ;;  %v228_v61 = vadd.f32 %v215_v44, %v194_v58 }
 0x135   : >> { %594 = vrot.lane.b32.xlu1 %v580_v46, %s871_s17  ;;  %592 = vrot.lane.b32.xlu0 %v579_v47, %s871_s17 }
 0x137   : >> { %v219_v49 = vpop.permute.xlu1 %218  ;;  %v217_v50 = vpop.permute.xlu0 %216 }
 0x138   : >> { %v229_v62 = vadd.f32 %v217_v50, %v195_v20  ;;  %v230_v25 = vadd.f32 %v219_v49, %v196_v5 }
 0x13b   : >> { %v247_v56 = vpop.permute.xlu1 %246  ;;  %v221_v57 = vpop.permute.xlu0 %220 }
 0x13c   : >> { %v261_v59 = vadd.f32 %v247_v56, %v227_v54  ;;  %v231_v7 = vadd.f32 %v221_v57, %v197_v24 }
 0x13f   : >> { %v251_v63 = vpop.permute.xlu1 %250  ;;  %v249_v21 = vpop.permute.xlu0 %248 }
 0x140   : >> { %v263_v0 = vadd.f32 %v251_v63, %v229_v62  ;;  %v262_v6 = vadd.f32 %v249_v21, %v228_v61 }
 0x143   : >> { %v255_v8 = vpop.permute.xlu1 %254  ;;  %v253_v9 = vpop.permute.xlu0 %252 }
 0x144   : >> { %v265_v4 = vadd.f32 %v255_v8, %v231_v7  ;;  %v264_v10 = vadd.f32 %v253_v9, %v230_v25 }
 0x147   : >> { %v283_v3 = vpop.permute.xlu1 %282  ;;  %v281_v11 = vpop.permute.xlu0 %280 }
 0x148   : >> { %v296_v12 = vadd.f32 %v283_v3, %v262_v6  ;;  %v295_v30 = vadd.f32 %v281_v11, %v261_v59 }
 0x14b   : >> { %v287_v13 = vpop.permute.xlu1 %286  ;;  %v285_v14 = vpop.permute.xlu0 %284 }
 0x14c   : >> { %v298_v15 = vadd.f32 %v287_v13, %v264_v10  ;;  %v297_v16 = vadd.f32 %v285_v14, %v263_v0 }
 0x14f   : >> { %v315_v17 = vpop.permute.xlu1 %314  ;;  %v289_v2 = vpop.permute.xlu0 %288 }
 0x150   : >> { %v329_v18 = vadd.f32 %v315_v17, %v295_v30  ;;  %v299_v1 = vadd.f32 %v289_v2, %v265_v4 }
 0x153   : >> { %v319_v19 = vpop.permute.xlu1 %318  ;;  %v317_v22 = vpop.permute.xlu0 %316 }
 0x154   : >> { %v331_v23 = vadd.f32 %v319_v19, %v297_v16  ;;  %v330_v26 = vadd.f32 %v317_v22, %v296_v12 }
 0x157   : >> { %v323_v27 = vpop.permute.xlu1 %322  ;;  %v321_v28 = vpop.permute.xlu0 %320 }
 0x158   : >> { %v333_v29 = vadd.f32 %v323_v27, %v299_v1  ;;  %v332_v31 = vadd.f32 %v321_v28, %v298_v15 }
 0x15b   : >> { %v351_v32 = vpop.permute.xlu1 %350  ;;  %v349_v33 = vpop.permute.xlu0 %348 }
 0x15c   : >> { %v363_v59 = vadd.f32 %v349_v33, %v329_v18  ;;  %v364_v63 = vadd.f32 %v351_v32, %v330_v26 }
 0x15f   : >> { %v355_v34 = vpop.permute.xlu1 %354  ;;  %v353_v35 = vpop.permute.xlu0 %352 }
 0x160   : >> { %v365_v21 = vadd.f32 %v353_v35, %v331_v23  ;;  %v366_v9 = vadd.f32 %v355_v34, %v332_v31 }
 0x163   : >> { %v383_v36 = vpop.permute.xlu1 %382  ;;  %v357_v37 = vpop.permute.xlu0 %356 }
 0x164   : >> { %v397_v62 = vadd.f32 %v383_v36, %v363_v59  ;;  %v367_v8 = vadd.f32 %v357_v37, %v333_v29 }
 0x167   : >> { %v387_v38 = vpop.permute.xlu1 %386  ;;  %v385_v39 = vpop.permute.xlu0 %384 }
 0x168   : >> { %v399_v6 = vadd.f32 %v387_v38, %v365_v21  ;;  %v398_v25 = vadd.f32 %v385_v39, %v364_v63 }
 0x16b   : >> { %v391_v40 = vpop.permute.xlu1 %390  ;;  %v389_v41 = vpop.permute.xlu0 %388 }
 0x16c   : >> { %v401_v11 = vadd.f32 %v391_v40, %v367_v8  ;;  %v400_v13 = vadd.f32 %v389_v41, %v366_v9 }
 0x16f   : >> { %v419_v42 = vpop.permute.xlu1 %418  ;;  %v417_v43 = vpop.permute.xlu0 %416 }
 0x170   : >> { %v431_v5 = vadd.f32 %v417_v43, %v397_v62  ;;  %v432_v4 = vadd.f32 %v419_v42, %v398_v25 }
 0x173   : >> { %v423_v44 = vpop.permute.xlu1 %422  ;;  %v421_v45 = vpop.permute.xlu0 %420 }
 0x174   : >> { %v433_v10 = vadd.f32 %v421_v45, %v399_v6  ;;  %v434_v2 = vadd.f32 %v423_v44, %v400_v13 }
 0x177   : >> { %v451_v46 = vpop.permute.xlu1 %450  ;;  %v425_v47 = vpop.permute.xlu0 %424 }
 0x178   : >> { %v465_v7 = vadd.f32 %v451_v46, %v431_v5  ;;  %v435_v17 = vadd.f32 %v425_v47, %v401_v11 }
 0x17b   : >> { %v455_v48 = vpop.permute.xlu1 %454  ;;  %v453_v49 = vpop.permute.xlu0 %452 }
 0x17c   : >> { %v467_v14 = vadd.f32 %v455_v48, %v433_v10  ;;  %v466_v15 = vadd.f32 %v453_v49, %v432_v4  ;;  %v606_v48 = vld [vmem:[%s1157_s2] sm:$0xff] (%p162_p5)  ;;  %v607_v49 = vld [vmem:[%s1157_s2 + $0x8] sm:$0xff] (%p162_p5) }
 0x17f   : >> { %v459_v50 = vpop.permute.xlu1 %458  ;;  %v457_v51 = vpop.permute.xlu0 %456 }
 0x180   : >> { %v469_v22 = vadd.f32 %v459_v50, %v435_v17  ;;  %v468_v27 = vadd.f32 %v457_v51, %v434_v2  ;;  %v608_v50 = vld [vmem:[%s1157_s2 + $0x10] sm:$0xff] (%p162_p5) }
 0x183   : >> { %v487_v52 = vpop.permute.xlu1 %486  ;;  %v485_v53 = vpop.permute.xlu0 %484 }
 0x184   : >> { %v499_v3 = vadd.f32 %v485_v53, %v465_v7  ;;  %v500_v18 = vadd.f32 %v487_v52, %v466_v15 }
 0x187   : >> { %v491_v54 = vpop.permute.xlu1 %490  ;;  %v489_v55 = vpop.permute.xlu0 %488 }
 0x188   : >> { %v501_v1 = vadd.f32 %v489_v55, %v467_v14  ;;  %v502_v32 = vadd.f32 %v491_v54, %v468_v27  ;;  %v609_v54 = vld [vmem:[%s1157_s2 + $0x18] sm:$0xff] (%p162_p5)  ;;  %v610_v55 = vld [vmem:[%s1157_s2 + $0x20] sm:$0x3f] (%p162_p5) }
 0x18b   : >> { %v519_v56 = vpop.permute.xlu1 %518  ;;  %v493_v57 = vpop.permute.xlu0 %492 }
 0x18c   : >> { %v533_v16 = vadd.f32 %v519_v56, %v499_v3  ;;  %v503_v33 = vadd.f32 %v493_v57, %v469_v22 }
 0x18f   : >> { %v523_v58 = vpop.permute.xlu1 %522  ;;  %v521_v20 = vpop.permute.xlu0 %520 }
 0x190   : >> { %v535_v28 = vadd.f32 %v523_v58, %v501_v1  ;;  %v534_v29 = vadd.f32 %v521_v20, %v500_v18 }
 0x193   : >> { %v527_v60 = vpop.permute.xlu1 %526  ;;  %v525_v61 = vpop.permute.xlu0 %524 }
 0x194   : >> { %v537_v38 = vadd.f32 %v527_v60, %v503_v33  ;;  %v536_v39 = vadd.f32 %v525_v61, %v502_v32 }
 0x197   : >> { %v555_v24 = vpop.permute.xlu1 %554  ;;  %v553_v0 = vpop.permute.xlu0 %552 }
 0x198   : >> { %v567_v19 = vadd.f32 %v553_v0, %v533_v16  ;;  %v568_v34 = vadd.f32 %v555_v24, %v534_v29 }
 0x19b   : >> { %v559_v12 = vpop.permute.xlu1 %558  ;;  %v557_v30 = vpop.permute.xlu0 %556 }
 0x19c   : >> { %v569_v35 = vadd.f32 %v557_v30, %v535_v28  ;;  %v570_v42 = vadd.f32 %v559_v12, %v536_v39 }
 0x19f   : >> { %v587_v23 = vpop.permute.xlu1 %586  ;;  %v561_v26 = vpop.permute.xlu0 %560 }
 0x1a0   : >> { %v601_v31 = vadd.f32 %v587_v23, %v567_v19   ;;  %v571_v43 = vadd.f32 %v561_v26, %v537_v38 }
 0x1a2   : >> { %v1162_v5 = vmov %v601_v31  ;;  %v611_v51 = vadd.f32 (%p162_p5), %v606_v48, %v601_v31 }
 0x1a3   : >> { %v591_v36 = vpop.permute.xlu1 %590  ;;  %v589_v37 = vpop.permute.xlu0 %588 }
 0x1a4   : >> { %v603_v40 = vadd.f32 %v591_v36, %v569_v35   ;;  %v602_v41 = vadd.f32 %v589_v37, %v568_v34   ;;  %164 = sbr.rel (!%p162_p5) target bundleno = 23 (0x17), region = 70  ;;  %617 = vst.msk [vmem:[%s1157_s2] sm:$0xff] (%p162_p5), %vm616_vm2, %v611_v51 }
 0x1a6   : >> { %v1160_v3 = vmov %v603_v40  ;;  %v1161_v4 = vmov %v602_v41  ;;  %v612_v52 = vadd.f32 (%p162_p5), %v607_v49, %v602_v41  ;;  %v613_v53 = vadd.f32 (%p162_p5), %v608_v50, %v603_v40 }
 0x1a7   : >> { %v595_v44 = vpop.permute.xlu1 %594  ;;  %v593_v45 = vpop.permute.xlu0 %592 }
 0x1a8   : >> { %v605_v46 = vadd.f32 %v595_v44, %v571_v43   ;;  %v604_v47 = vadd.f32 %v593_v45, %v570_v42   ;;  %618 = vst.msk [vmem:[%s1157_s2 + $0x8] sm:$0xff] (%p162_p5), %vm616_vm2, %v612_v52  ;;  %619 = vst.msk [vmem:[%s1157_s2 + $0x10] sm:$0xff] (%p162_p5), %vm616_vm2, %v613_v53 }
 0x1aa   : >> { %v1158_v1 = vmov %v605_v46  ;;  %v1159_v2 = vmov %v604_v47  ;;  %v614_v56 = vadd.f32 (%p162_p5), %v609_v54, %v604_v47  ;;  %v615_v57 = vadd.f32 (%p162_p5), %v610_v55, %v605_v46 }
 0x1ac   : > { %620 = vst.msk [vmem:[%s1157_s2 + $0x18] sm:$0xff] %vm616_vm2, %v614_v56 }
 0x1ad   : > { %622 = vst.msk [vmem:[%s1157_s2 + $0x20] sm:$0x3f] %vm621_vm3, %v615_v57 }
 0x1ae PF: > { %s12_s9 = sadd.s32 1, %s833_s9  }
 0x1af   : > { %p9_p6 = scmp.ge.s32.totalorder %s12_s9, 15  }
 0x1b1   :  { %11 = sbr.rel (!%p9_p6) target bundleno = 1 (0x1), region = 81 }

// kernel: net_forward.12
= control target key start
LH: loop header
LB: loop body
LE: loop exit
PB: predicated region body
PF: predicated region fallthrough
CT: control target
= control target key end

     0   :  { %s697_s9 = smov 0   ;;  %s910_s0 = inlined_call_operand.vmem [shape: bf16[8,147,37,128], index: 0, kind: input, shape index: {}]   ;;  %s911_s1 = inlined_call_operand.vmem [shape: f32[8,147,128], index: 1, kind: input, shape index: {}]   ;;  %s912_s2 = inlined_call_operand.vmem [shape: f32[37,37], index: 2, kind: output, shape index: {}]  }
   0x1 LB: > { %s516_s10 = sadd.s32 4294967295, %s648_s9   ;;  %p519_p0 = scmp.ge.s32.totalorder %s648_s9, 1  ;;  %s648_s9 = sphi %s697_s9, %s12_s9  }
   0x2   : > { %p117_p1 = scmp.lt.s32.totalorder %s648_s9, 9 }
   0x4   : > { %p118_p2 = pnand %p519_p0, %p117_p1 }
   0x5   : > { %p139_p3 = scmp.lt.s32.totalorder (!%p118_p2), %s516_s10, 7  ;;  %p522_p4 = scmp.ne.s32.totalorder (!%p118_p2), %s516_s10, 0 }
   0x6   : > { %121 = sbr.rel (%p118_p2) target bundleno = 381 (0x17d), region = 28 }
   0xd   : > { %s140_s11 = scalar_select %p139_p3, %s516_s10, 7 }
   0xe   : > { %152 = sbr.rel (%p522_p4) target bundleno = 21 (0x15), region = 32  ;;  %vm153_vm0 = vcmask (!%p522_p4), 302080   ;;  %vm158_vm1 = vcmask (!%p522_p4), 299008   ;;  %v674_v0 = vmov (!%p522_p4), 0.0  }
   0xf   : > { %s536_s12 = smul.u32 2940, %s140_s11  ;;  %154 = vst.msk [vmem:[%s912_s2] sm:$0xff] (!%p522_p4), %vm153_vm0, %v674_v0  ;;  %155 = vst.msk [vmem:[%s912_s2 + $0x8] sm:$0xff] (!%p522_p4), %vm153_vm0, %v674_v0 }
  0x10   : > { %s537_s13 = smul.u32 152, %s140_s11  ;;  %156 = vst.msk [vmem:[%s912_s2 + $0x10] sm:$0xff] (!%p522_p4), %vm153_vm0, %v674_v0  ;;  %157 = vst.msk [vmem:[%s912_s2 + $0x18] sm:$0xff] (!%p522_p4), %vm153_vm0, %v674_v0 }
  0x11   : > { %s708_s16 = scalar_lea.vmem %s910_s0, %s536_s12  ;;  %159 = vst.msk [vmem:[%s912_s2 + $0x20] sm:$0x1f] (!%p522_p4), %vm158_vm1, %v674_v0 }
  0x12   : > { %s713_s19 = scalar_lea.vmem %s911_s1, %s537_s13 }
  0x15 PF: > { %v730_v1 = vmov 0.0   ;;  %v732_v2 = vmov 0.0   ;;  %v734_v3 = vmov 0.0   ;;  %v736_v4 = vmov 0.0   ;;  %s740_s30 = smov 0  }
  0x16   : > { %v738_v5 = vmov 0.0  }
  0x17 LB: >> { %s184_s3 = scalar_lea.vmem %s713_s19, %s672_s30  ;;  %s675_s4 = smov 127   ;;  %s672_s30 = sphi %s740_s30, %s165_s30   ;;  %v668_v5 = vphi %v738_v5, %v917_v5   ;;  %v664_v4 = vphi %v736_v4, %v916_v4   ;;  %v660_v3 = vphi %v734_v3, %v915_v3   ;;  %v656_v2 = vphi %v732_v2, %v914_v2   ;;  %v652_v1 = vphi %v730_v1, %v913_v1  }
  0x18   : >> { %v185_v6 = vld [vmem:[%s184_s3] sm:$0x1]  ;;  %s676_s5 = smov 125   ;;  %s677_s6 = smov 126  }
  0x19   : >> { %198 = vrot.lane.b32.xlu0 %v185_v6, %s675_s4  ;;  %266 = vrot.lane.b32.xlu1 %v185_v6, %s676_s5  ;;  %538 = vpush %v185_v6  ;;  %s678_s7 = smov 124   ;;  %s679_s8 = smov 123  }
  0x1a   : >> { %s680_s10 = smov 122   ;;  %s681_s11 = smov 121  }
  0x1b   : >> { %s526_s12 = smul.u32 20, %s672_s30  ;;  %s165_s30 = sadd.s32 1, %s672_s30  }
  0x1c   : >> { %p162_p5 = scmp.ge.s32.totalorder %s165_s30, 147  }
  0x1d   : >> { %232 = vrot.lane.b32.xlu0 %v185_v6, %s677_s6  ;;  %300 = vrot.lane.b32.xlu1 %v185_v6, %s678_s7  ;;  %s173_s13 = scalar_lea.vmem %s708_s16, %s526_s12  ;;  %vm446_vm2 = vcmask (%p162_p5), 302080   ;;  %vm451_vm3 = vcmask (%p162_p5), 299008  }
  0x1e   : >> { %v528_v14 = vld [vmem:[%s173_s13] sm:$0xff]   ;;  %v535_v17 = vld [vmem:[%s173_s13 + $0x8] sm:$0xff]   ;;  %v178_v23 = vld [vmem:[%s173_s13 + $0x10] sm:$0x7] }
  0x1f   : >> { %v771_v15 = vunpack.c.l.bf16 %v528_v14  ;;  %v773_v16 = vunpack.c.h.bf16 %v528_v14  ;;  %v777_v19 = vunpack.c.l.bf16 %v535_v17  ;;  %v779_v20 = vunpack.c.h.bf16 %v535_v17 }
  0x20   : >> { %v785_v25 = vunpack.c.l.bf16 %v178_v23 }
  0x21   : >> { %334 = vrot.lane.b32.xlu0 %v185_v6, %s679_s8  ;;  %368 = vrot.lane.b32.xlu1 %v185_v6, %s680_s10 }
  0x25   : >> { %402 = vrot.lane.b32.xlu0 %v185_v6, %s681_s11 }
  0x4a   : >> { %s775_s14 = spop %538 }
  0x8b   : >> { %v199_v7 = vpop.permute.xlu0 %198  ;;  %v267_v8 = vpop.permute.xlu1 %266 }
  0x8c   : >> { %540 = vpush %v199_v7 }
  0x8f   : >> { %v233_v9 = vpop.permute.xlu0 %232  ;;  %v301_v10 = vpop.permute.xlu1 %300 }
  0x90   : >> { %542 = vpush %v233_v9 }
  0x91   : >> { %544 = vpush %v267_v8 }
  0x92   : >> { %546 = vpush %v301_v10 }
  0x93   : >> { %v335_v11 = vpop.permute.xlu0 %334  ;;  %v369_v12 = vpop.permute.xlu1 %368 }
  0x94   : >> { %548 = vpush %v335_v11 }
  0x95   : >> { %550 = vpush %v369_v12 }
  0x97   : >> { %v403_v13 = vpop.permute.xlu0 %402 }
  0x98   : >> { %552 = vpush %v403_v13 }
  0xbd   : >> { %s541_s15 = spop %540 }
  0xbe   : >> { %v201_v18 = vstv %s541_s15 }
  0xbf   : >> { %v203_v21 = vmul.f32 %v773_v16, %v201_v18  ;;  %v202_v22 = vmul.f32 %v771_v15, %v201_v18  ;;  %v205_v26 = vmul.f32 %v779_v20, %v201_v18  ;;  %v204_v27 = vmul.f32 %v777_v19, %v201_v18 }
  0xc0   : >> { %v206_v29 = vmul.f32 %v201_v18, %v785_v25 }
  0xc1   : >> { %214 = vrot.lane.b32.xlu0 %v203_v21, %s675_s4  ;;  %212 = vrot.lane.b32.xlu1 %v202_v22, %s675_s4  ;;  %s543_s17 = spop %542 }
  0xc2   : >> { %v235_v24 = vstv %s543_s17  ;;  %s545_s18 = spop %544 }
  0xc3   : >> { %v236_v28 = vmul.f32 %v771_v15, %v235_v24  ;;  %v238_v30 = vmul.f32 %v777_v19, %v235_v24  ;;  %v237_v31 = vmul.f32 %v773_v16, %v235_v24  ;;  %v269_v32 = vstv %s545_s18  ;;  %s547_s20 = spop %546 }
  0xc4   : >> { %v240_v33 = vmul.f32 %v235_v24, %v785_v25  ;;  %v239_v34 = vmul.f32 %v779_v20, %v235_v24  ;;  %v271_v35 = vmul.f32 %v773_v16, %v269_v32  ;;  %v270_v36 = vmul.f32 %v771_v15, %v269_v32 }
  0xc5   : >> { %218 = vrot.lane.b32.xlu0 %v205_v26, %s675_s4  ;;  %216 = vrot.lane.b32.xlu1 %v204_v27, %s675_s4  ;;  %v303_v37 = vstv %s547_s20  ;;  %v273_v38 = vmul.f32 %v779_v20, %v269_v32  ;;  %v272_v39 = vmul.f32 %v777_v19, %v269_v32  ;;  %v274_v41 = vmul.f32 %v269_v32, %v785_v25  ;;  %s549_s21 = spop %548 }
  0xc6   : >> { %v304_v40 = vmul.f32 %v771_v15, %v303_v37  ;;  %v306_v42 = vmul.f32 %v777_v19, %v303_v37  ;;  %v305_v43 = vmul.f32 %v773_v16, %v303_v37  ;;  %v337_v44 = vstv %s549_s21  ;;  %s551_s22 = spop %550 }
  0xc7   : >> { %v308_v45 = vmul.f32 %v303_v37, %v785_v25  ;;  %v307_v46 = vmul.f32 %v779_v20, %v303_v37  ;;  %v339_v47 = vmul.f32 %v773_v16, %v337_v44  ;;  %v338_v48 = vmul.f32 %v771_v15, %v337_v44 }
  0xc8   : >> { %v371_v49 = vstv %s551_s22  ;;  %v341_v50 = vmul.f32 %v779_v20, %v337_v44  ;;  %v340_v51 = vmul.f32 %v777_v19, %v337_v44  ;;  %v342_v53 = vmul.f32 %v337_v44, %v785_v25 }
  0xc9   : >> { %246 = vrot.lane.b32.xlu0 %v236_v28, %s677_s6  ;;  %220 = vrot.lane.b32.xlu1 %v206_v29, %s675_s4  ;;  %v372_v52 = vmul.f32 %v771_v15, %v371_v49  ;;  %v374_v54 = vmul.f32 %v777_v19, %v371_v49  ;;  %v373_v55 = vmul.f32 %v773_v16, %v371_v49  ;;  %s553_s23 = spop %552 }
  0xca   : >> { %v405_v56 = vstv %s553_s23  ;;  %v376_v57 = vmul.f32 %v371_v49, %v785_v25  ;;  %v375_v58 = vmul.f32 %v779_v20, %v371_v49 }
  0xcb   : >> { %v407_v59 = vmul.f32 %v773_v16, %v405_v56  ;;  %v406_v60 = vmul.f32 %v771_v15, %v405_v56  ;;  %v409_v61 = vmul.f32 %v779_v20, %v405_v56  ;;  %v408_v62 = vmul.f32 %v777_v19, %v405_v56 }
  0xcc   : >> { %v410_v63 = vmul.f32 %v405_v56, %v785_v25 }
  0xcd   : >> { %250 = vrot.lane.b32.xlu0 %v238_v30, %s677_s6  ;;  %248 = vrot.lane.b32.xlu1 %v237_v31, %s677_s6  ;;  %v187_v30 = vstv %s775_s14 }
  0xd1   : >> { %254 = vrot.lane.b32.xlu0 %v240_v33, %s677_s6  ;;  %252 = vrot.lane.b32.xlu1 %v239_v34, %s677_s6  ;;  %v189_v33 = vmul.f32 %v773_v16, %v187_v30  ;;  %v188_v34 = vmul.f32 %v771_v15, %v187_v30 }
  0xd3   : >> { %v194_v37 = vadd.f32 %v664_v4, %v189_v33  ;;  %v439_v33 = vld [vmem:[%s912_s2 + $0x18] sm:$0xff] (%p162_p5) }
  0xd5   : >> { %282 = vrot.lane.b32.xlu0 %v271_v35, %s676_s5  ;;  %280 = vrot.lane.b32.xlu1 %v270_v36, %s676_s5 }
  0xd9   : >> { %286 = vrot.lane.b32.xlu0 %v273_v38, %s676_s5  ;;  %284 = vrot.lane.b32.xlu1 %v272_v39, %s676_s5  ;;  %v193_v38 = vadd.f32 %v668_v5, %v188_v34  ;;  %v191_v39 = vmul.f32 %v779_v20, %v187_v30  ;;  %v440_v34 = vld [vmem:[%s912_s2 + $0x20] sm:$0x1f] (%p162_p5) }
  0xdb   : >> { %v196_v16 = vadd.f32 %v656_v2, %v191_v39 }
  0xdd   : >> { %314 = vrot.lane.b32.xlu0 %v304_v40, %s678_s7  ;;  %288 = vrot.lane.b32.xlu1 %v274_v41, %s676_s5  ;;  %v190_v40 = vmul.f32 %v777_v19, %v187_v30 }
  0xdf   : >> { %v195_v15 = vadd.f32 %v660_v3, %v190_v40 }
  0xe1   : >> { %318 = vrot.lane.b32.xlu0 %v306_v42, %s678_s7  ;;  %316 = vrot.lane.b32.xlu1 %v305_v43, %s678_s7 }
  0xe5   : >> { %322 = vrot.lane.b32.xlu0 %v308_v45, %s678_s7  ;;  %320 = vrot.lane.b32.xlu1 %v307_v46, %s678_s7  ;;  %v192_v45 = vmul.f32 %v187_v30, %v785_v25 }
  0xe7   : >> { %v197_v19 = vadd.f32 %v652_v1, %v192_v45 }
  0xe9   : >> { %350 = vrot.lane.b32.xlu0 %v339_v47, %s679_s8  ;;  %348 = vrot.lane.b32.xlu1 %v338_v48, %s679_s8 }
  0xed   : >> { %354 = vrot.lane.b32.xlu0 %v341_v50, %s679_s8  ;;  %352 = vrot.lane.b32.xlu1 %v340_v51, %s679_s8 }
  0xf1   : >> { %382 = vrot.lane.b32.xlu0 %v372_v52, %s680_s10  ;;  %356 = vrot.lane.b32.xlu1 %v342_v53, %s679_s8 }
  0xf5   : >> { %386 = vrot.lane.b32.xlu0 %v374_v54, %s680_s10  ;;  %384 = vrot.lane.b32.xlu1 %v373_v55, %s680_s10 }
  0xf9   : >> { %390 = vrot.lane.b32.xlu0 %v376_v57, %s680_s10  ;;  %388 = vrot.lane.b32.xlu1 %v375_v58, %s680_s10 }
  0xfd   : >> { %418 = vrot.lane.b32.xlu0 %v407_v59, %s681_s11  ;;  %416 = vrot.lane.b32.xlu1 %v406_v60, %s681_s11 }
 0x101   : >> { %422 = vrot.lane.b32.xlu0 %v409_v61, %s681_s11  ;;  %420 = vrot.lane.b32.xlu1 %v408_v62, %s681_s11 }
 0x105   : >> { %424 = vrot.lane.b32.xlu1 %v410_v63, %s681_s11 }
 0x133   : >> { %v215_v0 = vpop.permute.xlu0 %214  ;;  %v213_v6 = vpop.permute.xlu1 %212 }
 0x134   : >> { %v228_v43 = vadd.f32 %v215_v0, %v194_v37  ;;  %v227_v44 = vadd.f32 %v213_v6, %v193_v38 }
 0x137   : >> { %v219_v7 = vpop.permute.xlu0 %218  ;;  %v217_v8 = vpop.permute.xlu1 %216 }
 0x138   : >> { %v230_v49 = vadd.f32 %v219_v7, %v196_v16  ;;  %v229_v5 = vadd.f32 %v217_v8, %v195_v15 }
 0x13b   : >> { %v247_v9 = vpop.permute.xlu0 %246  ;;  %v221_v10 = vpop.permute.xlu1 %220 }
 0x13c   : >> { %v261_v46 = vadd.f32 %v247_v9, %v227_v44  ;;  %v231_v55 = vadd.f32 %v221_v10, %v197_v19 }
 0x13f   : >> { %v251_v11 = vpop.permute.xlu0 %250  ;;  %v249_v12 = vpop.permute.xlu1 %248 }
 0x140   : >> { %v262_v47 = vadd.f32 %v249_v12, %v228_v43  ;;  %v263_v51 = vadd.f32 %v251_v11, %v229_v5 }
 0x143   : >> { %v255_v13 = vpop.permute.xlu0 %254  ;;  %v253_v14 = vpop.permute.xlu1 %252 }
 0x144   : >> { %v264_v52 = vadd.f32 %v253_v14, %v230_v49  ;;  %v265_v59 = vadd.f32 %v255_v13, %v231_v55 }
 0x147   : >> { %v283_v17 = vpop.permute.xlu0 %282  ;;  %v281_v18 = vpop.permute.xlu1 %280 }
 0x148   : >> { %v296_v50 = vadd.f32 %v283_v17, %v262_v47  ;;  %v295_v20 = vadd.f32 %v281_v18, %v261_v46 }
 0x14b   : >> { %v287_v21 = vpop.permute.xlu0 %286  ;;  %v285_v22 = vpop.permute.xlu1 %284 }
 0x14c   : >> { %v298_v2 = vadd.f32 %v287_v21, %v264_v52  ;;  %v297_v57 = vadd.f32 %v285_v22, %v263_v51 }
 0x14f   : >> { %v315_v23 = vpop.permute.xlu0 %314  ;;  %v289_v24 = vpop.permute.xlu1 %288 }
 0x150   : >> { %v329_v53 = vadd.f32 %v315_v23, %v295_v20  ;;  %v299_v0 = vadd.f32 %v289_v24, %v265_v59  ;;  %v436_v24 = vld [vmem:[%s912_s2] sm:$0xff] (%p162_p5) }
 0x153   : >> { %v319_v26 = vpop.permute.xlu0 %318  ;;  %v317_v27 = vpop.permute.xlu1 %316 }
 0x154   : >> { %v330_v54 = vadd.f32 %v317_v27, %v296_v50  ;;  %v331_v60 = vadd.f32 %v319_v26, %v297_v57 }
 0x157   : >> { %v323_v28 = vpop.permute.xlu0 %322  ;;  %v321_v29 = vpop.permute.xlu1 %320 }
 0x158   : >> { %v332_v61 = vadd.f32 %v321_v29, %v298_v2  ;;  %v333_v12 = vadd.f32 %v323_v28, %v299_v0  ;;  %v437_v28 = vld [vmem:[%s912_s2 + $0x8] sm:$0xff] (%p162_p5)  ;;  %v438_v29 = vld [vmem:[%s912_s2 + $0x10] sm:$0xff] (%p162_p5) }
 0x15b   : >> { %v351_v31 = vpop.permute.xlu0 %350  ;;  %v349_v32 = vpop.permute.xlu1 %348 }
 0x15c   : >> { %v364_v3 = vadd.f32 %v351_v31, %v330_v54  ;;  %v363_v58 = vadd.f32 %v349_v32, %v329_v53 }
 0x15f   : >> { %v355_v35 = vpop.permute.xlu0 %354  ;;  %v353_v36 = vpop.permute.xlu1 %352 }
 0x160   : >> { %v366_v1 = vadd.f32 %v355_v35, %v332_v61  ;;  %v365_v8 = vadd.f32 %v353_v36, %v331_v60 }
 0x163   : >> { %v383_v41 = vpop.permute.xlu0 %382  ;;  %v357_v42 = vpop.permute.xlu1 %356 }
 0x164   : >> { %v397_v62 = vadd.f32 %v383_v41, %v363_v58  ;;  %v367_v21 = vadd.f32 %v357_v42, %v333_v12 }
 0x167   : >> { %v387_v48 = vpop.permute.xlu0 %386  ;;  %v385_v4 = vpop.permute.xlu1 %384 }
 0x168   : >> { %v398_v63 = vadd.f32 %v385_v4, %v364_v3  ;;  %v399_v10 = vadd.f32 %v387_v48, %v365_v8 }
 0x16b   : >> { %v391_v25 = vpop.permute.xlu0 %390  ;;  %v389_v56 = vpop.permute.xlu1 %388 }
 0x16c   : >> { %v400_v14 = vadd.f32 %v389_v56, %v366_v1  ;;  %v401_v13 = vadd.f32 %v391_v25, %v367_v21 }
 0x16f   : >> { %v419_v6 = vpop.permute.xlu0 %418  ;;  %v417_v7 = vpop.permute.xlu1 %416 }
 0x170   : >> { %v432_v9 = vadd.f32 %v419_v6, %v398_v63   ;;  %v431_v11 = vadd.f32 %v417_v7, %v397_v62  }
 0x172   : >> { %v916_v4 = vmov %v432_v9  ;;  %v917_v5 = vmov %v431_v11  ;;  %v441_v30 = vadd.f32 (%p162_p5), %v436_v24, %v431_v11  ;;  %v442_v31 = vadd.f32 (%p162_p5), %v437_v28, %v432_v9 }
 0x173   : >> { %v423_v17 = vpop.permute.xlu0 %422  ;;  %v421_v18 = vpop.permute.xlu1 %420 }
 0x174   : >> { %v434_v22 = vadd.f32 %v423_v17, %v400_v14   ;;  %v433_v23 = vadd.f32 %v421_v18, %v399_v10   ;;  %164 = sbr.rel (!%p162_p5) target bundleno = 23 (0x17), region = 70  ;;  %447 = vst.msk [vmem:[%s912_s2] sm:$0xff] (%p162_p5), %vm446_vm2, %v441_v30  ;;  %448 = vst.msk [vmem:[%s912_s2 + $0x8] sm:$0xff] (%p162_p5), %vm446_vm2, %v442_v31 }
 0x176   : >> { %v914_v2 = vmov %v434_v22  ;;  %v915_v3 = vmov %v433_v23  ;;  %v443_v32 = vadd.f32 (%p162_p5), %v438_v29, %v433_v23  ;;  %v444_v35 = vadd.f32 (%p162_p5), %v439_v33, %v434_v22 }
 0x177   : >> { %v425_v26 = vpop.permute.xlu1 %424 }
 0x178   : >> { %v435_v27 = vadd.f32 %v425_v26, %v401_v13   ;;  %449 = vst.msk [vmem:[%s912_s2 + $0x10] sm:$0xff] (%p162_p5), %vm446_vm2, %v443_v32  ;;  %450 = vst.msk [vmem:[%s912_s2 + $0x18] sm:$0xff] (%p162_p5), %vm446_vm2, %v444_v35 }
 0x17a   : >> { %v913_v1 = vmov %v435_v27  ;;  %v445_v36 = vadd.f32 (%p162_p5), %v440_v34, %v435_v27 }
 0x17c   : > { %452 = vst.msk [vmem:[%s912_s2 + $0x20] sm:$0x1f] %vm451_vm3, %v445_v36 }
 0x17d PF: > { %s12_s9 = sadd.s32 1, %s648_s9  }
 0x17e   : > { %p9_p6 = scmp.ge.s32.totalorder %s12_s9, 10  }
 0x180   :  { %11 = sbr.rel (!%p9_p6) target bundleno = 1 (0x1), region = 81 }

// kernel: net_forward.13
= control target key start
LH: loop header
LB: loop body
LE: loop exit
PB: predicated region body
PF: predicated region fallthrough
CT: control target
= control target key end

     0   :  { %s545_s9 = smov 0   ;;  %s684_s0 = inlined_call_operand.vmem [shape: bf16[4,192,37,128], index: 0, kind: input, shape index: {}]   ;;  %s685_s1 = inlined_call_operand.vmem [shape: f32[4,192,128], index: 1, kind: input, shape index: {}]   ;;  %s686_s2 = inlined_call_operand.vmem [shape: f32[37,37], index: 2, kind: output, shape index: {}]  }
   0x1 LB: > { %s380_s10 = sadd.s32 4294967295, %s500_s9   ;;  %p383_p0 = scmp.ge.s32.totalorder %s500_s9, 1  ;;  %s500_s9 = sphi %s545_s9, %s12_s9  }
   0x2   : > { %p117_p1 = scmp.lt.s32.totalorder %s500_s9, 5 }
   0x4   : > { %p118_p2 = pnand %p383_p0, %p117_p1 }
   0x5   : > { %p139_p3 = scmp.lt.s32.totalorder (!%p118_p2), %s380_s10, 3  ;;  %p386_p4 = scmp.ne.s32.totalorder (!%p118_p2), %s380_s10, 0 }
   0x6   : > { %121 = sbr.rel (%p118_p2) target bundleno = 343 (0x157), region = 28 }
   0xd   : > { %s140_s11 = scalar_select %p139_p3, %s380_s10, 3 }
   0xe   : > { %152 = sbr.rel (%p386_p4) target bundleno = 21 (0x15), region = 32  ;;  %vm153_vm0 = vcmask (!%p386_p4), 302080   ;;  %vm158_vm1 = vcmask (!%p386_p4), 299008   ;;  %v526_v0 = vmov (!%p386_p4), 0.0  }
   0xf   : > { %s400_s12 = smul.u32 3840, %s140_s11  ;;  %154 = vst.msk [vmem:[%s686_s2] sm:$0xff] (!%p386_p4), %vm153_vm0, %v526_v0  ;;  %155 = vst.msk [vmem:[%s686_s2 + $0x8] sm:$0xff] (!%p386_p4), %vm153_vm0, %v526_v0 }
  0x10   : > { %s401_s13 = smul.u32 192, %s140_s11  ;;  %156 = vst.msk [vmem:[%s686_s2 + $0x10] sm:$0xff] (!%p386_p4), %vm153_vm0, %v526_v0  ;;  %157 = vst.msk [vmem:[%s686_s2 + $0x18] sm:$0xff] (!%p386_p4), %vm153_vm0, %v526_v0 }
  0x11   : > { %s556_s16 = scalar_lea.vmem %s684_s0, %s400_s12  ;;  %159 = vst.msk [vmem:[%s686_s2 + $0x20] sm:$0x1f] (!%p386_p4), %vm158_vm1, %v526_v0 }
  0x12   : > { %s561_s19 = scalar_lea.vmem %s685_s1, %s401_s13 }
  0x15 PF: > { %v578_v1 = vmov 0.0   ;;  %v580_v2 = vmov 0.0   ;;  %v582_v3 = vmov 0.0   ;;  %v584_v4 = vmov 0.0   ;;  %s588_s30 = smov 0  }
  0x16   : > { %v586_v5 = vmov 0.0  }
  0x17 LB: >> { %s184_s3 = scalar_lea.vmem %s561_s19, %s524_s30  ;;  %s527_s4 = smov 127   ;;  %s524_s30 = sphi %s588_s30, %s165_s30   ;;  %v520_v5 = vphi %v586_v5, %v691_v5   ;;  %v516_v4 = vphi %v584_v4, %v690_v4   ;;  %v512_v3 = vphi %v582_v3, %v689_v3   ;;  %v508_v2 = vphi %v580_v2, %v688_v2   ;;  %v504_v1 = vphi %v578_v1, %v687_v1  }
  0x18   : >> { %v185_v6 = vld [vmem:[%s184_s3] sm:$0x1]  ;;  %s528_s5 = smov 125   ;;  %s529_s6 = smov 126  }
  0x19   : >> { %198 = vrot.lane.b32.xlu0 %v185_v6, %s527_s4  ;;  %266 = vrot.lane.b32.xlu1 %v185_v6, %s528_s5  ;;  %402 = vpush %v185_v6  ;;  %s390_s7 = smul.u32 20, %s524_s30  ;;  %s165_s30 = sadd.s32 1, %s524_s30  }
  0x1a   : >> { %p162_p5 = scmp.ge.s32.totalorder %s165_s30, 192  }
  0x1b   : >> { %s173_s8 = scalar_lea.vmem %s556_s16, %s390_s7  ;;  %vm310_vm2 = vcmask (%p162_p5), 302080   ;;  %vm315_vm3 = vcmask (%p162_p5), 299008  }
  0x1c   : >> { %v392_v10 = vld [vmem:[%s173_s8] sm:$0xff]   ;;  %v399_v13 = vld [vmem:[%s173_s8 + $0x8] sm:$0xff]   ;;  %v178_v19 = vld [vmem:[%s173_s8 + $0x10] sm:$0x7] }
  0x1d   : >> { %232 = vrot.lane.b32.xlu0 %v185_v6, %s529_s6  ;;  %v393_v11 = vunpack.c.l.bf16 %v392_v10  ;;  %v394_v12 = vunpack.c.h.bf16 %v392_v10  ;;  %v397_v15 = vunpack.c.l.bf16 %v399_v13  ;;  %v398_v16 = vunpack.c.h.bf16 %v399_v13 }
  0x1e   : >> { %v183_v21 = vunpack.c.l.bf16 %v178_v19 }
  0x4a   : >> { %s615_s10 = spop %402 }
  0x4b   : >> { %v187_v40 = vstv %s615_s10 }
  0x4c   : >> { %v189_v43 = vmul.f32 %v394_v12, %v187_v40  ;;  %v188_v44 = vmul.f32 %v393_v11, %v187_v40  ;;  %v191_v49 = vmul.f32 %v398_v16, %v187_v40  ;;  %v190_v50 = vmul.f32 %v397_v15, %v187_v40 }
  0x4d   : >> { %v192_v55 = vmul.f32 %v187_v40, %v183_v21 }
  0x4e   : >> { %v194_v47 = vadd.f32 %v516_v4, %v189_v43  ;;  %v193_v48 = vadd.f32 %v520_v5, %v188_v44  ;;  %v196_v56 = vadd.f32 %v508_v2, %v191_v49  ;;  %v195_v57 = vadd.f32 %v512_v3, %v190_v50 }
  0x4f   : >> { %v197_v4 = vadd.f32 %v504_v1, %v192_v55 }
  0x8b   : >> { %v199_v7 = vpop.permute.xlu0 %198  ;;  %v267_v8 = vpop.permute.xlu1 %266 }
  0x8c   : >> { %404 = vpush %v199_v7 }
  0x8f   : >> { %v233_v9 = vpop.permute.xlu0 %232 }
  0x90   : >> { %406 = vpush %v233_v9 }
  0x91   : >> { %408 = vpush %v267_v8 }
  0xbd   : >> { %s405_s11 = spop %404 }
  0xbe   : >> { %v201_v14 = vstv %s405_s11 }
  0xbf   : >> { %v203_v17 = vmul.f32 %v394_v12, %v201_v14  ;;  %v202_v18 = vmul.f32 %v393_v11, %v201_v14  ;;  %v205_v22 = vmul.f32 %v398_v16, %v201_v14  ;;  %v204_v23 = vmul.f32 %v397_v15, %v201_v14 }
  0xc0   : >> { %v206_v25 = vmul.f32 %v201_v14, %v183_v21 }
  0xc1   : >> { %214 = vrot.lane.b32.xlu0 %v203_v17, %s527_s4  ;;  %212 = vrot.lane.b32.xlu1 %v202_v18, %s527_s4  ;;  %s407_s12 = spop %406  ;;  %v302_v17 = vld [vmem:[%s686_s2 + $0x10] sm:$0xff] (%p162_p5) }
  0xc2   : >> { %v235_v20 = vstv %s407_s12  ;;  %s409_s13 = spop %408 }
  0xc3   : >> { %v236_v24 = vmul.f32 %v393_v11, %v235_v20  ;;  %v238_v26 = vmul.f32 %v397_v15, %v235_v20  ;;  %v237_v27 = vmul.f32 %v394_v12, %v235_v20  ;;  %v269_v28 = vstv %s409_s13 }
  0xc4   : >> { %v240_v29 = vmul.f32 %v235_v20, %v183_v21  ;;  %v239_v30 = vmul.f32 %v398_v16, %v235_v20  ;;  %v271_v31 = vmul.f32 %v394_v12, %v269_v28  ;;  %v270_v32 = vmul.f32 %v393_v11, %v269_v28 }
  0xc5   : >> { %218 = vrot.lane.b32.xlu0 %v205_v22, %s527_s4  ;;  %216 = vrot.lane.b32.xlu1 %v204_v23, %s527_s4  ;;  %v273_v33 = vmul.f32 %v398_v16, %v269_v28  ;;  %v272_v34 = vmul.f32 %v397_v15, %v269_v28  ;;  %v274_v35 = vmul.f32 %v269_v28, %v183_v21  ;;  %v300_v15 = vld [vmem:[%s686_s2] sm:$0xff] (%p162_p5)  ;;  %v301_v16 = vld [vmem:[%s686_s2 + $0x8] sm:$0xff] (%p162_p5) }
  0xc6   : > { %v303_v21 = vld [vmem:[%s686_s2 + $0x18] sm:$0xff] (%p162_p5) }
  0xc9   : >> { %246 = vrot.lane.b32.xlu0 %v236_v24, %s529_s6  ;;  %220 = vrot.lane.b32.xlu1 %v206_v25, %s527_s4 }
  0xcd   : >> { %250 = vrot.lane.b32.xlu0 %v238_v26, %s529_s6  ;;  %248 = vrot.lane.b32.xlu1 %v237_v27, %s529_s6 }
  0xd1   : >> { %254 = vrot.lane.b32.xlu0 %v240_v29, %s529_s6  ;;  %252 = vrot.lane.b32.xlu1 %v239_v30, %s529_s6 }
  0xd5   : >> { %282 = vrot.lane.b32.xlu0 %v271_v31, %s528_s5  ;;  %280 = vrot.lane.b32.xlu1 %v270_v32, %s528_s5 }
  0xd9   : >> { %286 = vrot.lane.b32.xlu0 %v273_v33, %s528_s5  ;;  %284 = vrot.lane.b32.xlu1 %v272_v34, %s528_s5 }
  0xdd   : >> { %288 = vrot.lane.b32.xlu1 %v274_v35, %s528_s5 }
 0x133   : >> { %v215_v36 = vpop.permute.xlu0 %214  ;;  %v213_v37 = vpop.permute.xlu1 %212 }
 0x134   : >> { %v228_v53 = vadd.f32 %v215_v36, %v194_v47  ;;  %v227_v54 = vadd.f32 %v213_v37, %v193_v48 }
 0x137   : >> { %v219_v38 = vpop.permute.xlu0 %218  ;;  %v217_v39 = vpop.permute.xlu1 %216 }
 0x138   : >> { %v230_v62 = vadd.f32 %v219_v38, %v196_v56  ;;  %v229_v63 = vadd.f32 %v217_v39, %v195_v57 }
 0x13b   : >> { %v247_v41 = vpop.permute.xlu0 %246  ;;  %v221_v42 = vpop.permute.xlu1 %220 }
 0x13c   : >> { %v261_v58 = vadd.f32 %v247_v41, %v227_v54  ;;  %v231_v10 = vadd.f32 %v221_v42, %v197_v4 }
 0x13f   : >> { %v251_v45 = vpop.permute.xlu0 %250  ;;  %v249_v46 = vpop.permute.xlu1 %248 }
 0x140   : >> { %v262_v59 = vadd.f32 %v249_v46, %v228_v53  ;;  %v263_v5 = vadd.f32 %v251_v45, %v229_v63 }
 0x143   : >> { %v255_v51 = vpop.permute.xlu0 %254  ;;  %v253_v52 = vpop.permute.xlu1 %252 }
 0x144   : >> { %v264_v7 = vadd.f32 %v253_v52, %v230_v62  ;;  %v265_v2 = vadd.f32 %v255_v51, %v231_v10 }
 0x147   : >> { %v283_v60 = vpop.permute.xlu0 %282  ;;  %v281_v61 = vpop.permute.xlu1 %280 }
 0x148   : >> { %v296_v0 = vadd.f32 %v283_v60, %v262_v59   ;;  %v295_v6 = vadd.f32 %v281_v61, %v261_v58  }
 0x14a   : >> { %v690_v4 = vmov %v296_v0  ;;  %v305_v18 = vadd.f32 (%p162_p5), %v300_v15, %v295_v6  ;;  %v306_v19 = vadd.f32 (%p162_p5), %v301_v16, %v296_v0 }
 0x14b   : >> { %v287_v8 = vpop.permute.xlu0 %286  ;;  %v285_v9 = vpop.permute.xlu1 %284 }
 0x14c   : >> { %v298_v11 = vadd.f32 %v287_v8, %v264_v7   ;;  %v297_v12 = vadd.f32 %v285_v9, %v263_v5   ;;  %v691_v5 = vmov %v295_v6  ;;  %164 = sbr.rel (!%p162_p5) target bundleno = 23 (0x17), region = 70  ;;  %311 = vst.msk [vmem:[%s686_s2] sm:$0xff] (%p162_p5), %vm310_vm2, %v305_v18  ;;  %312 = vst.msk [vmem:[%s686_s2 + $0x8] sm:$0xff] (%p162_p5), %vm310_vm2, %v306_v19 }
 0x14e   : >> { %v689_v3 = vmov %v297_v12  ;;  %v307_v20 = vadd.f32 (%p162_p5), %v302_v17, %v297_v12 }
 0x14f   : >> { %v289_v13 = vpop.permute.xlu1 %288  ;;  %v308_v3 = vadd.f32 (%p162_p5), %v303_v21, %v298_v11 }
 0x150   : >> { %v299_v14 = vadd.f32 %v289_v13, %v265_v2   ;;  %v688_v2 = vmov %v298_v11  ;;  %313 = vst.msk [vmem:[%s686_s2 + $0x10] sm:$0xff] (%p162_p5), %vm310_vm2, %v307_v20 }
 0x151   : > { %314 = vst.msk [vmem:[%s686_s2 + $0x18] sm:$0xff] (%p162_p5), %vm310_vm2, %v308_v3 }
 0x152   : >> { %v687_v1 = vmov %v299_v14 }
 0x153   : > { %v304_v1 = vld [vmem:[%s686_s2 + $0x20] sm:$0x1f] }
 0x154   : > { %v309_v22 = vadd.f32 %v304_v1, %v299_v14 }
 0x156   : > { %316 = vst.msk [vmem:[%s686_s2 + $0x20] sm:$0x1f] %vm315_vm3, %v309_v22 }
 0x157 PF: > { %s12_s9 = sadd.s32 1, %s500_s9  }
 0x158   : > { %p9_p6 = scmp.ge.s32.totalorder %s12_s9, 6  }
 0x15a   :  { %11 = sbr.rel (!%p9_p6) target bundleno = 1 (0x1), region = 81 }

// kernel: net_forward.14
= control target key start
LH: loop header
LB: loop body
LE: loop exit
PB: predicated region body
PF: predicated region fallthrough
CT: control target
= control target key end

     0   :  { %s469_s9 = smov 0   ;;  %s572_s0 = inlined_call_operand.vmem [shape: bf16[2,192,37,128], index: 0, kind: input, shape index: {}]   ;;  %s573_s1 = inlined_call_operand.vmem [shape: f32[2,192,128], index: 1, kind: input, shape index: {}]   ;;  %s574_s2 = inlined_call_operand.vmem [shape: f32[37,37], index: 2, kind: output, shape index: {}]  }
   0x1 LB: > { %s312_s10 = sadd.s32 4294967295, %s426_s9   ;;  %p315_p0 = scmp.ge.s32.totalorder %s426_s9, 1  ;;  %s426_s9 = sphi %s469_s9, %s12_s9  }
   0x2   : > { %p117_p1 = scmp.lt.s32.totalorder %s426_s9, 3 }
   0x4   : > { %p118_p2 = pnand %p315_p0, %p117_p1 }
   0x5   : > { %p139_p3 = scmp.lt.s32.totalorder (!%p118_p2), %s312_s10, 1  ;;  %p318_p4 = scmp.ne.s32.totalorder (!%p118_p2), %s312_s10, 0 }
   0x6   : > { %121 = sbr.rel (%p118_p2) target bundleno = 321 (0x141), region = 28 }
   0xd   : > { %s140_s11 = scalar_select %p139_p3, %s312_s10, 1 }
   0xe   : > { %152 = sbr.rel (%p318_p4) target bundleno = 21 (0x15), region = 32  ;;  %vm153_vm0 = vcmask (!%p318_p4), 302080   ;;  %vm158_vm1 = vcmask (!%p318_p4), 299008   ;;  %v452_v0 = vmov (!%p318_p4), 0.0  }
   0xf   : > { %s332_s12 = smul.u32 3840, %s140_s11  ;;  %154 = vst.msk [vmem:[%s574_s2] sm:$0xff] (!%p318_p4), %vm153_vm0, %v452_v0  ;;  %155 = vst.msk [vmem:[%s574_s2 + $0x8] sm:$0xff] (!%p318_p4), %vm153_vm0, %v452_v0 }
  0x10   : > { %s333_s13 = smul.u32 192, %s140_s11  ;;  %156 = vst.msk [vmem:[%s574_s2 + $0x10] sm:$0xff] (!%p318_p4), %vm153_vm0, %v452_v0  ;;  %157 = vst.msk [vmem:[%s574_s2 + $0x18] sm:$0xff] (!%p318_p4), %vm153_vm0, %v452_v0 }
  0x11   : > { %s480_s16 = scalar_lea.vmem %s572_s0, %s332_s12  ;;  %159 = vst.msk [vmem:[%s574_s2 + $0x20] sm:$0x1f] (!%p318_p4), %vm158_vm1, %v452_v0 }
  0x12   : > { %s485_s19 = scalar_lea.vmem %s573_s1, %s333_s13 }
  0x15 PF: > { %v502_v1 = vmov 0.0   ;;  %v504_v2 = vmov 0.0   ;;  %v506_v3 = vmov 0.0   ;;  %v508_v4 = vmov 0.0   ;;  %s512_s30 = smov 0  }
  0x16   : > { %v510_v5 = vmov 0.0  }
  0x17 LB: >> { %s184_s3 = scalar_lea.vmem %s485_s19, %s450_s30  ;;  %s453_s4 = smov 127   ;;  %s450_s30 = sphi %s512_s30, %s165_s30   ;;  %v446_v5 = vphi %v510_v5, %v579_v5   ;;  %v442_v4 = vphi %v508_v4, %v578_v4   ;;  %v438_v3 = vphi %v506_v3, %v577_v3   ;;  %v434_v2 = vphi %v504_v2, %v576_v2   ;;  %v430_v1 = vphi %v502_v1, %v575_v1  }
  0x18   : >> { %v185_v6 = vld [vmem:[%s184_s3] sm:$0x1]  ;;  %s322_s5 = smul.u32 20, %s450_s30  ;;  %s165_s30 = sadd.s32 1, %s450_s30  }
  0x19   : >> { %198 = vrot.lane.b32.xlu0 %v185_v6, %s453_s4  ;;  %334 = vpush %v185_v6  ;;  %p162_p5 = scmp.ge.s32.totalorder %s165_s30, 192  }
  0x1a   : >> { %s173_s6 = scalar_lea.vmem %s480_s16, %s322_s5  ;;  %v232_v43 = vld [vmem:[%s574_s2] sm:$0xff] (%p162_p5)  ;;  %vm242_vm2 = vcmask (%p162_p5), 302080   ;;  %v233_v44 = vld [vmem:[%s574_s2 + $0x8] sm:$0xff] (%p162_p5)  ;;  %v234_v45 = vld [vmem:[%s574_s2 + $0x10] sm:$0xff] (%p162_p5)  ;;  %vm247_vm3 = vcmask (%p162_p5), 299008  }
  0x1b   : >> { %v324_v8 = vld [vmem:[%s173_s6] sm:$0xff]   ;;  %v331_v11 = vld [vmem:[%s173_s6 + $0x8] sm:$0xff]   ;;  %v178_v17 = vld [vmem:[%s173_s6 + $0x10] sm:$0x7] }
  0x1c   : >> { %v326_v9 = vunpack.c.h.bf16 %v324_v8  ;;  %v325_v10 = vunpack.c.l.bf16 %v324_v8  ;;  %v329_v15 = vunpack.c.l.bf16 %v331_v11  ;;  %v330_v16 = vunpack.c.h.bf16 %v331_v11  ;;  %v235_v49 = vld [vmem:[%s574_s2 + $0x18] sm:$0xff] (%p162_p5)  ;;  %v236_v50 = vld [vmem:[%s574_s2 + $0x20] sm:$0x1f] (%p162_p5) }
  0x1d   : >> { %v183_v18 = vunpack.c.l.bf16 %v178_v17 }
  0x4a   : >> { %s335_s7 = spop %334 }
  0x4b   : >> { %v187_v22 = vstv %s335_s7 }
  0x4c   : >> { %v189_v23 = vmul.f32 %v326_v9, %v187_v22  ;;  %v188_v24 = vmul.f32 %v325_v10, %v187_v22  ;;  %v190_v27 = vmul.f32 %v329_v15, %v187_v22  ;;  %v191_v28 = vmul.f32 %v330_v16, %v187_v22 }
  0x4d   : >> { %v192_v35 = vmul.f32 %v187_v22, %v183_v18 }
  0x4e   : >> { %v194_v25 = vadd.f32 %v442_v4, %v189_v23  ;;  %v193_v26 = vadd.f32 %v446_v5, %v188_v24  ;;  %v195_v33 = vadd.f32 %v438_v3, %v190_v27  ;;  %v196_v34 = vadd.f32 %v434_v2, %v191_v28 }
  0x4f   : >> { %v197_v40 = vadd.f32 %v430_v1, %v192_v35 }
  0x8b   : >> { %v199_v7 = vpop.permute.xlu0 %198 }
  0x8c   : >> { %336 = vpush %v199_v7 }
  0xbd   : >> { %s337_s8 = spop %336 }
  0xbe   : >> { %v201_v12 = vstv %s337_s8 }
  0xbf   : >> { %v203_v13 = vmul.f32 %v326_v9, %v201_v12  ;;  %v202_v14 = vmul.f32 %v325_v10, %v201_v12  ;;  %v204_v19 = vmul.f32 %v329_v15, %v201_v12  ;;  %v205_v20 = vmul.f32 %v330_v16, %v201_v12 }
  0xc0   : >> { %v206_v21 = vmul.f32 %v201_v12, %v183_v18 }
  0xc1   : >> { %214 = vrot.lane.b32.xlu1 %v203_v13, %s453_s4  ;;  %212 = vrot.lane.b32.xlu0 %v202_v14, %s453_s4 }
  0xc5   : >> { %216 = vrot.lane.b32.xlu1 %v204_v19, %s453_s4  ;;  %218 = vrot.lane.b32.xlu0 %v205_v20, %s453_s4 }
  0xc9   : >> { %220 = vrot.lane.b32.xlu1 %v206_v21, %s453_s4 }
 0x133   : >> { %v215_v29 = vpop.permute.xlu1 %214  ;;  %v213_v30 = vpop.permute.xlu0 %212 }
 0x134   : >> { %v228_v31 = vadd.f32 %v215_v29, %v194_v25   ;;  %v227_v32 = vadd.f32 %v213_v30, %v193_v26  }
 0x136   : >> { %v578_v4 = vmov %v228_v31  ;;  %v579_v5 = vmov %v227_v32  ;;  %v237_v46 = vadd.f32 (%p162_p5), %v232_v43, %v227_v32  ;;  %v238_v47 = vadd.f32 (%p162_p5), %v233_v44, %v228_v31 }
 0x137   : >> { %v217_v36 = vpop.permute.xlu1 %216  ;;  %v219_v37 = vpop.permute.xlu0 %218 }
 0x138   : >> { %v229_v38 = vadd.f32 %v217_v36, %v195_v33   ;;  %v230_v39 = vadd.f32 %v219_v37, %v196_v34   ;;  %164 = sbr.rel (!%p162_p5) target bundleno = 23 (0x17), region = 70  ;;  %243 = vst.msk [vmem:[%s574_s2] sm:$0xff] (%p162_p5), %vm242_vm2, %v237_v46  ;;  %244 = vst.msk [vmem:[%s574_s2 + $0x8] sm:$0xff] (%p162_p5), %vm242_vm2, %v238_v47 }
 0x13a   : >> { %v576_v2 = vmov %v230_v39  ;;  %v577_v3 = vmov %v229_v38  ;;  %v239_v48 = vadd.f32 (%p162_p5), %v234_v45, %v229_v38  ;;  %v240_v51 = vadd.f32 (%p162_p5), %v235_v49, %v230_v39 }
 0x13b   : >> { %v221_v41 = vpop.permute.xlu1 %220 }
 0x13c   : >> { %v231_v42 = vadd.f32 %v221_v41, %v197_v40   ;;  %245 = vst.msk [vmem:[%s574_s2 + $0x10] sm:$0xff] (%p162_p5), %vm242_vm2, %v239_v48  ;;  %246 = vst.msk [vmem:[%s574_s2 + $0x18] sm:$0xff] (%p162_p5), %vm242_vm2, %v240_v51 }
 0x13e   : >> { %v575_v1 = vmov %v231_v42  ;;  %v241_v52 = vadd.f32 (%p162_p5), %v236_v50, %v231_v42 }
 0x140   : > { %248 = vst.msk [vmem:[%s574_s2 + $0x20] sm:$0x1f] %vm247_vm3, %v241_v52 }
 0x141 PF: > { %s12_s9 = sadd.s32 1, %s426_s9  }
 0x142   : > { %p9_p6 = scmp.ge.s32.totalorder %s12_s9, 4  }
 0x144   :  { %11 = sbr.rel (!%p9_p6) target bundleno = 1 (0x1), region = 81 }

// kernel: net_forward.15
= control target key start
LH: loop header
LB: loop body
LE: loop exit
PB: predicated region body
PF: predicated region fallthrough
CT: control target
= control target key end

     0   :  { %s469_s9 = smov 0   ;;  %s572_s0 = inlined_call_operand.vmem [shape: bf16[2,75,37,128], index: 0, kind: input, shape index: {}]   ;;  %s573_s1 = inlined_call_operand.vmem [shape: f32[2,75,128], index: 1, kind: input, shape index: {}]   ;;  %s574_s2 = inlined_call_operand.vmem [shape: f32[37,37], index: 2, kind: output, shape index: {}]  }
   0x1 LB: > { %s312_s10 = sadd.s32 4294967295, %s426_s9   ;;  %p315_p0 = scmp.ge.s32.totalorder %s426_s9, 1  ;;  %s426_s9 = sphi %s469_s9, %s12_s9  }
   0x2   : > { %p117_p1 = scmp.lt.s32.totalorder %s426_s9, 3 }
   0x4   : > { %p118_p2 = pnand %p315_p0, %p117_p1 }
   0x5   : > { %p139_p3 = scmp.lt.s32.totalorder (!%p118_p2), %s312_s10, 1  ;;  %p318_p4 = scmp.ne.s32.totalorder (!%p118_p2), %s312_s10, 0 }
   0x6   : > { %121 = sbr.rel (%p118_p2) target bundleno = 321 (0x141), region = 28 }
   0xd   : > { %s140_s11 = scalar_select %p139_p3, %s312_s10, 1 }
   0xe   : > { %152 = sbr.rel (%p318_p4) target bundleno = 21 (0x15), region = 32  ;;  %vm153_vm0 = vcmask (!%p318_p4), 302080   ;;  %vm158_vm1 = vcmask (!%p318_p4), 299008   ;;  %v452_v0 = vmov (!%p318_p4), 0.0  }
   0xf   : > { %s332_s12 = smul.u32 1500, %s140_s11  ;;  %154 = vst.msk [vmem:[%s574_s2] sm:$0xff] (!%p318_p4), %vm153_vm0, %v452_v0  ;;  %155 = vst.msk [vmem:[%s574_s2 + $0x8] sm:$0xff] (!%p318_p4), %vm153_vm0, %v452_v0 }
  0x10   : > { %s333_s13 = smul.u32 80, %s140_s11  ;;  %156 = vst.msk [vmem:[%s574_s2 + $0x10] sm:$0xff] (!%p318_p4), %vm153_vm0, %v452_v0  ;;  %157 = vst.msk [vmem:[%s574_s2 + $0x18] sm:$0xff] (!%p318_p4), %vm153_vm0, %v452_v0 }
  0x11   : > { %s480_s16 = scalar_lea.vmem %s572_s0, %s332_s12  ;;  %159 = vst.msk [vmem:[%s574_s2 + $0x20] sm:$0x1f] (!%p318_p4), %vm158_vm1, %v452_v0 }
  0x12   : > { %s485_s19 = scalar_lea.vmem %s573_s1, %s333_s13 }
  0x15 PF: > { %v502_v1 = vmov 0.0   ;;  %v504_v2 = vmov 0.0   ;;  %v506_v3 = vmov 0.0   ;;  %v508_v4 = vmov 0.0   ;;  %s512_s30 = smov 0  }
  0x16   : > { %v510_v5 = vmov 0.0  }
  0x17 LB: >> { %s184_s3 = scalar_lea.vmem %s485_s19, %s450_s30  ;;  %s453_s4 = smov 127   ;;  %s450_s30 = sphi %s512_s30, %s165_s30   ;;  %v446_v5 = vphi %v510_v5, %v579_v5   ;;  %v442_v4 = vphi %v508_v4, %v578_v4   ;;  %v438_v3 = vphi %v506_v3, %v577_v3   ;;  %v434_v2 = vphi %v504_v2, %v576_v2   ;;  %v430_v1 = vphi %v502_v1, %v575_v1  }
  0x18   : >> { %v185_v6 = vld [vmem:[%s184_s3] sm:$0x1]  ;;  %s322_s5 = smul.u32 20, %s450_s30  ;;  %s165_s30 = sadd.s32 1, %s450_s30  }
  0x19   : >> { %198 = vrot.lane.b32.xlu0 %v185_v6, %s453_s4  ;;  %334 = vpush %v185_v6  ;;  %p162_p5 = scmp.ge.s32.totalorder %s165_s30, 75  }
  0x1a   : >> { %s173_s6 = scalar_lea.vmem %s480_s16, %s322_s5  ;;  %v232_v43 = vld [vmem:[%s574_s2] sm:$0xff] (%p162_p5)  ;;  %vm242_vm2 = vcmask (%p162_p5), 302080   ;;  %v233_v44 = vld [vmem:[%s574_s2 + $0x8] sm:$0xff] (%p162_p5)  ;;  %v234_v45 = vld [vmem:[%s574_s2 + $0x10] sm:$0xff] (%p162_p5)  ;;  %vm247_vm3 = vcmask (%p162_p5), 299008  }
  0x1b   : >> { %v324_v8 = vld [vmem:[%s173_s6] sm:$0xff]   ;;  %v331_v11 = vld [vmem:[%s173_s6 + $0x8] sm:$0xff]   ;;  %v178_v17 = vld [vmem:[%s173_s6 + $0x10] sm:$0x7] }
  0x1c   : >> { %v326_v9 = vunpack.c.h.bf16 %v324_v8  ;;  %v325_v10 = vunpack.c.l.bf16 %v324_v8  ;;  %v329_v15 = vunpack.c.l.bf16 %v331_v11  ;;  %v330_v16 = vunpack.c.h.bf16 %v331_v11  ;;  %v235_v49 = vld [vmem:[%s574_s2 + $0x18] sm:$0xff] (%p162_p5)  ;;  %v236_v50 = vld [vmem:[%s574_s2 + $0x20] sm:$0x1f] (%p162_p5) }
  0x1d   : >> { %v183_v18 = vunpack.c.l.bf16 %v178_v17 }
  0x4a   : >> { %s335_s7 = spop %334 }
  0x4b   : >> { %v187_v22 = vstv %s335_s7 }
  0x4c   : >> { %v189_v23 = vmul.f32 %v326_v9, %v187_v22  ;;  %v188_v24 = vmul.f32 %v325_v10, %v187_v22  ;;  %v190_v27 = vmul.f32 %v329_v15, %v187_v22  ;;  %v191_v28 = vmul.f32 %v330_v16, %v187_v22 }
  0x4d   : >> { %v192_v35 = vmul.f32 %v187_v22, %v183_v18 }
  0x4e   : >> { %v194_v25 = vadd.f32 %v442_v4, %v189_v23  ;;  %v193_v26 = vadd.f32 %v446_v5, %v188_v24  ;;  %v195_v33 = vadd.f32 %v438_v3, %v190_v27  ;;  %v196_v34 = vadd.f32 %v434_v2, %v191_v28 }
  0x4f   : >> { %v197_v40 = vadd.f32 %v430_v1, %v192_v35 }
  0x8b   : >> { %v199_v7 = vpop.permute.xlu0 %198 }
  0x8c   : >> { %336 = vpush %v199_v7 }
  0xbd   : >> { %s337_s8 = spop %336 }
  0xbe   : >> { %v201_v12 = vstv %s337_s8 }
  0xbf   : >> { %v203_v13 = vmul.f32 %v326_v9, %v201_v12  ;;  %v202_v14 = vmul.f32 %v325_v10, %v201_v12  ;;  %v204_v19 = vmul.f32 %v329_v15, %v201_v12  ;;  %v205_v20 = vmul.f32 %v330_v16, %v201_v12 }
  0xc0   : >> { %v206_v21 = vmul.f32 %v201_v12, %v183_v18 }
  0xc1   : >> { %214 = vrot.lane.b32.xlu1 %v203_v13, %s453_s4  ;;  %212 = vrot.lane.b32.xlu0 %v202_v14, %s453_s4 }
  0xc5   : >> { %216 = vrot.lane.b32.xlu1 %v204_v19, %s453_s4  ;;  %218 = vrot.lane.b32.xlu0 %v205_v20, %s453_s4 }
  0xc9   : >> { %220 = vrot.lane.b32.xlu1 %v206_v21, %s453_s4 }
 0x133   : >> { %v215_v29 = vpop.permute.xlu1 %214  ;;  %v213_v30 = vpop.permute.xlu0 %212 }
 0x134   : >> { %v228_v31 = vadd.f32 %v215_v29, %v194_v25   ;;  %v227_v32 = vadd.f32 %v213_v30, %v193_v26  }
 0x136   : >> { %v578_v4 = vmov %v228_v31  ;;  %v579_v5 = vmov %v227_v32  ;;  %v237_v46 = vadd.f32 (%p162_p5), %v232_v43, %v227_v32  ;;  %v238_v47 = vadd.f32 (%p162_p5), %v233_v44, %v228_v31 }
 0x137   : >> { %v217_v36 = vpop.permute.xlu1 %216  ;;  %v219_v37 = vpop.permute.xlu0 %218 }
 0x138   : >> { %v229_v38 = vadd.f32 %v217_v36, %v195_v33   ;;  %v230_v39 = vadd.f32 %v219_v37, %v196_v34   ;;  %164 = sbr.rel (!%p162_p5) target bundleno = 23 (0x17), region = 70  ;;  %243 = vst.msk [vmem:[%s574_s2] sm:$0xff] (%p162_p5), %vm242_vm2, %v237_v46  ;;  %244 = vst.msk [vmem:[%s574_s2 + $0x8] sm:$0xff] (%p162_p5), %vm242_vm2, %v238_v47 }
 0x13a   : >> { %v576_v2 = vmov %v230_v39  ;;  %v577_v3 = vmov %v229_v38  ;;  %v239_v48 = vadd.f32 (%p162_p5), %v234_v45, %v229_v38  ;;  %v240_v51 = vadd.f32 (%p162_p5), %v235_v49, %v230_v39 }
 0x13b   : >> { %v221_v41 = vpop.permute.xlu1 %220 }
 0x13c   : >> { %v231_v42 = vadd.f32 %v221_v41, %v197_v40   ;;  %245 = vst.msk [vmem:[%s574_s2 + $0x10] sm:$0xff] (%p162_p5), %vm242_vm2, %v239_v48  ;;  %246 = vst.msk [vmem:[%s574_s2 + $0x18] sm:$0xff] (%p162_p5), %vm242_vm2, %v240_v51 }
 0x13e   : >> { %v575_v1 = vmov %v231_v42  ;;  %v241_v52 = vadd.f32 (%p162_p5), %v236_v50, %v231_v42 }
 0x140   : > { %248 = vst.msk [vmem:[%s574_s2 + $0x20] sm:$0x1f] %vm247_vm3, %v241_v52 }
 0x141 PF: > { %s12_s9 = sadd.s32 1, %s426_s9  }
 0x142   : > { %p9_p6 = scmp.ge.s32.totalorder %s12_s9, 4  }
 0x144   :  { %11 = sbr.rel (!%p9_p6) target bundleno = 1 (0x1), region = 81 }

// kernel: net_forward.16
= control target key start
LH: loop header
LB: loop body
LE: loop exit
PB: predicated region body
PF: predicated region fallthrough
CT: control target
= control target key end

     0   :  { %s470_s9 = smov 0   ;;  %s573_s0 = inlined_call_operand.vmem [shape: bf16[2,27,37,128], index: 0, kind: input, shape index: {}]   ;;  %s574_s1 = inlined_call_operand.vmem [shape: f32[2,27,128], index: 1, kind: input, shape index: {}]   ;;  %s575_s2 = inlined_call_operand.vmem [shape: f32[37,37], index: 2, kind: output, shape index: {}]  }
   0x1 LB: > { %s312_s10 = sadd.s32 4294967295, %s427_s9   ;;  %p315_p0 = scmp.ge.s32.totalorder %s427_s9, 1  ;;  %s427_s9 = sphi %s470_s9, %s12_s9  }
   0x2   : > { %p117_p1 = scmp.lt.s32.totalorder %s427_s9, 3 }
   0x4   : > { %p118_p2 = pnand %p315_p0, %p117_p1 }
   0x5   : > { %p139_p3 = scmp.lt.s32.totalorder (!%p118_p2), %s312_s10, 1  ;;  %p319_p4 = scmp.ne.s32.totalorder (!%p118_p2), %s312_s10, 0 }
   0x6   : > { %121 = sbr.rel (%p118_p2) target bundleno = 321 (0x141), region = 28 }
   0xd   : > { %s140_s11 = scalar_select %p139_p3, %s312_s10, 1 }
   0xe   : > { %152 = sbr.rel (%p319_p4) target bundleno = 21 (0x15), region = 32  ;;  %vm153_vm0 = vcmask (!%p319_p4), 302080   ;;  %vm158_vm1 = vcmask (!%p319_p4), 299008   ;;  %v453_v0 = vmov (!%p319_p4), 0.0  }
   0xf   : > { %s334_s12 = smul.u32 540, %s140_s11  ;;  %s323_s13 = sshll.u32 %s140_s11, 5  ;;  %154 = vst.msk [vmem:[%s575_s2] sm:$0xff] (!%p319_p4), %vm153_vm0, %v453_v0  ;;  %155 = vst.msk [vmem:[%s575_s2 + $0x8] sm:$0xff] (!%p319_p4), %vm153_vm0, %v453_v0 }
  0x10   : > { %s481_s16 = scalar_lea.vmem %s574_s1, %s323_s13  ;;  %156 = vst.msk [vmem:[%s575_s2 + $0x10] sm:$0xff] (!%p319_p4), %vm153_vm0, %v453_v0  ;;  %157 = vst.msk [vmem:[%s575_s2 + $0x18] sm:$0xff] (!%p319_p4), %vm153_vm0, %v453_v0 }
  0x11   : > { %s486_s19 = scalar_lea.vmem %s573_s0, %s334_s12  ;;  %159 = vst.msk [vmem:[%s575_s2 + $0x20] sm:$0x1f] (!%p319_p4), %vm158_vm1, %v453_v0 }
  0x15 PF: > { %v503_v1 = vmov 0.0   ;;  %v505_v2 = vmov 0.0   ;;  %v507_v3 = vmov 0.0   ;;  %v509_v4 = vmov 0.0   ;;  %s513_s30 = smov 0  }
  0x16   : > { %v511_v5 = vmov 0.0  }
  0x17 LB: >> { %s184_s3 = scalar_lea.vmem %s481_s16, %s451_s30  ;;  %s454_s4 = smov 127   ;;  %s451_s30 = sphi %s513_s30, %s165_s30   ;;  %v447_v5 = vphi %v511_v5, %v580_v5   ;;  %v443_v4 = vphi %v509_v4, %v579_v4   ;;  %v439_v3 = vphi %v507_v3, %v578_v3   ;;  %v435_v2 = vphi %v505_v2, %v577_v2   ;;  %v431_v1 = vphi %v503_v1, %v576_v1  }
  0x18   : >> { %v185_v6 = vld [vmem:[%s184_s3] sm:$0x1]  ;;  %s324_s5 = smul.u32 20, %s451_s30  ;;  %s165_s30 = sadd.s32 1, %s451_s30  }
  0x19   : >> { %198 = vrot.lane.b32.xlu0 %v185_v6, %s454_s4  ;;  %335 = vpush %v185_v6  ;;  %p162_p5 = scmp.ge.s32.totalorder %s165_s30, 27  }
  0x1a   : >> { %s173_s6 = scalar_lea.vmem %s486_s19, %s324_s5  ;;  %v232_v43 = vld [vmem:[%s575_s2] sm:$0xff] (%p162_p5)  ;;  %vm242_vm2 = vcmask (%p162_p5), 302080   ;;  %v233_v44 = vld [vmem:[%s575_s2 + $0x8] sm:$0xff] (%p162_p5)  ;;  %v234_v45 = vld [vmem:[%s575_s2 + $0x10] sm:$0xff] (%p162_p5)  ;;  %vm247_vm3 = vcmask (%p162_p5), 299008  }
  0x1b   : >> { %v326_v8 = vld [vmem:[%s173_s6] sm:$0xff]   ;;  %v333_v11 = vld [vmem:[%s173_s6 + $0x8] sm:$0xff]   ;;  %v178_v17 = vld [vmem:[%s173_s6 + $0x10] sm:$0x7] }
  0x1c   : >> { %v328_v9 = vunpack.c.h.bf16 %v326_v8  ;;  %v327_v10 = vunpack.c.l.bf16 %v326_v8  ;;  %v331_v15 = vunpack.c.l.bf16 %v333_v11  ;;  %v332_v16 = vunpack.c.h.bf16 %v333_v11  ;;  %v235_v49 = vld [vmem:[%s575_s2 + $0x18] sm:$0xff] (%p162_p5)  ;;  %v236_v50 = vld [vmem:[%s575_s2 + $0x20] sm:$0x1f] (%p162_p5) }
  0x1d   : >> { %v183_v18 = vunpack.c.l.bf16 %v178_v17 }
  0x4a   : >> { %s336_s7 = spop %335 }
  0x4b   : >> { %v187_v22 = vstv %s336_s7 }
  0x4c   : >> { %v189_v23 = vmul.f32 %v328_v9, %v187_v22  ;;  %v188_v24 = vmul.f32 %v327_v10, %v187_v22  ;;  %v190_v27 = vmul.f32 %v331_v15, %v187_v22  ;;  %v191_v28 = vmul.f32 %v332_v16, %v187_v22 }
  0x4d   : >> { %v192_v35 = vmul.f32 %v187_v22, %v183_v18 }
  0x4e   : >> { %v194_v25 = vadd.f32 %v443_v4, %v189_v23  ;;  %v193_v26 = vadd.f32 %v447_v5, %v188_v24  ;;  %v195_v33 = vadd.f32 %v439_v3, %v190_v27  ;;  %v196_v34 = vadd.f32 %v435_v2, %v191_v28 }
  0x4f   : >> { %v197_v40 = vadd.f32 %v431_v1, %v192_v35 }
  0x8b   : >> { %v199_v7 = vpop.permute.xlu0 %198 }
  0x8c   : >> { %337 = vpush %v199_v7 }
  0xbd   : >> { %s338_s8 = spop %337 }
  0xbe   : >> { %v201_v12 = vstv %s338_s8 }
  0xbf   : >> { %v203_v13 = vmul.f32 %v328_v9, %v201_v12  ;;  %v202_v14 = vmul.f32 %v327_v10, %v201_v12  ;;  %v204_v19 = vmul.f32 %v331_v15, %v201_v12  ;;  %v205_v20 = vmul.f32 %v332_v16, %v201_v12 }
  0xc0   : >> { %v206_v21 = vmul.f32 %v201_v12, %v183_v18 }
  0xc1   : >> { %214 = vrot.lane.b32.xlu1 %v203_v13, %s454_s4  ;;  %212 = vrot.lane.b32.xlu0 %v202_v14, %s454_s4 }
  0xc5   : >> { %216 = vrot.lane.b32.xlu1 %v204_v19, %s454_s4  ;;  %218 = vrot.lane.b32.xlu0 %v205_v20, %s454_s4 }
  0xc9   : >> { %220 = vrot.lane.b32.xlu1 %v206_v21, %s454_s4 }
 0x133   : >> { %v215_v29 = vpop.permute.xlu1 %214  ;;  %v213_v30 = vpop.permute.xlu0 %212 }
 0x134   : >> { %v228_v31 = vadd.f32 %v215_v29, %v194_v25   ;;  %v227_v32 = vadd.f32 %v213_v30, %v193_v26  }
 0x136   : >> { %v579_v4 = vmov %v228_v31  ;;  %v580_v5 = vmov %v227_v32  ;;  %v237_v46 = vadd.f32 (%p162_p5), %v232_v43, %v227_v32  ;;  %v238_v47 = vadd.f32 (%p162_p5), %v233_v44, %v228_v31 }
 0x137   : >> { %v217_v36 = vpop.permute.xlu1 %216  ;;  %v219_v37 = vpop.permute.xlu0 %218 }
 0x138   : >> { %v229_v38 = vadd.f32 %v217_v36, %v195_v33   ;;  %v230_v39 = vadd.f32 %v219_v37, %v196_v34   ;;  %164 = sbr.rel (!%p162_p5) target bundleno = 23 (0x17), region = 70  ;;  %243 = vst.msk [vmem:[%s575_s2] sm:$0xff] (%p162_p5), %vm242_vm2, %v237_v46  ;;  %244 = vst.msk [vmem:[%s575_s2 + $0x8] sm:$0xff] (%p162_p5), %vm242_vm2, %v238_v47 }
 0x13a   : >> { %v577_v2 = vmov %v230_v39  ;;  %v578_v3 = vmov %v229_v38  ;;  %v239_v48 = vadd.f32 (%p162_p5), %v234_v45, %v229_v38  ;;  %v240_v51 = vadd.f32 (%p162_p5), %v235_v49, %v230_v39 }
 0x13b   : >> { %v221_v41 = vpop.permute.xlu1 %220 }
 0x13c   : >> { %v231_v42 = vadd.f32 %v221_v41, %v197_v40   ;;  %245 = vst.msk [vmem:[%s575_s2 + $0x10] sm:$0xff] (%p162_p5), %vm242_vm2, %v239_v48  ;;  %246 = vst.msk [vmem:[%s575_s2 + $0x18] sm:$0xff] (%p162_p5), %vm242_vm2, %v240_v51 }
 0x13e   : >> { %v576_v1 = vmov %v231_v42  ;;  %v241_v52 = vadd.f32 (%p162_p5), %v236_v50, %v231_v42 }
 0x140   : > { %248 = vst.msk [vmem:[%s575_s2 + $0x20] sm:$0x1f] %vm247_vm3, %v241_v52 }
 0x141 PF: > { %s12_s9 = sadd.s32 1, %s427_s9  }
 0x142   : > { %p9_p6 = scmp.ge.s32.totalorder %s12_s9, 4  }
 0x144   :  { %11 = sbr.rel (!%p9_p6) target bundleno = 1 (0x1), region = 81 }

// kernel: net_forward.17
= control target key start
LH: loop header
LB: loop body
LE: loop exit
PB: predicated region body
PF: predicated region fallthrough
CT: control target
= control target key end

     0   :  { %s2486_s21 = smov 127   ;;  %vm73_vm0 = vcmask 1046528   ;;  %vm518_vm1 = vcmask 302080   ;;  %vm526_vm2 = vcmask 299008   ;;  %s2487_s17 = smov 126   ;;  %vm297_vm3 = vcmask 1045504   ;;  %s4320_s0 = inlined_call_operand.vmem [shape: f32[38,38], index: 0, kind: input, shape index: {}]   ;;  %s4321_s8 = inlined_call_operand.vmem [shape: f32[1,8], index: 8, kind: input, shape index: {}]   ;;  %s4322_s1 = inlined_call_operand.vmem [shape: f32[44,44], index: 1, kind: input, shape index: {}]   ;;  %s4323_s2 = inlined_call_operand.vmem [shape: f32[38,38], index: 2, kind: input, shape index: {}]   ;;  %s4324_s9 = inlined_call_operand.vmem [shape: f32[4,8,37,37], index: 9, kind: input, shape index: {}]   ;;  %s4325_s3 = inlined_call_operand.vmem [shape: f32[37,37], index: 3, kind: input, shape index: {}]   ;;  %s4326_s4 = inlined_call_operand.vmem [shape: f32[37,37], index: 4, kind: input, shape index: {}]   ;;  %s4327_s5 = inlined_call_operand.vmem [shape: f32[37,37], index: 5, kind: input, shape index: {}]   ;;  %s4328_s6 = inlined_call_operand.vmem [shape: f32[37,37], index: 6, kind: input, shape index: {}]   ;;  %s4329_s7 = inlined_call_operand.vmem [shape: f32[37,37], index: 7, kind: input, shape index: {}]   ;;  %s4330_s10 = inlined_call_operand.vmem [shape: f32[1,4], index: 10, kind: input, shape index: {}]   ;;  %s4331_s11 = inlined_call_operand.vmem [shape: f32[8,128], index: 11, kind: output, shape index: {}]  }
   0x1   :  { %v40_v0 = vld [vmem:[%s4320_s0 + $0x10] sm:$0xff]  ;;  %v38_v1 = vld [vmem:[%s4320_s0] sm:$0xff]  ;;  %v41_v2 = vld [vmem:[%s4320_s0 + $0x18] sm:$0xff]  ;;  %s2488_s20 = smov 125   ;;  %s2489_s24 = smov 124   ;;  %vm338_vm4 = vcmask 1043456  }
   0x2   :  { %52 = vrot.lane.b32.xlu1 %v40_v0, %s2486_s21  ;;  %48 = vrot.lane.b32.xlu0 %v38_v1, %s2486_s21  ;;  %v39_v3 = vld [vmem:[%s4320_s0 + $0x8] sm:$0xff]  ;;  %v2572_v4 = vld [vmem:[%s4321_s8] sm:$0x1]  ;;  %s2490_s25 = smov 123   ;;  %s2491_s26 = smov 122   ;;  %vm317_vm5 = vcmask 1044480  }
   0x3   :  { %2324 = vpush %v2572_v4  ;;  %v42_v5 = vld [vmem:[%s4320_s0 + $0x20] sm:$0x3f]  ;;  %v2621_v51 = vld [vmem:[%s4322_s1 + $0x8] sm:$0xff]  ;;  %v2628_v52 = vld [vmem:[%s4322_s1 + $0x18] sm:$0xff]  ;;  %s2492_s29 = smov 121   ;;  %vm360_vm6 = vcmask 1042432  }
   0x4   :  { %v2614_v50 = vld [vmem:[%s4322_s1] sm:$0xff]  ;;  %v2646_v54 = vld [vmem:[%s4322_s1 + $0x10] sm:$0xff]  ;;  %v2667_v61 = vld [vmem:[%s4322_s1 + $0x28] sm:$0xf]  ;;  %vm382_vm7 = vcmask 1041408   ;;  %vm404_vm8 = vcmask 1040384  }
   0x5   :  { %v2637_v53 = vld [vmem:[%s4322_s1 + $0x20] sm:$0xff] }
   0x6   :  { %54 = vrot.lane.b32.xlu1 %v41_v2, %s2486_s21  ;;  %50 = vrot.lane.b32.xlu0 %v39_v3, %s2486_s21 }
   0xa   :  { %56 = vrot.lane.b32.xlu0 %v42_v5, %s2486_s21 }
  0x34   :  { %s2325_s30 = spop %2324 }
  0x35   :  { %v507_v19 = vstv %s2325_s30 }
  0x74   :  { %v53_v6 = vpop.permute.xlu1 %52  ;;  %v49_v7 = vpop.permute.xlu0 %48 }
  0x75   :  { %v65_v8 = vmax.f32 %v40_v0, %v53_v6  ;;  %v63_v9 = vmax.f32 %v38_v1, %v49_v7 }
  0x77   :  { %v77_v14 = vrot.slane %v65_v8, 1  ;;  %v74_v15 = vrot.slane %v63_v9, 1 }
  0x78   :  { %v55_v10 = vpop.permute.xlu1 %54  ;;  %v51_v11 = vpop.permute.xlu0 %50 }
  0x79   :  { %v66_v12 = vmax.f32 %v41_v2, %v55_v10  ;;  %v64_v13 = vmax.f32 %v39_v3, %v51_v11 }
  0x7b   :  { %v79_v16 = vrot.slane %v66_v12, 1  ;;  %v75_v17 = vrot.slane %v64_v13, 1 }
  0x7c   :  { %v57_v18 = vpop.permute.xlu0 %56 }
  0x7d   :  { %v80_v20 = vsel %vm73_vm0, %v77_v14, %v79_v16  ;;  %v76_v21 = vsel %vm73_vm0, %v74_v15, %v75_v17  ;;  %v78_v22 = vsel %vm73_vm0, %v75_v17, %v77_v14  ;;  %v67_v23 = vmax.f32 %v42_v5, %v57_v18 }
  0x7e   :  { %v88_v24 = vmax.f32 %v63_v9, %v76_v21  ;;  %v89_v25 = vmax.f32 %v64_v13, %v78_v22  ;;  %v90_v26 = vmax.f32 %v65_v8, %v80_v20 }
  0x7f   :  { %v81_v27 = vrot.slane %v67_v23, 1 }
  0x80   :  { %v2584_v28 = vadd.f32 %v507_v19, %v88_v24  ;;  %v2586_v29 = vadd.f32 %v507_v19, %v89_v25  ;;  %v2588_v30 = vadd.f32 %v507_v19, %v90_v26 }
  0x81   :  { %v82_v31 = vsel %vm73_vm0, %v79_v16, %v81_v27  ;;  %v92_v32 = vmax.f32 %v67_v23, %v81_v27 }
  0x82   :  { %v91_v33 = vmax.f32 %v66_v12, %v82_v31  ;;  %v513_v34 = vmax.f32 %v2584_v28, 0.0  ;;  %v514_v35 = vmax.f32 %v2586_v29, 0.0  ;;  %v515_v36 = vmax.f32 %v2588_v30, 0.0 }
  0x83   :  { %v2594_v37 = vadd.f32 %v507_v19, %v92_v32 }
  0x84   :  { %v2596_v38 = vadd.f32 %v507_v19, %v91_v33  ;;  %v519_v39 = vsel %vm518_vm1, %v513_v34, 0.0  ;;  %v520_v40 = vsel %vm518_vm1, %v514_v35, 0.0  ;;  %v522_v44 = vsel %vm518_vm1, %v515_v36, 0.0 }
  0x85   :  { %v521_v41 = vadd.f32 %v520_v40, %v519_v39  ;;  %v517_v43 = vmax.f32 %v2594_v37, 0.0 }
  0x86   :  { %v516_v42 = vmax.f32 %v2596_v38, 0.0 }
  0x87   :  { %v523_v45 = vadd.f32 %v522_v44, %v521_v41  ;;  %v527_v48 = vsel %vm526_vm2, %v517_v43, 0.0 }
  0x88   :  { %v524_v46 = vsel %vm518_vm1, %v516_v42, 0.0 }
  0x89   :  { %v525_v47 = vadd.f32 %v524_v46, %v523_v45 }
  0x8b   :  { %v528_v49 = vadd.f32 %v527_v48, %v525_v47 }
  0x8d   :  { %529 = vadd.xlane.f32.xlu1 %v528_v49 }
  0x9e   :  { %105 = vrot.lane.b32.xlu1 %v2614_v50, %s2486_s21 }
  0xa2   :  { %107 = vrot.lane.b32.xlu1 %v2621_v51, %s2486_s21 }
  0xa6   :  { %111 = vrot.lane.b32.xlu1 %v2628_v52, %s2486_s21 }
  0xaa   :  { %131 = vrot.lane.b32.xlu1 %v2621_v51, %s2487_s17 }
  0xae   :  { %113 = vrot.lane.b32.xlu1 %v2637_v53, %s2486_s21 }
  0xb2   :  { %153 = vrot.lane.b32.xlu1 %v2614_v50, %s2488_s20 }
  0xb6   :  { %157 = vrot.lane.b32.xlu1 %v2646_v54, %s2488_s20 }
  0xba   :  { %159 = vrot.lane.b32.xlu1 %v2628_v52, %s2488_s20 }
  0xbe   :  { %179 = vrot.lane.b32.xlu1 %v2621_v51, %s2489_s24 }
  0xc2   :  { %161 = vrot.lane.b32.xlu1 %v2637_v53, %s2488_s20 }
  0xc6   :  { %201 = vrot.lane.b32.xlu1 %v2614_v50, %s2490_s25 }
  0xca   :  { %205 = vrot.lane.b32.xlu1 %v2646_v54, %s2490_s25 }
  0xce   :  { %207 = vrot.lane.b32.xlu1 %v2628_v52, %s2490_s25 }
  0xd2   :  { %227 = vrot.lane.b32.xlu1 %v2621_v51, %s2491_s26 }
  0xd6   :  { %115 = vrot.lane.b32.xlu1 %v2667_v61, %s2486_s21 }
  0xda   :  { %231 = vrot.lane.b32.xlu1 %v2628_v52, %s2491_s26 }
  0xde   :  { %251 = vrot.lane.b32.xlu1 %v2621_v51, %s2492_s29 }
  0xe2   :  { %139 = vrot.lane.b32.xlu1 %v2667_v61, %s2487_s17 }
  0xe6   :  { %255 = vrot.lane.b32.xlu1 %v2628_v52, %s2492_s29 }
  0xea   :  { %257 = vrot.lane.b32.xlu1 %v2637_v53, %s2492_s29 }
  0xee   :  { %211 = vrot.lane.b32.xlu1 %v2667_v61, %s2490_s25 }
  0xf2   :  { %259 = vrot.lane.b32.xlu1 %v2667_v61, %s2492_s29 }
 0x11a   :  { %v530_v55 = vpop.xlane.xlu1 %529 }
 0x11b   :  { %v531_v56 = vrot.slane %v530_v55, 4 }
 0x11d   :  { %v532_v57 = vadd.f32 %v531_v56, %v530_v55 }
 0x11e   :  { %v106_v20 = vpop.permute.xlu1 %105 }
 0x11f   :  { %v533_v58 = vrot.slane %v532_v57, 2 }
 0x121   :  { %v534_v59 = vadd.f32 %v533_v58, %v532_v57 }
 0x122   :  { %v108_v21 = vpop.permute.xlu1 %107 }
 0x123   :  { %v535_v60 = vrot.slane %v534_v59, 1 }
 0x125   :  { %v536_v62 = vadd.f32 %v535_v60, %v534_v59 }
 0x126   :  { %v112_v22 = vpop.permute.xlu1 %111 }
 0x127   :  { %2326 = vpush %v536_v62 }
 0x12a   :  { %v132_v23 = vpop.permute.xlu1 %131 }
 0x12e   :  { %v114_v29 = vpop.permute.xlu1 %113 }
 0x158   :  { %s2327_s1 = spop %2326 }
 0x159   :  { %s540_s30 = smul.f32 0.0007304602, %s2327_s1 }
 0x15b   :  { %v541_v63 = vstv %s540_s30 }
 0x15c   :  { %v2687_v0 = vsub.f32 %v513_v34, %v541_v63  ;;  %v2691_v1 = vsub.f32 %v514_v35, %v541_v63  ;;  %v2695_v2 = vsub.f32 %v515_v36, %v541_v63  ;;  %v2697_v3 = vsub.f32 %v516_v42, %v541_v63  ;;  %v154_v34 = vpop.permute.xlu1 %153 }
 0x15d   :  { %v2703_v7 = vsub.f32 %v517_v43, %v541_v63 }
 0x15e   :  { %v547_v5 = vmul.f32 %v2687_v0, %v2687_v0  ;;  %v548_v6 = vmul.f32 %v2691_v1, %v2691_v1  ;;  %v549_v8 = vmul.f32 %v2695_v2, %v2695_v2  ;;  %v550_v9 = vmul.f32 %v2697_v3, %v2697_v3 }
 0x15f   :  { %v551_v13 = vmul.f32 %v2703_v7, %v2703_v7 }
 0x160   :  { %v552_v10 = vsel %vm518_vm1, %v547_v5, 0.0  ;;  %v553_v11 = vsel %vm518_vm1, %v548_v6, 0.0  ;;  %v555_v14 = vsel %vm518_vm1, %v549_v8, 0.0  ;;  %v557_v16 = vsel %vm518_vm1, %v550_v9, 0.0  ;;  %v158_v37 = vpop.permute.xlu1 %157 }
 0x161   :  { %v554_v12 = vadd.f32 %v553_v11, %v552_v10  ;;  %v559_v18 = vsel %vm526_vm2, %v551_v13, 0.0  ;;  %v124_v8 = vmax.f32 %v2621_v51, %v108_v21  ;;  %v126_v9 = vmax.f32 %v2628_v52, %v112_v22 }
 0x162   :  { %v123_v10 = vmax.f32 %v2614_v50, %v106_v20  ;;  %v127_v11 = vmax.f32 %v2637_v53, %v114_v29 }
 0x163   :  { %v556_v15 = vadd.f32 %v555_v14, %v554_v12  ;;  %v148_v13 = vmax.f32 %v124_v8, %v132_v23 }
 0x164   :  { %v160_v39 = vpop.permute.xlu1 %159 }
 0x165   :  { %v558_v17 = vadd.f32 %v557_v16, %v556_v15 }
 0x167   :  { %v560_v19 = vadd.f32 %v559_v18, %v558_v17 }
 0x168   :  { %v180_v42 = vpop.permute.xlu1 %179 }
 0x169   :  { %561 = vadd.xlane.f32.xlu0 %v560_v19 }
 0x16c   :  { %v162_v44 = vpop.permute.xlu1 %161 }
 0x170   :  { %v202_v47 = vpop.permute.xlu1 %201 }
 0x174   :  { %v206_v49 = vpop.permute.xlu1 %205 }
 0x178   :  { %v208_v57 = vpop.permute.xlu1 %207 }
 0x17c   :  { %v228_v59 = vpop.permute.xlu1 %227 }
 0x17f   :  { %589 = vrot.lane.b32.xlu0 %v2572_v4, %s2486_s21 }
 0x180   :  { %v116_v62 = vpop.permute.xlu1 %115 }
 0x183   :  { %109 = vrot.lane.b32.xlu0 %v2646_v54, %s2486_s21 }
 0x184   :  { %v232_v6 = vpop.permute.xlu1 %231 }
 0x187   :  { %129 = vrot.lane.b32.xlu0 %v2614_v50, %s2487_s17 }
 0x188   :  { %v252_v17 = vpop.permute.xlu1 %251 }
 0x18b   :  { %133 = vrot.lane.b32.xlu0 %v2646_v54, %s2487_s17 }
 0x18c   :  { %v140_v20 = vpop.permute.xlu1 %139 }
 0x18f   :  { %135 = vrot.lane.b32.xlu0 %v2628_v52, %s2487_s17 }
 0x193   :  { %155 = vrot.lane.b32.xlu0 %v2621_v51, %s2488_s20 }
 0x197   :  { %137 = vrot.lane.b32.xlu0 %v2637_v53, %s2487_s17 }
 0x19b   :  { %177 = vrot.lane.b32.xlu0 %v2614_v50, %s2489_s24 }
 0x19f   :  { %181 = vrot.lane.b32.xlu0 %v2646_v54, %s2489_s24 }
 0x1a3   :  { %183 = vrot.lane.b32.xlu0 %v2628_v52, %s2489_s24 }
 0x1a7   :  { %203 = vrot.lane.b32.xlu0 %v2621_v51, %s2490_s25 }
 0x1ab   :  { %185 = vrot.lane.b32.xlu0 %v2637_v53, %s2489_s24 }
 0x1af   :  { %225 = vrot.lane.b32.xlu0 %v2614_v50, %s2491_s26 }
 0x1b3   :  { %229 = vrot.lane.b32.xlu0 %v2646_v54, %s2491_s26 }
 0x1b7   :  { %209 = vrot.lane.b32.xlu0 %v2637_v53, %s2490_s25 }
 0x1bb   :  { %249 = vrot.lane.b32.xlu0 %v2614_v50, %s2492_s29 }
 0x1bf   :  { %253 = vrot.lane.b32.xlu0 %v2646_v54, %s2492_s29 }
 0x1c3   :  { %233 = vrot.lane.b32.xlu0 %v2637_v53, %s2491_s26 }
 0x1c7   :  { %163 = vrot.lane.b32.xlu0 %v2667_v61, %s2488_s20 }
 0x1cb   :  { %187 = vrot.lane.b32.xlu0 %v2667_v61, %s2489_s24 }
 0x1cf   :  { %235 = vrot.lane.b32.xlu0 %v2667_v61, %s2491_s26 }
 0x1f6   :  { %v562_v24 = vpop.xlane.xlu0 %561 }
 0x1f7   :  { %v563_v25 = vrot.slane %v562_v24, 4 }
 0x1f9   :  { %v564_v26 = vadd.f32 %v563_v25, %v562_v24 }
 0x1fa   :  { %v590_v27 = vpop.permute.xlu0 %589 }
 0x1fb   :  { %v565_v28 = vrot.slane %v564_v26, 2 }
 0x1fd   :  { %v566_v30 = vadd.f32 %v565_v28, %v564_v26 }
 0x1fe   :  { %v110_v31 = vpop.permute.xlu0 %109 }
 0x1ff   :  { %v567_v32 = vrot.slane %v566_v30, 1  ;;  %v125_v12 = vmax.f32 %v2646_v54, %v110_v31  ;;  %v128_v54 = vmax.f32 %v2667_v61, %v116_v62 }
 0x201   :  { %v568_v33 = vadd.f32 %v567_v32, %v566_v30 }
 0x202   :  { %v130_v35 = vpop.permute.xlu0 %129 }
 0x203   :  { %2328 = vpush %v568_v33  ;;  %v147_v18 = vmax.f32 %v123_v10, %v130_v35  ;;  %v152_v33 = vmax.f32 %v128_v54, %v140_v20  ;;  %v256_v35 = vpop.permute.xlu1 %255 }
 0x205   :  { %v171_v21 = vmax.f32 %v147_v18, %v154_v34 }
 0x206   :  { %v134_v36 = vpop.permute.xlu0 %133 }
 0x207   :  { %v149_v19 = vmax.f32 %v125_v12, %v134_v36 }
 0x209   :  { %v173_v52 = vmax.f32 %v149_v19, %v158_v37 }
 0x20a   :  { %v136_v38 = vpop.permute.xlu0 %135 }
 0x20b   :  { %v150_v16 = vmax.f32 %v126_v9, %v136_v38 }
 0x20d   :  { %v174_v51 = vmax.f32 %v150_v16, %v160_v39 }
 0x20e   :  { %v156_v40 = vpop.permute.xlu0 %155 }
 0x20f   :  { %v172_v25 = vmax.f32 %v148_v13, %v156_v40 }
 0x211   :  { %v196_v53 = vmax.f32 %v172_v25, %v180_v42  ;;  %v258_v42 = vpop.permute.xlu1 %257 }
 0x212   :  { %v138_v41 = vpop.permute.xlu0 %137 }
 0x213   :  { %v151_v24 = vmax.f32 %v127_v11, %v138_v41 }
 0x215   :  { %v175_v22 = vmax.f32 %v151_v24, %v162_v44 }
 0x216   :  { %v178_v43 = vpop.permute.xlu0 %177 }
 0x217   :  { %v195_v23 = vmax.f32 %v171_v21, %v178_v43 }
 0x21a   :  { %v182_v45 = vpop.permute.xlu0 %181 }
 0x21b   :  { %v197_v28 = vmax.f32 %v173_v52, %v182_v45 }
 0x21d   :  { %v221_v36 = vmax.f32 %v197_v28, %v206_v49  ;;  %v212_v49 = vpop.permute.xlu1 %211 }
 0x21e   :  { %v184_v46 = vpop.permute.xlu0 %183 }
 0x21f   :  { %v198_v26 = vmax.f32 %v174_v51, %v184_v46 }
 0x221   :  { %v222_v32 = vmax.f32 %v198_v26, %v208_v57 }
 0x222   :  { %v204_v48 = vpop.permute.xlu0 %203 }
 0x223   :  { %v220_v30 = vmax.f32 %v196_v53, %v204_v48  ;;  %v246_v41 = vmax.f32 %v222_v32, %v232_v6 }
 0x225   :  { %v244_v34 = vmax.f32 %v220_v30, %v228_v59 }
 0x226   :  { %v186_v55 = vpop.permute.xlu0 %185 }
 0x227   :  { %v199_v29 = vmax.f32 %v175_v22, %v186_v55  ;;  %v2768_v45 = vmax.f32 %v244_v34, %v252_v17  ;;  %v2772_v55 = vmax.f32 %v246_v41, %v256_v35 }
 0x229   :  { %v283_v62 = vrot.slane %v2772_v55, 1  ;;  %v299_v17 = vrot.slane %v2768_v45, 2  ;;  %v303_v24 = vrot.slane %v2772_v55, 2  ;;  %v319_v25 = vrot.slane %v2768_v45, 3 }
 0x22a   :  { %v226_v56 = vpop.permute.xlu0 %225  ;;  %v340_v32 = vrot.slane %v2768_v45, 4 }
 0x22e   :  { %v230_v58 = vpop.permute.xlu0 %229 }
 0x22f   :  { %v245_v39 = vmax.f32 %v221_v36, %v230_v58  ;;  %v279_v58 = vrot.slane %v2768_v45, 1 }
 0x232   :  { %v210_v60 = vpop.permute.xlu0 %209 }
 0x233   :  { %v223_v38 = vmax.f32 %v199_v29, %v210_v60 }
 0x234   :  { %s2329_s0 = spop %2328 }
 0x235   :  { %s572_s12 = smul.f32 0.0007304602, %s2329_s0 }
 0x236   :  { %v250_v5 = vpop.permute.xlu0 %249 }
 0x237   :  { %s573_s13 = sadd.f32 1e-05, %s572_s12 }
 0x239   :  { %v574_v63 = vstv %s573_s13 }
 0x23a   :  { %2469 = vrsqrt.f32 %v574_v63  ;;  %v254_v14 = vpop.permute.xlu0 %253 }
 0x23b   :  { %v2766_v61 = vmax.f32 %v245_v39, %v254_v14 }
 0x23d   :  { %v281_v57 = vrot.slane %v2766_v61, 1  ;;  %v301_v11 = vrot.slane %v2766_v61, 2  ;;  %v321_v22 = vrot.slane %v2766_v61, 3  ;;  %v342_v36 = vrot.slane %v2766_v61, 4 }
 0x23e   :  { %v234_v50 = vpop.permute.xlu0 %233 }
 0x23f   :  { %v247_v40 = vmax.f32 %v223_v38, %v234_v50  ;;  %v282_v6 = vsel %vm73_vm0, %v279_v58, %v281_v57  ;;  %v284_v8 = vsel %vm73_vm0, %v281_v57, %v283_v62  ;;  %v302_v21 = vsel %vm297_vm3, %v299_v17, %v301_v11 }
 0x240   :  { %v293_v14 = vmax.f32 %v2768_v45, %v282_v6  ;;  %v294_v16 = vmax.f32 %v2766_v61, %v284_v8  ;;  %v304_v20 = vsel %vm297_vm3, %v301_v11, %v303_v24  ;;  %v322_v35 = vsel %vm317_vm5, %v319_v25, %v321_v22 }
 0x241   :  { %v2770_v48 = vmax.f32 %v247_v40, %v258_v42  ;;  %v343_v57 = vsel %vm338_vm4, %v340_v32, %v342_v36 }
 0x242   :  { %v164_v31 = vpop.permute.xlu0 %163  ;;  %v313_v26 = vmax.f32 %v293_v14, %v302_v21 }
 0x243   :  { %v176_v44 = vmax.f32 %v152_v33, %v164_v31  ;;  %v285_v59 = vrot.slane %v2770_v48, 1  ;;  %v305_v18 = vrot.slane %v2770_v48, 2  ;;  %v325_v28 = vrot.slane %v2770_v48, 3 }
 0x244   :  { %v2470_v15 = vpop.eup %2469  ;;  %v323_v31 = vrot.slane %v2772_v55, 3  ;;  %v346_v38 = vrot.slane %v2770_v48, 4  ;;  %v333_v41 = vmax.f32 %v313_v26, %v322_v35  ;;  %v388_v26 = vrot.slane %v2772_v55, 6 }
 0x245   :  { %2330 = vpush %v2470_v15  ;;  %v286_v9 = vsel %vm73_vm0, %v283_v62, %v285_v59  ;;  %v260_v15 = vpop.permute.xlu1 %259  ;;  %v306_v54 = vsel %vm297_vm3, %v303_v24, %v305_v18  ;;  %v296_v29 = vmax.f32 %v2770_v48, %v285_v59  ;;  %v364_v59 = vrot.slane %v2766_v61, 5 }
 0x246   :  { %2332 = vpush %v590_v27  ;;  %v219_v27 = vmax.f32 %v195_v23, %v202_v47  ;;  %v188_v43 = vpop.permute.xlu0 %187  ;;  %v295_v19 = vmax.f32 %v2772_v55, %v286_v9  ;;  %v314_v23 = vmax.f32 %v294_v16, %v304_v20  ;;  %v326_v40 = vsel %vm317_vm5, %v323_v31, %v325_v28 }
 0x247   :  { %v200_v47 = vmax.f32 %v176_v44, %v188_v43  ;;  %v316_v44 = vmax.f32 %v296_v29, %v305_v18  ;;  %v356_v6 = vmax.f32 %v333_v41, %v343_v57  ;;  %v368_v9 = vrot.slane %v2770_v48, 5 }
 0x248   :  { %v243_v37 = vmax.f32 %v219_v27, %v226_v56  ;;  %v315_v30 = vmax.f32 %v295_v19, %v306_v54  ;;  %v384_v16 = vrot.slane %v2768_v45, 6  ;;  %v406_v29 = vrot.slane %v2768_v45, 7 }
 0x249   :  { %v224_v60 = vmax.f32 %v200_v47, %v212_v49  ;;  %v344_v47 = vrot.slane %v2772_v55, 4  ;;  %v362_v49 = vrot.slane %v2768_v45, 5  ;;  %v408_v35 = vrot.slane %v2766_v61, 7 }
 0x24a   :  { %v2764_v46 = vmax.f32 %v243_v37, %v250_v5  ;;  %v236_v63 = vpop.permute.xlu0 %235  ;;  %v324_v37 = vsel %vm317_vm5, %v321_v22, %v323_v31  ;;  %v335_v43 = vmax.f32 %v315_v30, %v326_v40  ;;  %v390_v22 = vrot.slane %v2770_v48, 6 }
 0x24b   :  { %v248_v12 = vmax.f32 %v224_v60, %v236_v63  ;;  %v334_v42 = vmax.f32 %v314_v23, %v324_v37  ;;  %v345_v62 = vsel %vm338_vm4, %v342_v36, %v344_v47  ;;  %v347_v63 = vsel %vm338_vm4, %v344_v47, %v346_v38 }
 0x24c   :  { %v278_v56 = vrot.slane %v2764_v46, 1  ;;  %v298_v10 = vrot.slane %v2764_v46, 2  ;;  %v318_v52 = vrot.slane %v2764_v46, 3  ;;  %v339_v27 = vrot.slane %v2764_v46, 4 }
 0x24d   :  { %v2797_v50 = vmax.f32 %v248_v12, %v260_v15  ;;  %v357_v8 = vmax.f32 %v334_v42, %v345_v62  ;;  %v358_v12 = vmax.f32 %v335_v43, %v347_v63  ;;  %v383_v15 = vrot.slane %v2764_v46, 6 }
 0x24e   :  { %v280_v5 = vsel %vm73_vm0, %v278_v56, %v279_v58  ;;  %v300_v51 = vsel %vm297_vm3, %v298_v10, %v299_v17  ;;  %v320_v33 = vsel %vm317_vm5, %v318_v52, %v319_v25  ;;  %v341_v56 = vsel %vm338_vm4, %v339_v27, %v340_v32 }
 0x24f   :  { %v292_v13 = vmax.f32 %v2764_v46, %v280_v5  ;;  %v348_v34 = vrot.slane %v2797_v50, 4  ;;  %v361_v58 = vrot.slane %v2764_v46, 5  ;;  %v336_v10 = vmax.f32 %v316_v44, %v325_v28 }
 0x250   :  { %v370_v11 = vrot.slane %v2797_v50, 5  ;;  %v365_v18 = vsel %vm360_vm6, %v362_v49, %v364_v59  ;;  %v386_v25 = vrot.slane %v2766_v61, 6  ;;  %v392_v20 = vrot.slane %v2797_v50, 6 }
 0x251   :  { %v312_v53 = vmax.f32 %v292_v13, %v300_v51  ;;  %v349_v60 = vsel %vm338_vm4, %v346_v38, %v348_v34  ;;  %v366_v13 = vrot.slane %v2772_v55, 5  ;;  %v363_v14 = vsel %vm360_vm6, %v361_v58, %v362_v49 }
 0x252   :  { %v359_v17 = vmax.f32 %v336_v10, %v349_v60  ;;  %v378_v21 = vmax.f32 %v356_v6, %v365_v18  ;;  %v371_v54 = vsel %vm360_vm6, %v368_v9, %v370_v11  ;;  %v385_v23 = vsel %vm382_vm7, %v383_v15, %v384_v16 }
 0x253   :  { %v332_v39 = vmax.f32 %v312_v53, %v320_v33  ;;  %v367_v19 = vsel %vm360_vm6, %v364_v59, %v366_v13  ;;  %v369_v51 = vsel %vm360_vm6, %v366_v13, %v368_v9  ;;  %v405_v28 = vrot.slane %v2764_v46, 7 }
 0x254   :  { %v379_v52 = vmax.f32 %v357_v8, %v367_v19  ;;  %v380_v53 = vmax.f32 %v358_v12, %v369_v51  ;;  %v381_v30 = vmax.f32 %v359_v17, %v371_v54  ;;  %v387_v31 = vsel %vm382_vm7, %v384_v16, %v386_v25 }
 0x255   :  { %v355_v5 = vmax.f32 %v332_v39, %v341_v56  ;;  %v389_v32 = vsel %vm382_vm7, %v386_v25, %v388_v26  ;;  %v391_v27 = vsel %vm382_vm7, %v388_v26, %v390_v22  ;;  %v400_v36 = vmax.f32 %v378_v21, %v387_v31 }
 0x256   :  { %v401_v38 = vmax.f32 %v379_v52, %v389_v32  ;;  %v412_v34 = vrot.slane %v2770_v48, 7  ;;  %v414_v37 = vrot.slane %v2797_v50, 7  ;;  %v402_v46 = vmax.f32 %v380_v53, %v391_v27 }
 0x257   :  { %v377_v24 = vmax.f32 %v355_v5, %v363_v14  ;;  %v410_v45 = vrot.slane %v2772_v55, 7  ;;  %v393_v39 = vsel %vm382_vm7, %v390_v22, %v392_v20  ;;  %v407_v40 = vsel %vm404_vm8, %v405_v28, %v406_v29 }
 0x258   :  { %v403_v41 = vmax.f32 %v381_v30, %v393_v39  ;;  %v409_v61 = vsel %vm404_vm8, %v406_v29, %v408_v35  ;;  %v415_v56 = vsel %vm404_vm8, %v412_v34, %v414_v37  ;;  %v426_v39 = vld [vmem:[%s4323_s2] sm:$0xff] }
 0x259   :  { %v399_v33 = vmax.f32 %v377_v24, %v385_v23  ;;  %v411_v42 = vsel %vm404_vm8, %v408_v35, %v410_v45  ;;  %v413_v48 = vsel %vm404_vm8, %v410_v45, %v412_v34  ;;  %v422_v43 = vmax.f32 %v400_v36, %v409_v61  ;;  %v429_v61 = vld [vmem:[%s4323_s2 + $0x18] sm:$0xff] }
 0x25a   :  { %v423_v50 = vmax.f32 %v401_v38, %v411_v42  ;;  %v424_v49 = vmax.f32 %v402_v46, %v413_v48  ;;  %v425_v59 = vmax.f32 %v403_v41, %v415_v56  ;;  %v428_v41 = vld [vmem:[%s4323_s2 + $0x10] sm:$0xff]  ;;  %v430_v42 = vld [vmem:[%s4323_s2 + $0x20] sm:$0x3f] }
 0x25b   :  { %v421_v44 = vmax.f32 %v399_v33, %v407_v40  ;;  %v427_v40 = vld [vmem:[%s4323_s2 + $0x8] sm:$0xff] }
 0x276   :  { %s2845_s14 = spop %2330 }
 0x277   :  { %s2333_s15 = spop %2332 }
 0x278   :  { %v593_v47 = vstv %s2333_s15 }
 0x279   :  { %v594_v55 = vadd.f32 %v593_v47, %v421_v44  ;;  %v595_v57 = vadd.f32 %v593_v47, %v422_v43  ;;  %v596_v58 = vadd.f32 %v593_v47, %v423_v50  ;;  %v597_v60 = vadd.f32 %v593_v47, %v424_v49 }
 0x27a   :  { %v598_v6 = vadd.f32 %v593_v47, %v425_v59 }
 0x27b   :  { %v599_v62 = vmax.f32 %v594_v55, 0.0  ;;  %v600_v63 = vmax.f32 %v595_v57, 0.0  ;;  %v601_v5 = vmax.f32 %v596_v58, 0.0  ;;  %v602_v8 = vmax.f32 %v597_v60, 0.0 }
 0x27c   :  { %v603_v12 = vmax.f32 %v598_v6, 0.0 }
 0x27d   :  { %v604_v9 = vsel %vm518_vm1, %v599_v62, 0.0  ;;  %v605_v10 = vsel %vm518_vm1, %v600_v63, 0.0  ;;  %v607_v13 = vsel %vm518_vm1, %v601_v5, 0.0  ;;  %v609_v15 = vsel %vm518_vm1, %v602_v8, 0.0 }
 0x27e   :  { %v606_v11 = vadd.f32 %v605_v10, %v604_v9  ;;  %v611_v17 = vsel %vm526_vm2, %v603_v12, 0.0 }
 0x280   :  { %v608_v14 = vadd.f32 %v607_v13, %v606_v11 }
 0x282   :  { %v610_v16 = vadd.f32 %v609_v15, %v608_v14 }
 0x284   :  { %v612_v18 = vadd.f32 %v611_v17, %v610_v16 }
 0x286   :  { %613 = vadd.xlane.f32.xlu0 %v612_v18 }
 0x29c   :  { %672 = vrot.lane.b32.xlu0 %v2572_v4, %s2487_s17 }
 0x2a0   :  { %438 = vrot.lane.b32.xlu0 %v427_v40, %s2486_s21 }
 0x2a4   :  { %442 = vrot.lane.b32.xlu0 %v429_v61, %s2486_s21 }
 0x313   :  { %v614_v19 = vpop.xlane.xlu0 %613 }
 0x314   :  { %v615_v24 = vrot.slane %v614_v19, 4 }
 0x316   :  { %v616_v25 = vadd.f32 %v615_v24, %v614_v19 }
 0x317   :  { %v673_v57 = vpop.permute.xlu0 %672 }
 0x318   :  { %v617_v51 = vrot.slane %v616_v25, 2 }
 0x31a   :  { %v618_v21 = vadd.f32 %v617_v51, %v616_v25 }
 0x31c   :  { %v619_v52 = vrot.slane %v618_v21, 1 }
 0x31e   :  { %v620_v22 = vadd.f32 %v619_v52, %v618_v21 }
 0x320   :  { %2334 = vpush %v620_v22 }
 0x351   :  { %s2335_s16 = spop %2334 }
 0x352   :  { %s624_s18 = smul.f32 0.0007304602, %s2335_s16 }
 0x354   :  { %v625_v20 = vstv %s624_s18 }
 0x355   :  { %v2861_v53 = vsub.f32 %v599_v62, %v625_v20  ;;  %v2863_v26 = vsub.f32 %v600_v63, %v625_v20  ;;  %v2865_v54 = vsub.f32 %v601_v5, %v625_v20  ;;  %v2867_v23 = vsub.f32 %v602_v8, %v625_v20  ;;  %v439_v62 = vpop.permute.xlu0 %438 }
 0x356   :  { %v2873_v29 = vsub.f32 %v603_v12, %v625_v20  ;;  %v452_v8 = vmax.f32 %v427_v40, %v439_v62  ;;  %v2209_v40 = vld [vmem:[%s4324_s9 + $0x168] sm:$0xff]  ;;  %v2250_v62 = vld [vmem:[%s4324_s9 + $0x2b0] sm:$0xff] }
 0x357   :  { %v631_v4 = vmul.f32 %v2861_v53, %v2861_v53  ;;  %v632_v28 = vmul.f32 %v2863_v26, %v2863_v26  ;;  %v633_v30 = vmul.f32 %v2865_v54, %v2865_v54  ;;  %v634_v31 = vmul.f32 %v2867_v23, %v2867_v23 }
 0x358   :  { %v635_v27 = vmul.f32 %v2873_v29, %v2873_v29  ;;  %v462_v13 = vrot.slane %v452_v8, 1 }
 0x359   :  { %v636_v32 = vsel %vm518_vm1, %v631_v4, 0.0  ;;  %v637_v33 = vsel %vm518_vm1, %v632_v28, 0.0  ;;  %v639_v36 = vsel %vm518_vm1, %v633_v30, 0.0  ;;  %v641_v34 = vsel %vm518_vm1, %v634_v31, 0.0  ;;  %v443_v5 = vpop.permute.xlu0 %442 }
 0x35a   :  { %v638_v35 = vadd.f32 %v637_v33, %v636_v32  ;;  %v643_v46 = vsel %vm526_vm2, %v635_v27, 0.0  ;;  %v454_v11 = vmax.f32 %v429_v61, %v443_v5  ;;  %v2211_v61 = vld [vmem:[%s4324_s9 + $0x178] sm:$0xff] }
 0x35c   :  { %v640_v38 = vadd.f32 %v639_v36, %v638_v35  ;;  %v466_v16 = vrot.slane %v454_v11, 1 }
 0x35e   :  { %v642_v37 = vadd.f32 %v641_v34, %v640_v38 }
 0x360   :  { %v644_v45 = vadd.f32 %v643_v46, %v642_v37 }
 0x362   :  { %645 = vadd.xlane.f32.xlu1 %v644_v45 }
 0x373   :  { %436 = vrot.lane.b32.xlu1 %v426_v39, %s2486_s21 }
 0x377   :  { %440 = vrot.lane.b32.xlu1 %v428_v41, %s2486_s21 }
 0x37b   :  { %444 = vrot.lane.b32.xlu1 %v430_v42, %s2486_s21 }
 0x3ef   :  { %v646_v44 = vpop.xlane.xlu1 %645 }
 0x3f0   :  { %v647_v48 = vrot.slane %v646_v44, 4 }
 0x3f2   :  { %v648_v43 = vadd.f32 %v647_v48, %v646_v44  ;;  %v2249_v48 = vld [vmem:[%s4324_s9 + $0x2a8] sm:$0xff] }
 0x3f3   :  { %v437_v59 = vpop.permute.xlu1 %436 }
 0x3f4   :  { %v649_v50 = vrot.slane %v648_v43, 2  ;;  %v451_v6 = vmax.f32 %v426_v39, %v437_v59 }
 0x3f6   :  { %v650_v47 = vadd.f32 %v649_v50, %v648_v43  ;;  %v461_v12 = vrot.slane %v451_v6, 1 }
 0x3f7   :  { %v441_v60 = vpop.permute.xlu1 %440 }
 0x3f8   :  { %v651_v49 = vrot.slane %v650_v47, 1  ;;  %v453_v10 = vmax.f32 %v428_v41, %v441_v60  ;;  %v463_v17 = vsel %vm73_vm0, %v461_v12, %v462_v13  ;;  %v2210_v41 = vld [vmem:[%s4324_s9 + $0x170] sm:$0xff] }
 0x3f9   :  { %v475_v51 = vmax.f32 %v451_v6, %v463_v17 }
 0x3fa   :  { %v652_v56 = vadd.f32 %v651_v49, %v650_v47  ;;  %v464_v15 = vrot.slane %v453_v10, 1  ;;  %v2212_v49 = vld [vmem:[%s4324_s9 + $0x180] sm:$0xff] }
 0x3fb   :  { %v445_v63 = vpop.permute.xlu1 %444 }
 0x3fc   :  { %2336 = vpush %v652_v56  ;;  %v455_v9 = vmax.f32 %v430_v42, %v445_v63  ;;  %v465_v19 = vsel %vm73_vm0, %v462_v13, %v464_v15  ;;  %v467_v24 = vsel %vm73_vm0, %v464_v15, %v466_v16  ;;  %v2251_v63 = vld [vmem:[%s4324_s9 + $0x2b8] sm:$0xff]  ;;  %v2289_v15 = vld [vmem:[%s4324_s9 + $0x3e8] sm:$0xff] }
 0x3fd   :  { %v476_v52 = vmax.f32 %v452_v8, %v465_v19  ;;  %v477_v22 = vmax.f32 %v453_v10, %v467_v24  ;;  %v2290_v24 = vld [vmem:[%s4324_s9 + $0x3f0] sm:$0xff] }
 0x3fe   :  { %v468_v14 = vrot.slane %v455_v9, 1 }
 0x400   :  { %v469_v18 = vsel %vm73_vm0, %v466_v16, %v468_v14  ;;  %v479_v20 = vmax.f32 %v455_v9, %v468_v14  ;;  %v2252_v14 = vld [vmem:[%s4324_s9 + $0x2c0] sm:$0xff] }
 0x401   :  { %v478_v21 = vmax.f32 %v454_v11, %v469_v18 }
 0x42d   :  { %s2337_s15 = spop %2336 }
 0x42e   :  { %s656_s16 = smul.f32 0.0007304602, %s2337_s15 }
 0x430   :  { %s657_s18 = sadd.f32 1e-05, %s656_s16 }
 0x432   :  { %v658_v55 = vstv %s657_s18 }
 0x433   :  { %2471 = vrsqrt.f32 %v658_v55  ;;  %v2213_v55 = vld [vmem:[%s4324_s9 + $0x188] sm:$0x1f] }
 0x43d   :  { %v2472_v58 = vpop.eup %2471 }
 0x43e   :  { %2338 = vpush %v2472_v58 }
 0x43f   :  { %2340 = vpush %v673_v57 }
 0x46f   :  { %s2339_s2 = spop %2338 }
 0x470   :  { %v661_v25 = vstv %s2339_s2  ;;  %s2341_s19 = spop %2340 }
 0x471   :  { %v676_v4 = vstv %s2341_s19  ;;  %v662_v28 = vmul.f32 %v661_v25, %v2861_v53  ;;  %v663_v30 = vmul.f32 %v661_v25, %v2863_v26  ;;  %v664_v31 = vmul.f32 %v661_v25, %v2865_v54 }
 0x472   :  { %v2913_v32 = vadd.f32 %v676_v4, %v475_v51  ;;  %v2915_v33 = vadd.f32 %v676_v4, %v476_v52  ;;  %v2917_v35 = vadd.f32 %v676_v4, %v477_v22  ;;  %v665_v27 = vmul.f32 %v661_v25, %v2867_v23  ;;  %v2253_v51 = vld [vmem:[%s4324_s9 + $0x2c8] sm:$0x1f]  ;;  %v2291_v52 = vld [vmem:[%s4324_s9 + $0x3f8] sm:$0xff] }
 0x473   :  { %v666_v36 = vmul.f32 %v661_v25, %v2873_v29  ;;  %v2921_v38 = vadd.f32 %v676_v4, %v478_v21  ;;  %v2926_v37 = vadd.f32 %v676_v4, %v479_v20  ;;  %v2928_v54 = vmax.f32 %v662_v28, 0.0  ;;  %v2292_v28 = vld [vmem:[%s4324_s9 + $0x400] sm:$0xff] }
 0x474   :  { %v682_v34 = vmax.f32 %v2913_v32, 0.0  ;;  %v683_v53 = vmax.f32 %v2915_v33, 0.0  ;;  %v684_v26 = vmax.f32 %v2917_v35, 0.0  ;;  %v2930_v46 = vmax.f32 %v663_v30, 0.0 }
 0x475   :  { %v2932_v45 = vmax.f32 %v664_v31, 0.0  ;;  %v685_v23 = vmax.f32 %v2921_v38, 0.0  ;;  %v2950_v42 = vmax.f32 %v665_v27, 0.0  ;;  %v2955_v43 = vmax.f32 %v666_v36, 0.0 }
 0x476   :  { %v687_v29 = vsel %vm518_vm1, %v682_v34, 0.0  ;;  %v688_v39 = vsel %vm518_vm1, %v683_v53, 0.0  ;;  %v686_v50 = vmax.f32 %v2926_v37, 0.0  ;;  %v690_v47 = vsel %vm518_vm1, %v684_v26, 0.0 }
 0x477   :  { %v689_v44 = vadd.f32 %v688_v39, %v687_v29  ;;  %v1456_v57 = vmul.f32 %v2209_v40, %v2928_v54  ;;  %v1457_v58 = vmul.f32 %v2210_v41, %v2930_v46  ;;  %v1458_v59 = vmul.f32 %v2211_v61, %v2932_v45  ;;  %v2293_v41 = vld [vmem:[%s4324_s9 + $0x408] sm:$0x1f] }
 0x478   :  { %v692_v60 = vsel %vm518_vm1, %v685_v23, 0.0  ;;  %v1705_v5 = vmul.f32 %v2249_v48, %v2928_v54  ;;  %v1459_v8 = vmul.f32 %v2212_v49, %v2950_v42  ;;  %v694_v11 = vsel %vm526_vm2, %v686_v50, 0.0 }
 0x479   :  { %v691_v56 = vadd.f32 %v690_v47, %v689_v44  ;;  %v1461_v9 = vsel %vm518_vm1, %v1456_v57, 0.0  ;;  %v1462_v10 = vsel %vm518_vm1, %v1457_v58, 0.0  ;;  %v1460_v12 = vmul.f32 %v2213_v55, %v2955_v43 }
 0x47a   :  { %v1463_v13 = vadd.f32 %v1462_v10, %v1461_v9  ;;  %v1464_v17 = vsel %vm518_vm1, %v1458_v59, 0.0  ;;  %v1706_v18 = vmul.f32 %v2250_v62, %v2930_v46  ;;  %v1707_v19 = vmul.f32 %v2251_v63, %v2932_v45 }
 0x47b   :  { %v693_v6 = vadd.f32 %v692_v60, %v691_v56  ;;  %v1710_v21 = vsel %vm518_vm1, %v1705_v5, 0.0  ;;  %v1466_v22 = vsel %vm518_vm1, %v1459_v8, 0.0  ;;  %v1708_v20 = vmul.f32 %v2252_v14, %v2950_v42 }
 0x47c   :  { %v1465_v25 = vadd.f32 %v1464_v17, %v1463_v13  ;;  %v1711_v4 = vsel %vm518_vm1, %v1706_v18, 0.0  ;;  %v1954_v30 = vmul.f32 %v2289_v15, %v2928_v54  ;;  %v1468_v27 = vsel %vm526_vm2, %v1460_v12, 0.0 }
 0x47d   :  { %v695_v16 = vadd.f32 %v694_v11, %v693_v6  ;;  %v1712_v36 = vadd.f32 %v1711_v4, %v1710_v21  ;;  %v1955_v29 = vmul.f32 %v2290_v24, %v2930_v46  ;;  %v1709_v39 = vmul.f32 %v2253_v51, %v2955_v43  ;;  %v3039_v11 = vld [vmem:[%s4321_s8] sm:$0x1] }
 0x47e   :  { %v1467_v31 = vadd.f32 %v1466_v22, %v1465_v25  ;;  %v1713_v40 = vsel %vm518_vm1, %v1707_v19, 0.0  ;;  %v1956_v61 = vmul.f32 %v2291_v52, %v2932_v45  ;;  %v1959_v44 = vsel %vm518_vm1, %v1954_v30, 0.0 }
 0x47f   :  { %696 = vadd.xlane.f32.xlu0 %v695_v16  ;;  %v1714_v47 = vadd.f32 %v1713_v40, %v1712_v36  ;;  %v1957_v49 = vmul.f32 %v2292_v28, %v2950_v42  ;;  %v1960_v56 = vsel %vm518_vm1, %v1955_v29, 0.0  ;;  %v1715_v55 = vsel %vm518_vm1, %v1708_v20, 0.0 }
 0x480   :  { %v3022_v48 = vadd.f32 %v1468_v27, %v1467_v31  ;;  %v1961_v57 = vadd.f32 %v1960_v56, %v1959_v44  ;;  %v1958_v59 = vmul.f32 %v2293_v41, %v2955_v43  ;;  %v1962_v60 = vsel %vm518_vm1, %v1956_v61, 0.0  ;;  %v482_v56 = vld [vmem:[%s4325_s3 + $0x10] sm:$0xff] }
 0x481   :  { %v1716_v58 = vadd.f32 %v1715_v55, %v1714_v47  ;;  %v1717_v62 = vsel %vm526_vm2, %v1709_v39, 0.0  ;;  %v1964_v6 = vsel %vm518_vm1, %v1957_v49, 0.0  ;;  %v480_v47 = vld [vmem:[%s4325_s3] sm:$0xff]  ;;  %v481_v49 = vld [vmem:[%s4325_s3 + $0x8] sm:$0xff]  ;;  %v483_v55 = vld [vmem:[%s4325_s3 + $0x18] sm:$0xff] }
 0x482   :  { %v1963_v63 = vadd.f32 %v1962_v60, %v1961_v57  ;;  %v1966_v9 = vsel %vm526_vm2, %v1958_v59, 0.0 }
 0x483   :  { %v3030_v5 = vadd.f32 %v1717_v62, %v1716_v58  ;;  %v484_v58 = vld [vmem:[%s4325_s3 + $0x20] sm:$0x1f] }
 0x484   :  { %v1965_v8 = vadd.f32 %v1964_v6, %v1963_v63 }
 0x486   :  { %v3034_v10 = vadd.f32 %v1966_v9, %v1965_v8 }
 0x488   :  { %4341 = vst [vmem:[#allocation2_spill] sm:$0xff] %v3034_v10 }
 0x495   :  { %755 = vrot.lane.b32.xlu0 %v3039_v11, %s2488_s20 }
 0x50c   :  { %v697_v12 = vpop.xlane.xlu0 %696 }
 0x50d   :  { %v698_v13 = vrot.slane %v697_v12, 4 }
 0x50f   :  { %v699_v14 = vadd.f32 %v698_v13, %v697_v12 }
 0x510   :  { %v756_v61 = vpop.permute.xlu0 %755 }
 0x511   :  { %v700_v15 = vrot.slane %v699_v14, 2 }
 0x513   :  { %v701_v16 = vadd.f32 %v700_v15, %v699_v14 }
 0x515   :  { %v702_v17 = vrot.slane %v701_v16, 1 }
 0x517   :  { %v703_v18 = vadd.f32 %v702_v17, %v701_v16 }
 0x519   :  { %2342 = vpush %v703_v18 }
 0x54a   :  { %s2343_s1 = spop %2342 }
 0x54b   :  { %s707_s30 = smul.f32 0.0007304602, %s2343_s1 }
 0x54d   :  { %v708_v19 = vstv %s707_s30 }
 0x54e   :  { %v3045_v24 = vsub.f32 %v682_v34, %v708_v19  ;;  %v3049_v25 = vsub.f32 %v683_v53, %v708_v19  ;;  %v3053_v51 = vsub.f32 %v684_v26, %v708_v19  ;;  %v3057_v21 = vsub.f32 %v685_v23, %v708_v19 }
 0x54f   :  { %v3065_v34 = vsub.f32 %v686_v50, %v708_v19 }
 0x550   :  { %v714_v52 = vmul.f32 %v3045_v24, %v3045_v24  ;;  %v715_v32 = vmul.f32 %v3049_v25, %v3049_v25  ;;  %v716_v33 = vmul.f32 %v3053_v51, %v3053_v51  ;;  %v717_v35 = vmul.f32 %v3057_v21, %v3057_v21 }
 0x551   :  { %v718_v23 = vmul.f32 %v3065_v34, %v3065_v34 }
 0x552   :  { %v719_v38 = vsel %vm518_vm1, %v714_v52, 0.0  ;;  %v720_v53 = vsel %vm518_vm1, %v715_v32, 0.0  ;;  %v722_v22 = vsel %vm518_vm1, %v716_v33, 0.0  ;;  %v724_v37 = vsel %vm518_vm1, %v717_v35, 0.0 }
 0x553   :  { %v721_v26 = vadd.f32 %v720_v53, %v719_v38  ;;  %v726_v4 = vsel %vm526_vm2, %v718_v23, 0.0 }
 0x555   :  { %v723_v20 = vadd.f32 %v722_v22, %v721_v26 }
 0x557   :  { %v725_v50 = vadd.f32 %v724_v37, %v723_v20 }
 0x559   :  { %v727_v28 = vadd.f32 %v726_v4, %v725_v50 }
 0x55b   :  { %728 = vadd.xlane.f32.xlu1 %v727_v28 }
 0x5e8   :  { %v729_v30 = vpop.xlane.xlu1 %728 }
 0x5e9   :  { %v730_v31 = vrot.slane %v729_v30, 4 }
 0x5eb   :  { %v731_v27 = vadd.f32 %v730_v31, %v729_v30 }
 0x5ed   :  { %v732_v36 = vrot.slane %v731_v27, 2 }
 0x5ef   :  { %v733_v29 = vadd.f32 %v732_v36, %v731_v27 }
 0x5f1   :  { %v734_v39 = vrot.slane %v733_v29, 1 }
 0x5f3   :  { %v735_v40 = vadd.f32 %v734_v39, %v733_v29 }
 0x5f5   :  { %2344 = vpush %v735_v40 }
 0x626   :  { %s2345_s8 = spop %2344 }
 0x627   :  { %s739_s0 = smul.f32 0.0007304602, %s2345_s8 }
 0x629   :  { %s740_s12 = sadd.f32 1e-05, %s739_s0 }
 0x62b   :  { %v741_v41 = vstv %s740_s12 }
 0x62c   :  { %2473 = vrsqrt.f32 %v741_v41 }
 0x636   :  { %v2474_v44 = vpop.eup %2473 }
 0x637   :  { %2346 = vpush %v2474_v44 }
 0x638   :  { %2348 = vpush %v756_v61 }
 0x668   :  { %s3078_s13 = spop %2346 }
 0x669   :  { %s2349_s15 = spop %2348 }
 0x66a   :  { %v759_v57 = vstv %s2349_s15 }
 0x66b   :  { %v760_v59 = vadd.f32 %v759_v57, %v480_v47  ;;  %v761_v60 = vadd.f32 %v759_v57, %v481_v49  ;;  %v762_v62 = vadd.f32 %v759_v57, %v482_v56  ;;  %v763_v63 = vadd.f32 %v759_v57, %v483_v55 }
 0x66c   :  { %v764_v12 = vadd.f32 %v759_v57, %v484_v58 }
 0x66d   :  { %v765_v6 = vmax.f32 %v760_v59, 0.0  ;;  %v766_v8 = vmax.f32 %v761_v60, 0.0  ;;  %v767_v9 = vmax.f32 %v762_v62, 0.0  ;;  %v768_v13 = vmax.f32 %v763_v63, 0.0 }
 0x66e   :  { %v769_v17 = vmax.f32 %v764_v12, 0.0 }
 0x66f   :  { %v770_v14 = vsel %vm518_vm1, %v765_v6, 0.0  ;;  %v771_v15 = vsel %vm518_vm1, %v766_v8, 0.0  ;;  %v773_v18 = vsel %vm518_vm1, %v767_v9, 0.0  ;;  %v775_v52 = vsel %vm518_vm1, %v768_v13, 0.0 }
 0x670   :  { %v772_v16 = vadd.f32 %v771_v15, %v770_v14  ;;  %v777_v33 = vsel %vm526_vm2, %v769_v17, 0.0 }
 0x672   :  { %v774_v19 = vadd.f32 %v773_v18, %v772_v16  ;;  %v486_v18 = vld [vmem:[%s4326_s4 + $0x8] sm:$0xff] }
 0x674   :  { %v776_v32 = vadd.f32 %v775_v52, %v774_v19  ;;  %v487_v19 = vld [vmem:[%s4326_s4 + $0x10] sm:$0xff]  ;;  %v488_v52 = vld [vmem:[%s4326_s4 + $0x18] sm:$0xff] }
 0x676   :  { %v778_v35 = vadd.f32 %v777_v33, %v776_v32 }
 0x678   :  { %779 = vadd.xlane.f32.xlu1 %v778_v35 }
 0x705   :  { %v780_v38 = vpop.xlane.xlu1 %779 }
 0x706   :  { %v781_v53 = vrot.slane %v780_v38, 4 }
 0x708   :  { %v782_v26 = vadd.f32 %v781_v53, %v780_v38  ;;  %v489_v53 = vld [vmem:[%s4326_s4 + $0x20] sm:$0x1f] }
 0x70a   :  { %v783_v23 = vrot.slane %v782_v26, 2 }
 0x70c   :  { %v784_v22 = vadd.f32 %v783_v23, %v782_v26 }
 0x70e   :  { %v785_v20 = vrot.slane %v784_v22, 1 }
 0x710   :  { %v786_v37 = vadd.f32 %v785_v20, %v784_v22 }
 0x712   :  { %2350 = vpush %v786_v37 }
 0x743   :  { %s2351_s3 = spop %2350 }
 0x744   :  { %s790_s8 = smul.f32 0.0007304602, %s2351_s3 }
 0x746   :  { %v791_v50 = vstv %s790_s8 }
 0x747   :  { %v792_v4 = vsub.f32 %v765_v6, %v791_v50  ;;  %v793_v28 = vsub.f32 %v766_v8, %v791_v50  ;;  %v794_v30 = vsub.f32 %v767_v9, %v791_v50  ;;  %v795_v31 = vsub.f32 %v768_v13, %v791_v50 }
 0x748   :  { %v796_v29 = vsub.f32 %v769_v17, %v791_v50  ;;  %v485_v17 = vld [vmem:[%s4326_s4] sm:$0xff] }
 0x749   :  { %v797_v27 = vmul.f32 %v792_v4, %v792_v4  ;;  %v798_v36 = vmul.f32 %v793_v28, %v793_v28  ;;  %v799_v39 = vmul.f32 %v794_v30, %v794_v30  ;;  %v800_v40 = vmul.f32 %v795_v31, %v795_v31 }
 0x74a   :  { %v801_v47 = vmul.f32 %v796_v29, %v796_v29 }
 0x74b   :  { %v802_v41 = vsel %vm518_vm1, %v797_v27, 0.0  ;;  %v803_v61 = vsel %vm518_vm1, %v798_v36, 0.0  ;;  %v805_v49 = vsel %vm518_vm1, %v799_v39, 0.0  ;;  %v807_v55 = vsel %vm518_vm1, %v800_v40, 0.0 }
 0x74c   :  { %v804_v44 = vadd.f32 %v803_v61, %v802_v41  ;;  %v809_v58 = vsel %vm526_vm2, %v801_v47, 0.0  ;;  %v2219_v61 = vld [vmem:[%s4324_s9 + $0x1b8] sm:$0xff]  ;;  %v2221_v47 = vld [vmem:[%s4324_s9 + $0x1c8] sm:$0xff] }
 0x74e   :  { %v806_v56 = vadd.f32 %v805_v49, %v804_v44  ;;  %v2220_v44 = vld [vmem:[%s4324_s9 + $0x1c0] sm:$0xff] }
 0x750   :  { %v808_v57 = vadd.f32 %v807_v55, %v806_v56  ;;  %v2259_v55 = vld [vmem:[%s4324_s9 + $0x2f8] sm:$0xff] }
 0x752   :  { %v810_v59 = vadd.f32 %v809_v58, %v808_v57 }
 0x754   :  { %811 = vadd.xlane.f32.xlu1 %v810_v59 }
 0x765   :  { %838 = vrot.lane.b32.xlu1 %v3039_v11, %s2489_s24 }
 0x7e1   :  { %v812_v60 = vpop.xlane.xlu1 %811 }
 0x7e2   :  { %v813_v62 = vrot.slane %v812_v60, 4 }
 0x7e4   :  { %v814_v63 = vadd.f32 %v813_v62, %v812_v60  ;;  %v2222_v60 = vld [vmem:[%s4324_s9 + $0x1d0] sm:$0xff] }
 0x7e5   :  { %v839_v14 = vpop.permute.xlu1 %838 }
 0x7e6   :  { %v815_v6 = vrot.slane %v814_v63, 2 }
 0x7e8   :  { %v816_v8 = vadd.f32 %v815_v6, %v814_v63  ;;  %v2223_v63 = vld [vmem:[%s4324_s9 + $0x1d8] sm:$0x1f] }
 0x7ea   :  { %v817_v9 = vrot.slane %v816_v8, 1 }
 0x7ec   :  { %v818_v12 = vadd.f32 %v817_v9, %v816_v8 }
 0x7ee   :  { %2352 = vpush %v818_v12 }
 0x81f   :  { %s2353_s0 = spop %2352 }
 0x820   :  { %s822_s12 = smul.f32 0.0007304602, %s2353_s0 }
 0x822   :  { %s823_s15 = sadd.f32 1e-05, %s822_s12 }
 0x824   :  { %v824_v13 = vstv %s823_s15 }
 0x825   :  { %2475 = vrsqrt.f32 %v824_v13  ;;  %v2260_v13 = vld [vmem:[%s4324_s9 + $0x300] sm:$0xff] }
 0x82f   :  { %v2476_v15 = vpop.eup %2475 }
 0x830   :  { %2354 = vpush %v2476_v15 }
 0x831   :  { %2356 = vpush %v839_v14  ;;  %v2261_v14 = vld [vmem:[%s4324_s9 + $0x308] sm:$0xff] }
 0x861   :  { %s2355_s16 = spop %2354 }
 0x862   :  { %v827_v16 = vstv %s2355_s16  ;;  %s2357_s24 = spop %2356  ;;  %s2494_s16 = smov 0.0  }
 0x863   :  { %v842_v32 = vstv %s2357_s24  ;;  %v828_v33 = vmul.f32 %v827_v16, %v792_v4  ;;  %v829_v35 = vmul.f32 %v827_v16, %v793_v28  ;;  %v830_v38 = vmul.f32 %v827_v16, %v794_v30 }
 0x864   :  { %v3122_v26 = vadd.f32 %v842_v32, %v485_v17  ;;  %v3124_v23 = vadd.f32 %v842_v32, %v486_v18  ;;  %v3126_v22 = vadd.f32 %v842_v32, %v487_v19  ;;  %v831_v20 = vmul.f32 %v827_v16, %v795_v31 }
 0x865   :  { %v832_v37 = vmul.f32 %v827_v16, %v796_v29  ;;  %v3128_v50 = vadd.f32 %v842_v32, %v488_v52  ;;  %v3133_v30 = vadd.f32 %v842_v32, %v489_v53  ;;  %v3135_v36 = vmax.f32 %v828_v33, 0.0 }
 0x866   :  { %v848_v27 = vmax.f32 %v3122_v26, 0.0  ;;  %v849_v4 = vmax.f32 %v3124_v23, 0.0  ;;  %v850_v28 = vmax.f32 %v3126_v22, 0.0  ;;  %v3137_v39 = vmax.f32 %v829_v35, 0.0  ;;  %v2262_v35 = vld [vmem:[%s4324_s9 + $0x310] sm:$0xff] }
 0x867   :  { %v3139_v40 = vmax.f32 %v830_v38, 0.0  ;;  %v851_v41 = vmax.f32 %v3128_v50, 0.0  ;;  %v3157_v49 = vmax.f32 %v831_v20, 0.0  ;;  %v3162_v57 = vmax.f32 %v832_v37, 0.0  ;;  %v2299_v38 = vld [vmem:[%s4324_s9 + $0x438] sm:$0xff] }
 0x868   :  { %v853_v31 = vsel %vm518_vm1, %v848_v27, 0.0  ;;  %v854_v29 = vsel %vm518_vm1, %v849_v4, 0.0  ;;  %v852_v58 = vmax.f32 %v3133_v30, 0.0  ;;  %v856_v59 = vsel %vm518_vm1, %v850_v28, 0.0 }
 0x869   :  { %v855_v56 = vadd.f32 %v854_v29, %v853_v31  ;;  %v1516_v6 = vmul.f32 %v2219_v61, %v3135_v36  ;;  %v1517_v8 = vmul.f32 %v2220_v44, %v3137_v39  ;;  %v1518_v9 = vmul.f32 %v2221_v47, %v3139_v40  ;;  %v2300_v29 = vld [vmem:[%s4324_s9 + $0x440] sm:$0xff]  ;;  %v2263_v44 = vld [vmem:[%s4324_s9 + $0x318] sm:$0x1f] }
 0x86a   :  { %v858_v12 = vsel %vm518_vm1, %v851_v41, 0.0  ;;  %v1765_v15 = vmul.f32 %v2259_v55, %v3135_v36  ;;  %v1519_v17 = vmul.f32 %v2222_v60, %v3157_v49  ;;  %v860_v52 = vsel %vm526_vm2, %v852_v58, 0.0 }
 0x86b   :  { %v857_v62 = vadd.f32 %v856_v59, %v855_v56  ;;  %v1521_v18 = vsel %vm518_vm1, %v1516_v6, 0.0  ;;  %v1522_v19 = vsel %vm518_vm1, %v1517_v8, 0.0  ;;  %v1520_v32 = vmul.f32 %v2223_v63, %v3162_v57  ;;  %v2301_v56 = vld [vmem:[%s4324_s9 + $0x448] sm:$0xff] }
 0x86c   :  { %v1523_v33 = vadd.f32 %v1522_v19, %v1521_v18  ;;  %v1524_v20 = vsel %vm518_vm1, %v1518_v9, 0.0  ;;  %v1766_v37 = vmul.f32 %v2260_v13, %v3137_v39  ;;  %v1767_v31 = vmul.f32 %v2261_v14, %v3139_v40 }
 0x86d   :  { %v859_v16 = vadd.f32 %v858_v12, %v857_v62  ;;  %v1770_v47 = vsel %vm518_vm1, %v1765_v15, 0.0  ;;  %v1526_v55 = vsel %vm518_vm1, %v1519_v17, 0.0  ;;  %v1768_v59 = vmul.f32 %v2262_v35, %v3157_v49  ;;  %v2302_v62 = vld [vmem:[%s4324_s9 + $0x450] sm:$0xff]  ;;  %v2303_v15 = vld [vmem:[%s4324_s9 + $0x458] sm:$0x1f] }
 0x86e   :  { %v1525_v61 = vadd.f32 %v1524_v20, %v1523_v33  ;;  %v1771_v60 = vsel %vm518_vm1, %v1766_v37, 0.0  ;;  %v2014_v63 = vmul.f32 %v2299_v38, %v3135_v36  ;;  %v1528_v8 = vsel %vm526_vm2, %v1520_v32, 0.0 }
 0x86f   :  { %v861_v53 = vadd.f32 %v860_v52, %v859_v16  ;;  %v1772_v9 = vadd.f32 %v1771_v60, %v1770_v47  ;;  %v2015_v12 = vmul.f32 %v2300_v29, %v3137_v39  ;;  %v1769_v13 = vmul.f32 %v2263_v44, %v3162_v57 }
 0x870   :  { %v1527_v6 = vadd.f32 %v1526_v55, %v1525_v61  ;;  %v1773_v14 = vsel %vm518_vm1, %v1767_v31, 0.0  ;;  %v2016_v16 = vmul.f32 %v2301_v56, %v3139_v40  ;;  %v2019_v17 = vsel %vm518_vm1, %v2014_v63, 0.0 }
 0x871   :  { %862 = vadd.xlane.f32.xlu0 %v861_v53  ;;  %v1774_v19 = vadd.f32 %v1773_v14, %v1772_v9  ;;  %v2017_v52 = vmul.f32 %v2302_v62, %v3157_v49  ;;  %v2020_v32 = vsel %vm518_vm1, %v2015_v12, 0.0  ;;  %v1775_v33 = vsel %vm518_vm1, %v1768_v59, 0.0 }
 0x872   :  { %v3229_v18 = vadd.f32 %v1528_v8, %v1527_v6  ;;  %v2021_v35 = vadd.f32 %v2020_v32, %v2019_v17  ;;  %v2018_v53 = vmul.f32 %v2303_v15, %v3162_v57  ;;  %v2022_v20 = vsel %vm518_vm1, %v2016_v16, 0.0 }
 0x873   :  { %v1776_v38 = vadd.f32 %v1775_v33, %v1774_v19  ;;  %v1777_v37 = vsel %vm526_vm2, %v1769_v13, 0.0  ;;  %v2024_v61 = vsel %vm518_vm1, %v2017_v52, 0.0 }
 0x874   :  { %v2023_v31 = vadd.f32 %v2022_v20, %v2021_v35  ;;  %v2026_v47 = vsel %vm526_vm2, %v2018_v53, 0.0 }
 0x875   :  { %v3237_v29 = vadd.f32 %v1777_v37, %v1776_v38 }
 0x876   :  { %v2025_v44 = vadd.f32 %v2024_v61, %v2023_v31 }
 0x877   :  { %4342 = vst [vmem:[#allocation3_spill] sm:$0xff] %v3237_v29 }
 0x878   :  { %v3241_v56 = vadd.f32 %v2026_v47, %v2025_v44 }
 0x87a   :  { %4343 = vst [vmem:[#allocation4_spill] sm:$0xff] %v3241_v56 }
 0x887   :  { %921 = vrot.lane.b32.xlu0 %v3039_v11, %s2490_s25 }
 0x8fe   :  { %v863_v55 = vpop.xlane.xlu0 %862 }
 0x8ff   :  { %v864_v59 = vrot.slane %v863_v55, 4 }
 0x901   :  { %v865_v60 = vadd.f32 %v864_v59, %v863_v55  ;;  %v490_v55 = vld [vmem:[%s4327_s5] sm:$0xff]  ;;  %v491_v59 = vld [vmem:[%s4327_s5 + $0x8] sm:$0xff] }
 0x902   :  { %v922_v44 = vpop.permute.xlu0 %921 }
 0x903   :  { %v866_v62 = vrot.slane %v865_v60, 2 }
 0x905   :  { %v867_v63 = vadd.f32 %v866_v62, %v865_v60  ;;  %v492_v60 = vld [vmem:[%s4327_s5 + $0x10] sm:$0xff]  ;;  %v493_v62 = vld [vmem:[%s4327_s5 + $0x18] sm:$0xff] }
 0x907   :  { %v868_v6 = vrot.slane %v867_v63, 1 }
 0x909   :  { %v869_v8 = vadd.f32 %v868_v6, %v867_v63  ;;  %v494_v6 = vld [vmem:[%s4327_s5 + $0x20] sm:$0x1f] }
 0x90b   :  { %2358 = vpush %v869_v8 }
 0x93c   :  { %s2359_s28 = spop %2358 }
 0x93d   :  { %s873_s1 = smul.f32 0.0007304602, %s2359_s28 }
 0x93f   :  { %v874_v9 = vstv %s873_s1 }
 0x940   :  { %v3247_v12 = vsub.f32 %v848_v27, %v874_v9  ;;  %v3251_v13 = vsub.f32 %v849_v4, %v874_v9  ;;  %v3255_v14 = vsub.f32 %v850_v28, %v874_v9  ;;  %v3259_v15 = vsub.f32 %v851_v41, %v874_v9 }
 0x941   :  { %v3267_v27 = vsub.f32 %v852_v58, %v874_v9 }
 0x942   :  { %v880_v16 = vmul.f32 %v3247_v12, %v3247_v12  ;;  %v881_v26 = vmul.f32 %v3251_v13, %v3251_v13  ;;  %v882_v23 = vmul.f32 %v3255_v14, %v3255_v14  ;;  %v883_v22 = vmul.f32 %v3259_v15, %v3259_v15 }
 0x943   :  { %v884_v41 = vmul.f32 %v3267_v27, %v3267_v27 }
 0x944   :  { %v885_v50 = vsel %vm518_vm1, %v880_v16, 0.0  ;;  %v886_v4 = vsel %vm518_vm1, %v881_v26, 0.0  ;;  %v888_v17 = vsel %vm518_vm1, %v882_v23, 0.0  ;;  %v890_v30 = vsel %vm518_vm1, %v883_v22, 0.0 }
 0x945   :  { %v887_v28 = vadd.f32 %v886_v4, %v885_v50  ;;  %v892_v52 = vsel %vm526_vm2, %v884_v41, 0.0 }
 0x947   :  { %v889_v19 = vadd.f32 %v888_v17, %v887_v28 }
 0x949   :  { %v891_v58 = vadd.f32 %v890_v30, %v889_v19 }
 0x94b   :  { %v893_v32 = vadd.f32 %v892_v52, %v891_v58 }
 0x94d   :  { %894 = vadd.xlane.f32.xlu1 %v893_v32 }
 0x9da   :  { %v895_v33 = vpop.xlane.xlu1 %894 }
 0x9db   :  { %v896_v35 = vrot.slane %v895_v33, 4 }
 0x9dd   :  { %v897_v38 = vadd.f32 %v896_v35, %v895_v33 }
 0x9df   :  { %v898_v53 = vrot.slane %v897_v38, 2 }
 0x9e1   :  { %v899_v20 = vadd.f32 %v898_v53, %v897_v38 }
 0x9e3   :  { %v900_v37 = vrot.slane %v899_v20, 1 }
 0x9e5   :  { %v901_v31 = vadd.f32 %v900_v37, %v899_v20 }
 0x9e7   :  { %2360 = vpush %v901_v31 }
 0xa18   :  { %s2361_s25 = spop %2360 }
 0xa19   :  { %s905_s30 = smul.f32 0.0007304602, %s2361_s25 }
 0xa1b   :  { %s906_s3 = sadd.f32 1e-05, %s905_s30 }
 0xa1d   :  { %v907_v61 = vstv %s906_s3 }
 0xa1e   :  { %2477 = vrsqrt.f32 %v907_v61 }
 0xa28   :  { %v2478_v47 = vpop.eup %2477 }
 0xa29   :  { %2362 = vpush %v2478_v47 }
 0xa2a   :  { %2364 = vpush %v922_v44 }
 0xa5a   :  { %s3280_s4 = spop %2362 }
 0xa5b   :  { %s2365_s8 = spop %2364 }
 0xa5c   :  { %v925_v63 = vstv %s2365_s8 }
 0xa5d   :  { %v926_v8 = vadd.f32 %v925_v63, %v490_v55  ;;  %v927_v9 = vadd.f32 %v925_v63, %v491_v59  ;;  %v928_v16 = vadd.f32 %v925_v63, %v492_v60  ;;  %v929_v26 = vadd.f32 %v925_v63, %v493_v62 }
 0xa5e   :  { %v930_v4 = vadd.f32 %v925_v63, %v494_v6 }
 0xa5f   :  { %v931_v23 = vmax.f32 %v926_v8, 0.0  ;;  %v932_v22 = vmax.f32 %v927_v9, 0.0  ;;  %v933_v50 = vmax.f32 %v928_v16, 0.0  ;;  %v934_v28 = vmax.f32 %v929_v26, 0.0 }
 0xa60   :  { %v935_v30 = vmax.f32 %v930_v4, 0.0 }
 0xa61   :  { %v936_v41 = vsel %vm518_vm1, %v931_v23, 0.0  ;;  %v937_v17 = vsel %vm518_vm1, %v932_v22, 0.0  ;;  %v939_v58 = vsel %vm518_vm1, %v933_v50, 0.0  ;;  %v941_v32 = vsel %vm518_vm1, %v934_v28, 0.0 }
 0xa62   :  { %v938_v19 = vadd.f32 %v937_v17, %v936_v41  ;;  %v943_v35 = vsel %vm526_vm2, %v935_v30, 0.0 }
 0xa64   :  { %v940_v52 = vadd.f32 %v939_v58, %v938_v19 }
 0xa66   :  { %v942_v33 = vadd.f32 %v941_v32, %v940_v52 }
 0xa68   :  { %v944_v38 = vadd.f32 %v943_v35, %v942_v33 }
 0xa6a   :  { %945 = vadd.xlane.f32.xlu1 %v944_v38 }
 0xaf7   :  { %v946_v53 = vpop.xlane.xlu1 %945 }
 0xaf8   :  { %v947_v20 = vrot.slane %v946_v53, 4 }
 0xafa   :  { %v948_v37 = vadd.f32 %v947_v20, %v946_v53 }
 0xafc   :  { %v949_v31 = vrot.slane %v948_v37, 2 }
 0xafe   :  { %v950_v61 = vadd.f32 %v949_v31, %v948_v37 }
 0xb00   :  { %v951_v44 = vrot.slane %v950_v61, 1 }
 0xb02   :  { %v952_v47 = vadd.f32 %v951_v44, %v950_v61 }
 0xb04   :  { %2366 = vpush %v952_v47  ;;  %v495_v47 = vld [vmem:[%s4328_s6] sm:$0xff] }
 0xb35   :  { %s2367_s5 = spop %2366 }
 0xb36   :  { %s956_s27 = smul.f32 0.0007304602, %s2367_s5 }
 0xb38   :  { %v957_v55 = vstv %s956_s27 }
 0xb39   :  { %v958_v59 = vsub.f32 %v931_v23, %v957_v55  ;;  %v959_v60 = vsub.f32 %v932_v22, %v957_v55  ;;  %v960_v62 = vsub.f32 %v933_v50, %v957_v55  ;;  %v961_v63 = vsub.f32 %v934_v28, %v957_v55 }
 0xb3a   :  { %v962_v9 = vsub.f32 %v935_v30, %v957_v55  ;;  %v496_v55 = vld [vmem:[%s4328_s6 + $0x8] sm:$0xff] }
 0xb3b   :  { %v963_v6 = vmul.f32 %v958_v59, %v958_v59  ;;  %v964_v8 = vmul.f32 %v959_v60, %v959_v60  ;;  %v965_v16 = vmul.f32 %v960_v62, %v960_v62  ;;  %v966_v26 = vmul.f32 %v961_v63, %v961_v63 }
 0xb3c   :  { %v967_v19 = vmul.f32 %v962_v9, %v962_v9 }
 0xb3d   :  { %v968_v4 = vsel %vm518_vm1, %v963_v6, 0.0  ;;  %v969_v41 = vsel %vm518_vm1, %v964_v8, 0.0  ;;  %v971_v58 = vsel %vm518_vm1, %v965_v16, 0.0  ;;  %v973_v32 = vsel %vm518_vm1, %v966_v26, 0.0  ;;  %v497_v6 = vld [vmem:[%s4328_s6 + $0x10] sm:$0xff]  ;;  %v498_v8 = vld [vmem:[%s4328_s6 + $0x18] sm:$0xff] }
 0xb3e   :  { %v970_v17 = vadd.f32 %v969_v41, %v968_v4  ;;  %v975_v22 = vsel %vm526_vm2, %v967_v19, 0.0 }
 0xb40   :  { %v972_v52 = vadd.f32 %v971_v58, %v970_v17  ;;  %v499_v17 = vld [vmem:[%s4328_s6 + $0x20] sm:$0x1f] }
 0xb42   :  { %v974_v23 = vadd.f32 %v973_v32, %v972_v52 }
 0xb44   :  { %v976_v50 = vadd.f32 %v975_v22, %v974_v23 }
 0xb46   :  { %977 = vadd.xlane.f32.xlu1 %v976_v50 }
 0xb57   :  { %1004 = vrot.lane.b32.xlu1 %v3039_v11, %s2491_s26 }
 0xbd3   :  { %v978_v28 = vpop.xlane.xlu1 %977 }
 0xbd4   :  { %v979_v30 = vrot.slane %v978_v28, 4 }
 0xbd6   :  { %v980_v33 = vadd.f32 %v979_v30, %v978_v28 }
 0xbd7   :  { %v1005_v31 = vpop.permute.xlu1 %1004 }
 0xbd8   :  { %v981_v35 = vrot.slane %v980_v33, 2 }
 0xbda   :  { %v982_v38 = vadd.f32 %v981_v35, %v980_v33 }
 0xbdc   :  { %v983_v53 = vrot.slane %v982_v38, 1 }
 0xbde   :  { %v984_v20 = vadd.f32 %v983_v53, %v982_v38  ;;  %v2229_v38 = vld [vmem:[%s4324_s9 + $0x208] sm:$0xff]  ;;  %v2230_v53 = vld [vmem:[%s4324_s9 + $0x210] sm:$0xff] }
 0xbe0   :  { %2368 = vpush %v984_v20  ;;  %v2231_v20 = vld [vmem:[%s4324_s9 + $0x218] sm:$0xff] }
 0xc11   :  { %s2369_s28 = spop %2368 }
 0xc12   :  { %s988_s1 = smul.f32 0.0007304602, %s2369_s28 }
 0xc14   :  { %s989_s25 = sadd.f32 1e-05, %s988_s1 }
 0xc16   :  { %v990_v37 = vstv %s989_s25 }
 0xc17   :  { %2479 = vrsqrt.f32 %v990_v37 }
 0xc21   :  { %v2480_v61 = vpop.eup %2479 }
 0xc22   :  { %2370 = vpush %v2480_v61  ;;  %v2269_v61 = vld [vmem:[%s4324_s9 + $0x348] sm:$0xff] }
 0xc23   :  { %2372 = vpush %v1005_v31 }
 0xc53   :  { %s2371_s30 = spop %2370 }
 0xc54   :  { %v993_v44 = vstv %s2371_s30  ;;  %s2373_s26 = spop %2372 }
 0xc55   :  { %v1008_v16 = vstv %s2373_s26  ;;  %v994_v26 = vmul.f32 %v993_v44, %v958_v59  ;;  %v995_v4 = vmul.f32 %v993_v44, %v959_v60  ;;  %v996_v41 = vmul.f32 %v993_v44, %v960_v62 }
 0xc56   :  { %v3324_v19 = vadd.f32 %v1008_v16, %v495_v47  ;;  %v3326_v58 = vadd.f32 %v1008_v16, %v496_v55  ;;  %v3328_v52 = vadd.f32 %v1008_v16, %v497_v6  ;;  %v997_v32 = vmul.f32 %v993_v44, %v961_v63  ;;  %v2232_v6 = vld [vmem:[%s4324_s9 + $0x220] sm:$0xff] }
 0xc57   :  { %v998_v23 = vmul.f32 %v993_v44, %v962_v9  ;;  %v3330_v22 = vadd.f32 %v1008_v16, %v498_v8  ;;  %v3335_v62 = vadd.f32 %v1008_v16, %v499_v17  ;;  %v3337_v28 = vmax.f32 %v994_v26, 0.0  ;;  %v2233_v16 = vld [vmem:[%s4324_s9 + $0x228] sm:$0x1f] }
 0xc58   :  { %v4336_v50 = vmax.f32 %v3324_v19, 0.0  ;;  %v4335_v59 = vmax.f32 %v3326_v58, 0.0  ;;  %v4333_v60 = vmax.f32 %v3328_v52, 0.0  ;;  %v3339_v30 = vmax.f32 %v995_v4, 0.0 }
 0xc59   :  { %v3341_v33 = vmax.f32 %v996_v41, 0.0  ;;  %v4332_v35 = vmax.f32 %v3330_v22, 0.0  ;;  %v3359_v37 = vmax.f32 %v997_v32, 0.0  ;;  %v3364_v44 = vmax.f32 %v998_v23, 0.0  ;;  %v2270_v32 = vld [vmem:[%s4324_s9 + $0x350] sm:$0xff]  ;;  %v2271_v23 = vld [vmem:[%s4324_s9 + $0x358] sm:$0xff] }
 0xc5a   :  { %v1019_v63 = vsel %vm518_vm1, %v4336_v50, 0.0  ;;  %v1020_v9 = vsel %vm518_vm1, %v4335_v59, 0.0  ;;  %v4334_v47 = vmax.f32 %v3335_v62, 0.0  ;;  %v1022_v55 = vsel %vm518_vm1, %v4333_v60, 0.0  ;;  %v2272_v60 = vld [vmem:[%s4324_s9 + $0x360] sm:$0xff] }
 0xc5b   :  { %v1021_v31 = vadd.f32 %v1020_v9, %v1019_v63  ;;  %v1576_v26 = vmul.f32 %v2229_v38, %v3337_v28  ;;  %v1577_v4 = vmul.f32 %v2230_v53, %v3339_v30  ;;  %v1578_v41 = vmul.f32 %v2231_v20, %v3341_v33 }
 0xc5c   :  { %v1024_v17 = vsel %vm518_vm1, %v4332_v35, 0.0  ;;  %v1825_v63 = vmul.f32 %v2269_v61, %v3337_v28  ;;  %v1579_v38 = vmul.f32 %v2232_v6, %v3359_v37  ;;  %v2309_v61 = vld [vmem:[%s4324_s9 + $0x488] sm:$0xff] }
 0xc5d   :  { %v1023_v8 = vadd.f32 %v1022_v55, %v1021_v31  ;;  %v1581_v53 = vsel %vm518_vm1, %v1576_v26, 0.0  ;;  %v1582_v20 = vsel %vm518_vm1, %v1577_v4, 0.0  ;;  %v1026_v31 = vsel %vm526_vm2, %v4334_v47, 0.0 }
 0xc5e   :  { %v1580_v55 = vmul.f32 %v2233_v16, %v3364_v44  ;;  %v1583_v35 = vadd.f32 %v1582_v20, %v1581_v53  ;;  %v1826_v26 = vmul.f32 %v2270_v32, %v3339_v30  ;;  %v1827_v4 = vmul.f32 %v2271_v23, %v3341_v33  ;;  %v2310_v16 = vld [vmem:[%s4324_s9 + $0x490] sm:$0xff]  ;;  %v2273_v53 = vld [vmem:[%s4324_s9 + $0x368] sm:$0x1f] }
 0xc5f   :  { %v1025_v9 = vadd.f32 %v1024_v17, %v1023_v8  ;;  %v1584_v8 = vsel %vm518_vm1, %v1578_v41, 0.0  ;;  %v1830_v20 = vsel %vm518_vm1, %v1825_v63, 0.0  ;;  %v1586_v41 = vsel %vm518_vm1, %v1579_v38, 0.0 }
 0xc60   :  { %v1585_v17 = vadd.f32 %v1584_v8, %v1583_v35  ;;  %v1828_v32 = vmul.f32 %v2272_v60, %v3359_v37  ;;  %v1831_v23 = vsel %vm518_vm1, %v1826_v26, 0.0  ;;  %v2312_v35 = vld [vmem:[%s4324_s9 + $0x4a0] sm:$0xff]  ;;  %v1588_v63 = vsel %vm526_vm2, %v1580_v55, 0.0  ;;  %v2313_v60 = vld [vmem:[%s4324_s9 + $0x4a8] sm:$0x1f] }
 0xc61   :  { %v1027_v6 = vadd.f32 %v1026_v31, %v1025_v9  ;;  %v2311_v9 = vld [vmem:[%s4324_s9 + $0x498] sm:$0xff]  ;;  %v2074_v31 = vmul.f32 %v2309_v61, %v3337_v28  ;;  %v1832_v47 = vadd.f32 %v1831_v23, %v1830_v20  ;;  %v2075_v59 = vmul.f32 %v2310_v16, %v3339_v30 }
 0xc62   :  { %v1587_v8 = vadd.f32 %v1586_v41, %v1585_v17  ;;  %v1833_v38 = vsel %vm518_vm1, %v1827_v4, 0.0  ;;  %v2076_v26 = vmul.f32 %v2311_v9, %v3341_v33  ;;  %v2077_v55 = vmul.f32 %v2312_v35, %v3359_v37 }
 0xc63   :  { %1028 = vadd.xlane.f32.xlu0 %v1027_v6  ;;  %v1829_v6 = vmul.f32 %v2273_v53, %v3364_v44  ;;  %v2079_v50 = vsel %vm518_vm1, %v2074_v31, 0.0  ;;  %v1834_v61 = vadd.f32 %v1833_v38, %v1832_v47  ;;  %v2080_v17 = vsel %vm518_vm1, %v2075_v59, 0.0 }
 0xc64   :  { %v3431_v56 = vadd.f32 %v1588_v63, %v1587_v8  ;;  %v1835_v16 = vsel %vm518_vm1, %v1828_v32, 0.0  ;;  %v2081_v53 = vadd.f32 %v2080_v17, %v2079_v50  ;;  %v2078_v4 = vmul.f32 %v2313_v60, %v3364_v44 }
 0xc65   :  { %v1836_v20 = vadd.f32 %v1835_v16, %v1834_v61  ;;  %v2082_v41 = vsel %vm518_vm1, %v2076_v26, 0.0  ;;  %v1837_v23 = vsel %vm526_vm2, %v1829_v6, 0.0  ;;  %v2084_v31 = vsel %vm518_vm1, %v2077_v55, 0.0 }
 0xc66   :  { %v2083_v9 = vadd.f32 %v2082_v41, %v2081_v53  ;;  %v2086_v35 = vsel %vm526_vm2, %v2078_v4, 0.0  ;;  %v4346_v61 = vmax.f32 %v3324_v19, 0.0  ;;  %v4347_v17 = vmax.f32 %v3326_v58, 0.0 }
 0xc67   :  { %v3439_v10 = vadd.f32 %v1837_v23, %v1836_v20  ;;  %v4349_v20 = vmax.f32 %v3330_v22, 0.0  ;;  %v4350_v23 = vmax.f32 %v3335_v62, 0.0 }
 0xc68   :  { %v2085_v47 = vadd.f32 %v2084_v31, %v2083_v9 }
 0xc69   :  { %4344 = vst [vmem:[#allocation5_spill] sm:$0xff] %v3439_v10 }
 0xc6a   :  { %v3443_v8 = vadd.f32 %v2086_v35, %v2085_v47 }
 0xc6c   :  { %4345 = vst [vmem:[#allocation6_spill] sm:$0xff] %v3443_v8 }
 0xc79   :  { %1087 = vrot.lane.b32.xlu0 %v3039_v11, %s2492_s29  ;;  %v4348_v11 = vmax.f32 %v3328_v52, 0.0 }
 0xcf0   :  { %v1029_v50 = vpop.xlane.xlu0 %1028 }
 0xcf1   :  { %v1030_v59 = vrot.slane %v1029_v50, 4 }
 0xcf3   :  { %v1031_v32 = vadd.f32 %v1030_v59, %v1029_v50 }
 0xcf5   :  { %v1032_v63 = vrot.slane %v1031_v32, 2 }
 0xcf7   :  { %v1033_v38 = vadd.f32 %v1032_v63, %v1031_v32 }
 0xcf9   :  { %v1034_v60 = vrot.slane %v1033_v38, 1 }
 0xcfb   :  { %v1035_v6 = vadd.f32 %v1034_v60, %v1033_v38 }
 0xcfd   :  { %2374 = vpush %v1035_v6 }
 0xd2e   :  { %s2375_s3 = spop %2374 }
 0xd2f   :  { %s1039_s8 = smul.f32 0.0007304602, %s2375_s3 }
 0xd31   :  { %v1040_v26 = vstv %s1039_s8 }
 0xd32   :  { %v3449_v55 = vsub.f32 %v4346_v61, %v1040_v26  ;;  %v3453_v16 = vsub.f32 %v4347_v17, %v1040_v26  ;;  %v3457_v53 = vsub.f32 %v4348_v11, %v1040_v26  ;;  %v3461_v4 = vsub.f32 %v4349_v20, %v1040_v26 }
 0xd33   :  { %v3469_v9 = vsub.f32 %v4350_v23, %v1040_v26 }
 0xd34   :  { %v1046_v41 = vmul.f32 %v3449_v55, %v3449_v55  ;;  %v1047_v19 = vmul.f32 %v3453_v16, %v3453_v16  ;;  %v1048_v58 = vmul.f32 %v3457_v53, %v3457_v53  ;;  %v1049_v52 = vmul.f32 %v3461_v4, %v3461_v4 }
 0xd35   :  { %v1050_v35 = vmul.f32 %v3469_v9, %v3469_v9 }
 0xd36   :  { %v1051_v22 = vsel %vm518_vm1, %v1046_v41, 0.0  ;;  %v1052_v31 = vsel %vm518_vm1, %v1047_v19, 0.0  ;;  %v1054_v50 = vsel %vm518_vm1, %v1048_v58, 0.0  ;;  %v1056_v62 = vsel %vm518_vm1, %v1049_v52, 0.0  ;;  %v1088_v19 = vpop.permute.xlu0 %1087 }
 0xd37   :  { %v1053_v47 = vadd.f32 %v1052_v31, %v1051_v22  ;;  %v1058_v63 = vsel %vm526_vm2, %v1050_v35, 0.0  ;;  %v577_v58 = vstv %s2845_s14  ;;  %v1172_v35 = vld [vmem:[%s4324_s9] sm:$0xff] }
 0xd38   :  { %v578_v52 = vmul.f32 %v577_v58, %v2687_v0  ;;  %v579_v22 = vmul.f32 %v577_v58, %v2691_v1  ;;  %v581_v1 = vmul.f32 %v577_v58, %v2697_v3  ;;  %v1175_v3 = vld [vmem:[%s4324_s9 + $0x18] sm:$0xff] }
 0xd39   :  { %v1055_v59 = vadd.f32 %v1054_v50, %v1053_v47  ;;  %v1173_v50 = vld [vmem:[%s4324_s9 + $0x8] sm:$0xff] }
 0xd3a   :  { %v3485_v31 = vmax.f32 %v578_v52, 0.0  ;;  %v3487_v47 = vmax.f32 %v579_v22, 0.0 }
 0xd3b   :  { %v1057_v32 = vadd.f32 %v1056_v62, %v1055_v59  ;;  %v580_v59 = vmul.f32 %v577_v58, %v2695_v2  ;;  %v3507_v2 = vmax.f32 %v581_v1, 0.0 }
 0xd3c   :  { %v1177_v62 = vmul.f32 %v1172_v35, %v3485_v31  ;;  %v1178_v0 = vmul.f32 %v1173_v50, %v3487_v47 }
 0xd3d   :  { %v1059_v38 = vadd.f32 %v1058_v63, %v1057_v32  ;;  %v3499_v32 = vmax.f32 %v580_v59, 0.0  ;;  %v1174_v63 = vld [vmem:[%s4324_s9 + $0x10] sm:$0xff] }
 0xd3f   :  { %1060 = vadd.xlane.f32.xlu1 %v1059_v38  ;;  %v1182_v38 = vsel %vm518_vm1, %v1177_v62, 0.0  ;;  %v2171_v62 = vld [vmem:[%s4324_s9 + $0x38] sm:$0xff] }
 0xdcc   :  { %v1061_v60 = vpop.xlane.xlu1 %1060 }
 0xdcd   :  { %v1062_v6 = vrot.slane %v1061_v60, 4 }
 0xdcf   :  { %v1063_v26 = vadd.f32 %v1062_v6, %v1061_v60  ;;  %v1183_v60 = vsel %vm518_vm1, %v1178_v0, 0.0  ;;  %v582_v6 = vmul.f32 %v577_v58, %v2703_v7  ;;  %v2170_v58 = vld [vmem:[%s4324_s9 + $0x30] sm:$0xff] }
 0xdd0   :  { %v1208_v1 = vmul.f32 %v2170_v58, %v2930_v46 }
 0xdd1   :  { %v1064_v61 = vrot.slane %v1063_v26, 2 }
 0xdd3   :  { %v1065_v17 = vadd.f32 %v1064_v61, %v1063_v26  ;;  %v1179_v26 = vmul.f32 %v1174_v63, %v3499_v32  ;;  %v1184_v61 = vadd.f32 %v1183_v60, %v1182_v38  ;;  %v500_v63 = vld [vmem:[%s4329_s7] sm:$0xff] }
 0xdd5   :  { %v1066_v11 = vrot.slane %v1065_v17, 1 }
 0xdd7   :  { %v1067_v20 = vadd.f32 %v1066_v11, %v1065_v17  ;;  %v3513_v17 = vmax.f32 %v582_v6, 0.0  ;;  %v1180_v11 = vmul.f32 %v1175_v3, %v3507_v2  ;;  %v2172_v6 = vld [vmem:[%s4324_s9 + $0x40] sm:$0xff]  ;;  %v1209_v3 = vmul.f32 %v2171_v62, %v2932_v45  ;;  %v2174_v45 = vld [vmem:[%s4324_s9 + $0x50] sm:$0xff] }
 0xdd9   :  { %2376 = vpush %v1067_v20  ;;  %v1185_v20 = vsel %vm518_vm1, %v1179_v26, 0.0  ;;  %v1187_v22 = vsel %vm518_vm1, %v1180_v11, 0.0  ;;  %v2173_v26 = vld [vmem:[%s4324_s9 + $0x48] sm:$0x1f] }
 0xdda   :  { %v1186_v7 = vadd.f32 %v1185_v20, %v1184_v61  ;;  %v504_v20 = vld [vmem:[%s4329_s7 + $0x20] sm:$0x1f]  ;;  %v1211_v62 = vmul.f32 %v2173_v26, %v2955_v43 }
 0xddc   :  { %v1188_v35 = vadd.f32 %v1187_v22, %v1186_v7  ;;  %v1213_v7 = vsel %vm518_vm1, %v1208_v1, 0.0 }
 0xe0a   :  { %s2377_s29 = spop %2376 }
 0xe0b   :  { %s1071_s0 = smul.f32 0.0007304602, %s2377_s29 }
 0xe0d   :  { %s1072_s12 = sadd.f32 1e-05, %s1071_s0 }
 0xe0f   :  { %v1073_v41 = vstv %s1072_s12 }
 0xe10   :  { %2481 = vrsqrt.f32 %v1073_v41  ;;  %v1176_v41 = vld [vmem:[%s4324_s9 + $0x20] sm:$0x1f] }
 0xe11   :  { %v1181_v52 = vmul.f32 %v1176_v41, %v3513_v17 }
 0xe13   :  { %v1189_v38 = vsel %vm526_vm2, %v1181_v52, 0.0 }
 0xe14   :  { %v3551_v60 = vadd.f32 %v1189_v38, %v1188_v35 }
 0xe1a   :  { %v2482_v23 = vpop.eup %2481 }
 0xe1b   :  { %2378 = vpush %v2482_v23  ;;  %v2169_v23 = vld [vmem:[%s4324_s9 + $0x28] sm:$0xff] }
 0xe1c   :  { %2380 = vpush %v1088_v19  ;;  %v744_v19 = vstv %s3078_s13  ;;  %v1207_v0 = vmul.f32 %v2169_v23, %v2928_v54  ;;  %v503_v54 = vld [vmem:[%s4329_s7 + $0x18] sm:$0xff]  ;;  %v3570_v23 = vstv %s3280_s4 }
 0xe1d   :  { %v745_v50 = vmul.f32 %v744_v19, %v3045_v24  ;;  %v746_v59 = vmul.f32 %v744_v19, %v3049_v25  ;;  %v501_v24 = vld [vmem:[%s4329_s7 + $0x8] sm:$0xff]  ;;  %v502_v25 = vld [vmem:[%s4329_s7 + $0x10] sm:$0xff]  ;;  %v747_v35 = vmul.f32 %v744_v19, %v3053_v51  ;;  %v911_v51 = vmul.f32 %v3570_v23, %v3247_v12 }
 0xe1e   :  { %v1212_v41 = vsel %vm518_vm1, %v1207_v0, 0.0  ;;  %v2175_v0 = vld [vmem:[%s4324_s9 + $0x58] sm:$0xff]  ;;  %v748_v12 = vmul.f32 %v744_v19, %v3057_v21 }
 0xe1f   :  { %v3560_v61 = vmax.f32 %v745_v50, 0.0  ;;  %v3562_v11 = vmax.f32 %v746_v59, 0.0  ;;  %v1210_v59 = vmul.f32 %v2172_v6, %v2950_v42  ;;  %v912_v42 = vmul.f32 %v3570_v23, %v3251_v13 }
 0xe20   :  { %v1214_v38 = vadd.f32 %v1213_v7, %v1212_v41  ;;  %v1215_v13 = vsel %vm518_vm1, %v1209_v3, 0.0  ;;  %v2179_v7 = vld [vmem:[%s4324_s9 + $0x78] sm:$0xff] }
 0xe21   :  { %v1237_v43 = vmul.f32 %v2174_v45, %v3560_v61  ;;  %v1238_v26 = vmul.f32 %v2175_v0, %v3562_v11  ;;  %v1217_v41 = vsel %vm518_vm1, %v1210_v59, 0.0  ;;  %v2180_v45 = vld [vmem:[%s4324_s9 + $0x80] sm:$0xff]  ;;  %v3623_v59 = vmax.f32 %v911_v51, 0.0 }
 0xe22   :  { %v3625_v0 = vmax.f32 %v912_v42, 0.0  ;;  %v1267_v21 = vmul.f32 %v2179_v7, %v3135_v36  ;;  %v1268_v51 = vmul.f32 %v2180_v45, %v3137_v39  ;;  %v2184_v42 = vld [vmem:[%s4324_s9 + $0xa0] sm:$0xff]  ;;  %v913_v36 = vmul.f32 %v3570_v23, %v3255_v14  ;;  %v2177_v7 = vld [vmem:[%s4324_s9 + $0x68] sm:$0xff] }
 0xe23   :  { %v2181_v14 = vld [vmem:[%s4324_s9 + $0x88] sm:$0xff] }
 0xe4c   :  { %s3531_s25 = spop %2378 }
 0xe4d   :  { %s2381_s26 = spop %2380 }
 0xe4e   :  { %v1091_v46 = vstv %s2381_s26 }
 0xe4f   :  { %v3572_v58 = vadd.f32 %v1091_v46, %v500_v63  ;;  %v3574_v52 = vadd.f32 %v1091_v46, %v501_v24  ;;  %v3576_v22 = vadd.f32 %v1091_v46, %v502_v25  ;;  %v3582_v50 = vadd.f32 %v1091_v46, %v503_v54 }
 0xe50   :  { %v3592_v25 = vadd.f32 %v1091_v46, %v504_v20 }
 0xe51   :  { %v4337_v1 = vmax.f32 %v3572_v58, 0.0  ;;  %v4338_v63 = vmax.f32 %v3574_v52, 0.0  ;;  %v4339_v24 = vmax.f32 %v3576_v22, 0.0  ;;  %v4340_v54 = vmax.f32 %v3582_v50, 0.0 }
 0xe52   :  { %v4351_v39 = vmax.f32 %v3592_v25, 0.0 }
 0xe53   :  { %v1102_v6 = vsel %vm518_vm1, %v4337_v1, 0.0  ;;  %v1103_v46 = vsel %vm518_vm1, %v4338_v63, 0.0  ;;  %v749_v1 = vmul.f32 %v744_v19, %v3065_v34  ;;  %v3617_v63 = vmax.f32 %v747_v35, 0.0 }
 0xe54   :  { %v1104_v20 = vadd.f32 %v1103_v46, %v1102_v6  ;;  %v1105_v3 = vsel %vm518_vm1, %v4339_v24, 0.0  ;;  %v2176_v46 = vld [vmem:[%s4324_s9 + $0x60] sm:$0xff]  ;;  %v1242_v34 = vsel %vm518_vm1, %v1237_v43, 0.0  ;;  %v1107_v19 = vsel %vm518_vm1, %v4340_v54, 0.0 }
 0xe55   :  { %v1243_v35 = vsel %vm518_vm1, %v1238_v26, 0.0  ;;  %v3646_v43 = vstv %s3531_s25  ;;  %v1216_v54 = vadd.f32 %v1215_v13, %v1214_v38  ;;  %v3648_v8 = vmax.f32 %v749_v1, 0.0  ;;  %v2178_v38 = vld [vmem:[%s4324_s9 + $0x70] sm:$0x1f] }
 0xe56   :  { %v1106_v6 = vadd.f32 %v1105_v3, %v1104_v20  ;;  %v2185_v20 = vld [vmem:[%s4324_s9 + $0xa8] sm:$0xff]  ;;  %v3643_v3 = vmax.f32 %v748_v12, 0.0  ;;  %v1109_v26 = vsel %vm526_vm2, %v4351_v39, 0.0  ;;  %v1239_v12 = vmul.f32 %v2176_v46, %v3617_v63 }
 0xe57   :  { %v1244_v1 = vadd.f32 %v1243_v35, %v1242_v34  ;;  %v1297_v13 = vmul.f32 %v2184_v42, %v3623_v59  ;;  %v1078_v46 = vmul.f32 %v3646_v43, %v3453_v16  ;;  %v1273_v39 = vsel %vm518_vm1, %v1268_v51, 0.0  ;;  %v2190_v16 = vld [vmem:[%s4324_s9 + $0xd0] sm:$0xff] }
 0xe58   :  { %v1108_v24 = vadd.f32 %v1107_v19, %v1106_v6  ;;  %v1298_v6 = vmul.f32 %v2185_v20, %v3625_v0  ;;  %v1077_v19 = vmul.f32 %v3646_v43, %v3449_v55  ;;  %v914_v34 = vmul.f32 %v3570_v23, %v3259_v15  ;;  %v2189_v55 = vld [vmem:[%s4324_s9 + $0xc8] sm:$0xff] }
 0xe59   :  { %v1218_v35 = vadd.f32 %v1217_v41, %v1216_v54  ;;  %v1240_v42 = vmul.f32 %v2177_v7, %v3643_v3  ;;  %v1241_v51 = vmul.f32 %v2178_v38, %v3648_v8  ;;  %v1245_v15 = vsel %vm518_vm1, %v1239_v12, 0.0  ;;  %v2186_v7 = vld [vmem:[%s4324_s9 + $0xb0] sm:$0xff] }
 0xe5a   :  { %v1110_v45 = vadd.f32 %v1109_v26, %v1108_v24  ;;  %v1272_v24 = vsel %vm518_vm1, %v1267_v21, 0.0  ;;  %v1219_v26 = vsel %vm526_vm2, %v1211_v62, 0.0  ;;  %v3683_v21 = vmax.f32 %v913_v36, 0.0  ;;  %v2182_v62 = vld [vmem:[%s4324_s9 + $0x90] sm:$0xff] }
 0xe5b   :  { %v1269_v54 = vmul.f32 %v2181_v14, %v3139_v40  ;;  %v1246_v41 = vadd.f32 %v1245_v15, %v1244_v1  ;;  %v1274_v20 = vadd.f32 %v1273_v39, %v1272_v24  ;;  %v1303_v36 = vsel %vm518_vm1, %v1298_v6, 0.0  ;;  %v2194_v6 = vld [vmem:[%s4324_s9 + $0xf0] sm:$0xff] }
 0xe5c   :  { %1111 = vadd.xlane.f32.xlu1 %v1110_v45  ;;  %v1302_v45 = vsel %vm518_vm1, %v1297_v13, 0.0  ;;  %v3696_v10 = vmax.f32 %v1077_v19, 0.0  ;;  %v3698_v38 = vmax.f32 %v1078_v46, 0.0  ;;  %v1327_v12 = vmul.f32 %v2189_v55, %v3337_v28  ;;  %v2195_v28 = vld [vmem:[%s4324_s9 + $0xf8] sm:$0xff] }
 0xe5d   :  { %v1328_v29 = vmul.f32 %v2190_v16, %v3339_v30  ;;  %v915_v40 = vmul.f32 %v3570_v23, %v3267_v27  ;;  %v3704_v1 = vmax.f32 %v914_v34, 0.0  ;;  %v1220_v14 = vadd.f32 %v1219_v26, %v1218_v35 }
 0xe5e   :  { %v1270_v13 = vmul.f32 %v2182_v62, %v3157_v49  ;;  %v1079_v30 = vmul.f32 %v3646_v43, %v3457_v53  ;;  %v1247_v27 = vsel %vm518_vm1, %v1240_v42, 0.0  ;;  %v1275_v23 = vsel %vm518_vm1, %v1269_v54, 0.0  ;;  %v2187_v49 = vld [vmem:[%s4324_s9 + $0xb8] sm:$0xff]  ;;  %v2204_v54 = vld [vmem:[%s4324_s9 + $0x140] sm:$0xff] }
 0xe5f   :  { %v1299_v19 = vmul.f32 %v2186_v7, %v3683_v21  ;;  %v1248_v46 = vadd.f32 %v1247_v27, %v1246_v41  ;;  %v1249_v24 = vsel %vm526_vm2, %v1241_v51, 0.0  ;;  %v1276_v39 = vadd.f32 %v1275_v23, %v1274_v20  ;;  %v2191_v53 = vld [vmem:[%s4324_s9 + $0xd8] sm:$0xff] }
 0xe60   :  { %1191 = vadd.xlane.f32.xlu1 %v3551_v60  ;;  %v2183_v60 = vld [vmem:[%s4324_s9 + $0x98] sm:$0x1f]  ;;  %v1304_v34 = vadd.f32 %v1303_v36, %v1302_v45  ;;  %v1332_v35 = vsel %vm518_vm1, %v1327_v12, 0.0  ;;  %v1333_v26 = vsel %vm518_vm1, %v1328_v29, 0.0  ;;  %v1357_v42 = vmul.f32 %v2194_v6, %v3696_v10  ;;  %v2205_v29 = vld [vmem:[%s4324_s9 + $0x148] sm:$0xff]  ;;  %v2192_v45 = vld [vmem:[%s4324_s9 + $0xe0] sm:$0xff] }
 0xe61   :  { %v1358_v55 = vmul.f32 %v2195_v28, %v3698_v38  ;;  %v3733_v16 = vmax.f32 %v915_v40, 0.0  ;;  %v1271_v15 = vmul.f32 %v2183_v60, %v3162_v57  ;;  %v1277_v51 = vsel %vm518_vm1, %v1270_v13, 0.0  ;;  %v2188_v57 = vld [vmem:[%s4324_s9 + $0xc0] sm:$0x1f] }
 0xe62   :  { %v1300_v62 = vmul.f32 %v2187_v49, %v3704_v1  ;;  %v1080_v41 = vmul.f32 %v3646_v43, %v3461_v4  ;;  %v3746_v20 = vmax.f32 %v1079_v30, 0.0  ;;  %v1305_v7 = vsel %vm518_vm1, %v1299_v19, 0.0  ;;  %v2196_v4 = vld [vmem:[%s4324_s9 + $0x100] sm:$0xff]  ;;  %v2214_v19 = vld [vmem:[%s4324_s9 + $0x190] sm:$0xff] }
 0xe63   :  { %v1329_v36 = vmul.f32 %v2191_v53, %v3341_v33  ;;  %v1250_v12 = vadd.f32 %v1249_v24, %v1248_v46  ;;  %v1278_v40 = vadd.f32 %v1277_v51, %v1276_v39  ;;  %v1334_v13 = vadd.f32 %v1333_v26, %v1332_v35  ;;  %v2215_v46 = vld [vmem:[%s4324_s9 + $0x198] sm:$0xff]  ;;  %v2206_v35 = vld [vmem:[%s4324_s9 + $0x150] sm:$0xff] }
 0xe64   :  { %1221 = vadd.xlane.f32.xlu1 %v1220_v14  ;;  %v1306_v14 = vadd.f32 %v1305_v7, %v1304_v34  ;;  %v1362_v6 = vsel %vm518_vm1, %v1357_v42, 0.0  ;;  %v1363_v28 = vsel %vm518_vm1, %v1358_v55, 0.0  ;;  %v1426_v30 = vmul.f32 %v2204_v54, %v3485_v31  ;;  %v2193_v34 = vld [vmem:[%s4324_s9 + $0xe8] sm:$0x1f]  ;;  %v2224_v7 = vld [vmem:[%s4324_s9 + $0x1e0] sm:$0xff] }
 0xe65   :  { %v1427_v27 = vmul.f32 %v2205_v29, %v3487_v47  ;;  %v1279_v60 = vsel %vm526_vm2, %v1271_v15, 0.0  ;;  %v1301_v33 = vmul.f32 %v2188_v57, %v3733_v16  ;;  %v1307_v23 = vsel %vm518_vm1, %v1300_v62, 0.0 }
 0xe66   :  { %v1330_v49 = vmul.f32 %v2192_v45, %v3359_v37  ;;  %v1081_v24 = vmul.f32 %v3646_v43, %v3469_v9  ;;  %v3775_v39 = vmax.f32 %v1080_v41, 0.0  ;;  %v1335_v53 = vsel %vm518_vm1, %v1329_v36, 0.0  ;;  %v2197_v9 = vld [vmem:[%s4324_s9 + $0x108] sm:$0xff] }
 0xe67   :  { %v1359_v37 = vmul.f32 %v2196_v4, %v3746_v20  ;;  %v1280_v26 = vadd.f32 %v1279_v60, %v1278_v40  ;;  %v1308_v42 = vadd.f32 %v1307_v23, %v1306_v14  ;;  %v1336_v55 = vadd.f32 %v1335_v53, %v1334_v13  ;;  %v2225_v45 = vld [vmem:[%s4324_s9 + $0x1e8] sm:$0xff] }
 0xe68   :  { %1251 = vadd.xlane.f32.xlu1 %v1250_v12  ;;  %v1364_v43 = vadd.f32 %v1363_v28, %v1362_v6  ;;  %v1431_v15 = vsel %vm518_vm1, %v1426_v30, 0.0  ;;  %v1432_v51 = vsel %vm518_vm1, %v1427_v27, 0.0  ;;  %v1486_v62 = vmul.f32 %v2214_v19, %v3560_v61  ;;  %v2198_v6 = vld [vmem:[%s4324_s9 + $0x110] sm:$0x1f]  ;;  %v2216_v27 = vld [vmem:[%s4324_s9 + $0x1a0] sm:$0xff] }
 0xe69   :  { %v1487_v54 = vmul.f32 %v2215_v46, %v3562_v11  ;;  %v1309_v29 = vsel %vm526_vm2, %v1301_v33, 0.0  ;;  %v1331_v41 = vmul.f32 %v2193_v34, %v3364_v44  ;;  %v1428_v57 = vmul.f32 %v2206_v35, %v3499_v32  ;;  %v2207_v44 = vld [vmem:[%s4324_s9 + $0x158] sm:$0xff] }
 0xe6a   :  { %v3801_v36 = vmax.f32 %v1081_v24, 0.0  ;;  %v1337_v12 = vsel %vm518_vm1, %v1330_v49, 0.0  ;;  %v1360_v40 = vmul.f32 %v2197_v9, %v3775_v39  ;;  %v1365_v14 = vsel %vm518_vm1, %v1359_v37, 0.0  ;;  %v2234_v24 = vld [vmem:[%s4324_s9 + $0x230] sm:$0xff]  ;;  %v2235_v34 = vld [vmem:[%s4324_s9 + $0x238] sm:$0xff] }
 0xe6b   :  { %v1310_v13 = vadd.f32 %v1309_v29, %v1308_v42  ;;  %v1338_v4 = vadd.f32 %v1337_v12, %v1336_v55  ;;  %v1366_v28 = vadd.f32 %v1365_v14, %v1364_v43  ;;  %v1433_v30 = vadd.f32 %v1432_v51, %v1431_v15  ;;  %v2217_v15 = vld [vmem:[%s4324_s9 + $0x1a8] sm:$0xff]  ;;  %v2244_v12 = vld [vmem:[%s4324_s9 + $0x280] sm:$0xff] }
 0xe6c   :  { %1281 = vadd.xlane.f32.xlu1 %v1280_v26  ;;  %v1491_v60 = vsel %vm518_vm1, %v1486_v62, 0.0  ;;  %v1492_v33 = vsel %vm518_vm1, %v1487_v54, 0.0  ;;  %v1546_v23 = vmul.f32 %v2224_v7, %v3623_v59  ;;  %v1547_v49 = vmul.f32 %v2225_v45, %v3625_v0  ;;  %v2208_v26 = vld [vmem:[%s4324_s9 + $0x160] sm:$0x1f]  ;;  %v2226_v62 = vld [vmem:[%s4324_s9 + $0x1f0] sm:$0xff] }
 0xe6d   :  { %v1429_v19 = vmul.f32 %v2207_v44, %v3507_v2  ;;  %v1434_v46 = vsel %vm518_vm1, %v1428_v57, 0.0  ;;  %v1339_v53 = vsel %vm526_vm2, %v1331_v41, 0.0  ;;  %v1361_v37 = vmul.f32 %v2198_v6, %v3801_v36  ;;  %v2218_v44 = vld [vmem:[%s4324_s9 + $0x1b0] sm:$0x1f] }
 0xe6e   :  { %v1367_v35 = vsel %vm518_vm1, %v1360_v40, 0.0  ;;  %v1488_v42 = vmul.f32 %v2216_v27, %v3617_v63  ;;  %v1340_v55 = vadd.f32 %v1339_v53, %v1338_v4  ;;  %v1435_v43 = vadd.f32 %v1434_v46, %v1433_v30  ;;  %v2245_v40 = vld [vmem:[%s4324_s9 + $0x288] sm:$0xff] }
 0xe6f   :  { %v1368_v9 = vadd.f32 %v1367_v35, %v1366_v28  ;;  %v1493_v51 = vadd.f32 %v1492_v33, %v1491_v60  ;;  %v1551_v54 = vsel %vm518_vm1, %v1546_v23, 0.0  ;;  %v1552_v29 = vsel %vm518_vm1, %v1547_v49, 0.0  ;;  %v2227_v60 = vld [vmem:[%s4324_s9 + $0x1f8] sm:$0xff]  ;;  %v2236_v23 = vld [vmem:[%s4324_s9 + $0x240] sm:$0xff] }
 0xe70   :  { %1311 = vadd.xlane.f32.xlu1 %v1310_v13  ;;  %v1606_v41 = vmul.f32 %v2234_v24, %v3696_v10  ;;  %v1607_v57 = vmul.f32 %v2235_v34, %v3698_v38  ;;  %v1430_v7 = vmul.f32 %v2208_v26, %v3513_v17  ;;  %v1436_v45 = vsel %vm518_vm1, %v1429_v19, 0.0  ;;  %v2255_v35 = vld [vmem:[%s4324_s9 + $0x2d8] sm:$0xff] }
 0xe71   :  { %v1369_v14 = vsel %vm526_vm2, %v1361_v37, 0.0  ;;  %v1489_v13 = vmul.f32 %v2217_v15, %v3643_v3  ;;  %v1494_v4 = vsel %vm518_vm1, %v1488_v42, 0.0  ;;  %v1548_v6 = vmul.f32 %v2226_v62, %v3683_v21  ;;  %v2254_v37 = vld [vmem:[%s4324_s9 + $0x2d0] sm:$0xff]  ;;  %v2228_v62 = vld [vmem:[%s4324_s9 + $0x200] sm:$0x1f] }
 0xe72   :  { %v1370_v28 = vadd.f32 %v1369_v14, %v1368_v9  ;;  %v1437_v30 = vadd.f32 %v1436_v45, %v1435_v43  ;;  %v1495_v27 = vadd.f32 %v1494_v4, %v1493_v51  ;;  %v1553_v33 = vadd.f32 %v1552_v29, %v1551_v54  ;;  %v2246_v43 = vld [vmem:[%s4324_s9 + $0x290] sm:$0xff]  ;;  %v2237_v29 = vld [vmem:[%s4324_s9 + $0x248] sm:$0xff] }
 0xe73   :  { %v1611_v49 = vsel %vm518_vm1, %v1606_v41, 0.0  ;;  %v1612_v19 = vsel %vm518_vm1, %v1607_v57, 0.0  ;;  %v1675_v46 = vmul.f32 %v2244_v12, %v3485_v31  ;;  %v1676_v24 = vmul.f32 %v2245_v40, %v3487_v47 }
 0xe74   :  { %1341 = vadd.xlane.f32.xlu1 %v1340_v55  ;;  %v1438_v34 = vsel %vm526_vm2, %v1430_v7, 0.0  ;;  %v1490_v53 = vmul.f32 %v2218_v44, %v3648_v8  ;;  %v1496_v26 = vsel %vm518_vm1, %v1489_v13, 0.0  ;;  %v1549_v42 = vmul.f32 %v2227_v60, %v3704_v1  ;;  %v2264_v44 = vld [vmem:[%s4324_s9 + $0x320] sm:$0xff]  ;;  %v2265_v13 = vld [vmem:[%s4324_s9 + $0x328] sm:$0xff] }
 0xe75   :  { %v1554_v55 = vsel %vm518_vm1, %v1548_v6, 0.0  ;;  %v1608_v9 = vmul.f32 %v2236_v23, %v3746_v20  ;;  %v1439_v15 = vadd.f32 %v1438_v34, %v1437_v30  ;;  %v1497_v51 = vadd.f32 %v1496_v26, %v1495_v27  ;;  %v2247_v27 = vld [vmem:[%s4324_s9 + $0x298] sm:$0xff]  ;;  %v2238_v23 = vld [vmem:[%s4324_s9 + $0x250] sm:$0x1f] }
 0xe76   :  { %v1555_v54 = vadd.f32 %v1554_v55, %v1553_v33  ;;  %v1613_v41 = vadd.f32 %v1612_v19, %v1611_v49  ;;  %v1680_v57 = vsel %vm518_vm1, %v1675_v46, 0.0  ;;  %v1681_v7 = vsel %vm518_vm1, %v1676_v24, 0.0  ;;  %v2256_v46 = vld [vmem:[%s4324_s9 + $0x2e0] sm:$0xff]  ;;  %v2275_v55 = vld [vmem:[%s4324_s9 + $0x378] sm:$0xff] }
 0xe77   :  { %v1735_v45 = vmul.f32 %v2254_v37, %v3560_v61  ;;  %v1736_v12 = vmul.f32 %v2255_v35, %v3562_v11  ;;  %v1498_v40 = vsel %vm526_vm2, %v1490_v53, 0.0  ;;  %v1677_v14 = vmul.f32 %v2246_v43, %v3499_v32 }
 0xe78   :  { %1371 = vadd.xlane.f32.xlu1 %v1370_v28  ;;  %v1550_v4 = vmul.f32 %v2228_v62, %v3733_v16  ;;  %v1556_v6 = vsel %vm518_vm1, %v1549_v42, 0.0  ;;  %v1609_v28 = vmul.f32 %v2237_v29, %v3775_v39  ;;  %v1614_v30 = vsel %vm518_vm1, %v1608_v9, 0.0  ;;  %v2274_v42 = vld [vmem:[%s4324_s9 + $0x370] sm:$0xff] }
 0xe79   :  { %v1499_v60 = vadd.f32 %v1498_v40, %v1497_v51  ;;  %v1557_v33 = vadd.f32 %v1556_v6, %v1555_v54  ;;  %v1615_v49 = vadd.f32 %v1614_v30, %v1613_v41  ;;  %v1682_v19 = vadd.f32 %v1681_v7, %v1680_v57  ;;  %v2248_v51 = vld [vmem:[%s4324_s9 + $0x2a0] sm:$0x1f]  ;;  %v2257_v57 = vld [vmem:[%s4324_s9 + $0x2e8] sm:$0xff] }
 0xe7a   :  { %v1740_v24 = vsel %vm518_vm1, %v1735_v45, 0.0  ;;  %v1741_v34 = vsel %vm518_vm1, %v1736_v12, 0.0  ;;  %v1795_v53 = vmul.f32 %v2264_v44, %v3623_v59  ;;  %v1796_v37 = vmul.f32 %v2265_v13, %v3625_v0  ;;  %v2266_v45 = vld [vmem:[%s4324_s9 + $0x330] sm:$0xff]  ;;  %v2284_v6 = vld [vmem:[%s4324_s9 + $0x3c0] sm:$0xff] }
 0xe7b   :  { %v1678_v35 = vmul.f32 %v2247_v27, %v3507_v2  ;;  %v1683_v26 = vsel %vm518_vm1, %v1677_v14, 0.0  ;;  %v1558_v9 = vsel %vm526_vm2, %v1550_v4, 0.0  ;;  %v1610_v43 = vmul.f32 %v2238_v23, %v3801_v36  ;;  %v2258_v27 = vld [vmem:[%s4324_s9 + $0x2f0] sm:$0x1f] }
 0xe7c   :  { %1440 = vadd.xlane.f32.xlu1 %v1439_v15  ;;  %v1616_v15 = vsel %vm518_vm1, %v1609_v28, 0.0  ;;  %v1737_v62 = vmul.f32 %v2256_v46, %v3617_v63  ;;  %v1559_v54 = vadd.f32 %v1558_v9, %v1557_v33  ;;  %v1684_v41 = vadd.f32 %v1683_v26, %v1682_v19  ;;  %v2285_v28 = vld [vmem:[%s4324_s9 + $0x3c8] sm:$0xff] }
 0xe7d   :  { %v1617_v29 = vadd.f32 %v1616_v15, %v1615_v49  ;;  %v1742_v7 = vadd.f32 %v1741_v34, %v1740_v24  ;;  %v1800_v12 = vsel %vm518_vm1, %v1795_v53, 0.0  ;;  %v1801_v40 = vsel %vm518_vm1, %v1796_v37, 0.0  ;;  %v2267_v24 = vld [vmem:[%s4324_s9 + $0x338] sm:$0xff]  ;;  %v2276_v53 = vld [vmem:[%s4324_s9 + $0x380] sm:$0xff] }
 0xe7e   :  { %v1855_v14 = vmul.f32 %v2274_v42, %v3696_v10  ;;  %v1856_v44 = vmul.f32 %v2275_v55, %v3698_v38  ;;  %v1679_v13 = vmul.f32 %v2248_v51, %v3513_v17  ;;  %v1685_v4 = vsel %vm518_vm1, %v1678_v35, 0.0  ;;  %v2295_v15 = vld [vmem:[%s4324_s9 + $0x418] sm:$0xff] }
 0xe7f   :  { %v1618_v30 = vsel %vm526_vm2, %v1610_v43, 0.0  ;;  %v1743_v33 = vsel %vm518_vm1, %v1737_v62, 0.0  ;;  %v1797_v23 = vmul.f32 %v2266_v45, %v3683_v21  ;;  %v1686_v19 = vadd.f32 %v1685_v4, %v1684_v41  ;;  %v2294_v43 = vld [vmem:[%s4324_s9 + $0x410] sm:$0xff]  ;;  %v2277_v45 = vld [vmem:[%s4324_s9 + $0x388] sm:$0xff] }
 0xe80   :  { %1500 = vadd.xlane.f32.xlu1 %v1499_v60  ;;  %v1738_v60 = vmul.f32 %v2257_v57, %v3643_v3  ;;  %v1619_v49 = vadd.f32 %v1618_v30, %v1617_v29  ;;  %v1744_v46 = vadd.f32 %v1743_v33, %v1742_v7  ;;  %v1802_v34 = vadd.f32 %v1801_v40, %v1800_v12  ;;  %v2268_v57 = vld [vmem:[%s4324_s9 + $0x340] sm:$0x1f]  ;;  %v2305_v30 = vld [vmem:[%s4324_s9 + $0x468] sm:$0xff] }
 0xe81   :  { %v1860_v37 = vsel %vm518_vm1, %v1855_v14, 0.0  ;;  %v1861_v35 = vsel %vm518_vm1, %v1856_v44, 0.0  ;;  %v1924_v26 = vmul.f32 %v2284_v6, %v3485_v31  ;;  %v1925_v42 = vmul.f32 %v2285_v28, %v3487_v47  ;;  %v2304_v28 = vld [vmem:[%s4324_s9 + $0x460] sm:$0xff] }
 0xe82   :  { %v1687_v55 = vsel %vm526_vm2, %v1679_v13, 0.0  ;;  %v1739_v9 = vmul.f32 %v2258_v27, %v3648_v8  ;;  %v1745_v51 = vsel %vm518_vm1, %v1738_v60, 0.0  ;;  %v1798_v62 = vmul.f32 %v2267_v24, %v3704_v1  ;;  %v2296_v24 = vld [vmem:[%s4324_s9 + $0x420] sm:$0xff] }
 0xe83   :  { %v1803_v31 = vsel %vm518_vm1, %v1797_v23, 0.0  ;;  %v1857_v47 = vmul.f32 %v2276_v53, %v3746_v20  ;;  %v1688_v29 = vadd.f32 %v1687_v55, %v1686_v19  ;;  %v1746_v41 = vadd.f32 %v1745_v51, %v1744_v46  ;;  %v2314_v55 = vld [vmem:[%s4324_s9 + $0x4b0] sm:$0xff] }
 0xe84   :  { %1560 = vadd.xlane.f32.xlu1 %v1559_v54  ;;  %v2286_v54 = vld [vmem:[%s4324_s9 + $0x3d0] sm:$0xff]  ;;  %v1804_v7 = vadd.f32 %v1803_v31, %v1802_v34  ;;  %v1862_v12 = vadd.f32 %v1861_v35, %v1860_v37  ;;  %v1929_v40 = vsel %vm518_vm1, %v1924_v26, 0.0  ;;  %v1930_v14 = vsel %vm518_vm1, %v1925_v42, 0.0 }
 0xe85   :  { %v1984_v44 = vmul.f32 %v2294_v43, %v3560_v61  ;;  %v1985_v13 = vmul.f32 %v2295_v15, %v3562_v11  ;;  %v1747_v4 = vsel %vm526_vm2, %v1739_v9, 0.0  ;;  %v1926_v6 = vmul.f32 %v2286_v54, %v3499_v32  ;;  %v2287_v32 = vld [vmem:[%s4324_s9 + $0x3d8] sm:$0xff] }
 0xe86   :  { %v1799_v27 = vmul.f32 %v2268_v57, %v3733_v16  ;;  %v1805_v60 = vsel %vm518_vm1, %v1798_v62, 0.0  ;;  %v1858_v61 = vmul.f32 %v2277_v45, %v3775_v39  ;;  %v1863_v11 = vsel %vm518_vm1, %v1857_v47, 0.0  ;;  %v2315_v9 = vld [vmem:[%s4324_s9 + $0x4b8] sm:$0xff]  ;;  %v2297_v47 = vld [vmem:[%s4324_s9 + $0x428] sm:$0xff] }
 0xe87   :  { %v1748_v33 = vadd.f32 %v1747_v4, %v1746_v41  ;;  %v1806_v23 = vadd.f32 %v1805_v60, %v1804_v7  ;;  %v1864_v19 = vadd.f32 %v1863_v11, %v1862_v12  ;;  %v1931_v46 = vadd.f32 %v1930_v14, %v1929_v40  ;;  %v2298_v14 = vld [vmem:[%s4324_s9 + $0x430] sm:$0x1f] }
 0xe88   :  { %1620 = vadd.xlane.f32.xlu1 %v1619_v49  ;;  %v2278_v49 = vld [vmem:[%s4324_s9 + $0x390] sm:$0x1f]  ;;  %v1989_v34 = vsel %vm518_vm1, %v1984_v44, 0.0  ;;  %v1990_v53 = vsel %vm518_vm1, %v1985_v13, 0.0  ;;  %v2044_v37 = vmul.f32 %v2304_v28, %v3623_v59  ;;  %v2045_v35 = vmul.f32 %v2305_v30, %v3625_v0  ;;  %v2316_v30 = vld [vmem:[%s4324_s9 + $0x4c0] sm:$0xff] }
 0xe89   :  { %v1927_v26 = vmul.f32 %v2287_v32, %v3507_v2  ;;  %v1932_v42 = vsel %vm518_vm1, %v1926_v6, 0.0  ;;  %v1807_v43 = vsel %vm526_vm2, %v1799_v27, 0.0  ;;  %v1859_v15 = vmul.f32 %v2278_v49, %v3801_v36  ;;  %v2288_v2 = vld [vmem:[%s4324_s9 + $0x3e0] sm:$0x1f] }
 0xe8a   :  { %v1865_v59 = vsel %vm518_vm1, %v1858_v61, 0.0  ;;  %v1986_v0 = vmul.f32 %v2296_v24, %v3617_v63  ;;  %v1808_v51 = vadd.f32 %v1807_v43, %v1806_v23  ;;  %v1933_v31 = vadd.f32 %v1932_v42, %v1931_v46  ;;  %v2317_v24 = vld [vmem:[%s4324_s9 + $0x4c8] sm:$0xff]  ;;  %v2318_v42 = vld [vmem:[%s4324_s9 + $0x4d0] sm:$0x1f] }
 0xe8b   :  { %v1866_v62 = vadd.f32 %v1865_v59, %v1864_v19  ;;  %v1991_v54 = vadd.f32 %v1990_v53, %v1989_v34  ;;  %v2049_v41 = vsel %vm518_vm1, %v2044_v37, 0.0  ;;  %v2050_v57 = vsel %vm518_vm1, %v2045_v35, 0.0  ;;  %v2308_v19 = vld [vmem:[%s4324_s9 + $0x480] sm:$0x1f] }
 0xe8c   :  { %1689 = vadd.xlane.f32.xlu1 %v1688_v29  ;;  %v2306_v29 = vld [vmem:[%s4324_s9 + $0x470] sm:$0xff]  ;;  %v2104_v7 = vmul.f32 %v2314_v55, %v3696_v10  ;;  %v2105_v63 = vmul.f32 %v2315_v9, %v3698_v38  ;;  %v1928_v45 = vmul.f32 %v2288_v2, %v3513_v17  ;;  %v1934_v12 = vsel %vm518_vm1, %v1927_v26, 0.0  ;;  %v2307_v17 = vld [vmem:[%s4324_s9 + $0x478] sm:$0xff] }
 0xe8d   :  { %v1867_v40 = vsel %vm526_vm2, %v1859_v15, 0.0  ;;  %v1987_v44 = vmul.f32 %v2297_v47, %v3643_v3  ;;  %v1992_v13 = vsel %vm518_vm1, %v1986_v0, 0.0  ;;  %v2046_v4 = vmul.f32 %v2306_v29, %v3683_v21 }
 0xe8e   :  { %v1868_v10 = vadd.f32 %v1867_v40, %v1866_v62  ;;  %v1935_v6 = vadd.f32 %v1934_v12, %v1933_v31  ;;  %v1993_v38 = vadd.f32 %v1992_v13, %v1991_v54  ;;  %v2051_v28 = vadd.f32 %v2050_v57, %v2049_v41 }
 0xe8f   :  { %v2109_v27 = vsel %vm518_vm1, %v2104_v7, 0.0  ;;  %v2110_v3 = vsel %vm518_vm1, %v2105_v63, 0.0  ;;  %v1936_v60 = vsel %vm526_vm2, %v1928_v45, 0.0  ;;  %v1988_v21 = vmul.f32 %v2298_v14, %v3648_v8 }
 0xe90   :  { %1749 = vadd.xlane.f32.xlu1 %v1748_v33  ;;  %v1994_v61 = vsel %vm518_vm1, %v1987_v44, 0.0  ;;  %v2047_v11 = vmul.f32 %v2307_v17, %v3704_v1  ;;  %v2052_v32 = vsel %vm518_vm1, %v2046_v4, 0.0  ;;  %v2106_v33 = vmul.f32 %v2316_v30, %v3746_v20 }
 0xe91   :  { %v1937_v23 = vadd.f32 %v1936_v60, %v1935_v6  ;;  %v1995_v49 = vadd.f32 %v1994_v61, %v1993_v38  ;;  %v2053_v46 = vadd.f32 %v2052_v32, %v2051_v28  ;;  %v2111_v8 = vadd.f32 %v2110_v3, %v2109_v27  ;;  %v4357_v60 = vld [vmem:[#allocation3_spill] sm:$0xff]  ;;  %v4359_v61 = vld [vmem:[#allocation2_spill] sm:$0xff] }
 0xe92   :  { %v1996_v34 = vsel %vm526_vm2, %v1988_v21, 0.0  ;;  %v2048_v1 = vmul.f32 %v2308_v19, %v3733_v16  ;;  %v2054_v53 = vsel %vm518_vm1, %v2047_v11, 0.0  ;;  %v2107_v20 = vmul.f32 %v2317_v24, %v3775_v39  ;;  %v4358_v21 = vld [vmem:[#allocation5_spill] sm:$0xff]  ;;  %v4360_v11 = vld [vmem:[#allocation4_spill] sm:$0xff]  ;;  %v4361_v32 = vld [vmem:[#allocation6_spill] sm:$0xff] }
 0xe93   :  { %v2112_v37 = vsel %vm518_vm1, %v2106_v33, 0.0  ;;  %v1997_v35 = vadd.f32 %v1996_v34, %v1995_v49  ;;  %v2055_v26 = vadd.f32 %v2054_v53, %v2053_v46  ;;  %v2108_v43 = vmul.f32 %v2318_v42, %v3801_v36  ;;  %v1912_v53 = vld [vmem:[%s4330_s10] sm:$0x1] }
 0xe94   :  { %1809 = vadd.xlane.f32.xlu1 %v1808_v51  ;;  %v2113_v55 = vadd.f32 %v2112_v37, %v2111_v8  ;;  %v2056_v9 = vsel %vm526_vm2, %v2048_v1, 0.0  ;;  %v2114_v16 = vsel %vm518_vm1, %v2107_v20, 0.0  ;;  %v4352_v41 = vmax.f32 %v3572_v58, 0.0 }
 0xe95   :  { %v2057_v15 = vadd.f32 %v2056_v9, %v2055_v26  ;;  %v2116_v39 = vsel %vm526_vm2, %v2108_v43, 0.0  ;;  %v4353_v7 = vmax.f32 %v3574_v52, 0.0  ;;  %v4354_v45 = vmax.f32 %v3576_v22, 0.0 }
 0xe96   :  { %v2115_v59 = vadd.f32 %v2114_v16, %v2113_v55  ;;  %v4355_v40 = vmax.f32 %v3582_v50, 0.0  ;;  %v4356_v13 = vmax.f32 %v3592_v25, 0.0 }
 0xe98   :  { %1869 = vadd.xlane.f32.xlu1 %v1868_v10  ;;  %v2117_v2 = vadd.f32 %v2116_v39, %v2115_v59 }
 0xe9c   :  { %1938 = vadd.xlane.f32.xlu1 %v1937_v23 }
 0xea0   :  { %1998 = vadd.xlane.f32.xlu1 %v1997_v35 }
 0xea4   :  { %2058 = vadd.xlane.f32.xlu1 %v2057_v15 }
 0xea8   :  { %2118 = vadd.xlane.f32.xlu1 %v2117_v2 }
 0xee9   :  { %v1112_v0 = vpop.xlane.xlu1 %1111 }
 0xeea   :  { %v1113_v51 = vrot.slane %v1112_v0, 4 }
 0xeec   :  { %v1114_v62 = vadd.f32 %v1113_v51, %v1112_v0 }
 0xeee   :  { %v1115_v31 = vrot.slane %v1114_v62, 2 }
 0xef0   :  { %v1116_v47 = vadd.f32 %v1115_v31, %v1114_v62 }
 0xef2   :  { %v1117_v54 = vrot.slane %v1116_v47, 1 }
 0xef4   :  { %v1118_v29 = vadd.f32 %v1117_v54, %v1116_v47 }
 0xef6   :  { %2382 = vpush %v1118_v29 }
 0xf27   :  { %s2383_s14 = spop %2382 }
 0xf28   :  { %s1122_s2 = smul.f32 0.0007304602, %s2383_s14 }
 0xf2a   :  { %v1123_v36 = vstv %s1122_s2 }
 0xf2b   :  { %v4087_v57 = vsub.f32 %v4352_v41, %v1123_v36  ;;  %v4091_v63 = vsub.f32 %v4353_v7, %v1123_v36  ;;  %v4095_v12 = vsub.f32 %v4354_v45, %v1123_v36  ;;  %v4099_v14 = vsub.f32 %v4355_v40, %v1123_v36 }
 0xf2c   :  { %v4107_v4 = vsub.f32 %v4356_v13, %v1123_v36 }
 0xf2d   :  { %v1129_v44 = vmul.f32 %v4087_v57, %v4087_v57  ;;  %v1130_v58 = vmul.f32 %v4091_v63, %v4091_v63  ;;  %v1131_v52 = vmul.f32 %v4095_v12, %v4095_v12  ;;  %v1132_v22 = vmul.f32 %v4099_v14, %v4099_v14 }
 0xf2e   :  { %v1133_v38 = vmul.f32 %v4107_v4, %v4107_v4 }
 0xf2f   :  { %v1134_v50 = vsel %vm518_vm1, %v1129_v44, 0.0  ;;  %v1135_v10 = vsel %vm518_vm1, %v1130_v58, 0.0  ;;  %v1137_v17 = vsel %vm518_vm1, %v1131_v52, 0.0  ;;  %v1139_v25 = vsel %vm518_vm1, %v1132_v22, 0.0 }
 0xf30   :  { %v1136_v6 = vadd.f32 %v1135_v10, %v1134_v50  ;;  %v1141_v27 = vsel %vm526_vm2, %v1133_v38, 0.0 }
 0xf32   :  { %v1138_v28 = vadd.f32 %v1137_v17, %v1136_v6  ;;  %v1170_v6 = vld [vmem:[%s4330_s10] sm:$0x1] }
 0xf34   :  { %v1140_v30 = vadd.f32 %v1139_v25, %v1138_v28 }
 0xf36   :  { %v1142_v3 = vadd.f32 %v1141_v27, %v1140_v30 }
 0xf38   :  { %1143 = vadd.xlane.f32.xlu0 %v1142_v3 }
 0xf3c   :  { %1470 = vadd.xlane.f32.xlu0 %v3022_v48 }
 0xf40   :  { %1530 = vadd.xlane.f32.xlu0 %v3229_v18 }
 0xf44   :  { %1590 = vadd.xlane.f32.xlu0 %v3431_v56  ;;  %v1192_v56 = vpop.xlane.xlu1 %1191 }
 0xf45   :  { %v1193_v37 = vrot.slane %v1192_v56, 4 }
 0xf47   :  { %v1194_v9 = vadd.f32 %v1193_v37, %v1192_v56  ;;  %v2199_v56 = vld [vmem:[%s4324_s9 + $0x118] sm:$0xff] }
 0xf48   :  { %1719 = vadd.xlane.f32.xlu0 %v3030_v5  ;;  %v1414_v5 = vld [vmem:[%s4330_s10] sm:$0x1]  ;;  %v1222_v24 = vpop.xlane.xlu1 %1221  ;;  %v2203_v37 = vld [vmem:[%s4324_s9 + $0x138] sm:$0x1f] }
 0xf49   :  { %1416 = vrot.lane.b32.xlu1 %v1414_v5, %s2486_s21  ;;  %v1223_v35 = vrot.slane %v1222_v24, 4  ;;  %v1195_v0 = vrot.slane %v1194_v9, 2 }
 0xf4b   :  { %v1224_v16 = vadd.f32 %v1223_v35, %v1222_v24  ;;  %v1196_v7 = vadd.f32 %v1195_v0, %v1194_v9  ;;  %v2200_v24 = vld [vmem:[%s4324_s9 + $0x120] sm:$0xff]  ;;  %v2242_v9 = vld [vmem:[%s4324_s9 + $0x270] sm:$0xff] }
 0xf4c   :  { %1779 = vadd.xlane.f32.xlu0 %v4357_v60  ;;  %v1252_v8 = vpop.xlane.xlu1 %1251 }
 0xf4d   :  { %1914 = vrot.lane.b32.xlu1 %v1912_v53, %s2488_s20  ;;  %v1253_v26 = vrot.slane %v1252_v8, 4  ;;  %v1225_v31 = vrot.slane %v1224_v16, 2  ;;  %v1197_v52 = vrot.slane %v1196_v7, 1 }
 0xf4f   :  { %v1254_v59 = vadd.f32 %v1253_v26, %v1252_v8  ;;  %v1226_v40 = vadd.f32 %v1225_v31, %v1224_v16  ;;  %v1198_v30 = vadd.f32 %v1197_v52, %v1196_v7  ;;  %v2243_v31 = vld [vmem:[%s4324_s9 + $0x278] sm:$0x1f] }
 0xf50   :  { %1839 = vadd.xlane.f32.xlu0 %v4358_v21  ;;  %v1282_v34 = vpop.xlane.xlu1 %1281 }
 0xf51   :  { %v1283_v42 = vrot.slane %v1282_v34, 4  ;;  %v1255_v54 = vrot.slane %v1254_v59, 2  ;;  %v1227_v50 = vrot.slane %v1226_v40, 1 }
 0xf53   :  { %v1284_v2 = vadd.f32 %v1283_v42, %v1282_v34  ;;  %v1256_v58 = vadd.f32 %v1255_v54, %v1254_v59  ;;  %v1228_v3 = vadd.f32 %v1227_v50, %v1226_v40  ;;  %v2281_v54 = vld [vmem:[%s4324_s9 + $0x3a8] sm:$0xff] }
 0xf54   :  { %1968 = vadd.xlane.f32.xlu0 %v4359_v61  ;;  %v1312_v1 = vpop.xlane.xlu1 %1311 }
 0xf55   :  { %v1313_v43 = vrot.slane %v1312_v1, 4  ;;  %v1285_v36 = vrot.slane %v1284_v2, 2  ;;  %v1257_v38 = vrot.slane %v1256_v58, 1 }
 0xf57   :  { %v1314_v51 = vadd.f32 %v1313_v43, %v1312_v1  ;;  %v1286_v13 = vadd.f32 %v1285_v36, %v1284_v2  ;;  %v1258_v21 = vadd.f32 %v1257_v38, %v1256_v58  ;;  %v2240_v1 = vld [vmem:[%s4324_s9 + $0x260] sm:$0xff] }
 0xf58   :  { %2028 = vadd.xlane.f32.xlu0 %v4360_v11  ;;  %v1342_v20 = vpop.xlane.xlu1 %1341 }
 0xf59   :  { %v1343_v15 = vrot.slane %v1342_v20, 4  ;;  %v1315_v41 = vrot.slane %v1314_v51, 2  ;;  %v1287_v25 = vrot.slane %v1286_v13, 1 }
 0xf5b   :  { %v1344_v47 = vadd.f32 %v1343_v15, %v1342_v20  ;;  %v1316_v22 = vadd.f32 %v1315_v41, %v1314_v51  ;;  %v1288_v11 = vadd.f32 %v1287_v25, %v1286_v13  ;;  %v2241_v20 = vld [vmem:[%s4324_s9 + $0x268] sm:$0xff]  ;;  %v2279_v15 = vld [vmem:[%s4324_s9 + $0x398] sm:$0xff]  ;;  %v2282_v13 = vld [vmem:[%s4324_s9 + $0x3b0] sm:$0xff] }
 0xf5c   :  { %2088 = vadd.xlane.f32.xlu0 %v4361_v32  ;;  %v1372_v55 = vpop.xlane.xlu1 %1371  ;;  %v2321_v25 = vld [vmem:[%s4324_s9 + $0x4e8] sm:$0xff] }
 0xf5d   :  { %v1373_v39 = vrot.slane %v1372_v55, 4  ;;  %v1345_v45 = vrot.slane %v1344_v47, 2  ;;  %v1317_v27 = vrot.slane %v1316_v22, 1 }
 0xf5f   :  { %v1374_v29 = vadd.f32 %v1373_v39, %v1372_v55  ;;  %v1346_v10 = vadd.f32 %v1345_v45, %v1344_v47  ;;  %v1318_v32 = vadd.f32 %v1317_v27, %v1316_v22  ;;  %v2280_v47 = vld [vmem:[%s4324_s9 + $0x3a0] sm:$0xff]  ;;  %v2319_v45 = vld [vmem:[%s4324_s9 + $0x4d8] sm:$0xff] }
 0xf61   :  { %v1375_v44 = vrot.slane %v1374_v29, 2  ;;  %v1347_v60 = vrot.slane %v1346_v10, 1 }
 0xf63   :  { %v1376_v17 = vadd.f32 %v1375_v44, %v1374_v29 }
 0xf65   :  { %v1377_v61 = vrot.slane %v1376_v17, 1 }
 0xfc5   :  { %v1144_v33 = vpop.xlane.xlu0 %1143 }
 0xfc6   :  { %v1145_v23 = vrot.slane %v1144_v33, 4 }
 0xfc8   :  { %v1146_v49 = vadd.f32 %v1145_v23, %v1144_v33  ;;  %v1348_v33 = vadd.f32 %v1347_v60, %v1346_v10  ;;  %v1378_v23 = vadd.f32 %v1377_v61, %v1376_v17 }
 0xfca   :  { %v1147_v48 = vrot.slane %v1146_v49, 2 }
 0xfcc   :  { %v1148_v19 = vadd.f32 %v1147_v48, %v1146_v49 }
 0xfce   :  { %v1149_v18 = vrot.slane %v1148_v19, 1 }
 0xfd0   :  { %v1150_v46 = vadd.f32 %v1149_v18, %v1148_v19 }
 0xfd2   :  { %2384 = vpush %v1150_v46 }
0x1003   :  { %s2385_s5 = spop %2384 }
0x1004   :  { %s1154_s21 = smul.f32 0.0007304602, %s2385_s5 }
0x1006   :  { %s1155_s7 = sadd.f32 1e-05, %s1154_s21 }
0x1008   :  { %v1156_v62 = vstv %s1155_s7 }
0x1009   :  { %2483 = vrsqrt.f32 %v1156_v62 }
0x1013   :  { %v2484_v28 = vpop.eup %2483 }
0x1014   :  { %2386 = vpush %v2484_v28 }
0x1015   :  { %2388 = vpush %v1170_v6  ;;  %v2320_v6 = vld [vmem:[%s4324_s9 + $0x4e0] sm:$0xff] }
0x1016   :  { %2390 = vpush %v1198_v30 }
0x1017   :  { %2392 = vpush %v1228_v3 }
0x1018   :  { %2394 = vpush %v1258_v21 }
0x1019   :  { %2396 = vpush %v1288_v11 }
0x101a   :  { %2398 = vpush %v1318_v32  ;;  %v2283_v32 = vld [vmem:[%s4324_s9 + $0x3b8] sm:$0x1f] }
0x101b   :  { %2400 = vpush %v1348_v33 }
0x101c   :  { %2402 = vpush %v1378_v23  ;;  %v2322_v23 = vld [vmem:[%s4324_s9 + $0x4f0] sm:$0xff] }
0x1045   :  { %s2387_s27 = spop %2386 }
0x1046   :  { %v1159_v49 = vstv %s2387_s27 }
0x1047   :  { %v1160_v48 = vmul.f32 %v1159_v49, %v4087_v57  ;;  %v1161_v19 = vmul.f32 %v1159_v49, %v4091_v63  ;;  %v1162_v18 = vmul.f32 %v1159_v49, %v4095_v12  ;;  %v1163_v46 = vmul.f32 %v1159_v49, %v4099_v14  ;;  %v2201_v57 = vld [vmem:[%s4324_s9 + $0x128] sm:$0xff]  ;;  %v2202_v63 = vld [vmem:[%s4324_s9 + $0x130] sm:$0xff] }
0x1048   :  { %v1164_v5 = vmul.f32 %v1159_v49, %v4107_v4  ;;  %v2239_v4 = vld [vmem:[%s4324_s9 + $0x258] sm:$0xff] }
0x1049   :  { %v1165_v12 = vmax.f32 %v1160_v48, 0.0  ;;  %v1166_v14 = vmax.f32 %v1161_v19, 0.0  ;;  %v1167_v8 = vmax.f32 %v1162_v18, 0.0  ;;  %v1168_v34 = vmax.f32 %v1163_v46, 0.0 }
0x104a   :  { %v4163_v53 = vmax.f32 %v1164_v5, 0.0 }
0x104b   :  { %v1387_v35 = vmul.f32 %v2199_v56, %v1165_v12  ;;  %v1388_v26 = vmul.f32 %v2200_v24, %v1166_v14  ;;  %v1389_v42 = vmul.f32 %v2201_v57, %v1167_v8  ;;  %v1390_v55 = vmul.f32 %v2202_v63, %v1168_v34 }
0x104c   :  { %v1636_v43 = vmul.f32 %v2239_v4, %v1165_v12  ;;  %v1637_v16 = vmul.f32 %v2240_v1, %v1166_v14  ;;  %v1638_v2 = vmul.f32 %v2241_v20, %v1167_v8  ;;  %v1391_v0 = vmul.f32 %v2203_v37, %v4163_v53 }
0x104d   :  { %v1392_v59 = vsel %vm518_vm1, %v1387_v35, 0.0  ;;  %v1393_v39 = vsel %vm518_vm1, %v1388_v26, 0.0  ;;  %v1395_v62 = vsel %vm518_vm1, %v1389_v42, 0.0  ;;  %v1639_v29 = vmul.f32 %v2242_v9, %v1168_v34 }
0x104e   :  { %v1394_v51 = vadd.f32 %v1393_v39, %v1392_v59  ;;  %v1641_v36 = vsel %vm518_vm1, %v1636_v43, 0.0  ;;  %v1642_v41 = vsel %vm518_vm1, %v1637_v16, 0.0  ;;  %v1885_v7 = vmul.f32 %v2279_v15, %v1165_v12  ;;  %v1663_v43 = vld [vmem:[%s4330_s10] sm:$0x1]  ;;  %v1471_v59 = vpop.xlane.xlu0 %1470  ;;  %s2389_s10 = spop %2388 }
0x104f   :  { %v1397_v44 = vsel %vm518_vm1, %v1390_v55, 0.0  ;;  %v1643_v58 = vadd.f32 %v1642_v41, %v1641_v36  ;;  %v1640_v52 = vmul.f32 %v2243_v31, %v4163_v53  ;;  %v1644_v22 = vsel %vm518_vm1, %v1638_v2, 0.0 }
0x1050   :  { %v1396_v40 = vadd.f32 %v1395_v62, %v1394_v51  ;;  %v1886_v50 = vmul.f32 %v2280_v47, %v1166_v14  ;;  %v1887_v10 = vmul.f32 %v2281_v54, %v1167_v8  ;;  %v1890_v28 = vsel %vm518_vm1, %v1885_v7, 0.0 }
0x1051   :  { %v1645_v17 = vadd.f32 %v1644_v22, %v1643_v58  ;;  %v2134_v30 = vmul.f32 %v2319_v45, %v1165_v12  ;;  %v1399_v27 = vsel %vm526_vm2, %v1391_v0, 0.0  ;;  %v1646_v3 = vsel %vm518_vm1, %v1639_v29, 0.0 }
0x1052   :  { %v1398_v38 = vadd.f32 %v1397_v44, %v1396_v40  ;;  %v1888_v60 = vmul.f32 %v2282_v13, %v1168_v34  ;;  %v1891_v21 = vsel %vm518_vm1, %v1886_v50, 0.0  ;;  %v2135_v49 = vmul.f32 %v2320_v6, %v1166_v14  ;;  %v2323_v14 = vld [vmem:[%s4324_s9 + $0x4f8] sm:$0x1f]  ;;  %v1531_v2 = vpop.xlane.xlu0 %1530 }
0x1053   :  { %v1647_v11 = vadd.f32 %v1646_v3, %v1645_v17  ;;  %v1892_v33 = vadd.f32 %v1891_v21, %v1890_v28  ;;  %v1893_v48 = vsel %vm518_vm1, %v1887_v10, 0.0  ;;  %v2136_v19 = vmul.f32 %v2321_v25, %v1167_v8 }
0x1054   :  { %v1400_v61 = vadd.f32 %v1399_v27, %v1398_v38  ;;  %v2139_v18 = vsel %vm518_vm1, %v2134_v30, 0.0  ;;  %v1648_v46 = vsel %vm526_vm2, %v1640_v52, 0.0  ;;  %v2140_v5 = vsel %vm518_vm1, %v2135_v49, 0.0 }
0x1055   :  { %v1894_v56 = vadd.f32 %v1893_v48, %v1892_v33  ;;  %v1889_v24 = vmul.f32 %v2283_v32, %v4163_v53  ;;  %v1895_v57 = vsel %vm518_vm1, %v1888_v60, 0.0  ;;  %v2137_v63 = vmul.f32 %v2322_v23, %v1168_v34 }
0x1056   :  { %1401 = vadd.xlane.f32.xlu0 %v1400_v61  ;;  %v2141_v12 = vadd.f32 %v2140_v5, %v2139_v18  ;;  %v1649_v4 = vadd.f32 %v1648_v46, %v1647_v11  ;;  %v2142_v8 = vsel %vm518_vm1, %v2136_v19, 0.0  ;;  %v2138_v35 = vmul.f32 %v2323_v14, %v4163_v53  ;;  %v1441_v53 = vpop.xlane.xlu1 %1440  ;;  %v1591_v51 = vpop.xlane.xlu0 %1590 }
0x1057   :  { %v1896_v1 = vadd.f32 %v1895_v57, %v1894_v56  ;;  %v1897_v37 = vsel %vm526_vm2, %v1889_v24, 0.0  ;;  %v2144_v26 = vsel %vm518_vm1, %v2137_v63, 0.0  ;;  %v2493_v16 = vmov 0.0  }
0x1058   :  { %v2143_v20 = vadd.f32 %v2142_v8, %v2141_v12  ;;  %v2146_v34 = vsel %vm526_vm2, %v2138_v35, 0.0  ;;  %2161 = vst [vmem:[%s4331_s11 + $0x4] sm:$0x1] %v2493_v16  ;;  %2162 = vst [vmem:[%s4331_s11 + $0x5] sm:$0x1] %v2493_v16  ;;  %v1442_v41 = vrot.slane %v1441_v53, 4 }
0x1059   :  { %v1898_v42 = vadd.f32 %v1897_v37, %v1896_v1  ;;  %2163 = vst [vmem:[%s4331_s11 + $0x6] sm:$0x1] %v2493_v16  ;;  %2164 = vst [vmem:[%s4331_s11 + $0x7] sm:$0x1] %v2493_v16  ;;  %v1472_v27 = vrot.slane %v1471_v59, 4  ;;  %v1532_v11 = vrot.slane %v1531_v2, 4 }
0x105a   :  { %1650 = vadd.xlane.f32.xlu0 %v1649_v4  ;;  %v2145_v55 = vadd.f32 %v2144_v26, %v2143_v20  ;;  %v1501_v15 = vpop.xlane.xlu1 %1500  ;;  %v1720_v31 = vpop.xlane.xlu0 %1719  ;;  %v1443_v13 = vadd.f32 %v1442_v41, %v1441_v53  ;;  %v1592_v19 = vrot.slane %v1591_v51, 4 }
0x105b   :  { %v1502_v7 = vrot.slane %v1501_v15, 4  ;;  %v1473_v48 = vadd.f32 %v1472_v27, %v1471_v59  ;;  %v1533_v5 = vadd.f32 %v1532_v11, %v1531_v2  ;;  %v1721_v20 = vrot.slane %v1720_v31, 4 }
0x105c   :  { %v2147_v9 = vadd.f32 %v2146_v34, %v2145_v55  ;;  %v1444_v38 = vrot.slane %v1443_v13, 2  ;;  %v1593_v8 = vadd.f32 %v1592_v19, %v1591_v51 }
0x105d   :  { %v1503_v52 = vadd.f32 %v1502_v7, %v1501_v15  ;;  %v1474_v14 = vrot.slane %v1473_v48, 2 }
0x105e   :  { %1899 = vadd.xlane.f32.xlu0 %v1898_v42  ;;  %v1561_v39 = vpop.xlane.xlu1 %1560  ;;  %v4247_v54 = vpop.xlane.xlu0 %1779  ;;  %v1445_v60 = vadd.f32 %v1444_v38, %v1443_v13  ;;  %v1594_v2 = vrot.slane %v1593_v8, 2 }
0x105f   :  { %v1562_v40 = vrot.slane %v1561_v39, 4  ;;  %v1504_v17 = vrot.slane %v1503_v52, 2  ;;  %v1781_v53 = vrot.slane %v4247_v54, 4  ;;  %v1475_v51 = vadd.f32 %v1474_v14, %v1473_v48 }
0x1060   :  { %v1446_v18 = vrot.slane %v1445_v60, 1  ;;  %v1595_v27 = vadd.f32 %v1594_v2, %v1593_v8 }
0x1061   :  { %v1563_v22 = vadd.f32 %v1562_v40, %v1561_v39  ;;  %v1505_v21 = vadd.f32 %v1504_v17, %v1503_v52 }
0x1062   :  { %2148 = vadd.xlane.f32.xlu0 %v2147_v9  ;;  %v1621_v0 = vpop.xlane.xlu1 %1620  ;;  %v4249_v36 = vpop.xlane.xlu0 %1839  ;;  %v1447_v26 = vadd.f32 %v1446_v18, %v1445_v60  ;;  %v1534_v9 = vrot.slane %v1533_v5, 2 }
0x1063   :  { %v1622_v58 = vrot.slane %v1621_v0, 4  ;;  %v1564_v28 = vrot.slane %v1563_v22, 2  ;;  %v1506_v46 = vrot.slane %v1505_v21, 1  ;;  %v1841_v7 = vrot.slane %v4249_v36, 4 }
0x1065   :  { %v1623_v50 = vadd.f32 %v1622_v58, %v1621_v0  ;;  %v1565_v33 = vadd.f32 %v1564_v28, %v1563_v22  ;;  %v4263_v42 = vadd.f32 %v1506_v46, %v1505_v21  ;;  %v1722_v0 = vadd.f32 %v1721_v20, %v1720_v31 }
0x1066   :  { %v1690_v62 = vpop.xlane.xlu1 %1689  ;;  %v4251_v44 = vpop.xlane.xlu0 %1968  ;;  %v1782_v31 = vadd.f32 %v1781_v53, %v4247_v54  ;;  %v1842_v21 = vadd.f32 %v1841_v7, %v4249_v36 }
0x1067   :  { %v1624_v25 = vrot.slane %v1623_v50, 2  ;;  %v1691_v30 = vrot.slane %v1690_v62, 4  ;;  %v1566_v57 = vrot.slane %v1565_v33, 1 }
0x1069   :  { %v1625_v23 = vadd.f32 %v1624_v25, %v1623_v50  ;;  %v1692_v49 = vadd.f32 %v1691_v30, %v1690_v62  ;;  %v4265_v16 = vadd.f32 %v1566_v57, %v1565_v33  ;;  %v1535_v50 = vadd.f32 %v1534_v9, %v1533_v5 }
0x106a   :  { %v1750_v47 = vpop.xlane.xlu1 %1749  ;;  %v4255_v6 = vpop.xlane.xlu0 %2028  ;;  %v1476_v30 = vrot.slane %v1475_v51, 1  ;;  %v1596_v57 = vrot.slane %v1595_v27, 1 }
0x106b   :  { %v1751_v61 = vrot.slane %v1750_v47, 4  ;;  %v1626_v4 = vrot.slane %v1625_v23, 1  ;;  %v1693_v1 = vrot.slane %v1692_v49, 2  ;;  %v1536_v48 = vrot.slane %v1535_v50, 1 }
0x106c   :  { %v2030_v36 = vrot.slane %v4255_v6, 4 }
0x106d   :  { %v1752_v56 = vadd.f32 %v1751_v61, %v1750_v47  ;;  %v4268_v39 = vadd.f32 %v1626_v4, %v1625_v23  ;;  %v4270_v62 = vadd.f32 %v1693_v1, %v1692_v49  ;;  %v1970_v49 = vrot.slane %v4251_v44, 4 }
0x106e   :  { %v1810_v29 = vpop.xlane.xlu1 %1809  ;;  %v4259_v32 = vpop.xlane.xlu0 %2088  ;;  %v1843_v1 = vrot.slane %v1842_v21, 2 }
0x106f   :  { %v1811_v37 = vrot.slane %v1810_v29, 4  ;;  %v1753_v55 = vrot.slane %v1752_v56, 2  ;;  %v1695_v60 = vrot.slane %v4270_v62, 1  ;;  %v1971_v20 = vadd.f32 %v1970_v49, %v4251_v44 }
0x1071   :  { %v1812_v47 = vadd.f32 %v1811_v37, %v1810_v29  ;;  %v4278_v38 = vadd.f32 %v1753_v55, %v1752_v56  ;;  %v1723_v29 = vrot.slane %v1722_v0, 2  ;;  %v1783_v56 = vrot.slane %v1782_v31, 2 }
0x1072   :  { %v1870_v45 = vpop.xlane.xlu1 %1869 }
0x1073   :  { %v1871_v34 = vrot.slane %v1870_v45, 4  ;;  %v1813_v23 = vrot.slane %v1812_v47, 2  ;;  %v1755_v54 = vrot.slane %v4278_v38, 1  ;;  %v1724_v8 = vadd.f32 %v1723_v29, %v1722_v0 }
0x1074   :  { %v1784_v9 = vadd.f32 %v1783_v56, %v1782_v31  ;;  %v1844_v0 = vadd.f32 %v1843_v1, %v1842_v21 }
0x1075   :  { %v4275_v13 = vadd.f32 %v1871_v34, %v1870_v45  ;;  %v1725_v2 = vrot.slane %v1724_v8, 1 }
0x1076   :  { %v4253_v10 = vpop.xlane.xlu1 %1938 }
0x1077   :  { %v1940_v52 = vrot.slane %v4253_v10, 4  ;;  %v1873_v19 = vrot.slane %v4275_v13, 2 }
0x1078   :  { %1665 = vrot.lane.b32.xlu0 %v1663_v43, %s2487_s17  ;;  %s2391_s17 = spop %2390 }
0x1079   :  { %v1941_v18 = vadd.f32 %v1940_v52, %v4253_v10  ;;  %v2090_v10 = vrot.slane %v4259_v32, 4  ;;  %v1785_v52 = vrot.slane %v1784_v9, 1  ;;  %s1200_s21 = sadd.f32 %s2391_s17, %s2389_s10  ;;  %s2393_s7 = spop %2392 }
0x107a   :  { %v4257_v3 = vpop.xlane.xlu1 %1998  ;;  %s2395_s4 = spop %2394 }
0x107b   :  { %v2000_v46 = vrot.slane %v4257_v3, 4  ;;  %v1942_v53 = vrot.slane %v1941_v18, 2  ;;  %v2091_v7 = vadd.f32 %v2090_v10, %v4259_v32  ;;  %s1230_s20 = sadd.f32 %s2393_s7, %s1200_s21  ;;  %s2397_s28 = spop %2396 }
0x107c   :  { %s2399_s13 = spop %2398 }
0x107d   :  { %v2001_v55 = vadd.f32 %v2000_v46, %v4257_v3  ;;  %v1972_v3 = vrot.slane %v1971_v20, 2  ;;  %v1943_v31 = vadd.f32 %v1942_v53, %v1941_v18  ;;  %s1260_s27 = sadd.f32 %s2395_s4, %s1230_s20  ;;  %s2401_s26 = spop %2400 }
0x107e   :  { %v4261_v63 = vpop.xlane.xlu1 %2058  ;;  %s2403_s8 = spop %2402 }
0x107f   :  { %v2060_v4 = vrot.slane %v4261_v63, 4  ;;  %s1290_s1 = sadd.f32 %s2397_s28, %s1260_s27 }
0x1081   :  { %v2061_v44 = vadd.f32 %v2060_v4, %v4261_v63  ;;  %v1696_v63 = vadd.f32 %v1695_v60, %v4270_v62  ;;  %v1786_v62 = vadd.f32 %v1785_v52, %v1784_v9  ;;  %s1320_s30 = sadd.f32 %s2399_s13, %s1290_s1 }
0x1082   :  { %v4272_v41 = vpop.xlane.xlu1 %2118 }
0x1083   :  { %v2120_v34 = vrot.slane %v4272_v41, 4  ;;  %v2062_v32 = vrot.slane %v2061_v44, 2  ;;  %s1350_s3 = sadd.f32 %s2401_s26, %s1320_s30 }
0x1085   :  { %s1380_s29 = sadd.f32 %s2403_s8, %s1350_s3 }
0x1086   :  { %v1417_v61 = vpop.permute.xlu1 %1416 }
0x10e3   :  { %v1402_v24 = vpop.xlane.xlu0 %1401 }
0x10e4   :  { %v1403_v12 = vrot.slane %v1402_v24, 4 }
0x10e6   :  { %v1404_v35 = vadd.f32 %v1403_v12, %v1402_v24  ;;  %v1477_v24 = vadd.f32 %v1476_v30, %v1475_v51  ;;  %v1973_v30 = vadd.f32 %v1972_v3, %v1971_v20 }
0x10e7   :  { %v1651_v43 = vpop.xlane.xlu0 %1650 }
0x10e8   :  { %v1405_v15 = vrot.slane %v1404_v35, 2  ;;  %v1652_v59 = vrot.slane %v1651_v43, 4 }
0x10ea   :  { %v1653_v40 = vadd.f32 %v1652_v59, %v1651_v43  ;;  %v1406_v58 = vadd.f32 %v1405_v15, %v1404_v35  ;;  %v1537_v35 = vadd.f32 %v1536_v48, %v1535_v50  ;;  %v1814_v43 = vadd.f32 %v1813_v23, %v1812_v47 }
0x10eb   :  { %v1900_v22 = vpop.xlane.xlu0 %1899  ;;  %v2031_v15 = vadd.f32 %v2030_v36, %v4255_v6  ;;  %v1874_v47 = vadd.f32 %v1873_v19, %v4275_v13  ;;  %v2121_v6 = vadd.f32 %v2120_v34, %v4272_v41  ;;  %v2092_v13 = vrot.slane %v2091_v7, 2 }
0x10ec   :  { %v1654_v17 = vrot.slane %v1653_v40, 2  ;;  %v1901_v28 = vrot.slane %v1900_v22, 4  ;;  %v1407_v25 = vrot.slane %v1406_v58, 1  ;;  %v1815_v50 = vrot.slane %v1814_v43, 1 }
0x10ed   :  { %v1875_v41 = vrot.slane %v1874_v47, 1  ;;  %v1974_v23 = vrot.slane %v1973_v30, 1  ;;  %v2093_v49 = vadd.f32 %v2092_v13, %v2091_v7 }
0x10ee   :  { %v1902_v45 = vadd.f32 %v1901_v28, %v1900_v22  ;;  %v1408_v11 = vadd.f32 %v1407_v25, %v1406_v58  ;;  %v1655_v33 = vadd.f32 %v1654_v17, %v1653_v40  ;;  %v2002_v58 = vrot.slane %v2001_v55, 2 }
0x10ef   :  { %v2149_v5 = vpop.xlane.xlu0 %2148  ;;  %v1756_v22 = vadd.f32 %v1755_v54, %v4278_v38  ;;  %v1726_v17 = vadd.f32 %v1725_v2, %v1724_v8  ;;  %v1845_v28 = vrot.slane %v1844_v0, 1  ;;  %v1816_v60 = vadd.f32 %v1815_v50, %v1814_v43  ;;  %v1915_v54 = vpop.permute.xlu1 %1914 }
0x10f0   :  { %2404 = vpush %v1408_v11  ;;  %v1656_v12 = vrot.slane %v1655_v33, 1  ;;  %v1903_v14 = vrot.slane %v1902_v45, 2  ;;  %v2150_v37 = vrot.slane %v2149_v5, 4  ;;  %v2063_v11 = vadd.f32 %v2062_v32, %v2061_v44 }
0x10f1   :  { %2406 = vpush %v1417_v61  ;;  %v1846_v38 = vadd.f32 %v1845_v28, %v1844_v0  ;;  %v1944_v61 = vrot.slane %v1943_v31, 1  ;;  %v1975_v36 = vadd.f32 %v1974_v23, %v1973_v30 }
0x10f2   :  { %2408 = vpush %v1447_v26  ;;  %v1597_v26 = vadd.f32 %v1596_v57, %v1595_v27  ;;  %v1657_v59 = vadd.f32 %v1656_v12, %v1655_v33  ;;  %v1904_v51 = vadd.f32 %v1903_v14, %v1902_v45  ;;  %v2151_v40 = vadd.f32 %v2150_v37, %v2149_v5 }
0x10f3   :  { %2410 = vpush %v1477_v24  ;;  %v2003_v27 = vadd.f32 %v2002_v58, %v2001_v55  ;;  %v1876_v33 = vadd.f32 %v1875_v41, %v1874_v47  ;;  %v1945_v56 = vadd.f32 %v1944_v61, %v1943_v31  ;;  %v2064_v5 = vrot.slane %v2063_v11, 1 }
0x10f4   :  { %2412 = vpush %v4263_v42  ;;  %v1666_v42 = vpop.permute.xlu0 %1665  ;;  %v1905_v25 = vrot.slane %v1904_v51, 1  ;;  %v2152_v29 = vrot.slane %v2151_v40, 2  ;;  %v2094_v24 = vrot.slane %v2093_v49, 1 }
0x10f5   :  { %2414 = vpush %v1537_v35  ;;  %v2004_v19 = vrot.slane %v2003_v27, 1  ;;  %v2065_v14 = vadd.f32 %v2064_v5, %v2063_v11 }
0x10f6   :  { %2416 = vpush %v4265_v16  ;;  %v2032_v16 = vrot.slane %v2031_v15, 2  ;;  %v1906_v45 = vadd.f32 %v1905_v25, %v1904_v51  ;;  %v2153_v48 = vadd.f32 %v2152_v29, %v2151_v40  ;;  %v2095_v8 = vadd.f32 %v2094_v24, %v2093_v49 }
0x10f7   :  { %2418 = vpush %v1597_v26  ;;  %v2005_v12 = vadd.f32 %v2004_v19, %v2003_v27 }
0x10f8   :  { %2420 = vpush %v4268_v39  ;;  %v2122_v39 = vrot.slane %v2121_v6, 2  ;;  %v2033_v21 = vadd.f32 %v2032_v16, %v2031_v15  ;;  %v2154_v57 = vrot.slane %v2153_v48, 1 }
0x10f9   :  { %2422 = vpush %v1657_v59 }
0x10fa   :  { %2424 = vpush %v1666_v42  ;;  %v2123_v18 = vadd.f32 %v2122_v39, %v2121_v6  ;;  %v2034_v46 = vrot.slane %v2033_v21, 1  ;;  %v2155_v20 = vadd.f32 %v2154_v57, %v2153_v48 }
0x10fb   :  { %2426 = vpush %v1696_v63 }
0x10fc   :  { %2428 = vpush %v1726_v17  ;;  %v2124_v4 = vrot.slane %v2123_v18, 1  ;;  %v2035_v1 = vadd.f32 %v2034_v46, %v2033_v21 }
0x10fd   :  { %2430 = vpush %v1756_v22 }
0x10fe   :  { %2432 = vpush %v1786_v62  ;;  %v2125_v10 = vadd.f32 %v2124_v4, %v2123_v18 }
0x10ff   :  { %2434 = vpush %v1816_v60 }
0x1100   :  { %2436 = vpush %v1846_v38 }
0x1101   :  { %2438 = vpush %v1876_v33 }
0x1102   :  { %2440 = vpush %v1906_v45 }
0x1103   :  { %2442 = vpush %v1915_v54 }
0x1104   :  { %2444 = vpush %v1945_v56 }
0x1105   :  { %2446 = vpush %v1975_v36 }
0x1106   :  { %2448 = vpush %v2005_v12 }
0x1107   :  { %2450 = vpush %v2035_v1 }
0x1108   :  { %2452 = vpush %v2065_v14 }
0x1109   :  { %2454 = vpush %v2095_v8 }
0x110a   :  { %2456 = vpush %v2125_v10 }
0x110b   :  { %2458 = vpush %v2155_v20 }
0x1121   :  { %s2405_s0 = spop %2404 }
0x1122   :  { %s1410_s12 = sadd.f32 %s2405_s0, %s1380_s29  ;;  %s2407_s15 = spop %2406 }
0x1123   :  { %s2409_s25 = spop %2408 }
0x1124   :  { %s1411_s24 = smax.f32 %s2494_s16, %s1410_s12  ;;  %s1449_s18 = sadd.f32 %s2409_s25, %s2407_s15 }
0x1125   :  { %v1412_v37 = vstv %s1411_s24  ;;  %s2411_s9 = spop %2410 }
0x1126   :  { %1413 = vst [vmem:[%s4331_s11] sm:$0x1] %v1412_v37  ;;  %s1479_s19 = sadd.f32 %s2411_s9, %s1449_s18  ;;  %s2413_s6 = spop %2412 }
0x1127   :  { %s2415_s22 = spop %2414 }
0x1128   :  { %s1509_s23 = sadd.f32 %s2413_s6, %s1479_s19  ;;  %s2417_s5 = spop %2416 }
0x1129   :  { %s2419_s10 = spop %2418 }
0x112a   :  { %s1539_s17 = sadd.f32 %s2415_s22, %s1509_s23  ;;  %s2421_s21 = spop %2420 }
0x112b   :  { %s2423_s7 = spop %2422 }
0x112c   :  { %s1569_s20 = sadd.f32 %s2417_s5, %s1539_s17  ;;  %s2425_s4 = spop %2424 }
0x112d   :  { %s2427_s27 = spop %2426 }
0x112e   :  { %s1599_s28 = sadd.f32 %s2419_s10, %s1569_s20  ;;  %s2429_s1 = spop %2428 }
0x112f   :  { %s1698_s13 = sadd.f32 %s2427_s27, %s2425_s4  ;;  %s2431_s30 = spop %2430 }
0x1130   :  { %s1629_s26 = sadd.f32 %s2421_s21, %s1599_s28  ;;  %s2433_s3 = spop %2432 }
0x1131   :  { %s1728_s8 = sadd.f32 %s2429_s1, %s1698_s13  ;;  %s2435_s29 = spop %2434 }
0x1132   :  { %s1659_s0 = sadd.f32 %s2423_s7, %s1629_s26  ;;  %s2437_s12 = spop %2436 }
0x1133   :  { %s1758_s15 = sadd.f32 %s2431_s30, %s1728_s8  ;;  %s2439_s25 = spop %2438 }
0x1134   :  { %s1660_s24 = smax.f32 %s2494_s16, %s1659_s0  ;;  %s2441_s18 = spop %2440 }
0x1135   :  { %v1661_v35 = vstv %s1660_s24  ;;  %s1788_s9 = sadd.f32 %s2433_s3, %s1758_s15  ;;  %s2443_s14 = spop %2442 }
0x1136   :  { %1662 = vst [vmem:[%s4331_s11 + $0x1] sm:$0x1] %v1661_v35  ;;  %s2445_s6 = spop %2444 }
0x1137   :  { %s1818_s22 = sadd.f32 %s2435_s29, %s1788_s9  ;;  %s2447_s10 = spop %2446 }
0x1138   :  { %s1947_s23 = sadd.f32 %s2445_s6, %s2443_s14  ;;  %s2449_s7 = spop %2448 }
0x1139   :  { %s1848_s5 = sadd.f32 %s2437_s12, %s1818_s22  ;;  %s2451_s27 = spop %2450 }
0x113a   :  { %s1977_s17 = sadd.f32 %s2447_s10, %s1947_s23  ;;  %s2453_s13 = spop %2452 }
0x113b   :  { %s1878_s21 = sadd.f32 %s2439_s25, %s1848_s5  ;;  %s2455_s8 = spop %2454 }
0x113c   :  { %s2007_s20 = sadd.f32 %s2449_s7, %s1977_s17  ;;  %s2457_s0 = spop %2456 }
0x113d   :  { %s1908_s4 = sadd.f32 %s2441_s18, %s1878_s21  ;;  %s2459_s15 = spop %2458 }
0x113e   :  { %s2037_s28 = sadd.f32 %s2451_s27, %s2007_s20 }
0x113f   :  { %s1909_s1 = smax.f32 %s2494_s16, %s1908_s4 }
0x1140   :  { %v1910_v55 = vstv %s1909_s1  ;;  %s2067_s30 = sadd.f32 %s2453_s13, %s2037_s28 }
0x1141   :  { %1911 = vst [vmem:[%s4331_s11 + $0x2] sm:$0x1] %v1910_v55 }
0x1142   :  { %s2097_s29 = sadd.f32 %s2455_s8, %s2067_s30 }
0x1144   :  { %s2127_s12 = sadd.f32 %s2457_s0, %s2097_s29 }
0x1146   :  { %s2157_s25 = sadd.f32 %s2459_s15, %s2127_s12 }
0x1148   :  { %s2158_s24 = smax.f32 %s2494_s16, %s2157_s25 }
0x1149   :  { %v2159_v34 = vstv %s2158_s24 }
0x114a   :  { %2160 = vst [vmem:[%s4331_s11 + $0x3] sm:$0x1] %v2159_v34 }

</bundles_post_ra>
